<compile_context>
chip_gen: v5e
topology: v5e:2x2
jax: 0.10.0
libtpu: 0.0.40
codegen_flags: <defaults>
</compile_context>

<pallas_src>
import numpy as np

import jax
import jax.numpy as jnp
from jax.experimental import pallas as pl
from jax.experimental.pallas import tpu as pltpu

BN_EPS = 1e-5
LEAKY_SLOPE = 0.01  # nn.LeakyReLU default


def _vmem_spec():
    return pl.BlockSpec(memory_space=pltpu.MemorySpace.VMEM)


# ----------------------------------------------------------------------------
# Host-side weight packing (one-time, numpy)
# ----------------------------------------------------------------------------
def conv_banded_mats(w_oihw, w_in, stride):
    """Per-(kernel-row) banded matrices M[i]: (w_in*Ci, OW*Co).

    With activations packed as  act2d[row, w*Ci + ci]  the conv becomes
        out2d[out_row, :] = sum_i act2d[in_row(out_row, i), :] @ M[i]
    """
    co, ci, kh, kw = w_oihw.shape
    ow = (w_in - kw) // stride + 1
    m = np.zeros((kh, w_in * ci, ow * co), np.float32)
    for i in range(kh):
        for o in range(ow):
            for j in range(kw):
                wc = stride * o + j
                m[i, wc * ci:(wc + 1) * ci, o * co:(o + 1) * co] = w_oihw[:, :, i, j].T
    return m


def chan_fold_mats(ow, c):
    """R: (ow*c, c) sums the ow column-blocks per channel; R.T broadcasts back."""
    r = np.zeros((ow * c, c), np.float32)
    for w in range(ow):
        r[w * c:(w + 1) * c, :] = np.eye(c, dtype=np.float32)
    return r, np.ascontiguousarray(r.T)


def prepare_packed_params(params, output_size=6):
    f = np.asarray
    bf = jnp.bfloat16

    m1 = conv_banded_mats(f(params["c1w"]), w_in=60, stride=4)  # (8, 240, 448)
    m2 = conv_banded_mats(f(params["c2w"]), w_in=14, stride=2)  # (4, 448, 384)
    m3 = conv_banded_mats(f(params["c3w"]), w_in=6, stride=1)   # (3, 384, 256)

    r1, r1t = chan_fold_mats(14, 32)
    r2, r2t = chan_fold_mats(6, 64)
    r3, r3t = chan_fold_mats(4, 64)

    # Dueling head, layer 1: concat A||V and permute rows so that the kernel's
    # head-input lane order (h, w, c) reproduces PyTorch's NCHW flatten (c, h, w).
    idx = np.arange(1024)
    h_, rem = idx // 256, idx % 256
    w_, c_ = rem // 64, rem % 64
    perm = c_ * 16 + h_ * 4 + w_                        # k_kernel -> k_pytorch
    w1h = np.concatenate([f(params["aw1"]), f(params["vw1"])], axis=1)[perm]  # (1024, 256)
    b1h = np.concatenate([f(params["ab1"]), f(params["vb1"])], axis=1)        # (1, 256)

    # Layer 2: block-pack A2 (cols 0..out-1) and V2 (col out) into one matmul.
    w2h = np.zeros((256, output_size + 1), np.float32)
    w2h[:128, :output_size] = f(params["aw2"])
    w2h[128:, output_size] = f(params["vw2"])[:, 0]
    b2h = np.zeros((1, output_size + 1), np.float32)
    b2h[0, :output_size] = f(params["ab2"])[0]
    b2h[0, output_size] = f(params["vb2"])[0, 0]

    def f32(a):
        return jnp.asarray(a, jnp.float32)

    return dict(
        m1=jnp.asarray(m1, bf), m2=jnp.asarray(m2, bf), m3=jnp.asarray(m3, bf),
        r1=f32(r1), r1t=f32(r1t), r2=f32(r2), r2t=f32(r2t), r3=f32(r3), r3t=f32(r3t),
        g1=f32(f(params["g1"]).reshape(1, -1)), b1=f32(f(params["be1"]).reshape(1, -1)),
        g2=f32(f(params["g2"]).reshape(1, -1)), b2=f32(f(params["be2"]).reshape(1, -1)),
        g3=f32(f(params["g3"]).reshape(1, -1)), b3=f32(f(params["be3"]).reshape(1, -1)),
        w1h=jnp.asarray(w1h, bf), b1h=f32(b1h),
        w2h=jnp.asarray(w2h, bf), b2h=f32(b2h),
    )


# ----------------------------------------------------------------------------
# The fused kernel
# ----------------------------------------------------------------------------
def duel_cnn_kernel(xt_ref, m1_ref, g1_ref, b1_ref, r1_ref, r1t_ref,
                    m2_ref, g2_ref, b2_ref, r2_ref, r2t_ref,
                    m3_ref, g3_ref, b3_ref, r3_ref, r3t_ref,
                    w1h_ref, b1h_ref, w2h_ref, b2h_ref, q_ref):
    B = xt_ref.shape[1] // 14
    bf16 = jnp.bfloat16

    def dot32(a, b):
        return jnp.dot(a, b, preferred_element_type=jnp.float32)

    def bn_relu(blocks, g_ref_, be_ref_, r_ref_, rt_ref_, n_pos):
        # Training-mode BatchNorm2d on packed (rows, ow*C) blocks: one-pass
        # sum / sumsq, channel fold via R (stacked into one dot), broadcast
        # back via R.T (stacked into one dot), then ReLU.
        colsum = colsumsq = None
        for v in blocks:
            s = jnp.sum(v, axis=0, keepdims=True)
            s2 = jnp.sum(v * v, axis=0, keepdims=True)
            colsum = s if colsum is None else colsum + s
            colsumsq = s2 if colsumsq is None else colsumsq + s2
        stats = jnp.concatenate([colsum, colsumsq], axis=0)          # (2, ow*C)
        folded = dot32(stats, r_ref_[...]) * (1.0 / n_pos)           # (2, C)
        mean = folded[0:1, :]
        var = folded[1:2, :] - mean * mean                           # biased var
        scale_c = g_ref_[...] * jax.lax.rsqrt(var + BN_EPS)          # (1, C)
        shift_c = be_ref_[...] - mean * scale_c
        ss = jnp.concatenate([scale_c, shift_c], axis=0)             # (2, C)
        bcast = dot32(ss, rt_ref_[...])                              # (2, ow*C)
        scale, shift = bcast[0:1, :], bcast[1:2, :]
        return [jnp.maximum(v * scale + shift, 0.0) for v in blocks]

    # ---- conv1 + bn1 + relu -------------------------------------------------
    # xt[i] rows: [even-parity output rows (m, b-minor) | odd-parity rows].
    acc1 = dot32(xt_ref[0], m1_ref[0])
    for i in range(1, 8):
        acc1 = acc1 + dot32(xt_ref[i], m1_ref[i])                    # (14B, 448)
    h1e, h1o = acc1[:7 * B, :], acc1[7 * B:, :]
    h1e, h1o = bn_relu([h1e, h1o], g1_ref, b1_ref, r1_ref, r1t_ref, B * 14 * 14)
    h1 = (h1e.astype(bf16), h1o.astype(bf16))                        # 2 x (7B, 448)

    # ---- conv2 + bn2 + relu: 4 matmuls, batched over B ----------------------
    # Output rows ordered (oh, b); tap i reads a contiguous slice of h1[i%2].
    acc2 = None
    for i in range(4):
        p, q = i % 2, i // 2          # conv1 row for output row oh is 2*oh + i
        t = dot32(h1[p][q * B:(q + 6) * B, :], m2_ref[i])            # (6B, 384)
        acc2 = t if acc2 is None else acc2 + t
    (h2,) = bn_relu([acc2], g2_ref, b2_ref, r2_ref, r2t_ref, B * 6 * 6)
    h2 = h2.astype(bf16)                                             # (6B, 384)

    # ---- conv3 + bn3 + relu: 3 matmuls, batched over B ----------------------
    acc3 = None
    for i in range(3):
        t = dot32(h2[i * B:(i + 4) * B, :], m3_ref[i])               # (4B, 256)
        acc3 = t if acc3 is None else acc3 + t
    (h3,) = bn_relu([acc3], g3_ref, b3_ref, r3_ref, r3t_ref, B * 4 * 4)

    # ---- dueling head: 2 matmuls, vectorized over batch ---------------------
    # Lane-concatenate each sample's 4 rows of h3 into (B, 1024); lane offsets
    # are multiples of 256 (vreg-aligned).
    head_in = jnp.concatenate([h3[h * B:(h + 1) * B, :] for h in range(4)], axis=1)
    hid = dot32(head_in.astype(bf16), w1h_ref[...]) + b1h_ref[...]   # (B, 256)
    hid = jnp.where(hid > 0, hid, LEAKY_SLOPE * hid)                 # LeakyReLU
    o = dot32(hid.astype(bf16), w2h_ref[...]) + b2h_ref[...]         # (B, out+1)
    n_out = w2h_ref.shape[1] - 1
    a = o[:, :n_out]
    v = o[:, n_out:n_out + 1]
    q_ref[...] = v + a - jnp.sum(a, axis=1, keepdims=True) * (1.0 / n_out)


# ----------------------------------------------------------------------------
# Forward wrapper: the only XLA-side work is the one-time NCHW -> packed-row
# gather of the tiny input (~107 KB at B=2) feeding conv1's banded matmuls.
# ----------------------------------------------------------------------------
def duel_cnn_forward(x, packed):
    B, C, H, W = x.shape
    assert (C, H, W) == (4, 60, 60), "DuelCNN requires (B, 4, 60, 60) input"

    x2 = jnp.transpose(x, (0, 2, 3, 1)).reshape(B, H, W * C)   # rows (b,h), cols (w,c)
    taps = []
    for i in range(8):              # conv1 kernel-row tap
        halves = []
        for p in range(2):          # output-row parity: oh = 2m + p uses row 8m+4p+i
            t = x2[:, 4 * p + i: 4 * p + i + 49: 8, :]          # (B, 7, 240)
            halves.append(jnp.transpose(t, (1, 0, 2)).reshape(7 * B, W * C))
        taps.append(jnp.concatenate(halves, axis=0))            # (14B, 240)
    xt = jnp.stack(taps, axis=0).astype(jnp.bfloat16)           # (8, 14B, 240)

    out_size = packed["w2h"].shape[1] - 1
    ops = (xt,
           packed["m1"], packed["g1"], packed["b1"], packed["r1"], packed["r1t"],
           packed["m2"], packed["g2"], packed["b2"], packed["r2"], packed["r2t"],
           packed["m3"], packed["g3"], packed["b3"], packed["r3"], packed["r3t"],
           packed["w1h"], packed["b1h"], packed["w2h"], packed["b2h"])
    return pl.pallas_call(
        duel_cnn_kernel,
        out_shape=jax.ShapeDtypeStruct((B, out_size), jnp.float32),
        in_specs=[_vmem_spec() for _ in ops],
        out_specs=_vmem_spec(),
    )(*ops)


# ----------------------------------------------------------------------------
# Parameter init (deterministic, synthetic; PyTorch-layout weights)
# ----------------------------------------------------------------------------
def init_params(key, output_size=6):
    ks = jax.random.split(key, 20)

    def rnd(k, shape, scale):
        return scale * jax.random.normal(k, shape, jnp.float32)

    p = {}
    p["c1w"] = rnd(ks[0], (32, 4, 8, 8), 0.05)
    p["c1b"] = rnd(ks[1], (32,), 0.05)        # used only by the f32 reference
    p["c2w"] = rnd(ks[2], (64, 32, 4, 4), 0.05)
    p["c2b"] = rnd(ks[3], (64,), 0.05)
    p["c3w"] = rnd(ks[4], (64, 64, 3, 3), 0.05)
    p["c3b"] = rnd(ks[5], (64,), 0.05)
    p["g1"], p["be1"] = 1.0 + rnd(ks[6], (32,), 0.1), rnd(ks[7], (32,), 0.1)
    p["g2"], p["be2"] = 1.0 + rnd(ks[8], (64,), 0.1), rnd(ks[9], (64,), 0.1)
    p["g3"], p["be3"] = 1.0 + rnd(ks[10], (64,), 0.1), rnd(ks[11], (64,), 0.1)
    p["aw1"] = rnd(ks[12], (1024, 128), 1.0 / 32.0)
    p["ab1"] = rnd(ks[13], (1, 128), 0.05)
    p["aw2"] = rnd(ks[14], (128, output_size), 1.0 / np.sqrt(128.0))
    p["ab2"] = rnd(ks[15], (1, output_size), 0.05)
    p["vw1"] = rnd(ks[16], (1024, 128), 1.0 / 32.0)
    p["vb1"] = rnd(ks[17], (1, 128), 0.05)
    p["vw2"] = rnd(ks[18], (128, 1), 1.0 / np.sqrt(128.0))
    p["vb2"] = rnd(ks[19], (1, 1), 0.05)
    return p


# ----------------------------------------------------------------------------
# Pure-JAX f32 reference (original PyTorch semantics, incl. the conv bias that
# training-mode BN cancels — validating the kernel's dropped-bias optimization)
# ----------------------------------------------------------------------------
def duel_cnn_reference(x, params):
    def conv_ref(x, w, b, g, be, s):
        y = jax.lax.conv_general_dilated(
            x, w, window_strides=(s, s), padding="VALID",
            dimension_numbers=("NCHW", "OIHW", "NCHW"))
        y = y + b[None, :, None, None]
        mean = jnp.mean(y, axis=(0, 2, 3), keepdims=True)
        var = jnp.mean((y - mean) ** 2, axis=(0, 2, 3), keepdims=True)
        y = (y - mean) * jax.lax.rsqrt(var + BN_EPS)
        y = g[None, :, None, None] * y + be[None, :, None, None]
        return jnp.maximum(y, 0.0)

    x = conv_ref(x, params["c1w"], params["c1b"], params["g1"], params["be1"], 4)
    x = conv_ref(x, params["c2w"], params["c2b"], params["g2"], params["be2"], 2)
    x = conv_ref(x, params["c3w"], params["c3b"], params["g3"], params["be3"], 1)
    xf = x.reshape(x.shape[0], -1)

    def leaky(z):
        return jnp.where(z > 0, z, LEAKY_SLOPE * z)

    a = leaky(xf @ params["aw1"] + params["ab1"]) @ params["aw2"] + params["ab2"]
    v = leaky(xf @ params["vw1"] + params["vb1"]) @ params["vw2"] + params["vb2"]
    return v + (a - jnp.mean(a, axis=1, keepdims=True))


if __name__ == "__main__":
    key = jax.random.PRNGKey(0)
    k_x, k_p = jax.random.split(key)

    # 60x60 input is what the module's Linear(1024) implies (see header note).
    x = jax.random.normal(k_x, (2, 4, 60, 60), jnp.float32)
    params = init_params(k_p, output_size=6)
    packed = prepare_packed_params(params, output_size=6)

    fwd = jax.jit(duel_cnn_forward)
    q = jax.block_until_ready(fwd(x, packed))
    assert q.shape == (2, 6), q.shape

    q_ref = duel_cnn_reference(x, params)
    # bf16 matmul operands (f32 accumulation) => expected max error ~1e-2 on
    # O(1) outputs; a scale-aware 5e-2 bound cleanly separates precision noise
    # from any real logic error.
    err = float(jnp.max(jnp.abs(q - q_ref)))
    tol = 5e-2 * max(1.0, float(jnp.max(jnp.abs(q_ref))))
    assert err < tol, f"max abs err {err} exceeds tol {tol}"

    print("KERNEL_OK")
</pallas_src>

<mosaic_0001>
module attributes {stable_mosaic.version = 11 : i64} {
  func.func @duel_cnn_kernel(%arg0: memref<8x28x240xbf16, #tpu.memory_space<vmem>>, %arg1: memref<8x240x448xbf16, #tpu.memory_space<vmem>>, %arg2: memref<1x32xf32, #tpu.memory_space<vmem>>, %arg3: memref<1x32xf32, #tpu.memory_space<vmem>>, %arg4: memref<448x32xf32, #tpu.memory_space<vmem>>, %arg5: memref<32x448xf32, #tpu.memory_space<vmem>>, %arg6: memref<4x448x384xbf16, #tpu.memory_space<vmem>>, %arg7: memref<1x64xf32, #tpu.memory_space<vmem>>, %arg8: memref<1x64xf32, #tpu.memory_space<vmem>>, %arg9: memref<384x64xf32, #tpu.memory_space<vmem>>, %arg10: memref<64x384xf32, #tpu.memory_space<vmem>>, %arg11: memref<3x384x256xbf16, #tpu.memory_space<vmem>>, %arg12: memref<1x64xf32, #tpu.memory_space<vmem>>, %arg13: memref<1x64xf32, #tpu.memory_space<vmem>>, %arg14: memref<256x64xf32, #tpu.memory_space<vmem>>, %arg15: memref<64x256xf32, #tpu.memory_space<vmem>>, %arg16: memref<1024x256xbf16, #tpu.memory_space<vmem>>, %arg17: memref<1x256xf32, #tpu.memory_space<vmem>>, %arg18: memref<256x7xbf16, #tpu.memory_space<vmem>>, %arg19: memref<1x7xf32, #tpu.memory_space<vmem>>, %arg20: memref<2x6xf32, #tpu.memory_space<vmem>>) attributes {dimension_semantics = [], scalar_prefetch = 0 : i64, scratch_operands = 0 : i64, tpu.core_type = #tpu.core_type<tc>} {
    %c0 = arith.constant 0 : index
    %c0_0 = arith.constant 0 : index
    %c0_1 = arith.constant 0 : index
    %0 = vector.load %arg0[%c0, %c0_0, %c0_1] : memref<8x28x240xbf16, #tpu.memory_space<vmem>>, vector<1x28x240xbf16>
    %1 = vector.shape_cast %0 : vector<1x28x240xbf16> to vector<28x240xbf16>
    %c0_2 = arith.constant 0 : index
    %c0_3 = arith.constant 0 : index
    %c0_4 = arith.constant 0 : index
    %2 = vector.load %arg1[%c0_2, %c0_3, %c0_4] : memref<8x240x448xbf16, #tpu.memory_space<vmem>>, vector<1x240x448xbf16>
    %3 = vector.shape_cast %2 : vector<1x240x448xbf16> to vector<240x448xbf16>
    %cst = arith.constant dense<0.000000e+00> : vector<28x448xf32>
    %4 = tpu.matmul %1, %3, %cst {dimension_numbers = #tpu.dot_dimension_numbers<[1], [0], [0], [1], [0, 0, 1, 1], [], []>} : vector<28x240xbf16>, vector<240x448xbf16>, vector<28x448xf32> -> vector<28x448xf32>
    %c1 = arith.constant 1 : index
    %c0_5 = arith.constant 0 : index
    %c0_6 = arith.constant 0 : index
    %5 = vector.load %arg0[%c1, %c0_5, %c0_6] : memref<8x28x240xbf16, #tpu.memory_space<vmem>>, vector<1x28x240xbf16>
    %6 = vector.shape_cast %5 : vector<1x28x240xbf16> to vector<28x240xbf16>
    %c1_7 = arith.constant 1 : index
    %c0_8 = arith.constant 0 : index
    %c0_9 = arith.constant 0 : index
    %7 = vector.load %arg1[%c1_7, %c0_8, %c0_9] : memref<8x240x448xbf16, #tpu.memory_space<vmem>>, vector<1x240x448xbf16>
    %8 = vector.shape_cast %7 : vector<1x240x448xbf16> to vector<240x448xbf16>
    %cst_10 = arith.constant dense<0.000000e+00> : vector<28x448xf32>
    %9 = tpu.matmul %6, %8, %cst_10 {dimension_numbers = #tpu.dot_dimension_numbers<[1], [0], [0], [1], [0, 0, 1, 1], [], []>} : vector<28x240xbf16>, vector<240x448xbf16>, vector<28x448xf32> -> vector<28x448xf32>
    %10 = arith.addf %4, %9 : vector<28x448xf32>
    %c2 = arith.constant 2 : index
    %c0_11 = arith.constant 0 : index
    %c0_12 = arith.constant 0 : index
    %11 = vector.load %arg0[%c2, %c0_11, %c0_12] : memref<8x28x240xbf16, #tpu.memory_space<vmem>>, vector<1x28x240xbf16>
    %12 = vector.shape_cast %11 : vector<1x28x240xbf16> to vector<28x240xbf16>
    %c2_13 = arith.constant 2 : index
    %c0_14 = arith.constant 0 : index
    %c0_15 = arith.constant 0 : index
    %13 = vector.load %arg1[%c2_13, %c0_14, %c0_15] : memref<8x240x448xbf16, #tpu.memory_space<vmem>>, vector<1x240x448xbf16>
    %14 = vector.shape_cast %13 : vector<1x240x448xbf16> to vector<240x448xbf16>
    %cst_16 = arith.constant dense<0.000000e+00> : vector<28x448xf32>
    %15 = tpu.matmul %12, %14, %cst_16 {dimension_numbers = #tpu.dot_dimension_numbers<[1], [0], [0], [1], [0, 0, 1, 1], [], []>} : vector<28x240xbf16>, vector<240x448xbf16>, vector<28x448xf32> -> vector<28x448xf32>
    %16 = arith.addf %10, %15 : vector<28x448xf32>
    %c3 = arith.constant 3 : index
    %c0_17 = arith.constant 0 : index
    %c0_18 = arith.constant 0 : index
    %17 = vector.load %arg0[%c3, %c0_17, %c0_18] : memref<8x28x240xbf16, #tpu.memory_space<vmem>>, vector<1x28x240xbf16>
    %18 = vector.shape_cast %17 : vector<1x28x240xbf16> to vector<28x240xbf16>
    %c3_19 = arith.constant 3 : index
    %c0_20 = arith.constant 0 : index
    %c0_21 = arith.constant 0 : index
    %19 = vector.load %arg1[%c3_19, %c0_20, %c0_21] : memref<8x240x448xbf16, #tpu.memory_space<vmem>>, vector<1x240x448xbf16>
    %20 = vector.shape_cast %19 : vector<1x240x448xbf16> to vector<240x448xbf16>
    %cst_22 = arith.constant dense<0.000000e+00> : vector<28x448xf32>
    %21 = tpu.matmul %18, %20, %cst_22 {dimension_numbers = #tpu.dot_dimension_numbers<[1], [0], [0], [1], [0, 0, 1, 1], [], []>} : vector<28x240xbf16>, vector<240x448xbf16>, vector<28x448xf32> -> vector<28x448xf32>
    %22 = arith.addf %16, %21 : vector<28x448xf32>
    %c4 = arith.constant 4 : index
    %c0_23 = arith.constant 0 : index
    %c0_24 = arith.constant 0 : index
    %23 = vector.load %arg0[%c4, %c0_23, %c0_24] : memref<8x28x240xbf16, #tpu.memory_space<vmem>>, vector<1x28x240xbf16>
    %24 = vector.shape_cast %23 : vector<1x28x240xbf16> to vector<28x240xbf16>
    %c4_25 = arith.constant 4 : index
    %c0_26 = arith.constant 0 : index
    %c0_27 = arith.constant 0 : index
    %25 = vector.load %arg1[%c4_25, %c0_26, %c0_27] : memref<8x240x448xbf16, #tpu.memory_space<vmem>>, vector<1x240x448xbf16>
    %26 = vector.shape_cast %25 : vector<1x240x448xbf16> to vector<240x448xbf16>
    %cst_28 = arith.constant dense<0.000000e+00> : vector<28x448xf32>
    %27 = tpu.matmul %24, %26, %cst_28 {dimension_numbers = #tpu.dot_dimension_numbers<[1], [0], [0], [1], [0, 0, 1, 1], [], []>} : vector<28x240xbf16>, vector<240x448xbf16>, vector<28x448xf32> -> vector<28x448xf32>
    %28 = arith.addf %22, %27 : vector<28x448xf32>
    %c5 = arith.constant 5 : index
    %c0_29 = arith.constant 0 : index
    %c0_30 = arith.constant 0 : index
    %29 = vector.load %arg0[%c5, %c0_29, %c0_30] : memref<8x28x240xbf16, #tpu.memory_space<vmem>>, vector<1x28x240xbf16>
    %30 = vector.shape_cast %29 : vector<1x28x240xbf16> to vector<28x240xbf16>
    %c5_31 = arith.constant 5 : index
    %c0_32 = arith.constant 0 : index
    %c0_33 = arith.constant 0 : index
    %31 = vector.load %arg1[%c5_31, %c0_32, %c0_33] : memref<8x240x448xbf16, #tpu.memory_space<vmem>>, vector<1x240x448xbf16>
    %32 = vector.shape_cast %31 : vector<1x240x448xbf16> to vector<240x448xbf16>
    %cst_34 = arith.constant dense<0.000000e+00> : vector<28x448xf32>
    %33 = tpu.matmul %30, %32, %cst_34 {dimension_numbers = #tpu.dot_dimension_numbers<[1], [0], [0], [1], [0, 0, 1, 1], [], []>} : vector<28x240xbf16>, vector<240x448xbf16>, vector<28x448xf32> -> vector<28x448xf32>
    %34 = arith.addf %28, %33 : vector<28x448xf32>
    %c6 = arith.constant 6 : index
    %c0_35 = arith.constant 0 : index
    %c0_36 = arith.constant 0 : index
    %35 = vector.load %arg0[%c6, %c0_35, %c0_36] : memref<8x28x240xbf16, #tpu.memory_space<vmem>>, vector<1x28x240xbf16>
    %36 = vector.shape_cast %35 : vector<1x28x240xbf16> to vector<28x240xbf16>
    %c6_37 = arith.constant 6 : index
    %c0_38 = arith.constant 0 : index
    %c0_39 = arith.constant 0 : index
    %37 = vector.load %arg1[%c6_37, %c0_38, %c0_39] : memref<8x240x448xbf16, #tpu.memory_space<vmem>>, vector<1x240x448xbf16>
    %38 = vector.shape_cast %37 : vector<1x240x448xbf16> to vector<240x448xbf16>
    %cst_40 = arith.constant dense<0.000000e+00> : vector<28x448xf32>
    %39 = tpu.matmul %36, %38, %cst_40 {dimension_numbers = #tpu.dot_dimension_numbers<[1], [0], [0], [1], [0, 0, 1, 1], [], []>} : vector<28x240xbf16>, vector<240x448xbf16>, vector<28x448xf32> -> vector<28x448xf32>
    %40 = arith.addf %34, %39 : vector<28x448xf32>
    %c7 = arith.constant 7 : index
    %c0_41 = arith.constant 0 : index
    %c0_42 = arith.constant 0 : index
    %41 = vector.load %arg0[%c7, %c0_41, %c0_42] : memref<8x28x240xbf16, #tpu.memory_space<vmem>>, vector<1x28x240xbf16>
    %42 = vector.shape_cast %41 : vector<1x28x240xbf16> to vector<28x240xbf16>
    %c7_43 = arith.constant 7 : index
    %c0_44 = arith.constant 0 : index
    %c0_45 = arith.constant 0 : index
    %43 = vector.load %arg1[%c7_43, %c0_44, %c0_45] : memref<8x240x448xbf16, #tpu.memory_space<vmem>>, vector<1x240x448xbf16>
    %44 = vector.shape_cast %43 : vector<1x240x448xbf16> to vector<240x448xbf16>
    %cst_46 = arith.constant dense<0.000000e+00> : vector<28x448xf32>
    %45 = tpu.matmul %42, %44, %cst_46 {dimension_numbers = #tpu.dot_dimension_numbers<[1], [0], [0], [1], [0, 0, 1, 1], [], []>} : vector<28x240xbf16>, vector<240x448xbf16>, vector<28x448xf32> -> vector<28x448xf32>
    %46 = arith.addf %40, %45 : vector<28x448xf32>
    %47 = vector.extract_strided_slice %46 {offsets = [0, 0], sizes = [14, 448], strides = [1, 1]} : vector<28x448xf32> to vector<14x448xf32>
    %48 = vector.extract_strided_slice %46 {offsets = [14, 0], sizes = [14, 448], strides = [1, 1]} : vector<28x448xf32> to vector<14x448xf32>
    %cst_47 = arith.constant dense<0.000000e+00> : vector<448xf32>
    %49 = vector.multi_reduction <add>, %47, %cst_47 [0] : vector<14x448xf32> to vector<448xf32>
    %50 = vector.shape_cast %49 : vector<448xf32> to vector<1x448xf32>
    %51 = arith.mulf %47, %47 : vector<14x448xf32>
    %cst_48 = arith.constant dense<0.000000e+00> : vector<448xf32>
    %52 = vector.multi_reduction <add>, %51, %cst_48 [0] : vector<14x448xf32> to vector<448xf32>
    %53 = vector.shape_cast %52 : vector<448xf32> to vector<1x448xf32>
    %cst_49 = arith.constant dense<0.000000e+00> : vector<448xf32>
    %54 = vector.multi_reduction <add>, %48, %cst_49 [0] : vector<14x448xf32> to vector<448xf32>
    %55 = vector.shape_cast %54 : vector<448xf32> to vector<1x448xf32>
    %56 = arith.mulf %48, %48 : vector<14x448xf32>
    %cst_50 = arith.constant dense<0.000000e+00> : vector<448xf32>
    %57 = vector.multi_reduction <add>, %56, %cst_50 [0] : vector<14x448xf32> to vector<448xf32>
    %58 = vector.shape_cast %57 : vector<448xf32> to vector<1x448xf32>
    %59 = arith.addf %50, %55 : vector<1x448xf32>
    %60 = arith.addf %53, %58 : vector<1x448xf32>
    %61 = tpu.concatenate %59, %60 in 0 : vector<1x448xf32>, vector<1x448xf32> -> vector<2x448xf32>
    %c0_51 = arith.constant 0 : index
    %c0_52 = arith.constant 0 : index
    %62 = vector.load %arg4[%c0_51, %c0_52] : memref<448x32xf32, #tpu.memory_space<vmem>>, vector<448x32xf32>
    %cst_53 = arith.constant dense<0.000000e+00> : vector<2x32xf32>
    %63 = tpu.matmul %61, %62, %cst_53 {dimension_numbers = #tpu.dot_dimension_numbers<[1], [0], [0], [1], [0, 0, 1, 1], [], []>} : vector<2x448xf32>, vector<448x32xf32>, vector<2x32xf32> -> vector<2x32xf32>
    %cst_54 = arith.constant 0.00255102036 : f32
    %64 = vector.broadcast %cst_54 : f32 to vector<2x32xf32>
    %65 = arith.mulf %63, %64 : vector<2x32xf32>
    %66 = vector.extract_strided_slice %65 {offsets = [0, 0], sizes = [1, 32], strides = [1, 1]} : vector<2x32xf32> to vector<1x32xf32>
    %67 = vector.extract_strided_slice %65 {offsets = [1, 0], sizes = [1, 32], strides = [1, 1]} : vector<2x32xf32> to vector<1x32xf32>
    %68 = arith.mulf %66, %66 : vector<1x32xf32>
    %69 = arith.subf %67, %68 : vector<1x32xf32>
    %c0_55 = arith.constant 0 : index
    %c0_56 = arith.constant 0 : index
    %70 = vector.load %arg2[%c0_55, %c0_56] : memref<1x32xf32, #tpu.memory_space<vmem>>, vector<1x32xf32>
    %cst_57 = arith.constant 9.99999974E-6 : f32
    %71 = vector.broadcast %cst_57 : f32 to vector<1x32xf32>
    %72 = arith.addf %69, %71 : vector<1x32xf32>
    %73 = math.rsqrt %72 : vector<1x32xf32>
    %74 = arith.mulf %70, %73 : vector<1x32xf32>
    %c0_58 = arith.constant 0 : index
    %c0_59 = arith.constant 0 : index
    %75 = vector.load %arg3[%c0_58, %c0_59] : memref<1x32xf32, #tpu.memory_space<vmem>>, vector<1x32xf32>
    %76 = arith.mulf %66, %74 : vector<1x32xf32>
    %77 = arith.subf %75, %76 : vector<1x32xf32>
    %78 = tpu.concatenate %74, %77 in 0 : vector<1x32xf32>, vector<1x32xf32> -> vector<2x32xf32>
    %c0_60 = arith.constant 0 : index
    %c0_61 = arith.constant 0 : index
    %79 = vector.load %arg5[%c0_60, %c0_61] : memref<32x448xf32, #tpu.memory_space<vmem>>, vector<32x448xf32>
    %cst_62 = arith.constant dense<0.000000e+00> : vector<2x448xf32>
    %80 = tpu.matmul %78, %79, %cst_62 {dimension_numbers = #tpu.dot_dimension_numbers<[1], [0], [0], [1], [0, 0, 1, 1], [], []>} : vector<2x32xf32>, vector<32x448xf32>, vector<2x448xf32> -> vector<2x448xf32>
    %81 = vector.extract_strided_slice %80 {offsets = [0, 0], sizes = [1, 448], strides = [1, 1]} : vector<2x448xf32> to vector<1x448xf32>
    %82 = vector.extract_strided_slice %80 {offsets = [1, 0], sizes = [1, 448], strides = [1, 1]} : vector<2x448xf32> to vector<1x448xf32>
    %83 = vector.broadcast %81 : vector<1x448xf32> to vector<14x448xf32>
    %84 = arith.mulf %47, %83 : vector<14x448xf32>
    %85 = vector.broadcast %82 : vector<1x448xf32> to vector<14x448xf32>
    %86 = arith.addf %84, %85 : vector<14x448xf32>
    %cst_63 = arith.constant 0.000000e+00 : f32
    %87 = vector.broadcast %cst_63 : f32 to vector<14x448xf32>
    %88 = arith.maximumf %86, %87 : vector<14x448xf32>
    %89 = vector.broadcast %81 : vector<1x448xf32> to vector<14x448xf32>
    %90 = arith.mulf %48, %89 : vector<14x448xf32>
    %91 = vector.broadcast %82 : vector<1x448xf32> to vector<14x448xf32>
    %92 = arith.addf %90, %91 : vector<14x448xf32>
    %cst_64 = arith.constant 0.000000e+00 : f32
    %93 = vector.broadcast %cst_64 : f32 to vector<14x448xf32>
    %94 = arith.maximumf %92, %93 : vector<14x448xf32>
    %95 = arith.truncf %88 : vector<14x448xf32> to vector<14x448xbf16>
    %96 = arith.truncf %94 : vector<14x448xf32> to vector<14x448xbf16>
    %97 = vector.extract_strided_slice %95 {offsets = [0, 0], sizes = [12, 448], strides = [1, 1]} : vector<14x448xbf16> to vector<12x448xbf16>
    %c0_65 = arith.constant 0 : index
    %c0_66 = arith.constant 0 : index
    %c0_67 = arith.constant 0 : index
    %98 = vector.load %arg6[%c0_65, %c0_66, %c0_67] : memref<4x448x384xbf16, #tpu.memory_space<vmem>>, vector<1x448x384xbf16>
    %99 = vector.shape_cast %98 : vector<1x448x384xbf16> to vector<448x384xbf16>
    %cst_68 = arith.constant dense<0.000000e+00> : vector<12x384xf32>
    %100 = tpu.matmul %97, %99, %cst_68 {dimension_numbers = #tpu.dot_dimension_numbers<[1], [0], [0], [1], [0, 0, 1, 1], [], []>} : vector<12x448xbf16>, vector<448x384xbf16>, vector<12x384xf32> -> vector<12x384xf32>
    %101 = vector.extract_strided_slice %96 {offsets = [0, 0], sizes = [12, 448], strides = [1, 1]} : vector<14x448xbf16> to vector<12x448xbf16>
    %c1_69 = arith.constant 1 : index
    %c0_70 = arith.constant 0 : index
    %c0_71 = arith.constant 0 : index
    %102 = vector.load %arg6[%c1_69, %c0_70, %c0_71] : memref<4x448x384xbf16, #tpu.memory_space<vmem>>, vector<1x448x384xbf16>
    %103 = vector.shape_cast %102 : vector<1x448x384xbf16> to vector<448x384xbf16>
    %cst_72 = arith.constant dense<0.000000e+00> : vector<12x384xf32>
    %104 = tpu.matmul %101, %103, %cst_72 {dimension_numbers = #tpu.dot_dimension_numbers<[1], [0], [0], [1], [0, 0, 1, 1], [], []>} : vector<12x448xbf16>, vector<448x384xbf16>, vector<12x384xf32> -> vector<12x384xf32>
    %105 = arith.addf %100, %104 : vector<12x384xf32>
    %106 = vector.extract_strided_slice %95 {offsets = [2, 0], sizes = [12, 448], strides = [1, 1]} : vector<14x448xbf16> to vector<12x448xbf16>
    %c2_73 = arith.constant 2 : index
    %c0_74 = arith.constant 0 : index
    %c0_75 = arith.constant 0 : index
    %107 = vector.load %arg6[%c2_73, %c0_74, %c0_75] : memref<4x448x384xbf16, #tpu.memory_space<vmem>>, vector<1x448x384xbf16>
    %108 = vector.shape_cast %107 : vector<1x448x384xbf16> to vector<448x384xbf16>
    %cst_76 = arith.constant dense<0.000000e+00> : vector<12x384xf32>
    %109 = tpu.matmul %106, %108, %cst_76 {dimension_numbers = #tpu.dot_dimension_numbers<[1], [0], [0], [1], [0, 0, 1, 1], [], []>} : vector<12x448xbf16>, vector<448x384xbf16>, vector<12x384xf32> -> vector<12x384xf32>
    %110 = arith.addf %105, %109 : vector<12x384xf32>
    %111 = vector.extract_strided_slice %96 {offsets = [2, 0], sizes = [12, 448], strides = [1, 1]} : vector<14x448xbf16> to vector<12x448xbf16>
    %c3_77 = arith.constant 3 : index
    %c0_78 = arith.constant 0 : index
    %c0_79 = arith.constant 0 : index
    %112 = vector.load %arg6[%c3_77, %c0_78, %c0_79] : memref<4x448x384xbf16, #tpu.memory_space<vmem>>, vector<1x448x384xbf16>
    %113 = vector.shape_cast %112 : vector<1x448x384xbf16> to vector<448x384xbf16>
    %cst_80 = arith.constant dense<0.000000e+00> : vector<12x384xf32>
    %114 = tpu.matmul %111, %113, %cst_80 {dimension_numbers = #tpu.dot_dimension_numbers<[1], [0], [0], [1], [0, 0, 1, 1], [], []>} : vector<12x448xbf16>, vector<448x384xbf16>, vector<12x384xf32> -> vector<12x384xf32>
    %115 = arith.addf %110, %114 : vector<12x384xf32>
    %cst_81 = arith.constant dense<0.000000e+00> : vector<384xf32>
    %116 = vector.multi_reduction <add>, %115, %cst_81 [0] : vector<12x384xf32> to vector<384xf32>
    %117 = vector.shape_cast %116 : vector<384xf32> to vector<1x384xf32>
    %118 = arith.mulf %115, %115 : vector<12x384xf32>
    %cst_82 = arith.constant dense<0.000000e+00> : vector<384xf32>
    %119 = vector.multi_reduction <add>, %118, %cst_82 [0] : vector<12x384xf32> to vector<384xf32>
    %120 = vector.shape_cast %119 : vector<384xf32> to vector<1x384xf32>
    %121 = tpu.concatenate %117, %120 in 0 : vector<1x384xf32>, vector<1x384xf32> -> vector<2x384xf32>
    %c0_83 = arith.constant 0 : index
    %c0_84 = arith.constant 0 : index
    %122 = vector.load %arg9[%c0_83, %c0_84] : memref<384x64xf32, #tpu.memory_space<vmem>>, vector<384x64xf32>
    %cst_85 = arith.constant dense<0.000000e+00> : vector<2x64xf32>
    %123 = tpu.matmul %121, %122, %cst_85 {dimension_numbers = #tpu.dot_dimension_numbers<[1], [0], [0], [1], [0, 0, 1, 1], [], []>} : vector<2x384xf32>, vector<384x64xf32>, vector<2x64xf32> -> vector<2x64xf32>
    %cst_86 = arith.constant 0.013888889 : f32
    %124 = vector.broadcast %cst_86 : f32 to vector<2x64xf32>
    %125 = arith.mulf %123, %124 : vector<2x64xf32>
    %126 = vector.extract_strided_slice %125 {offsets = [0, 0], sizes = [1, 64], strides = [1, 1]} : vector<2x64xf32> to vector<1x64xf32>
    %127 = vector.extract_strided_slice %125 {offsets = [1, 0], sizes = [1, 64], strides = [1, 1]} : vector<2x64xf32> to vector<1x64xf32>
    %128 = arith.mulf %126, %126 : vector<1x64xf32>
    %129 = arith.subf %127, %128 : vector<1x64xf32>
    %c0_87 = arith.constant 0 : index
    %c0_88 = arith.constant 0 : index
    %130 = vector.load %arg7[%c0_87, %c0_88] : memref<1x64xf32, #tpu.memory_space<vmem>>, vector<1x64xf32>
    %cst_89 = arith.constant 9.99999974E-6 : f32
    %131 = vector.broadcast %cst_89 : f32 to vector<1x64xf32>
    %132 = arith.addf %129, %131 : vector<1x64xf32>
    %133 = math.rsqrt %132 : vector<1x64xf32>
    %134 = arith.mulf %130, %133 : vector<1x64xf32>
    %c0_90 = arith.constant 0 : index
    %c0_91 = arith.constant 0 : index
    %135 = vector.load %arg8[%c0_90, %c0_91] : memref<1x64xf32, #tpu.memory_space<vmem>>, vector<1x64xf32>
    %136 = arith.mulf %126, %134 : vector<1x64xf32>
    %137 = arith.subf %135, %136 : vector<1x64xf32>
    %138 = tpu.concatenate %134, %137 in 0 : vector<1x64xf32>, vector<1x64xf32> -> vector<2x64xf32>
    %c0_92 = arith.constant 0 : index
    %c0_93 = arith.constant 0 : index
    %139 = vector.load %arg10[%c0_92, %c0_93] : memref<64x384xf32, #tpu.memory_space<vmem>>, vector<64x384xf32>
    %cst_94 = arith.constant dense<0.000000e+00> : vector<2x384xf32>
    %140 = tpu.matmul %138, %139, %cst_94 {dimension_numbers = #tpu.dot_dimension_numbers<[1], [0], [0], [1], [0, 0, 1, 1], [], []>} : vector<2x64xf32>, vector<64x384xf32>, vector<2x384xf32> -> vector<2x384xf32>
    %141 = vector.extract_strided_slice %140 {offsets = [0, 0], sizes = [1, 384], strides = [1, 1]} : vector<2x384xf32> to vector<1x384xf32>
    %142 = vector.extract_strided_slice %140 {offsets = [1, 0], sizes = [1, 384], strides = [1, 1]} : vector<2x384xf32> to vector<1x384xf32>
    %143 = vector.broadcast %141 : vector<1x384xf32> to vector<12x384xf32>
    %144 = arith.mulf %115, %143 : vector<12x384xf32>
    %145 = vector.broadcast %142 : vector<1x384xf32> to vector<12x384xf32>
    %146 = arith.addf %144, %145 : vector<12x384xf32>
    %cst_95 = arith.constant 0.000000e+00 : f32
    %147 = vector.broadcast %cst_95 : f32 to vector<12x384xf32>
    %148 = arith.maximumf %146, %147 : vector<12x384xf32>
    %149 = arith.truncf %148 : vector<12x384xf32> to vector<12x384xbf16>
    %150 = vector.extract_strided_slice %149 {offsets = [0, 0], sizes = [8, 384], strides = [1, 1]} : vector<12x384xbf16> to vector<8x384xbf16>
    %c0_96 = arith.constant 0 : index
    %c0_97 = arith.constant 0 : index
    %c0_98 = arith.constant 0 : index
    %151 = vector.load %arg11[%c0_96, %c0_97, %c0_98] : memref<3x384x256xbf16, #tpu.memory_space<vmem>>, vector<1x384x256xbf16>
    %152 = vector.shape_cast %151 : vector<1x384x256xbf16> to vector<384x256xbf16>
    %cst_99 = arith.constant dense<0.000000e+00> : vector<8x256xf32>
    %153 = tpu.matmul %150, %152, %cst_99 {dimension_numbers = #tpu.dot_dimension_numbers<[1], [0], [0], [1], [0, 0, 1, 1], [], []>} : vector<8x384xbf16>, vector<384x256xbf16>, vector<8x256xf32> -> vector<8x256xf32>
    %154 = vector.extract_strided_slice %149 {offsets = [2, 0], sizes = [8, 384], strides = [1, 1]} : vector<12x384xbf16> to vector<8x384xbf16>
    %c1_100 = arith.constant 1 : index
    %c0_101 = arith.constant 0 : index
    %c0_102 = arith.constant 0 : index
    %155 = vector.load %arg11[%c1_100, %c0_101, %c0_102] : memref<3x384x256xbf16, #tpu.memory_space<vmem>>, vector<1x384x256xbf16>
    %156 = vector.shape_cast %155 : vector<1x384x256xbf16> to vector<384x256xbf16>
    %cst_103 = arith.constant dense<0.000000e+00> : vector<8x256xf32>
    %157 = tpu.matmul %154, %156, %cst_103 {dimension_numbers = #tpu.dot_dimension_numbers<[1], [0], [0], [1], [0, 0, 1, 1], [], []>} : vector<8x384xbf16>, vector<384x256xbf16>, vector<8x256xf32> -> vector<8x256xf32>
    %158 = arith.addf %153, %157 : vector<8x256xf32>
    %159 = vector.extract_strided_slice %149 {offsets = [4, 0], sizes = [8, 384], strides = [1, 1]} : vector<12x384xbf16> to vector<8x384xbf16>
    %c2_104 = arith.constant 2 : index
    %c0_105 = arith.constant 0 : index
    %c0_106 = arith.constant 0 : index
    %160 = vector.load %arg11[%c2_104, %c0_105, %c0_106] : memref<3x384x256xbf16, #tpu.memory_space<vmem>>, vector<1x384x256xbf16>
    %161 = vector.shape_cast %160 : vector<1x384x256xbf16> to vector<384x256xbf16>
    %cst_107 = arith.constant dense<0.000000e+00> : vector<8x256xf32>
    %162 = tpu.matmul %159, %161, %cst_107 {dimension_numbers = #tpu.dot_dimension_numbers<[1], [0], [0], [1], [0, 0, 1, 1], [], []>} : vector<8x384xbf16>, vector<384x256xbf16>, vector<8x256xf32> -> vector<8x256xf32>
    %163 = arith.addf %158, %162 : vector<8x256xf32>
    %cst_108 = arith.constant dense<0.000000e+00> : vector<256xf32>
    %164 = vector.multi_reduction <add>, %163, %cst_108 [0] : vector<8x256xf32> to vector<256xf32>
    %165 = vector.shape_cast %164 : vector<256xf32> to vector<1x256xf32>
    %166 = arith.mulf %163, %163 : vector<8x256xf32>
    %cst_109 = arith.constant dense<0.000000e+00> : vector<256xf32>
    %167 = vector.multi_reduction <add>, %166, %cst_109 [0] : vector<8x256xf32> to vector<256xf32>
    %168 = vector.shape_cast %167 : vector<256xf32> to vector<1x256xf32>
    %169 = tpu.concatenate %165, %168 in 0 : vector<1x256xf32>, vector<1x256xf32> -> vector<2x256xf32>
    %c0_110 = arith.constant 0 : index
    %c0_111 = arith.constant 0 : index
    %170 = vector.load %arg14[%c0_110, %c0_111] : memref<256x64xf32, #tpu.memory_space<vmem>>, vector<256x64xf32>
    %cst_112 = arith.constant dense<0.000000e+00> : vector<2x64xf32>
    %171 = tpu.matmul %169, %170, %cst_112 {dimension_numbers = #tpu.dot_dimension_numbers<[1], [0], [0], [1], [0, 0, 1, 1], [], []>} : vector<2x256xf32>, vector<256x64xf32>, vector<2x64xf32> -> vector<2x64xf32>
    %cst_113 = arith.constant 3.125000e-02 : f32
    %172 = vector.broadcast %cst_113 : f32 to vector<2x64xf32>
    %173 = arith.mulf %171, %172 : vector<2x64xf32>
    %174 = vector.extract_strided_slice %173 {offsets = [0, 0], sizes = [1, 64], strides = [1, 1]} : vector<2x64xf32> to vector<1x64xf32>
    %175 = vector.extract_strided_slice %173 {offsets = [1, 0], sizes = [1, 64], strides = [1, 1]} : vector<2x64xf32> to vector<1x64xf32>
    %176 = arith.mulf %174, %174 : vector<1x64xf32>
    %177 = arith.subf %175, %176 : vector<1x64xf32>
    %c0_114 = arith.constant 0 : index
    %c0_115 = arith.constant 0 : index
    %178 = vector.load %arg12[%c0_114, %c0_115] : memref<1x64xf32, #tpu.memory_space<vmem>>, vector<1x64xf32>
    %cst_116 = arith.constant 9.99999974E-6 : f32
    %179 = vector.broadcast %cst_116 : f32 to vector<1x64xf32>
    %180 = arith.addf %177, %179 : vector<1x64xf32>
    %181 = math.rsqrt %180 : vector<1x64xf32>
    %182 = arith.mulf %178, %181 : vector<1x64xf32>
    %c0_117 = arith.constant 0 : index
    %c0_118 = arith.constant 0 : index
    %183 = vector.load %arg13[%c0_117, %c0_118] : memref<1x64xf32, #tpu.memory_space<vmem>>, vector<1x64xf32>
    %184 = arith.mulf %174, %182 : vector<1x64xf32>
    %185 = arith.subf %183, %184 : vector<1x64xf32>
    %186 = tpu.concatenate %182, %185 in 0 : vector<1x64xf32>, vector<1x64xf32> -> vector<2x64xf32>
    %c0_119 = arith.constant 0 : index
    %c0_120 = arith.constant 0 : index
    %187 = vector.load %arg15[%c0_119, %c0_120] : memref<64x256xf32, #tpu.memory_space<vmem>>, vector<64x256xf32>
    %cst_121 = arith.constant dense<0.000000e+00> : vector<2x256xf32>
    %188 = tpu.matmul %186, %187, %cst_121 {dimension_numbers = #tpu.dot_dimension_numbers<[1], [0], [0], [1], [0, 0, 1, 1], [], []>} : vector<2x64xf32>, vector<64x256xf32>, vector<2x256xf32> -> vector<2x256xf32>
    %189 = vector.extract_strided_slice %188 {offsets = [0, 0], sizes = [1, 256], strides = [1, 1]} : vector<2x256xf32> to vector<1x256xf32>
    %190 = vector.extract_strided_slice %188 {offsets = [1, 0], sizes = [1, 256], strides = [1, 1]} : vector<2x256xf32> to vector<1x256xf32>
    %191 = vector.broadcast %189 : vector<1x256xf32> to vector<8x256xf32>
    %192 = arith.mulf %163, %191 : vector<8x256xf32>
    %193 = vector.broadcast %190 : vector<1x256xf32> to vector<8x256xf32>
    %194 = arith.addf %192, %193 : vector<8x256xf32>
    %cst_122 = arith.constant 0.000000e+00 : f32
    %195 = vector.broadcast %cst_122 : f32 to vector<8x256xf32>
    %196 = arith.maximumf %194, %195 : vector<8x256xf32>
    %197 = vector.extract_strided_slice %196 {offsets = [0, 0], sizes = [2, 256], strides = [1, 1]} : vector<8x256xf32> to vector<2x256xf32>
    %198 = vector.extract_strided_slice %196 {offsets = [2, 0], sizes = [2, 256], strides = [1, 1]} : vector<8x256xf32> to vector<2x256xf32>
    %199 = vector.extract_strided_slice %196 {offsets = [4, 0], sizes = [2, 256], strides = [1, 1]} : vector<8x256xf32> to vector<2x256xf32>
    %200 = vector.extract_strided_slice %196 {offsets = [6, 0], sizes = [2, 256], strides = [1, 1]} : vector<8x256xf32> to vector<2x256xf32>
    %201 = tpu.concatenate %197, %198, %199, %200 in 1 : vector<2x256xf32>, vector<2x256xf32>, vector<2x256xf32>, vector<2x256xf32> -> vector<2x1024xf32>
    %202 = arith.truncf %201 : vector<2x1024xf32> to vector<2x1024xbf16>
    %c0_123 = arith.constant 0 : index
    %c0_124 = arith.constant 0 : index
    %203 = vector.load %arg16[%c0_123, %c0_124] : memref<1024x256xbf16, #tpu.memory_space<vmem>>, vector<1024x256xbf16>
    %cst_125 = arith.constant dense<0.000000e+00> : vector<2x256xf32>
    %204 = tpu.matmul %202, %203, %cst_125 {dimension_numbers = #tpu.dot_dimension_numbers<[1], [0], [0], [1], [0, 0, 1, 1], [], []>} : vector<2x1024xbf16>, vector<1024x256xbf16>, vector<2x256xf32> -> vector<2x256xf32>
    %c0_126 = arith.constant 0 : index
    %c0_127 = arith.constant 0 : index
    %205 = vector.load %arg17[%c0_126, %c0_127] : memref<1x256xf32, #tpu.memory_space<vmem>>, vector<1x256xf32>
    %206 = vector.broadcast %205 : vector<1x256xf32> to vector<2x256xf32>
    %207 = arith.addf %204, %206 : vector<2x256xf32>
    %cst_128 = arith.constant 0.000000e+00 : f32
    %208 = vector.broadcast %cst_128 : f32 to vector<2x256xf32>
    %209 = arith.cmpf ogt, %207, %208 : vector<2x256xf32>
    %cst_129 = arith.constant 0.00999999977 : f32
    %210 = vector.broadcast %cst_129 : f32 to vector<2x256xf32>
    %211 = arith.mulf %210, %207 : vector<2x256xf32>
    %212 = arith.select %209, %207, %211 : vector<2x256xi1>, vector<2x256xf32>
    %213 = arith.truncf %212 : vector<2x256xf32> to vector<2x256xbf16>
    %c0_130 = arith.constant 0 : index
    %c0_131 = arith.constant 0 : index
    %214 = vector.load %arg18[%c0_130, %c0_131] : memref<256x7xbf16, #tpu.memory_space<vmem>>, vector<256x7xbf16>
    %cst_132 = arith.constant dense<0.000000e+00> : vector<2x7xf32>
    %215 = tpu.matmul %213, %214, %cst_132 {dimension_numbers = #tpu.dot_dimension_numbers<[1], [0], [0], [1], [0, 0, 1, 1], [], []>} : vector<2x256xbf16>, vector<256x7xbf16>, vector<2x7xf32> -> vector<2x7xf32>
    %c0_133 = arith.constant 0 : index
    %c0_134 = arith.constant 0 : index
    %216 = vector.load %arg19[%c0_133, %c0_134] : memref<1x7xf32, #tpu.memory_space<vmem>>, vector<1x7xf32>
    %217 = vector.broadcast %216 : vector<1x7xf32> to vector<2x7xf32>
    %218 = arith.addf %215, %217 : vector<2x7xf32>
    %219 = vector.extract_strided_slice %218 {offsets = [0, 0], sizes = [2, 6], strides = [1, 1]} : vector<2x7xf32> to vector<2x6xf32>
    %220 = vector.extract_strided_slice %218 {offsets = [0, 6], sizes = [2, 1], strides = [1, 1]} : vector<2x7xf32> to vector<2x1xf32>
    %221 = vector.broadcast %220 : vector<2x1xf32> to vector<2x6xf32>
    %222 = arith.addf %221, %219 : vector<2x6xf32>
    %cst_135 = arith.constant dense<0.000000e+00> : vector<2xf32>
    %223 = vector.multi_reduction <add>, %219, %cst_135 [1] : vector<2x6xf32> to vector<2xf32>
    %224 = vector.shape_cast %223 : vector<2xf32> to vector<2x1xf32>
    %cst_136 = arith.constant 0.166666672 : f32
    %225 = vector.broadcast %cst_136 : f32 to vector<2x1xf32>
    %226 = arith.mulf %224, %225 : vector<2x1xf32>
    %227 = vector.broadcast %226 : vector<2x1xf32> to vector<2x6xf32>
    %228 = arith.subf %222, %227 : vector<2x6xf32>
    %c0_137 = arith.constant 0 : index
    %c0_138 = arith.constant 0 : index
    %229 = vector.load %arg20[%c0_137, %c0_138] : memref<2x6xf32, #tpu.memory_space<vmem>>, vector<2x6xf32>
    tpu.vector_store %arg20[%c0_137, %c0_138], %228 {strides = array<i32>} : memref<2x6xf32, #tpu.memory_space<vmem>>, vector<2x6xf32>,
    return
  }
}

</mosaic_0001>

<bundles_post_ra>
// kernel: duel_cnn_forward.1
= control target key start
LH: loop header
LB: loop body
LE: loop exit
PB: predicated region body
PF: predicated region fallthrough
CT: control target
= control target key end

     0   :  { %s26434_s0 = inlined_call_operand.vmem [shape: bf16[8,28,240], index: 0, kind: input, shape index: {}]   ;;  %s26435_s1 = inlined_call_operand.vmem [shape: bf16[8,240,448], index: 1, kind: input, shape index: {}]   ;;  %s26436_s2 = inlined_call_operand.vmem [shape: f32[1,32], index: 2, kind: input, shape index: {}]   ;;  %s26437_s3 = inlined_call_operand.vmem [shape: f32[1,32], index: 3, kind: input, shape index: {}]   ;;  %s26438_s4 = inlined_call_operand.vmem [shape: f32[448,32], index: 4, kind: input, shape index: {}]   ;;  %s26439_s5 = inlined_call_operand.vmem [shape: f32[32,448], index: 5, kind: input, shape index: {}]   ;;  %s26440_s6 = inlined_call_operand.vmem [shape: bf16[4,448,384], index: 6, kind: input, shape index: {}]   ;;  %s26441_s7 = inlined_call_operand.vmem [shape: f32[1,64], index: 7, kind: input, shape index: {}]   ;;  %s26442_s8 = inlined_call_operand.vmem [shape: f32[1,64], index: 8, kind: input, shape index: {}]   ;;  %s26443_s9 = inlined_call_operand.vmem [shape: f32[384,64], index: 9, kind: input, shape index: {}]   ;;  %s26444_s10 = inlined_call_operand.vmem [shape: f32[64,384], index: 10, kind: input, shape index: {}]   ;;  %s26445_s11 = inlined_call_operand.vmem [shape: bf16[3,384,256], index: 11, kind: input, shape index: {}]   ;;  %s26446_s12 = inlined_call_operand.vmem [shape: f32[1,64], index: 12, kind: input, shape index: {}]   ;;  %s26447_s13 = inlined_call_operand.vmem [shape: f32[1,64], index: 13, kind: input, shape index: {}]   ;;  %s26448_s14 = inlined_call_operand.vmem [shape: f32[256,64], index: 14, kind: input, shape index: {}]   ;;  %s26449_s15 = inlined_call_operand.vmem [shape: f32[64,256], index: 15, kind: input, shape index: {}]   ;;  %s26450_s16 = inlined_call_operand.vmem [shape: bf16[1024,256], index: 16, kind: input, shape index: {}]   ;;  %s26451_s17 = inlined_call_operand.vmem [shape: f32[1,256], index: 17, kind: input, shape index: {}]   ;;  %s26452_s18 = inlined_call_operand.vmem [shape: bf16[256,7], index: 18, kind: input, shape index: {}]   ;;  %s26453_s19 = inlined_call_operand.vmem [shape: f32[1,7], index: 19, kind: input, shape index: {}]   ;;  %s26454_s20 = inlined_call_operand.hbm [shape: f32[2,6], index: 20, kind: output, shape index: {}]  }
   0x1   :  { %26458 = sst [smem:[#allocation6_spill]] %s26434_s0 }
   0x2   :  { %26459 = sst [smem:[#allocation7_spill]] %s26435_s1 }
   0x3   :  { %26460 = sst [smem:[#allocation8_spill]] %s26436_s2 }
   0x4   :  { %26461 = sst [smem:[#allocation9_spill]] %s26437_s3 }
   0x5   :  { %26462 = sst [smem:[#allocation10_spill]] %s26438_s4 }
   0x6   :  { %s26463_s23 = sld [smem:[#allocation7_spill]]  ;;  %vm515_vm0 = vcmask 916480  }
   0x7   :  { %s26464_s24 = sld [smem:[#allocation6_spill]] }
   0xc   :  { %v11123_v0 = vld [vmem:[%s26463_s23 + $0x2c0] sm:$0xf]  ;;  %v16537_v1 = vld [vmem:[%s26463_s23 + $0x2cc] sm:$0xf0]  ;;  %v16535_v5 = vld [vmem:[%s26463_s23 + $0x2c4] sm:$0xf] }
   0xd   :  { %v11235_v2 = vld [vmem:[%s26463_s23 + $0x3a0] sm:$0xf]  ;;  %v11124_v3 = vor.u32 %v16537_v1, %v11123_v0  ;;  %v16565_v4 = vld [vmem:[%s26463_s23 + $0x3ac] sm:$0xf0]  ;;  %v11125_v6 = vld [vmem:[%s26463_s23 + $0x2d0] sm:$0xf0] }
   0xe   :  { %v11236_v7 = vor.u32 %v16565_v4, %v11235_v2  ;;  %v11128_v8 = vor.u32 %v16535_v5, %v11125_v6  ;;  %v16563_v9 = vld [vmem:[%s26463_s23 + $0x3a4] sm:$0xf]  ;;  %v11237_v10 = vld [vmem:[%s26463_s23 + $0x3b0] sm:$0xf0]  ;;  %v11107_v11 = vld [vmem:[%s26463_s23 + $0x2a0] sm:$0xf] }
   0xf   :  { %522 = vmatpush.bf16.msra.mxu0 %v11124_v3  ;;  %v11240_v12 = vor.u32 %v16563_v9, %v11237_v10  ;;  %v16533_v13 = vld [vmem:[%s26463_s23 + $0x2ac] sm:$0xf0]  ;;  %v11219_v14 = vld [vmem:[%s26463_s23 + $0x380] sm:$0xf]  ;;  %v16531_v18 = vld [vmem:[%s26463_s23 + $0x2a4] sm:$0xf] }
  0x10   :  { %v16561_v15 = vld [vmem:[%s26463_s23 + $0x38c] sm:$0xf0]  ;;  %542 = vmatpush.bf16.msra.mxu1 %v11236_v7  ;;  %560 = vmatpush.bf16.msra.mxu2 %v11128_v8  ;;  %v11108_v16 = vor.u32 %v16533_v13, %v11107_v11  ;;  %v11109_v19 = vld [vmem:[%s26463_s23 + $0x2b0] sm:$0xf0]  ;;  %v16559_v20 = vld [vmem:[%s26463_s23 + $0x384] sm:$0xf] }
  0x11   :  { %v11220_v17 = vor.u32 %v16561_v15, %v11219_v14  ;;  %580 = vmatpush.bf16.msra.mxu3 %v11240_v12  ;;  %v11112_v21 = vor.u32 %v16531_v18, %v11109_v19  ;;  %v11221_v22 = vld [vmem:[%s26463_s23 + $0x390] sm:$0xf0]  ;;  %v11091_v23 = vld [vmem:[%s26463_s23 + $0x280] sm:$0xf]  ;;  %v16529_v24 = vld [vmem:[%s26463_s23 + $0x28c] sm:$0xf0] }
  0x12   :  { %v11224_v25 = vor.u32 %v16559_v20, %v11221_v22  ;;  %v11203_v26 = vld [vmem:[%s26463_s23 + $0x360] sm:$0xf]  ;;  %v16557_v27 = vld [vmem:[%s26463_s23 + $0x36c] sm:$0xf0]  ;;  %v16527_v28 = vld [vmem:[%s26463_s23 + $0x284] sm:$0xf]  ;;  %v11092_v29 = vor.u32 %v16529_v24, %v11091_v23 }
  0x13   :  { %523 = vmatpush.bf16.msra.mxu0 %v11108_v16  ;;  %v11093_v30 = vld [vmem:[%s26463_s23 + $0x290] sm:$0xf0]  ;;  %v16555_v31 = vld [vmem:[%s26463_s23 + $0x364] sm:$0xf]  ;;  %v11204_v33 = vor.u32 %v16557_v27, %v11203_v26  ;;  %v11075_v35 = vld [vmem:[%s26463_s23 + $0x260] sm:$0xf] }
  0x14   :  { %v11205_v32 = vld [vmem:[%s26463_s23 + $0x370] sm:$0xf0]  ;;  %543 = vmatpush.bf16.msra.mxu1 %v11220_v17  ;;  %561 = vmatpush.bf16.msra.mxu2 %v11112_v21  ;;  %v11096_v34 = vor.u32 %v16527_v28, %v11093_v30  ;;  %v16525_v36 = vld [vmem:[%s26463_s23 + $0x26c] sm:$0xf0]  ;;  %v11187_v37 = vld [vmem:[%s26463_s23 + $0x340] sm:$0xf] }
  0x15   :  { %581 = vmatpush.bf16.msra.mxu3 %v11224_v25  ;;  %v11208_v38 = vor.u32 %v16555_v31, %v11205_v32  ;;  %v16553_v39 = vld [vmem:[%s26463_s23 + $0x34c] sm:$0xf0]  ;;  %v16523_v40 = vld [vmem:[%s26463_s23 + $0x264] sm:$0xf]  ;;  %v11077_v41 = vld [vmem:[%s26463_s23 + $0x270] sm:$0xf0]  ;;  %v11076_v44 = vor.u32 %v16525_v36, %v11075_v35 }
  0x16   :  { %v16551_v42 = vld [vmem:[%s26463_s23 + $0x344] sm:$0xf]  ;;  %v11189_v43 = vld [vmem:[%s26463_s23 + $0x350] sm:$0xf0]  ;;  %v11188_v45 = vor.u32 %v16553_v39, %v11187_v37  ;;  %v11080_v46 = vor.u32 %v16523_v40, %v11077_v41  ;;  %v11059_v47 = vld [vmem:[%s26463_s23 + $0x240] sm:$0xf] }
  0x17   :  { %524 = vmatpush.bf16.msra.mxu0 %v11092_v29  ;;  %v16521_v48 = vld [vmem:[%s26463_s23 + $0x24c] sm:$0xf0]  ;;  %v11171_v49 = vld [vmem:[%s26463_s23 + $0x320] sm:$0xf]  ;;  %v11192_v50 = vor.u32 %v16551_v42, %v11189_v43  ;;  %v16519_v52 = vld [vmem:[%s26463_s23 + $0x244] sm:$0xf] }
  0x18   :  { %544 = vmatpush.bf16.msra.mxu1 %v11204_v33  ;;  %562 = vmatpush.bf16.msra.mxu2 %v11096_v34  ;;  %v16549_v51 = vld [vmem:[%s26463_s23 + $0x32c] sm:$0xf0]  ;;  %v11061_v53 = vld [vmem:[%s26463_s23 + $0x250] sm:$0xf0]  ;;  %v16547_v54 = vld [vmem:[%s26463_s23 + $0x324] sm:$0xf]  ;;  %v11060_v56 = vor.u32 %v16521_v48, %v11059_v47 }
  0x19   :  { %582 = vmatpush.bf16.msra.mxu3 %v11208_v38  ;;  %v11173_v55 = vld [vmem:[%s26463_s23 + $0x330] sm:$0xf0]  ;;  %v11172_v57 = vor.u32 %v16549_v51, %v11171_v49  ;;  %v11064_v58 = vor.u32 %v16519_v52, %v11061_v53  ;;  %v11043_v59 = vld [vmem:[%s26463_s23 + $0x220] sm:$0xf]  ;;  %v16517_v60 = vld [vmem:[%s26463_s23 + $0x22c] sm:$0xf0] }
  0x1a   :  { %v11155_v61 = vld [vmem:[%s26463_s23 + $0x300] sm:$0xf]  ;;  %v11176_v62 = vor.u32 %v16547_v54, %v11173_v55  ;;  %v16545_v63 = vld [vmem:[%s26463_s23 + $0x30c] sm:$0xf0]  ;;  %v16515_v0 = vld [vmem:[%s26463_s23 + $0x224] sm:$0xf]  ;;  %v11044_v4 = vor.u32 %v16517_v60, %v11043_v59 }
  0x1b   :  { %525 = vmatpush.bf16.msra.mxu0 %v11076_v44  ;;  %v11045_v1 = vld [vmem:[%s26463_s23 + $0x230] sm:$0xf0]  ;;  %v16543_v2 = vld [vmem:[%s26463_s23 + $0x304] sm:$0xf]  ;;  %v11027_v5 = vld [vmem:[%s26463_s23 + $0x200] sm:$0xf]  ;;  %v11156_v7 = vor.u32 %v16545_v63, %v11155_v61 }
  0x1c   :  { %545 = vmatpush.bf16.msra.mxu1 %v11188_v45  ;;  %563 = vmatpush.bf16.msra.mxu2 %v11080_v46  ;;  %v11157_v3 = vld [vmem:[%s26463_s23 + $0x310] sm:$0xf0]  ;;  %v16513_v6 = vld [vmem:[%s26463_s23 + $0x20c] sm:$0xf0]  ;;  %v11048_v8 = vor.u32 %v16515_v0, %v11045_v1  ;;  %v11139_v9 = vld [vmem:[%s26463_s23 + $0x2e0] sm:$0xf] }
  0x1d   :  { %583 = vmatpush.bf16.msra.mxu3 %v11192_v50  ;;  %v16541_v10 = vld [vmem:[%s26463_s23 + $0x2ec] sm:$0xf0]  ;;  %v16511_v11 = vld [vmem:[%s26463_s23 + $0x204] sm:$0xf]  ;;  %v11160_v12 = vor.u32 %v16543_v2, %v11157_v3  ;;  %v11029_v13 = vld [vmem:[%s26463_s23 + $0x210] sm:$0xf0]  ;;  %v11028_v19 = vor.u32 %v16513_v6, %v11027_v5 }
  0x1e   :  { %v16539_v14 = vld [vmem:[%s26463_s23 + $0x2e4] sm:$0xf]  ;;  %v11141_v15 = vld [vmem:[%s26463_s23 + $0x2f0] sm:$0xf0]  ;;  %v11131_v17 = vld [vmem:[%s26463_s23 + $0x2c8] sm:$0xf]  ;;  %v11140_v23 = vor.u32 %v16541_v10, %v11139_v9  ;;  %v11032_v24 = vor.u32 %v16511_v11, %v11029_v13 }
  0x1f   :  { %526 = vmatpush.bf16.msra.mxu0 %v11060_v56  ;;  %v16503_v16 = vld [vmem:[%s26464_s24 + $0x24] sm:$0xf]  ;;  %v16538_v18 = vld [vmem:[%s26463_s23 + $0x2d4] sm:$0xf0]  ;;  %v10997_v20 = vld [vmem:[%s26464_s24 + $0x28] sm:$0xf0]  ;;  %v11144_v28 = vor.u32 %v16539_v14, %v11141_v15 }
  0x20   :  { %546 = vmatpush.bf16.msra.mxu1 %v11172_v57  ;;  %564 = vmatpush.bf16.msra.mxu2 %v11064_v58  ;;  %v11243_v21 = vld [vmem:[%s26463_s23 + $0x3a8] sm:$0xf]  ;;  %v16566_v22 = vld [vmem:[%s26463_s23 + $0x3b4] sm:$0xf0]  ;;  %v11011_v25 = vld [vmem:[%s26463_s23 + $0x1e0] sm:$0xf]  ;;  %v11132_v30 = vor.u32 %v16538_v18, %v11131_v17  ;;  %v17931_v37 = vor.u32 %v16503_v16, %v10997_v20 }
  0x21   :  { %584 = vmatpush.bf16.msra.mxu3 %v11176_v62  ;;  %v16509_v26 = vld [vmem:[%s26463_s23 + $0x1ec] sm:$0xf0]  ;;  %v16507_v27 = vld [vmem:[%s26463_s23 + $0x1e4] sm:$0xf]  ;;  %v11013_v29 = vld [vmem:[%s26463_s23 + $0x1f0] sm:$0xf0]  ;;  %v11244_v34 = vor.u32 %v16566_v22, %v11243_v21 }
  0x22   :  { %v10995_v31 = vld [vmem:[%s26464_s24 + $0x20] sm:$0xf]  ;;  %v11115_v32 = vld [vmem:[%s26463_s23 + $0x2a8] sm:$0xf]  ;;  %v16534_v33 = vld [vmem:[%s26463_s23 + $0x2b4] sm:$0xf0]  ;;  %v11012_v38 = vor.u32 %v16509_v26, %v11011_v25  ;;  %v11016_v42 = vor.u32 %v16507_v27, %v11013_v29 }
  0x23   :  { %527 = vmatpush.bf16.msra.mxu0 %v11044_v4  ;;  %v16536_v35 = vld [vmem:[%s26463_s23 + $0x2cc] sm:$0xf]  ;;  %v11133_v36 = vld [vmem:[%s26463_s23 + $0x2d8] sm:$0xf0]  ;;  %v16504_v39 = vld [vmem:[%s26464_s24 + $0x24] sm:$0xf0]  ;;  %v11116_v43 = vor.u32 %v16534_v33, %v11115_v32 }
  0x24   :  { %547 = vmatpush.bf16.msra.mxu1 %v11156_v7  ;;  %565 = vmatpush.bf16.msra.mxu2 %v11048_v8  ;;  %v11227_v40 = vld [vmem:[%s26463_s23 + $0x388] sm:$0xf]  ;;  %v16562_v41 = vld [vmem:[%s26463_s23 + $0x394] sm:$0xf0]  ;;  %v11136_v44 = vor.u32 %v16536_v35, %v11133_v36  ;;  %v16564_v46 = vld [vmem:[%s26463_s23 + $0x3ac] sm:$0xf]  ;;  %v17951_v48 = vor.u32 %v16504_v39, %v10995_v31 }
  0x25   :  { %585 = vmatpush.bf16.msra.mxu3 %v11160_v12  ;;  %v11099_v45 = vld [vmem:[%s26463_s23 + $0x288] sm:$0xf]  ;;  %v11245_v47 = vld [vmem:[%s26463_s23 + $0x3b8] sm:$0xf0]  ;;  %v16530_v49 = vld [vmem:[%s26463_s23 + $0x294] sm:$0xf0]  ;;  %v11228_v50 = vor.u32 %v16562_v41, %v11227_v40 }
  0x26   :  { %v16532_v51 = vld [vmem:[%s26463_s23 + $0x2ac] sm:$0xf]  ;;  %v11117_v52 = vld [vmem:[%s26463_s23 + $0x2b8] sm:$0xf0]  ;;  %v11211_v53 = vld [vmem:[%s26463_s23 + $0x368] sm:$0xf]  ;;  %v11248_v55 = vor.u32 %v16564_v46, %v11245_v47  ;;  %v11100_v56 = vor.u32 %v16530_v49, %v11099_v45 }
  0x27   :  { %528 = vmatpush.bf16.msra.mxu0 %v11028_v19  ;;  %v16558_v54 = vld [vmem:[%s26463_s23 + $0x374] sm:$0xf0]  ;;  %v11120_v57 = vor.u32 %v16532_v51, %v11117_v52  ;;  %v11083_v58 = vld [vmem:[%s26463_s23 + $0x268] sm:$0xf]  ;;  %v16560_v59 = vld [vmem:[%s26463_s23 + $0x38c] sm:$0xf] }
  0x28   :  { %548 = vmatpush.bf16.msra.mxu1 %v11140_v23  ;;  %566 = vmatpush.bf16.msra.mxu2 %v11032_v24  ;;  %v11229_v60 = vld [vmem:[%s26463_s23 + $0x398] sm:$0xf0]  ;;  %v16526_v61 = vld [vmem:[%s26463_s23 + $0x274] sm:$0xf0]  ;;  %v11212_v62 = vor.u32 %v16558_v54, %v11211_v53  ;;  %v16528_v63 = vld [vmem:[%s26463_s23 + $0x28c] sm:$0xf] }
  0x29   :  { %586 = vmatpush.bf16.msra.mxu3 %v11144_v28  ;;  %v11101_v0 = vld [vmem:[%s26463_s23 + $0x298] sm:$0xf0]  ;;  %v11195_v1 = vld [vmem:[%s26463_s23 + $0x348] sm:$0xf]  ;;  %v16554_v2 = vld [vmem:[%s26463_s23 + $0x354] sm:$0xf0]  ;;  %v11232_v3 = vor.u32 %v16560_v59, %v11229_v60  ;;  %v11084_v4 = vor.u32 %v16526_v61, %v11083_v58 }
  0x2a   :  { %v11104_v5 = vor.u32 %v16528_v63, %v11101_v0  ;;  %v11067_v6 = vld [vmem:[%s26463_s23 + $0x248] sm:$0xf]  ;;  %v16556_v7 = vld [vmem:[%s26463_s23 + $0x36c] sm:$0xf]  ;;  %v11213_v8 = vld [vmem:[%s26463_s23 + $0x378] sm:$0xf0]  ;;  %v11196_v10 = vor.u32 %v16554_v2, %v11195_v1 }
  0x2b   :  { %11249 = vmatmul.msk.bf16.vlgmr.msra.gmra.mxu1 %vm515_vm0, %v17931_v37  ;;  %529 = vmatpush.bf16.msra.mxu0 %v11012_v38  ;;  %v16522_v9 = vld [vmem:[%s26463_s23 + $0x254] sm:$0xf0]  ;;  %v16524_v11 = vld [vmem:[%s26463_s23 + $0x26c] sm:$0xf]  ;;  %v11085_v12 = vld [vmem:[%s26463_s23 + $0x278] sm:$0xf0]  ;;  %v11216_v17 = vor.u32 %v16556_v7, %v11213_v8 }
  0x2c   :  { %598 = vmatpush.bf16.msrb.mxu1 %v11132_v30  ;;  %11251 = vmatmul.msk.bf16.vlgmr.msra.gmra.mxu3 %vm515_vm0, %v17931_v37  ;;  %v11179_v13 = vld [vmem:[%s26463_s23 + $0x328] sm:$0xf]  ;;  %v16550_v14 = vld [vmem:[%s26463_s23 + $0x334] sm:$0xf0]  ;;  %v16505_v15 = vld [vmem:[%s26464_s24 + $0x34] sm:$0xf]  ;;  %v11068_v18 = vor.u32 %v16522_v9, %v11067_v6  ;;  %v11088_v19 = vor.u32 %v16524_v11, %v11085_v12 }
  0x2d   :  { %618 = vmatpush.bf16.msrb.mxu3 %v11244_v34  ;;  %567 = vmatpush.bf16.msra.mxu2 %v11016_v42  ;;  %v11005_v16 = vld [vmem:[%s26464_s24 + $0x38] sm:$0x30]  ;;  %v11003_v20 = vld [vmem:[%s26464_s24 + $0x30] sm:$0xf]  ;;  %v11051_v21 = vld [vmem:[%s26463_s23 + $0x228] sm:$0xf]  ;;  %v11180_v25 = vor.u32 %v16550_v14, %v11179_v13 }
  0x2e   :  { %530 = vmatmul.bf16.vlgmr.msra.gmra.mxu0 %v17951_v48  ;;  %v16552_v22 = vld [vmem:[%s26463_s23 + $0x34c] sm:$0xf]  ;;  %v11197_v23 = vld [vmem:[%s26463_s23 + $0x358] sm:$0xf0]  ;;  %v16518_v24 = vld [vmem:[%s26463_s23 + $0x234] sm:$0xf0]  ;;  %v18049_v28 = vor.u32 %v16505_v15, %v11005_v16 }
  0x2f   :  { %636 = vmatpush.bf16.msrb.mxu0 %v11136_v44  ;;  %v16520_v26 = vld [vmem:[%s26463_s23 + $0x24c] sm:$0xf]  ;;  %v11069_v27 = vld [vmem:[%s26463_s23 + $0x258] sm:$0xf0]  ;;  %v16506_v29 = vld [vmem:[%s26464_s24 + $0x34] sm:$0x30]  ;;  %v11200_v32 = vor.u32 %v16552_v22, %v11197_v23  ;;  %v11052_v33 = vor.u32 %v16518_v24, %v11051_v21 }
  0x30   :  { %599 = vmatpush.bf16.msrb.mxu1 %v11116_v43  ;;  %568 = vmatmul.bf16.vlgmr.msra.gmra.mxu2 %v17951_v48  ;;  %v11163_v30 = vld [vmem:[%s26463_s23 + $0x308] sm:$0xf]  ;;  %v16546_v31 = vld [vmem:[%s26463_s23 + $0x314] sm:$0xf0]  ;;  %v11072_v34 = vor.u32 %v16520_v26, %v11069_v27  ;;  %v16548_v36 = vld [vmem:[%s26463_s23 + $0x32c] sm:$0xf]  ;;  %v18069_v39 = vor.u32 %v16506_v29, %v11003_v20 }
  0x31   :  { %619 = vmatpush.bf16.msrb.mxu3 %v11228_v50  ;;  %656 = vmatpush.bf16.msrb.mxu2 %v11248_v55  ;;  %v11035_v35 = vld [vmem:[%s26463_s23 + $0x208] sm:$0xf]  ;;  %v11181_v38 = vld [vmem:[%s26463_s23 + $0x338] sm:$0xf0]  ;;  %v16514_v40 = vld [vmem:[%s26463_s23 + $0x214] sm:$0xf0]  ;;  %v11164_v41 = vor.u32 %v16546_v31, %v11163_v30 }
  0x32   :  { %v16516_v42 = vld [vmem:[%s26463_s23 + $0x22c] sm:$0xf]  ;;  %v11053_v43 = vld [vmem:[%s26463_s23 + $0x238] sm:$0xf0]  ;;  %v11147_v44 = vld [vmem:[%s26463_s23 + $0x2e8] sm:$0xf]  ;;  %v11184_v46 = vor.u32 %v16548_v36, %v11181_v38  ;;  %v11036_v50 = vor.u32 %v16514_v40, %v11035_v35 }
  0x33   :  { %637 = vmatpush.bf16.msrb.mxu0 %v11120_v57  ;;  %v16542_v45 = vld [vmem:[%s26463_s23 + $0x2f4] sm:$0xf0]  ;;  %v11499_v47 = vld [vmem:[%s26463_s23 + $0x1c0] sm:$0xf]  ;;  %v16501_v49 = vld [vmem:[%s26463_s23 + $0x1cc] sm:$0xf0]  ;;  %v11056_v51 = vor.u32 %v16516_v42, %v11053_v43 }
  0x34   :  { %600 = vmatpush.bf16.msrb.mxu1 %v11100_v56  ;;  %v11019_v52 = vld [vmem:[%s26463_s23 + $0x1e8] sm:$0xf]  ;;  %v16544_v53 = vld [vmem:[%s26463_s23 + $0x30c] sm:$0xf]  ;;  %v11165_v54 = vld [vmem:[%s26463_s23 + $0x318] sm:$0xf0]  ;;  %v11148_v56 = vor.u32 %v16542_v45, %v11147_v44  ;;  %v11500_v61 = vor.u32 %v16501_v49, %v11499_v47 }
  0x35   :  { %620 = vmatpush.bf16.msrb.mxu3 %v11212_v62  ;;  %657 = vmatpush.bf16.msrb.mxu2 %v11232_v3  ;;  %v16510_v55 = vld [vmem:[%s26463_s23 + $0x1f4] sm:$0xf0]  ;;  %v16512_v57 = vld [vmem:[%s26463_s23 + $0x20c] sm:$0xf]  ;;  %v11037_v58 = vld [vmem:[%s26463_s23 + $0x218] sm:$0xf0]  ;;  %v11168_v62 = vor.u32 %v16544_v53, %v11165_v54 }
  0x36   :  { %v11387_v59 = vld [vmem:[%s26463_s23 + $0xe0] sm:$0xf]  ;;  %v16473_v60 = vld [vmem:[%s26463_s23 + $0xec] sm:$0xf0]  ;;  %v16508_v63 = vld [vmem:[%s26463_s23 + $0x1ec] sm:$0xf]  ;;  %v11020_v2 = vor.u32 %v16510_v55, %v11019_v52  ;;  %v11040_v3 = vor.u32 %v16512_v57, %v11037_v58 }
  0x37   :  { %638 = vmatpush.bf16.msrb.mxu0 %v11104_v5  ;;  %v11483_v0 = vld [vmem:[%s26463_s23 + $0x1a0] sm:$0xf]  ;;  %v16497_v1 = vld [vmem:[%s26463_s23 + $0x1ac] sm:$0xf0]  ;;  %v16540_v5 = vld [vmem:[%s26463_s23 + $0x2ec] sm:$0xf]  ;;  %v11388_v7 = vor.u32 %v16473_v60, %v11387_v59 }
  0x38   :  { %601 = vmatpush.bf16.msrb.mxu1 %v11084_v4  ;;  %v11021_v4 = vld [vmem:[%s26463_s23 + $0x1f8] sm:$0xf0]  ;;  %v11371_v8 = vld [vmem:[%s26463_s23 + $0xc0] sm:$0xf]  ;;  %v16499_v9 = vld [vmem:[%s26463_s23 + $0x1c4] sm:$0xf]  ;;  %v11484_v14 = vor.u32 %v16497_v1, %v11483_v0 }
  0x39   :  { %621 = vmatpush.bf16.msrb.mxu3 %v11196_v10  ;;  %658 = vmatpush.bf16.msrb.mxu2 %v11216_v17  ;;  %v11149_v6 = vld [vmem:[%s26463_s23 + $0x2f8] sm:$0xf0]  ;;  %v11501_v10 = vld [vmem:[%s26463_s23 + $0x1d0] sm:$0xf0]  ;;  %v16469_v11 = vld [vmem:[%s26463_s23 + $0xcc] sm:$0xf0] }
  0x3a   :  { %v16471_v12 = vld [vmem:[%s26463_s23 + $0xe4] sm:$0xf]  ;;  %v11389_v13 = vld [vmem:[%s26463_s23 + $0xf0] sm:$0xf0]  ;;  %v11152_v15 = vor.u32 %v16540_v5, %v11149_v6  ;;  %v11467_v16 = vld [vmem:[%s26463_s23 + $0x180] sm:$0xf]  ;;  %v11372_v20 = vor.u32 %v16469_v11, %v11371_v8 }
  0x3b   :  { %639 = vmatpush.bf16.msrb.mxu0 %v11088_v19  ;;  %11250 = vmatmul.msk.bf16.gmra.mxu1 %vm515_vm0, %v18049_v28  ;;  %v16493_v17 = vld [vmem:[%s26463_s23 + $0x18c] sm:$0xf0]  ;;  %v11504_v19 = vor.u32 %v16499_v9, %v11501_v10  ;;  %v11392_v21 = vor.u32 %v16471_v12, %v11389_v13  ;;  %v16495_v22 = vld [vmem:[%s26463_s23 + $0x1a4] sm:$0xf]  ;;  %v11485_v23 = vld [vmem:[%s26463_s23 + $0x1b0] sm:$0xf0] }
  0x3c   :  { %602 = vmatpush.bf16.msrb.mxu1 %v11068_v18  ;;  %11252 = vmatmul.msk.bf16.gmra.mxu3 %vm515_vm0, %v18049_v28  ;;  %v11024_v18 = vor.u32 %v16508_v63, %v11021_v4  ;;  %v11355_v24 = vld [vmem:[%s26463_s23 + $0xa0] sm:$0xf]  ;;  %v11468_v26 = vor.u32 %v16493_v17, %v11467_v16  ;;  %v16467_v27 = vld [vmem:[%s26463_s23 + $0xc4] sm:$0xf]  ;;  %v11373_v29 = vld [vmem:[%s26463_s23 + $0xd0] sm:$0xf0]  ;;  %v11488_v30 = vor.u32 %v16495_v22, %v11485_v23 }
  0x3d   :  { %622 = vmatpush.bf16.msrb.mxu3 %v11180_v25  ;;  %659 = vmatpush.bf16.msrb.mxu2 %v11200_v32  ;;  %v16465_v25 = vld [vmem:[%s26463_s23 + $0xac] sm:$0xf0]  ;;  %v11451_v31 = vld [vmem:[%s26463_s23 + $0x160] sm:$0xf]  ;;  %v11469_v35 = vld [vmem:[%s26463_s23 + $0x190] sm:$0xf0]  ;;  %v11376_v36 = vor.u32 %v16467_v27, %v11373_v29 }
  0x3e   :  { %535 = vmatmul.bf16.gmra.mxu0 %v18069_v39  ;;  %v16489_v32 = vld [vmem:[%s26463_s23 + $0x16c] sm:$0xf0]  ;;  %v11339_v38 = vld [vmem:[%s26463_s23 + $0x80] sm:$0xf]  ;;  %v11357_v42 = vld [vmem:[%s26463_s23 + $0xb0] sm:$0xf0] }
  0x3f   :  { %640 = vmatpush.bf16.msrb.mxu0 %v11072_v34  ;;  %v16491_v34 = vld [vmem:[%s26463_s23 + $0x184] sm:$0xf]  ;;  %v16461_v40 = vld [vmem:[%s26463_s23 + $0x8c] sm:$0xf0]  ;;  %v11452_v43 = vor.u32 %v16489_v32, %v11451_v31  ;;  %v11435_v44 = vld [vmem:[%s26463_s23 + $0x140] sm:$0xf] }
  0x40   :  { %603 = vmatpush.bf16.msrb.mxu1 %v11052_v33  ;;  %573 = vmatmul.bf16.gmra.mxu2 %v18069_v39  ;;  %v11356_v33 = vor.u32 %v16465_v25, %v11355_v24  ;;  %v11472_v45 = vor.u32 %v16491_v34, %v11469_v35 }
  0x41   :  { %623 = vmatpush.bf16.msrb.mxu3 %v11164_v41  ;;  %660 = vmatpush.bf16.msrb.mxu2 %v11184_v46  ;;  %v16463_v41 = vld [vmem:[%s26463_s23 + $0xa4] sm:$0xf]  ;;  %v16485_v46 = vld [vmem:[%s26463_s23 + $0x14c] sm:$0xf0] }
  0x43   :  { %641 = vmatpush.bf16.msrb.mxu0 %v11056_v51 }
  0x44   :  { %604 = vmatpush.bf16.msrb.mxu1 %v11036_v50 }
  0x45   :  { %624 = vmatpush.bf16.msrb.mxu3 %v11148_v56  ;;  %661 = vmatpush.bf16.msrb.mxu2 %v11168_v62 }
  0x47   :  { %642 = vmatpush.bf16.msrb.mxu0 %v11040_v3 }
  0x48   :  { %605 = vmatpush.bf16.msrb.mxu1 %v11020_v2 }
  0x49   :  { %1018 = vmatpush.bf16.msra.mxu3 %v11500_v61  ;;  %662 = vmatpush.bf16.msrb.mxu2 %v11152_v15 }
  0x4b   :  { %643 = vmatpush.bf16.msrb.mxu0 %v11024_v18  ;;  %606 = vmatmul.bf16.vlgmr.msrb.gmra.mxu1 %v17951_v48 }
  0x4c   :  { %998 = vmatpush.bf16.msra.mxu1 %v11388_v7  ;;  %11253 = vmatmul.msk.bf16.vlgmr.msrb.gmra.mxu3 %vm515_vm0, %v17931_v37 }
  0x4d   :  { %1019 = vmatpush.bf16.msra.mxu3 %v11484_v14  ;;  %1056 = vmatpush.bf16.msra.mxu2 %v11504_v19 }
  0x4f   :  { %1036 = vmatpush.bf16.msra.mxu0 %v11392_v21 }
  0x50   :  { %999 = vmatpush.bf16.msra.mxu1 %v11372_v20 }
  0x51   :  { %1020 = vmatpush.bf16.msra.mxu3 %v11468_v26  ;;  %1057 = vmatpush.bf16.msra.mxu2 %v11488_v30 }
  0x52   :  { %25 = vsyncpa [#allocation3], 0  ;;  %644 = vmatmul.bf16.vlgmr.msrb.gmra.mxu0 %v17951_v48  ;;  %v11340_v47 = vor.u32 %v16461_v40, %v11339_v38  ;;  %v16487_v49 = vld [vmem:[%s26463_s23 + $0x164] sm:$0xf]  ;;  %v11453_v50 = vld [vmem:[%s26463_s23 + $0x170] sm:$0xf0]  ;;  %11255 = vmatmul.msk.bf16.vlgmr.msrb.gmra.mxu2 %vm515_vm0, %v17931_v37  ;;  %v11360_v51 = vor.u32 %v16463_v41, %v11357_v42  ;;  %v11436_v37 = vor.u32 %v16485_v46, %v11435_v44 }
  0x53   :  { %1037 = vmatpush.bf16.msra.mxu0 %v11376_v36  ;;  %v11323_v52 = vld [vmem:[%s26463_s23 + $0x60] sm:$0xf]  ;;  %v16457_v48 = vld [vmem:[%s26463_s23 + $0x6c] sm:$0xf0]  ;;  %v16459_v53 = vld [vmem:[%s26463_s23 + $0x84] sm:$0xf]  ;;  %v11456_v55 = vor.u32 %v16487_v49, %v11453_v50 }
  0x54   :  { %1000 = vmatpush.bf16.msra.mxu1 %v11356_v33  ;;  %v11341_v54 = vld [vmem:[%s26463_s23 + $0x90] sm:$0xf0]  ;;  %v11419_v56 = vld [vmem:[%s26463_s23 + $0x120] sm:$0xf]  ;;  %v16481_v57 = vld [vmem:[%s26463_s23 + $0x12c] sm:$0xf0]  ;;  %v11324_v58 = vor.u32 %v16457_v48, %v11323_v52 }
  0x55   :  { %1021 = vmatpush.bf16.msra.mxu3 %v11452_v43  ;;  %1058 = vmatpush.bf16.msra.mxu2 %v11472_v45  ;;  %v16483_v59 = vld [vmem:[%s26463_s23 + $0x144] sm:$0xf]  ;;  %v11437_v60 = vld [vmem:[%s26463_s23 + $0x150] sm:$0xf0]  ;;  %v11344_v61 = vor.u32 %v16459_v53, %v11341_v54  ;;  %v11307_v62 = vld [vmem:[%s26463_s23 + $0x40] sm:$0xf]  ;;  %v11420_v2 = vor.u32 %v16481_v57, %v11419_v56 }
  0x56   :  { %v16453_v63 = vld [vmem:[%s26463_s23 + $0x4c] sm:$0xf0]  ;;  %v16455_v0 = vld [vmem:[%s26463_s23 + $0x64] sm:$0xf]  ;;  %v11325_v1 = vld [vmem:[%s26463_s23 + $0x70] sm:$0xf0]  ;;  %v11440_v3 = vor.u32 %v16483_v59, %v11437_v60 }
  0x57   :  { %1038 = vmatpush.bf16.msra.mxu0 %v11360_v51  ;;  %v11403_v4 = vld [vmem:[%s26463_s23 + $0x100] sm:$0xf]  ;;  %v11308_v5 = vor.u32 %v16453_v63, %v11307_v62  ;;  %v16477_v6 = vld [vmem:[%s26463_s23 + $0x10c] sm:$0xf0]  ;;  %v16479_v7 = vld [vmem:[%s26463_s23 + $0x124] sm:$0xf]  ;;  %v11328_v9 = vor.u32 %v16455_v0, %v11325_v1 }
  0x58   :  { %1001 = vmatpush.bf16.msra.mxu1 %v11340_v47  ;;  %v11421_v8 = vld [vmem:[%s26463_s23 + $0x130] sm:$0xf0]  ;;  %v11291_v10 = vld [vmem:[%s26463_s23 + $0x20] sm:$0xf]  ;;  %v16449_v11 = vld [vmem:[%s26463_s23 + $0x2c] sm:$0xf0]  ;;  %v11404_v15 = vor.u32 %v16477_v6, %v11403_v4 }
  0x59   :  { %1022 = vmatpush.bf16.msra.mxu3 %v11436_v37  ;;  %1059 = vmatpush.bf16.msra.mxu2 %v11456_v55  ;;  %v16451_v12 = vld [vmem:[%s26463_s23 + $0x44] sm:$0xf]  ;;  %v11309_v13 = vld [vmem:[%s26463_s23 + $0x50] sm:$0xf0]  ;;  %v11275_v14 = vld [vmem:[%s26463_s23] sm:$0xf]  ;;  %v11424_v16 = vor.u32 %v16479_v7, %v11421_v8  ;;  %v11292_v19 = vor.u32 %v16449_v11, %v11291_v10 }
  0x5a   :  { %v11507_v17 = vld [vmem:[%s26463_s23 + $0x1c8] sm:$0xf]  ;;  %v16502_v18 = vld [vmem:[%s26463_s23 + $0x1d4] sm:$0xf0]  ;;  %v16445_v20 = vld [vmem:[%s26463_s23 + $0xc] sm:$0xf0]  ;;  %v11312_v23 = vor.u32 %v16451_v12, %v11309_v13 }
  0x5b   :  { %1039 = vmatpush.bf16.msra.mxu0 %v11344_v61  ;;  %v16475_v21 = vld [vmem:[%s26463_s23 + $0x104] sm:$0xf]  ;;  %v11405_v22 = vld [vmem:[%s26463_s23 + $0x110] sm:$0xf0]  ;;  %611 = vmatmul.bf16.gmra.mxu1 %v18069_v39  ;;  %v16500_v25 = vld [vmem:[%s26463_s23 + $0x1cc] sm:$0xf]  ;;  %v11508_v31 = vor.u32 %v16502_v18, %v11507_v17  ;;  %v11276_v35 = vor.u32 %v16445_v20, %v11275_v14 }
  0x5c   :  { %1002 = vmatpush.bf16.msra.mxu1 %v11324_v58  ;;  %v16447_v24 = vld [vmem:[%s26463_s23 + $0x24] sm:$0xf]  ;;  %v11509_v26 = vld [vmem:[%s26463_s23 + $0x1d8] sm:$0xf0]  ;;  %11254 = vmatmul.msk.bf16.gmra.mxu3 %vm515_vm0, %v18049_v28  ;;  %v11293_v27 = vld [vmem:[%s26463_s23 + $0x30] sm:$0xf0]  ;;  %v11408_v32 = vor.u32 %v16475_v21, %v11405_v22 }
  0x5d   :  { %1023 = vmatpush.bf16.msra.mxu3 %v11420_v2  ;;  %1060 = vmatpush.bf16.msra.mxu2 %v11440_v3  ;;  %v11395_v29 = vld [vmem:[%s26463_s23 + $0xe8] sm:$0xf]  ;;  %v16474_v30 = vld [vmem:[%s26463_s23 + $0xf4] sm:$0xf0]  ;;  %v16443_v36 = vld [vmem:[%s26463_s23 + $0x4] sm:$0xf]  ;;  %v11512_v38 = vor.u32 %v16500_v25, %v11509_v26  ;;  %v11296_v40 = vor.u32 %v16447_v24, %v11293_v27 }
  0x5e   :  { %v11491_v33 = vld [vmem:[%s26463_s23 + $0x1a8] sm:$0xf]  ;;  %v16498_v34 = vld [vmem:[%s26463_s23 + $0x1b4] sm:$0xf0]  ;;  %v11277_v41 = vld [vmem:[%s26463_s23 + $0x10] sm:$0xf0]  ;;  %v11396_v42 = vor.u32 %v16474_v30, %v11395_v29 }
  0x5f   :  { %1040 = vmatpush.bf16.msra.mxu0 %v11328_v9  ;;  %v11493_v43 = vld [vmem:[%s26463_s23 + $0x1b8] sm:$0xf0]  ;;  %v11379_v44 = vld [vmem:[%s26463_s23 + $0xc8] sm:$0xf]  ;;  %v16472_v45 = vld [vmem:[%s26463_s23 + $0xec] sm:$0xf]  ;;  %v11492_v46 = vor.u32 %v16498_v34, %v11491_v33  ;;  %v11280_v48 = vor.u32 %v16443_v36, %v11277_v41 }
  0x60   :  { %1003 = vmatpush.bf16.msra.mxu1 %v11308_v5  ;;  %v11397_v47 = vld [vmem:[%s26463_s23 + $0xf8] sm:$0xf0]  ;;  %v11475_v49 = vld [vmem:[%s26463_s23 + $0x188] sm:$0xf]  ;;  %v16494_v50 = vld [vmem:[%s26463_s23 + $0x194] sm:$0xf0] }
  0x61   :  { %1024 = vmatpush.bf16.msra.mxu3 %v11404_v15  ;;  %1061 = vmatpush.bf16.msra.mxu2 %v11424_v16  ;;  %v11259_v52 = vld [vmem:[%s26464_s24] sm:$0xf]  ;;  %v16492_v54 = vld [vmem:[%s26463_s23 + $0x18c] sm:$0xf]  ;;  %v11477_v37 = vld [vmem:[%s26463_s23 + $0x198] sm:$0xf0]  ;;  %v11400_v58 = vor.u32 %v16472_v45, %v11397_v47  ;;  %v11476_v59 = vor.u32 %v16494_v50, %v11475_v49 }
  0x62   :  { %649 = vmatmul.bf16.gmra.mxu0 %v18069_v39  ;;  %11256 = vmatmul.msk.bf16.gmra.mxu2 %vm515_vm0, %v18049_v28  ;;  %v16496_v39 = vld [vmem:[%s26463_s23 + $0x1ac] sm:$0xf]  ;;  %v16470_v28 = vld [vmem:[%s26463_s23 + $0xd4] sm:$0xf0]  ;;  %v16440_v55 = vld [vmem:[%s26464_s24 + $0x4] sm:$0xf0]  ;;  %v11480_v2 = vor.u32 %v16492_v54, %v11477_v37 }
  0x63   :  { %1041 = vmatpush.bf16.msra.mxu0 %v11312_v23  ;;  %v11496_v51 = vor.u32 %v16496_v39, %v11493_v43  ;;  %v11380_v53 = vor.u32 %v16470_v28, %v11379_v44  ;;  %v16439_v56 = vld [vmem:[%s26464_s24 + $0x4] sm:$0xf]  ;;  %v11261_v57 = vld [vmem:[%s26464_s24 + $0x8] sm:$0xf0]  ;;  %v11363_v60 = vld [vmem:[%s26463_s23 + $0xa8] sm:$0xf]  ;;  %v18398_v3 = vor.u32 %v16440_v55, %v11259_v52 }
  0x64   :  { %1004 = vmatpush.bf16.msra.mxu1 %v11292_v19  ;;  %v16466_v61 = vld [vmem:[%s26463_s23 + $0xb4] sm:$0xf0]  ;;  %v16468_v62 = vld [vmem:[%s26463_s23 + $0xcc] sm:$0xf]  ;;  %v11381_v63 = vld [vmem:[%s26463_s23 + $0xd8] sm:$0xf0]  ;;  %v18406_v6 = vor.u32 %v16439_v56, %v11261_v57 }
  0x65   :  { %1094 = vmatpush.bf16.msrb.mxu3 %v11508_v31  ;;  %1062 = vmatpush.bf16.msra.mxu2 %v11408_v32  ;;  %v11459_v0 = vld [vmem:[%s26463_s23 + $0x168] sm:$0xf]  ;;  %v16490_v1 = vld [vmem:[%s26463_s23 + $0x174] sm:$0xf0]  ;;  %v16488_v4 = vld [vmem:[%s26463_s23 + $0x16c] sm:$0xf]  ;;  %v11364_v7 = vor.u32 %v16466_v61, %v11363_v60  ;;  %v11384_v8 = vor.u32 %v16468_v62, %v11381_v63 }
  0x66   :  { %v11461_v5 = vld [vmem:[%s26463_s23 + $0x178] sm:$0xf0]  ;;  %v11347_v9 = vld [vmem:[%s26463_s23 + $0x88] sm:$0xf]  ;;  %v16462_v10 = vld [vmem:[%s26463_s23 + $0x94] sm:$0xf0]  ;;  %v11460_v12 = vor.u32 %v16490_v1, %v11459_v0 }
  0x67   :  { %1042 = vmatpush.bf16.msra.mxu0 %v11296_v40  ;;  %v16464_v11 = vld [vmem:[%s26463_s23 + $0xac] sm:$0xf]  ;;  %v11365_v13 = vld [vmem:[%s26463_s23 + $0xb8] sm:$0xf0]  ;;  %v11443_v14 = vld [vmem:[%s26463_s23 + $0x148] sm:$0xf]  ;;  %v11464_v16 = vor.u32 %v16488_v4, %v11461_v5  ;;  %v11348_v19 = vor.u32 %v16462_v10, %v11347_v9 }
  0x68   :  { %1005 = vmatpush.bf16.msra.mxu1 %v11276_v35  ;;  %v16486_v15 = vld [vmem:[%s26463_s23 + $0x154] sm:$0xf0]  ;;  %v16484_v17 = vld [vmem:[%s26463_s23 + $0x14c] sm:$0xf]  ;;  %v11445_v18 = vld [vmem:[%s26463_s23 + $0x158] sm:$0xf0]  ;;  %v11368_v20 = vor.u32 %v16464_v11, %v11365_v13 }
  0x69   :  { %1132 = vmatpush.bf16.msrb.mxu2 %v11512_v38  ;;  %1095 = vmatpush.bf16.msrb.mxu3 %v11492_v46  ;;  %v11331_v21 = vld [vmem:[%s26463_s23 + $0x68] sm:$0xf]  ;;  %v16458_v22 = vld [vmem:[%s26463_s23 + $0x74] sm:$0xf0]  ;;  %v16460_v23 = vld [vmem:[%s26463_s23 + $0x8c] sm:$0xf]  ;;  %v11444_v24 = vor.u32 %v16486_v15, %v11443_v14  ;;  %v11448_v29 = vor.u32 %v16484_v17, %v11445_v18 }
  0x6a   :  { %v11349_v25 = vld [vmem:[%s26463_s23 + $0x98] sm:$0xf0]  ;;  %v11427_v26 = vld [vmem:[%s26463_s23 + $0x128] sm:$0xf]  ;;  %v16482_v27 = vld [vmem:[%s26463_s23 + $0x134] sm:$0xf0]  ;;  %v11332_v32 = vor.u32 %v16458_v22, %v11331_v21 }
  0x6b   :  { %1043 = vmatpush.bf16.msra.mxu0 %v11280_v48  ;;  %1006 = vmatmul.bf16.vlgmr.msra.gmra.mxu1 %v18398_v3  ;;  %v16480_v30 = vld [vmem:[%s26463_s23 + $0x12c] sm:$0xf]  ;;  %v11429_v31 = vld [vmem:[%s26463_s23 + $0x138] sm:$0xf0]  ;;  %v11315_v33 = vld [vmem:[%s26463_s23 + $0x48] sm:$0xf]  ;;  %v11352_v34 = vor.u32 %v16460_v23, %v11349_v25  ;;  %v11428_v40 = vor.u32 %v16482_v27, %v11427_v26 }
  0x6c   :  { %1074 = vmatpush.bf16.msrb.mxu1 %v11396_v42  ;;  %11513 = vmatmul.msk.bf16.vlgmr.msra.gmra.mxu3 %vm515_vm0, %v18406_v6  ;;  %v16454_v35 = vld [vmem:[%s26463_s23 + $0x54] sm:$0xf0]  ;;  %v16456_v36 = vld [vmem:[%s26463_s23 + $0x6c] sm:$0xf]  ;;  %v11333_v38 = vld [vmem:[%s26463_s23 + $0x78] sm:$0xf0]  ;;  %v11432_v44 = vor.u32 %v16480_v30, %v11429_v31 }
  0x6d   :  { %1133 = vmatpush.bf16.msrb.mxu2 %v11496_v51  ;;  %1096 = vmatpush.bf16.msrb.mxu3 %v11476_v59  ;;  %v11267_v41 = vld [vmem:[%s26464_s24 + $0x10] sm:$0xf]  ;;  %v16442_v42 = vld [vmem:[%s26464_s24 + $0x14] sm:$0x30]  ;;  %v11411_v39 = vld [vmem:[%s26463_s23 + $0x108] sm:$0xf]  ;;  %v11316_v50 = vor.u32 %v16454_v35, %v11315_v33 }
  0x6e   :  { %v16478_v43 = vld [vmem:[%s26463_s23 + $0x114] sm:$0xf0]  ;;  %v16476_v28 = vld [vmem:[%s26463_s23 + $0x10c] sm:$0xf]  ;;  %v11413_v45 = vld [vmem:[%s26463_s23 + $0x118] sm:$0xf0]  ;;  %v18522_v60 = vor.u32 %v16442_v42, %v11267_v41 }
  0x6f   :  { %1112 = vmatpush.bf16.msrb.mxu0 %v11400_v58  ;;  %v11827_v46 = vld [vmem:[%s26463_s23 + $0x580] sm:$0xf]  ;;  %v16629_v47 = vld [vmem:[%s26463_s23 + $0x58c] sm:$0xf0]  ;;  %v16441_v49 = vld [vmem:[%s26464_s24 + $0x14] sm:$0xf]  ;;  %v11412_v55 = vor.u32 %v16478_v43, %v11411_v39  ;;  %v11416_v58 = vor.u32 %v16476_v28, %v11413_v45 }
  0x70   :  { %1075 = vmatpush.bf16.msrb.mxu1 %v11380_v53  ;;  %v16627_v51 = vld [vmem:[%s26463_s23 + $0x584] sm:$0xf]  ;;  %v11829_v52 = vld [vmem:[%s26463_s23 + $0x590] sm:$0xf0]  ;;  %v11269_v48 = vld [vmem:[%s26464_s24 + $0x18] sm:$0x30]  ;;  %v11336_v53 = vor.u32 %v16456_v36, %v11333_v38  ;;  %v11828_v59 = vor.u32 %v16629_v47, %v11827_v46 }
  0x71   :  { %1134 = vmatpush.bf16.msrb.mxu2 %v11480_v2  ;;  %1097 = vmatpush.bf16.msrb.mxu3 %v11460_v12  ;;  %v11299_v54 = vld [vmem:[%s26463_s23 + $0x28] sm:$0xf]  ;;  %v16450_v37 = vld [vmem:[%s26463_s23 + $0x34] sm:$0xf0]  ;;  %v16452_v56 = vld [vmem:[%s26463_s23 + $0x4c] sm:$0xf]  ;;  %v11832_v63 = vor.u32 %v16627_v51, %v11829_v52  ;;  %v18530_v0 = vor.u32 %v16441_v49, %v11269_v48 }
  0x72   :  { %1044 = vmatmul.bf16.vlgmr.msra.gmra.mxu0 %v18398_v3  ;;  %11515 = vmatmul.msk.bf16.vlgmr.msra.gmra.mxu2 %vm515_vm0, %v18406_v6  ;;  %v11317_v57 = vld [vmem:[%s26463_s23 + $0x58] sm:$0xf0]  ;;  %v11811_v61 = vld [vmem:[%s26463_s23 + $0x560] sm:$0xf]  ;;  %v16625_v62 = vld [vmem:[%s26463_s23 + $0x56c] sm:$0xf0]  ;;  %v11300_v1 = vor.u32 %v16450_v37, %v11299_v54 }
  0x73   :  { %1113 = vmatpush.bf16.msrb.mxu0 %v11384_v8  ;;  %v11283_v2 = vld [vmem:[%s26463_s23 + $0x8] sm:$0xf]  ;;  %v16446_v4 = vld [vmem:[%s26463_s23 + $0x14] sm:$0xf0]  ;;  %v11320_v5 = vor.u32 %v16452_v56, %v11317_v57  ;;  %v16623_v8 = vld [vmem:[%s26463_s23 + $0x564] sm:$0xf]  ;;  %v11812_v13 = vor.u32 %v16625_v62, %v11811_v61 }
  0x74   :  { %1076 = vmatpush.bf16.msrb.mxu1 %v11364_v7  ;;  %v16448_v7 = vld [vmem:[%s26463_s23 + $0x2c] sm:$0xf]  ;;  %v11813_v9 = vld [vmem:[%s26463_s23 + $0x570] sm:$0xf0]  ;;  %v11301_v10 = vld [vmem:[%s26463_s23 + $0x38] sm:$0xf0] }
  0x75   :  { %1135 = vmatpush.bf16.msrb.mxu2 %v11464_v16  ;;  %1098 = vmatpush.bf16.msrb.mxu3 %v11444_v24  ;;  %v11715_v11 = vld [vmem:[%s26463_s23 + $0x4a0] sm:$0xf]  ;;  %v16601_v12 = vld [vmem:[%s26463_s23 + $0x4ac] sm:$0xf0]  ;;  %v11284_v16 = vor.u32 %v16446_v4, %v11283_v2  ;;  %v16444_v17 = vld [vmem:[%s26463_s23 + $0xc] sm:$0xf]  ;;  %v11816_v18 = vor.u32 %v16623_v8, %v11813_v9 }
  0x76   :  { %v11795_v14 = vld [vmem:[%s26463_s23 + $0x540] sm:$0xf]  ;;  %v16621_v15 = vld [vmem:[%s26463_s23 + $0x54c] sm:$0xf0]  ;;  %v11716_v21 = vor.u32 %v16601_v12, %v11715_v11  ;;  %v16619_v22 = vld [vmem:[%s26463_s23 + $0x544] sm:$0xf] }
  0x77   :  { %1114 = vmatpush.bf16.msrb.mxu0 %v11368_v20  ;;  %v11285_v20 = vld [vmem:[%s26463_s23 + $0x18] sm:$0xf0]  ;;  %v11797_v23 = vld [vmem:[%s26463_s23 + $0x550] sm:$0xf0]  ;;  %v16599_v24 = vld [vmem:[%s26463_s23 + $0x4a4] sm:$0xf]  ;;  %v11796_v27 = vor.u32 %v16621_v15, %v11795_v14 }
  0x78   :  { %1077 = vmatpush.bf16.msrb.mxu1 %v11348_v19  ;;  %v11304_v19 = vor.u32 %v16448_v7, %v11301_v10  ;;  %v11699_v25 = vld [vmem:[%s26463_s23 + $0x480] sm:$0xf]  ;;  %v16597_v26 = vld [vmem:[%s26463_s23 + $0x48c] sm:$0xf0]  ;;  %v11288_v33 = vor.u32 %v16444_v17, %v11285_v20  ;;  %v16615_v35 = vld [vmem:[%s26463_s23 + $0x524] sm:$0xf] }
  0x79   :  { %1136 = vmatpush.bf16.msrb.mxu2 %v11448_v29  ;;  %1099 = vmatpush.bf16.msrb.mxu3 %v11428_v40  ;;  %v11717_v29 = vld [vmem:[%s26463_s23 + $0x4b0] sm:$0xf0]  ;;  %v11779_v30 = vld [vmem:[%s26463_s23 + $0x520] sm:$0xf]  ;;  %v16617_v31 = vld [vmem:[%s26463_s23 + $0x52c] sm:$0xf0] }
  0x7a   :  { %v11781_v36 = vld [vmem:[%s26463_s23 + $0x530] sm:$0xf0]  ;;  %v11720_v38 = vor.u32 %v16599_v24, %v11717_v29  ;;  %v16595_v40 = vld [vmem:[%s26463_s23 + $0x484] sm:$0xf]  ;;  %v11683_v41 = vld [vmem:[%s26463_s23 + $0x460] sm:$0xf]  ;;  %v11780_v39 = vor.u32 %v16617_v31, %v11779_v30 }
  0x7b   :  { %1115 = vmatpush.bf16.msrb.mxu0 %v11352_v34  ;;  %1011 = vmatmul.bf16.gmra.mxu1 %v18522_v60  ;;  %v11700_v34 = vor.u32 %v16597_v26, %v11699_v25  ;;  %v16593_v42 = vld [vmem:[%s26463_s23 + $0x46c] sm:$0xf0]  ;;  %v11701_v43 = vld [vmem:[%s26463_s23 + $0x490] sm:$0xf0]  ;;  %v11784_v45 = vor.u32 %v16615_v35, %v11781_v36  ;;  %v16611_v47 = vld [vmem:[%s26463_s23 + $0x504] sm:$0xf] }
  0x7c   :  { %1078 = vmatpush.bf16.msrb.mxu1 %v11332_v32  ;;  %11514 = vmatmul.msk.bf16.gmra.mxu3 %vm515_vm0, %v18530_v0  ;;  %v11800_v32 = vor.u32 %v16619_v22, %v11797_v23  ;;  %v16613_v28 = vld [vmem:[%s26463_s23 + $0x50c] sm:$0xf0]  ;;  %v11684_v46 = vor.u32 %v16593_v42, %v11683_v41  ;;  %v11765_v49 = vld [vmem:[%s26463_s23 + $0x510] sm:$0xf0]  ;;  %v11667_v51 = vld [vmem:[%s26463_s23 + $0x440] sm:$0xf] }
  0x7d   :  { %1137 = vmatpush.bf16.msrb.mxu2 %v11432_v44  ;;  %1100 = vmatpush.bf16.msrb.mxu3 %v11412_v55  ;;  %v11763_v44 = vld [vmem:[%s26463_s23 + $0x500] sm:$0xf]  ;;  %v16589_v52 = vld [vmem:[%s26463_s23 + $0x44c] sm:$0xf0]  ;;  %v16591_v37 = vld [vmem:[%s26463_s23 + $0x464] sm:$0xf]  ;;  %v11768_v56 = vor.u32 %v16611_v47, %v11765_v49 }
  0x7e   :  { %v11764_v48 = vor.u32 %v16613_v28, %v11763_v44  ;;  %v16609_v54 = vld [vmem:[%s26463_s23 + $0x4ec] sm:$0xf0]  ;;  %v11685_v55 = vld [vmem:[%s26463_s23 + $0x470] sm:$0xf0]  ;;  %v11668_v57 = vor.u32 %v16589_v52, %v11667_v51  ;;  %v11651_v61 = vld [vmem:[%s26463_s23 + $0x420] sm:$0xf] }
  0x7f   :  { %1116 = vmatpush.bf16.msrb.mxu0 %v11336_v53  ;;  %v11747_v53 = vld [vmem:[%s26463_s23 + $0x4e0] sm:$0xf]  ;;  %v16585_v62 = vld [vmem:[%s26463_s23 + $0x42c] sm:$0xf0]  ;;  %v11669_v7 = vld [vmem:[%s26463_s23 + $0x450] sm:$0xf0] }
  0x80   :  { %1079 = vmatpush.bf16.msrb.mxu1 %v11316_v50  ;;  %v11704_v50 = vor.u32 %v16595_v40, %v11701_v43  ;;  %v11731_v2 = vld [vmem:[%s26463_s23 + $0x4c0] sm:$0xf]  ;;  %v16605_v4 = vld [vmem:[%s26463_s23 + $0x4cc] sm:$0xf0]  ;;  %v11652_v9 = vor.u32 %v16585_v62, %v11651_v61  ;;  %v16603_v11 = vld [vmem:[%s26463_s23 + $0x4c4] sm:$0xf] }
  0x81   :  { %1138 = vmatpush.bf16.msrb.mxu2 %v11416_v58  ;;  %1560 = vmatpush.bf16.msra.mxu3 %v11828_v59  ;;  %v16607_v58 = vld [vmem:[%s26463_s23 + $0x4e4] sm:$0xf]  ;;  %v11749_v59 = vld [vmem:[%s26463_s23 + $0x4f0] sm:$0xf0]  ;;  %v11635_v10 = vld [vmem:[%s26463_s23 + $0x400] sm:$0xf]  ;;  %v11732_v14 = vor.u32 %v16605_v4, %v11731_v2 }
  0x82   :  { %1049 = vmatmul.bf16.gmra.mxu0 %v18522_v60  ;;  %11516 = vmatmul.msk.bf16.gmra.mxu2 %vm515_vm0, %v18530_v0  ;;  %v11752_v8 = vor.u32 %v16607_v58, %v11749_v59  ;;  %v11733_v12 = vld [vmem:[%s26463_s23 + $0x4d0] sm:$0xf0]  ;;  %v11835_v15 = vld [vmem:[%s26463_s23 + $0x588] sm:$0xf]  ;;  %v11619_v22 = vld [vmem:[%s26463_s23 + $0x3e0] sm:$0xf] }
  0x83   :  { %1117 = vmatpush.bf16.msrb.mxu0 %v11320_v5  ;;  %v16587_v5 = vld [vmem:[%s26463_s23 + $0x444] sm:$0xf]  ;;  %v11736_v20 = vor.u32 %v16603_v11, %v11733_v12  ;;  %v11819_v23 = vld [vmem:[%s26463_s23 + $0x568] sm:$0xf]  ;;  %v16626_v24 = vld [vmem:[%s26463_s23 + $0x574] sm:$0xf0] }
  0x84   :  { %1080 = vmatpush.bf16.msrb.mxu1 %v11300_v1  ;;  %v11688_v1 = vor.u32 %v16591_v37, %v11685_v55  ;;  %v11672_v17 = vor.u32 %v16587_v5, %v11669_v7  ;;  %v11820_v26 = vor.u32 %v16626_v24, %v11819_v23  ;;  %v11837_v29 = vld [vmem:[%s26463_s23 + $0x598] sm:$0xf0]  ;;  %v16579_v30 = vld [vmem:[%s26463_s23 + $0x404] sm:$0xf]  ;;  %v11637_v31 = vld [vmem:[%s26463_s23 + $0x410] sm:$0xf0] }
  0x85   :  { %1598 = vmatpush.bf16.msra.mxu2 %v11832_v63  ;;  %1561 = vmatpush.bf16.msra.mxu3 %v11812_v13  ;;  %v11748_v63 = vor.u32 %v16609_v54, %v11747_v53  ;;  %v16581_v13 = vld [vmem:[%s26463_s23 + $0x40c] sm:$0xf0]  ;;  %v11723_v36 = vld [vmem:[%s26463_s23 + $0x4a8] sm:$0xf]  ;;  %v16622_v40 = vld [vmem:[%s26463_s23 + $0x554] sm:$0xf0]  ;;  %v11640_v41 = vor.u32 %v16579_v30, %v11637_v31 }
  0x86   :  { %v16573_v35 = vld [vmem:[%s26463_s23 + $0x3cc] sm:$0xf0]  ;;  %v16602_v42 = vld [vmem:[%s26463_s23 + $0x4b4] sm:$0xf0]  ;;  %v11821_v43 = vld [vmem:[%s26463_s23 + $0x578] sm:$0xf0] }
  0x87   :  { %1118 = vmatpush.bf16.msrb.mxu0 %v11304_v19  ;;  %v11653_v19 = vld [vmem:[%s26463_s23 + $0x430] sm:$0xf0]  ;;  %v16575_v44 = vld [vmem:[%s26463_s23 + $0x3e4] sm:$0xf]  ;;  %v11724_v49 = vor.u32 %v16602_v42, %v11723_v36  ;;  %v11787_v51 = vld [vmem:[%s26463_s23 + $0x528] sm:$0xf] }
  0x88   :  { %1081 = vmatpush.bf16.msrb.mxu1 %v11284_v16  ;;  %v16630_v16 = vld [vmem:[%s26463_s23 + $0x594] sm:$0xf0]  ;;  %v11621_v28 = vld [vmem:[%s26463_s23 + $0x3f0] sm:$0xf0]  ;;  %v16620_v54 = vld [vmem:[%s26463_s23 + $0x54c] sm:$0xf] }
  0x89   :  { %1599 = vmatpush.bf16.msra.mxu2 %v11816_v18  ;;  %1562 = vmatpush.bf16.msra.mxu3 %v11796_v27  ;;  %v16583_v18 = vld [vmem:[%s26463_s23 + $0x424] sm:$0xf]  ;;  %v16628_v27 = vld [vmem:[%s26463_s23 + $0x58c] sm:$0xf]  ;;  %v16618_v52 = vld [vmem:[%s26463_s23 + $0x534] sm:$0xf0] }
  0x8a   :  { %v11656_v25 = vor.u32 %v16583_v18, %v11653_v19  ;;  %v16598_v53 = vld [vmem:[%s26463_s23 + $0x494] sm:$0xf0]  ;;  %v11805_v37 = vld [vmem:[%s26463_s23 + $0x558] sm:$0xf0]  ;;  %v16571_v55 = vld [vmem:[%s26463_s23 + $0x3c4] sm:$0xf]  ;;  %v11788_v61 = vor.u32 %v16618_v52, %v11787_v51 }
  0x8b   :  { %1119 = vmatpush.bf16.msrb.mxu0 %v11288_v33  ;;  %1082 = vmatmul.bf16.vlgmr.msrb.gmra.mxu1 %v18398_v3  ;;  %v16600_v58 = vld [vmem:[%s26463_s23 + $0x4ac] sm:$0xf]  ;;  %v11725_v59 = vld [vmem:[%s26463_s23 + $0x4b8] sm:$0xf0]  ;;  %v16614_v2 = vld [vmem:[%s26463_s23 + $0x514] sm:$0xf0] }
  0x8c   :  { %1540 = vmatpush.bf16.msra.mxu1 %v11716_v21  ;;  %11517 = vmatmul.msk.bf16.vlgmr.msrb.gmra.mxu3 %vm515_vm0, %v18406_v6  ;;  %v11636_v21 = vor.u32 %v16581_v13, %v11635_v10  ;;  %v16616_v5 = vld [vmem:[%s26463_s23 + $0x52c] sm:$0xf]  ;;  %v11789_v7 = vld [vmem:[%s26463_s23 + $0x538] sm:$0xf0]  ;;  %v11675_v13 = vld [vmem:[%s26463_s23 + $0x448] sm:$0xf] }
  0x8d   :  { %1600 = vmatpush.bf16.msra.mxu2 %v11800_v32  ;;  %1563 = vmatpush.bf16.msra.mxu3 %v11780_v39  ;;  %v11840_v32 = vor.u32 %v16628_v27, %v11837_v29  ;;  %v16624_v39 = vld [vmem:[%s26463_s23 + $0x56c] sm:$0xf]  ;;  %v11709_v10 = vld [vmem:[%s26463_s23 + $0x498] sm:$0xf0]  ;;  %v16567_v18 = vld [vmem:[%s26464_s24 + $0x44] sm:$0xf] }
  0x8e   :  { %v11589_v19 = vld [vmem:[%s26464_s24 + $0x48] sm:$0xf0]  ;;  %v11693_v24 = vld [vmem:[%s26463_s23 + $0x478] sm:$0xf0]  ;;  %v11659_v27 = vld [vmem:[%s26463_s23 + $0x428] sm:$0xf] }
  0x8f   :  { %1578 = vmatpush.bf16.msra.mxu0 %v11720_v38  ;;  %v11803_v38 = vld [vmem:[%s26463_s23 + $0x548] sm:$0xf]  ;;  %v16592_v23 = vld [vmem:[%s26463_s23 + $0x46c] sm:$0xf]  ;;  %v16606_v30 = vld [vmem:[%s26463_s23 + $0x4d4] sm:$0xf0] }
  0x90   :  { %1541 = vmatpush.bf16.msra.mxu1 %v11700_v34  ;;  %v11603_v34 = vld [vmem:[%s26463_s23 + $0x3c0] sm:$0xf]  ;;  %v11804_v47 = vor.u32 %v16622_v40, %v11803_v38  ;;  %v11739_v29 = vld [vmem:[%s26463_s23 + $0x4c8] sm:$0xf]  ;;  %v16586_v31 = vld [vmem:[%s26463_s23 + $0x434] sm:$0xf0]  ;;  %v11696_v36 = vor.u32 %v16592_v23, %v11693_v24 }
  0x91   :  { %1601 = vmatpush.bf16.msra.mxu2 %v11784_v45  ;;  %1564 = vmatpush.bf16.msra.mxu3 %v11764_v48  ;;  %v11824_v45 = vor.u32 %v16624_v39, %v11821_v43  ;;  %v11624_v48 = vor.u32 %v16575_v44, %v11621_v28  ;;  %v16588_v40 = vld [vmem:[%s26463_s23 + $0x44c] sm:$0xf]  ;;  %v11740_v42 = vor.u32 %v16606_v30, %v11739_v29  ;;  %v11661_v52 = vld [vmem:[%s26463_s23 + $0x438] sm:$0xf0]  ;;  %v16685_v23 = vld [vmem:[%s26463_s23 + $0x72c] sm:$0xf0] }
  0x92   :  { %1120 = vmatmul.bf16.vlgmr.msrb.gmra.mxu0 %v18398_v3  ;;  %11519 = vmatmul.msk.bf16.vlgmr.msrb.gmra.mxu2 %vm515_vm0, %v18406_v6  ;;  %v11836_v3 = vor.u32 %v16630_v16, %v11835_v15  ;;  %v16577_v6 = vld [vmem:[%s26463_s23 + $0x3ec] sm:$0xf0]  ;;  %v16610_v15 = vld [vmem:[%s26463_s23 + $0x4f4] sm:$0xf0]  ;;  %v11660_v43 = vor.u32 %v16586_v31, %v11659_v27  ;;  %v16604_v44 = vld [vmem:[%s26463_s23 + $0x4cc] sm:$0xf] }
  0x93   :  { %1579 = vmatpush.bf16.msra.mxu0 %v11704_v50  ;;  %v11620_v33 = vor.u32 %v16577_v6, %v11619_v22  ;;  %v11707_v50 = vld [vmem:[%s26463_s23 + $0x488] sm:$0xf]  ;;  %v16590_v16 = vld [vmem:[%s26463_s23 + $0x454] sm:$0xf0]  ;;  %v16584_v51 = vld [vmem:[%s26463_s23 + $0x42c] sm:$0xf] }
  0x94   :  { %1542 = vmatpush.bf16.msra.mxu1 %v11684_v46  ;;  %v11604_v46 = vor.u32 %v16573_v35, %v11603_v34  ;;  %v11708_v62 = vor.u32 %v16598_v53, %v11707_v50  ;;  %v16568_v6 = vld [vmem:[%s26464_s24 + $0x44] sm:$0xf0]  ;;  %v18868_v35 = vor.u32 %v16567_v18, %v11589_v19  ;;  %v16576_v18 = vld [vmem:[%s26463_s23 + $0x3ec] sm:$0xf]  ;;  %v11629_v19 = vld [vmem:[%s26463_s23 + $0x3f8] sm:$0xf0] }
  0x95   :  { %1602 = vmatpush.bf16.msra.mxu2 %v11768_v56  ;;  %1565 = vmatpush.bf16.msra.mxu3 %v11748_v63  ;;  %v11605_v56 = vld [vmem:[%s26463_s23 + $0x3d0] sm:$0xf0]  ;;  %v11691_v63 = vld [vmem:[%s26463_s23 + $0x468] sm:$0xf]  ;;  %v11632_v31 = vor.u32 %v16576_v18, %v11629_v19  ;;  %v16675_v19 = vld [vmem:[%s26463_s23 + $0x6e4] sm:$0xf] }
  0x96   :  { %v11608_v4 = vor.u32 %v16571_v55, %v11605_v56  ;;  %v11627_v56 = vld [vmem:[%s26463_s23 + $0x3e8] sm:$0xf]  ;;  %v12141_v27 = vld [vmem:[%s26463_s23 + $0x750] sm:$0xf0]  ;;  %s26466_s21 = sld [smem:[#allocation10_spill]]  ;;  %vm4498_vm1 = vcmask 1045504  }
  0x97   :  { %1580 = vmatpush.bf16.msra.mxu0 %v11688_v1  ;;  %v11771_v1 = vld [vmem:[%s26463_s23 + $0x508] sm:$0xf]  ;;  %vm4587_vm2 = vcmask 1041408   ;;  %vm4523_vm3 = vcmask 523264   ;;  %vm4525_vm4 = vcmask 521216   ;;  %vm4738_vm5 = vcmask 1040384  }
  0x98   :  { %1543 = vmatpush.bf16.msra.mxu1 %v11668_v57  ;;  %v11808_v57 = vor.u32 %v16620_v54, %v11805_v37  ;;  %v11772_v11 = vor.u32 %v16614_v2, %v11771_v1  ;;  %v12155_v54 = vld [vmem:[%s26463_s23 + $0x760] sm:$0xf]  ;;  %v16693_v37 = vld [vmem:[%s26463_s23 + $0x76c] sm:$0xf0]  ;;  %s26468_s28 = sld [smem:[#allocation8_spill]]  ;;  %vm4929_vm9 = vcmask 261120  }
  0x99   :  { %1603 = vmatpush.bf16.msra.mxu2 %v11752_v8  ;;  %1566 = vmatpush.bf16.msra.mxu3 %v11732_v14  ;;  %v11728_v8 = vor.u32 %v16600_v58, %v11725_v59  ;;  %v11755_v14 = vld [vmem:[%s26463_s23 + $0x4e8] sm:$0xf]  ;;  %v12156_v58 = vor.u32 %v16693_v37, %v12155_v54  ;;  %s26469_s27 = sld [smem:[#allocation9_spill]]  ;;  %vm5328_vm10 = vcmask 1044480   ;;  %vm8085_vm11 = vcmask 1043456   ;;  %s10920_s3 = sshll.u32 %s26454_s20, 4  ;;  %s10921_s3 = int_to_ptr.hbm [resolvable:$true] %s10920_s3 }
  0x9b   :  { %1581 = vmatpush.bf16.msra.mxu0 %v11672_v17  ;;  %1087 = vmatmul.bf16.gmra.mxu1 %v18522_v60  ;;  %v16612_v17 = vld [vmem:[%s26463_s23 + $0x50c] sm:$0xf] }
  0x9c   :  { %1544 = vmatpush.bf16.msra.mxu1 %v11652_v9  ;;  %11518 = vmatmul.msk.bf16.gmra.mxu3 %vm515_vm0, %v18530_v0  ;;  %v11792_v9 = vor.u32 %v16616_v5, %v11789_v7  ;;  %v16689_v5 = vld [vmem:[%s26463_s23 + $0x74c] sm:$0xf0] }
  0x9d   :  { %1636 = vmatpush.bf16.msrb.mxu3 %v11836_v3  ;;  %1604 = vmatpush.bf16.msra.mxu2 %v11736_v20  ;;  %v11773_v3 = vld [vmem:[%s26463_s23 + $0x518] sm:$0xf0]  ;;  %v11587_v20 = vld [vmem:[%s26464_s24 + $0x40] sm:$0xf] }
  0x9e   :  { %v11776_v22 = vor.u32 %v16612_v17, %v11773_v3  ;;  %v18870_v38 = vor.u32 %v16568_v6, %v11587_v20  ;;  %v12043_v20 = vld [vmem:[%s26463_s23 + $0x680] sm:$0xf] }
  0x9f   :  { %1582 = vmatpush.bf16.msra.mxu0 %v11656_v25  ;;  %v11756_v25 = vor.u32 %v16610_v15, %v11755_v14  ;;  %v11597_v14 = vld [vmem:[%s26464_s24 + $0x58] sm:$0x30]  ;;  %v11595_v15 = vld [vmem:[%s26464_s24 + $0x50] sm:$0xf]  ;;  %v12123_v6 = vld [vmem:[%s26463_s23 + $0x720] sm:$0xf] }
  0xa0   :  { %1545 = vmatpush.bf16.msra.mxu1 %v11636_v21 }
  0xa1   :  { %1674 = vmatpush.bf16.msrb.mxu2 %v11840_v32  ;;  %1637 = vmatpush.bf16.msrb.mxu3 %v11820_v26  ;;  %v11676_v26 = vor.u32 %v16590_v16, %v11675_v13  ;;  %v16608_v32 = vld [vmem:[%s26463_s23 + $0x4ec] sm:$0xf]  ;;  %v16570_v16 = vld [vmem:[%s26464_s24 + $0x54] sm:$0x30] }
  0xa2   :  { %1125 = vmatmul.bf16.gmra.mxu0 %v18522_v60  ;;  %11520 = vmatmul.msk.bf16.gmra.mxu2 %vm515_vm0, %v18530_v0  ;;  %v16594_v60 = vld [vmem:[%s26463_s23 + $0x474] sm:$0xf0]  ;;  %v16596_v0 = vld [vmem:[%s26463_s23 + $0x48c] sm:$0xf] }
  0xa3   :  { %1583 = vmatpush.bf16.msra.mxu0 %v11640_v41  ;;  %v11692_v12 = vor.u32 %v16594_v60, %v11691_v63  ;;  %v11712_v21 = vor.u32 %v16596_v0, %v11709_v10  ;;  %v11677_v41 = vld [vmem:[%s26463_s23 + $0x458] sm:$0xf0]  ;;  %v12139_v60 = vld [vmem:[%s26463_s23 + $0x740] sm:$0xf]  ;;  %v16574_v0 = vld [vmem:[%s26463_s23 + $0x3d4] sm:$0xf0] }
  0xa4   :  { %1546 = vmatpush.bf16.msra.mxu1 %v11620_v33  ;;  %v11757_v33 = vld [vmem:[%s26463_s23 + $0x4f8] sm:$0xf0]  ;;  %v11680_v50 = vor.u32 %v16588_v40, %v11677_v41  ;;  %v12140_v10 = vor.u32 %v16689_v5, %v12139_v60  ;;  %v16663_v40 = vld [vmem:[%s26463_s23 + $0x684] sm:$0xf]  ;;  %v12045_v41 = vld [vmem:[%s26463_s23 + $0x690] sm:$0xf0] }
  0xa5   :  { %1675 = vmatpush.bf16.msrb.mxu2 %v11824_v45  ;;  %1638 = vmatpush.bf16.msrb.mxu3 %v11804_v47  ;;  %v11760_v39 = vor.u32 %v16608_v32, %v11757_v33  ;;  %v11643_v45 = vld [vmem:[%s26463_s23 + $0x408] sm:$0xf]  ;;  %v11741_v47 = vld [vmem:[%s26463_s23 + $0x4d8] sm:$0xf0]  ;;  %v16572_v32 = vld [vmem:[%s26463_s23 + $0x3cc] sm:$0xf]  ;;  %v12048_v37 = vor.u32 %v16663_v40, %v12045_v41 }
  0xa6   :  { %v11645_v63 = vld [vmem:[%s26463_s23 + $0x418] sm:$0xf0]  ;;  %v12077_v40 = vld [vmem:[%s26463_s23 + $0x6d0] sm:$0xf0] }
  0xa7   :  { %1584 = vmatpush.bf16.msra.mxu0 %v11624_v48  ;;  %v11744_v48 = vor.u32 %v16604_v44, %v11741_v47  ;;  %v11613_v33 = vld [vmem:[%s26463_s23 + $0x3d8] sm:$0xf0]  ;;  %v16661_v44 = vld [vmem:[%s26463_s23 + $0x66c] sm:$0xf0] }
  0xa8   :  { %1547 = vmatpush.bf16.msra.mxu1 %v11604_v46  ;;  %v550_v34 = vpop.f32.mrf.mxu1  ;;  %v16582_v46 = vld [vmem:[%s26463_s23 + $0x414] sm:$0xf0] }
  0xa9   :  { %1676 = vmatpush.bf16.msrb.mxu2 %v11808_v57  ;;  %1639 = vmatpush.bf16.msrb.mxu3 %v11788_v61  ;;  %v11644_v53 = vor.u32 %v16582_v46, %v11643_v45  ;;  %v16578_v57 = vld [vmem:[%s26463_s23 + $0x3f4] sm:$0xf0]  ;;  %v11664_v61 = vor.u32 %v16584_v51, %v11661_v52  ;;  %v16681_v45 = vld [vmem:[%s26463_s23 + $0x70c] sm:$0xf0]  ;;  %v16683_v51 = vld [vmem:[%s26463_s23 + $0x724] sm:$0xf] }
  0xaa   :  { %v11628_v2 = vor.u32 %v16578_v57, %v11627_v56  ;;  %v12125_v52 = vld [vmem:[%s26463_s23 + $0x730] sm:$0xf0] }
  0xab   :  { %1585 = vmatpush.bf16.msra.mxu0 %v11608_v4  ;;  %v531_v28 = vpop.f32.mrf.mxu0  ;;  %1548 = vmatmul.bf16.vlgmr.msra.gmra.mxu1 %v18870_v38  ;;  %v11611_v4 = vld [vmem:[%s26463_s23 + $0x3c8] sm:$0xf]  ;;  %v12128_v54 = vor.u32 %v16683_v51, %v12125_v52  ;;  %v12029_v56 = vld [vmem:[%s26463_s23 + $0x670] sm:$0xf0]  ;;  %v16667_v51 = vld [vmem:[%s26463_s23 + $0x6a4] sm:$0xf] }
  0xac   :  { %1616 = vmatpush.bf16.msrb.mxu1 %v11724_v49  ;;  %11841 = vmatmul.msk.bf16.vlgmr.msra.gmra.mxu3 %vm515_vm0, %v18868_v35  ;;  %v18893_v49 = vadd.f32 %v550_v34, %v531_v28  ;;  %v12107_v28 = vld [vmem:[%s26463_s23 + $0x700] sm:$0xf] }
  0xad   :  { %1677 = vmatpush.bf16.msrb.mxu2 %v11792_v9  ;;  %1640 = vmatpush.bf16.msrb.mxu3 %v11772_v11  ;;  %v16569_v9 = vld [vmem:[%s26464_s24 + $0x54] sm:$0xf]  ;;  %v16691_v11 = vld [vmem:[%s26463_s23 + $0x764] sm:$0xf] }
  0xae   :  { %v18980_v30 = vor.u32 %v16569_v9, %v11597_v14  ;;  %v16655_v9 = vld [vmem:[%s26463_s23 + $0x644] sm:$0xf]  ;;  %v16653_v14 = vld [vmem:[%s26463_s23 + $0x62c] sm:$0xf0] }
  0xaf   :  { %1654 = vmatpush.bf16.msrb.mxu0 %v11728_v8  ;;  %v588_v55 = vpop.f32.mrf.mxu3 }
  0xb0   :  { %1617 = vmatpush.bf16.msrb.mxu1 %v11708_v62  ;;  %v552_v59 = vpop.f32.mrf.mxu1  ;;  %v16580_v62 = vld [vmem:[%s26463_s23 + $0x40c] sm:$0xf] }
  0xb1   :  { %1678 = vmatpush.bf16.msrb.mxu2 %v11776_v22  ;;  %1641 = vmatpush.bf16.msrb.mxu3 %v11756_v25  ;;  %v11648_v17 = vor.u32 %v16580_v62, %v11645_v63  ;;  %v16665_v22 = vld [vmem:[%s26463_s23 + $0x68c] sm:$0xf0]  ;;  %v12124_v25 = vor.u32 %v16685_v23, %v12123_v6  ;;  %v16651_v23 = vld [vmem:[%s26463_s23 + $0x624] sm:$0xf] }
  0xb2   :  { %1586 = vmatmul.bf16.vlgmr.msra.gmra.mxu0 %v18870_v38  ;;  %11843 = vmatmul.msk.bf16.vlgmr.msra.gmra.mxu2 %vm515_vm0, %v18868_v35  ;;  %v16677_v62 = vld [vmem:[%s26463_s23 + $0x6ec] sm:$0xf0] }
  0xb3   :  { %1655 = vmatpush.bf16.msrb.mxu0 %v11712_v21  ;;  %v569_v1 = vpop.f32.mrf.mxu2  ;;  %v533_v8 = vpop.f32.mrf.mxu0  ;;  %v11612_v21 = vor.u32 %v16574_v0, %v11611_v4  ;;  %v12109_v4 = vld [vmem:[%s26463_s23 + $0x710] sm:$0xf0] }
  0xb4   :  { %1618 = vmatpush.bf16.msrb.mxu1 %v11692_v12  ;;  %v18931_v7 = vadd.f32 %v588_v55, %v569_v1  ;;  %v12157_v12 = vld [vmem:[%s26463_s23 + $0x770] sm:$0xf0]  ;;  %v18945_v13 = vadd.f32 %v552_v59, %v533_v8  ;;  %v16659_v55 = vld [vmem:[%s26463_s23 + $0x664] sm:$0xf]  ;;  %v16657_v59 = vld [vmem:[%s26463_s23 + $0x64c] sm:$0xf0] }
  0xb5   :  { %1642 = vmatpush.bf16.msrb.mxu3 %v11740_v42  ;;  %1679 = vmatpush.bf16.msrb.mxu2 %v11760_v39  ;;  %v12160_v3 = vor.u32 %v16691_v11, %v12157_v12  ;;  %v12044_v42 = vor.u32 %v16665_v22, %v12043_v20  ;;  %v12027_v39 = vld [vmem:[%s26463_s23 + $0x660] sm:$0xf]  ;;  %v12032_v8 = vor.u32 %v16659_v55, %v12029_v56  ;;  %v12013_v0 = vld [vmem:[%s26463_s23 + $0x650] sm:$0xf0]  ;;  %v16643_v56 = vld [vmem:[%s26463_s23 + $0x5e4] sm:$0xf] }
  0xb6   :  { %v12028_v57 = vor.u32 %v16661_v44, %v12027_v39  ;;  %v11995_v11 = vld [vmem:[%s26463_s23 + $0x620] sm:$0xf]  ;;  %v12093_v20 = vld [vmem:[%s26463_s23 + $0x6f0] sm:$0xf0]  ;;  %v12016_v6 = vor.u32 %v16655_v9, %v12013_v0  ;;  %v16637_v0 = vld [vmem:[%s26463_s23 + $0x5ac] sm:$0xf0] }
  0xb7   :  { %1656 = vmatpush.bf16.msrb.mxu0 %v11696_v36  ;;  %v590_v24 = vpop.f32.mrf.mxu3  ;;  %v18988_v36 = vor.u32 %v16570_v16, %v11595_v15  ;;  %v12075_v15 = vld [vmem:[%s26463_s23 + $0x6c0] sm:$0xf]  ;;  %v16673_v16 = vld [vmem:[%s26463_s23 + $0x6cc] sm:$0xf0]  ;;  %v12096_v22 = vor.u32 %v16675_v19, %v12093_v20  ;;  %v11981_v44 = vld [vmem:[%s26463_s23 + $0x610] sm:$0xf0] }
  0xb8   :  { %1619 = vmatpush.bf16.msrb.mxu1 %v11676_v26  ;;  %v16687_v26 = vld [vmem:[%s26463_s23 + $0x744] sm:$0xf]  ;;  %v555_v29 = vpop.f32.mrf.mxu1  ;;  %v12076_v18 = vor.u32 %v16673_v16, %v12075_v15  ;;  %v16692_v19 = vld [vmem:[%s26463_s23 + $0x76c] sm:$0xf]  ;;  %v12165_v20 = vld [vmem:[%s26463_s23 + $0x778] sm:$0xf0] }
  0xb9   :  { %1680 = vmatpush.bf16.msrb.mxu2 %v11744_v48  ;;  %2118 = vmatpush.bf16.msra.mxu3 %v12156_v58  ;;  %v12144_v34 = vor.u32 %v16687_v26, %v12141_v27  ;;  %v12011_v58 = vld [vmem:[%s26463_s23 + $0x640] sm:$0xf]  ;;  %v16649_v27 = vld [vmem:[%s26463_s23 + $0x60c] sm:$0xf0] }
  0xba   :  { %v11979_v26 = vld [vmem:[%s26463_s23 + $0x600] sm:$0xf] }
  0xbb   :  { %1657 = vmatpush.bf16.msrb.mxu0 %v11680_v50  ;;  %v536_v47 = vpop.f32.mrf.mxu0  ;;  %1553 = vmatmul.bf16.gmra.mxu1 %v18988_v36  ;;  %v12108_v50 = vor.u32 %v16681_v45, %v12107_v28  ;;  %v11980_v28 = vor.u32 %v16649_v27, %v11979_v26  ;;  %v12035_v27 = vld [vmem:[%s26463_s23 + $0x668] sm:$0xf] }
  0xbc   :  { %1620 = vmatpush.bf16.msrb.mxu1 %v11660_v43  ;;  %v571_v43 = vpop.f32.mrf.mxu2  ;;  %11842 = vmatmul.msk.bf16.gmra.mxu3 %vm515_vm0, %v18980_v30  ;;  %v19019_v48 = vadd.f32 %v555_v29, %v536_v47  ;;  %v12059_v29 = vld [vmem:[%s26463_s23 + $0x6a0] sm:$0xf] }
  0xbd   :  { %2119 = vmatpush.bf16.msra.mxu3 %v12140_v10  ;;  %2156 = vmatpush.bf16.msra.mxu2 %v12160_v3  ;;  %v19008_v46 = vadd.f32 %v590_v24, %v571_v43  ;;  %v12012_v10 = vor.u32 %v16657_v59, %v12011_v58  ;;  %v11997_v24 = vld [vmem:[%s26463_s23 + $0x630] sm:$0xf0]  ;;  %v16647_v43 = vld [vmem:[%s26463_s23 + $0x604] sm:$0xf]  ;;  %v11963_v47 = vld [vmem:[%s26463_s23 + $0x5e0] sm:$0xf] }
  0xbe   :  { %v12000_v39 = vor.u32 %v16651_v23, %v11997_v24  ;;  %v11984_v55 = vor.u32 %v16647_v43, %v11981_v44  ;;  %v11947_v59 = vld [vmem:[%s26463_s23 + $0x5c0] sm:$0xf]  ;;  %v16635_v23 = vld [vmem:[%s26463_s23 + $0x5a4] sm:$0xf]  ;;  %v11933_v24 = vld [vmem:[%s26463_s23 + $0x5b0] sm:$0xf0] }
  0xbf   :  { %1658 = vmatpush.bf16.msrb.mxu0 %v11664_v61  ;;  %v12091_v61 = vld [vmem:[%s26463_s23 + $0x6e0] sm:$0xf]  ;;  %v593_v63 = vpop.f32.mrf.mxu3  ;;  %v16664_v43 = vld [vmem:[%s26463_s23 + $0x68c] sm:$0xf]  ;;  %v12053_v44 = vld [vmem:[%s26463_s23 + $0x698] sm:$0xf0] }
  0xc0   :  { %1621 = vmatpush.bf16.msrb.mxu1 %v11644_v53  ;;  %v11616_v53 = vor.u32 %v16572_v32, %v11613_v33  ;;  %v12092_v1 = vor.u32 %v16677_v62, %v12091_v61  ;;  %v557_v60 = vpop.f32.mrf.mxu1  ;;  %v16641_v61 = vld [vmem:[%s26463_s23 + $0x5cc] sm:$0xf0]  ;;  %v12163_v62 = vld [vmem:[%s26463_s23 + $0x768] sm:$0xf] }
  0xc1   :  { %2120 = vmatpush.bf16.msra.mxu3 %v12124_v25  ;;  %2157 = vmatpush.bf16.msra.mxu2 %v12144_v34  ;;  %v11996_v25 = vor.u32 %v16653_v14, %v11995_v11  ;;  %v16671_v34 = vld [vmem:[%s26463_s23 + $0x6c4] sm:$0xf]  ;;  %v11948_v9 = vor.u32 %v16641_v61, %v11947_v59  ;;  %v12051_v11 = vld [vmem:[%s26463_s23 + $0x688] sm:$0xf]  ;;  %v16690_v14 = vld [vmem:[%s26463_s23 + $0x754] sm:$0xf0] }
  0xc2   :  { %1591 = vmatmul.bf16.gmra.mxu0 %v18988_v36  ;;  %11844 = vmatmul.msk.bf16.gmra.mxu2 %vm515_vm0, %v18980_v30  ;;  %v12133_v59 = vld [vmem:[%s26463_s23 + $0x738] sm:$0xf0]  ;;  %v16660_v61 = vld [vmem:[%s26463_s23 + $0x66c] sm:$0xf] }
  0xc3   :  { %1659 = vmatpush.bf16.msrb.mxu0 %v11648_v17  ;;  %v538_v3 = vpop.f32.mrf.mxu0 }
  0xc4   :  { %1622 = vmatpush.bf16.msrb.mxu1 %v11628_v2  ;;  %v16679_v2 = vld [vmem:[%s26463_s23 + $0x704] sm:$0xf]  ;;  %v574_v12 = vpop.f32.mrf.mxu2 }
  0xc5   :  { %2121 = vmatpush.bf16.msra.mxu3 %v12108_v50  ;;  %2158 = vmatpush.bf16.msra.mxu2 %v12128_v54  ;;  %v12112_v5 = vor.u32 %v16679_v2, %v12109_v4  ;;  %v19066_v17 = vadd.f32 %v593_v63, %v574_v12  ;;  %v16645_v50 = vld [vmem:[%s26463_s23 + $0x5ec] sm:$0xf0]  ;;  %v12061_v54 = vld [vmem:[%s26463_s23 + $0x6b0] sm:$0xf0]  ;;  %v16694_v63 = vld [vmem:[%s26463_s23 + $0x774] sm:$0xf0] }
  0xc6   :  { %v11964_v58 = vor.u32 %v16645_v50, %v11963_v47  ;;  %v12164_v2 = vor.u32 %v16694_v63, %v12163_v62  ;;  %v12147_v12 = vld [vmem:[%s26463_s23 + $0x748] sm:$0xf]  ;;  %v12037_v62 = vld [vmem:[%s26463_s23 + $0x678] sm:$0xf0] }
  0xc7   :  { %1660 = vmatpush.bf16.msrb.mxu0 %v11632_v31  ;;  %v16669_v31 = vld [vmem:[%s26463_s23 + $0x6ac] sm:$0xf0]  ;;  %v595_v32 = vpop.f32.mrf.mxu3 }
  0xc8   :  { %1623 = vmatpush.bf16.msrb.mxu1 %v11612_v21  ;;  %v19074_v21 = vadd.f32 %v557_v60, %v538_v3  ;;  %v12060_v33 = vor.u32 %v16669_v31, %v12059_v29  ;;  %v607_v41 = vpop.f32.mrf.mxu1  ;;  %v16639_v60 = vld [vmem:[%s26463_s23 + $0x5c4] sm:$0xf]  ;;  %v16666_v3 = vld [vmem:[%s26463_s23 + $0x694] sm:$0xf0]  ;;  %v12131_v29 = vld [vmem:[%s26463_s23 + $0x728] sm:$0xf] }
  0xc9   :  { %2122 = vmatpush.bf16.msra.mxu3 %v12092_v1  ;;  %2159 = vmatpush.bf16.msra.mxu2 %v12112_v5  ;;  %v12052_v26 = vor.u32 %v16666_v3, %v12051_v11  ;;  %v16686_v31 = vld [vmem:[%s26463_s23 + $0x734] sm:$0xf0] }
  0xcb   :  { %1661 = vmatpush.bf16.msrb.mxu0 %v11616_v53  ;;  %1624 = vmatmul.bf16.vlgmr.msrb.gmra.mxu1 %v18870_v38 }
  0xcc   :  { %2098 = vmatpush.bf16.msra.mxu1 %v12044_v42  ;;  %v12080_v42 = vor.u32 %v16671_v34, %v12077_v40  ;;  %v576_v45 = vpop.f32.mrf.mxu2  ;;  %11845 = vmatmul.msk.bf16.vlgmr.msrb.gmra.mxu3 %vm515_vm0, %v18868_v35  ;;  %v12132_v34 = vor.u32 %v16686_v31, %v12131_v29  ;;  %v16688_v40 = vld [vmem:[%s26463_s23 + $0x74c] sm:$0xf]  ;;  %v16631_v29 = vld [vmem:[%s26464_s24 + $0x64] sm:$0xf] }
  0xcd   :  { %2123 = vmatpush.bf16.msra.mxu3 %v12076_v18  ;;  %2160 = vmatpush.bf16.msra.mxu2 %v12096_v22  ;;  %v19115_v52 = vadd.f32 %v595_v32, %v576_v45  ;;  %v12148_v18 = vor.u32 %v16690_v14, %v12147_v12  ;;  %v12168_v22 = vor.u32 %v16692_v19, %v12165_v20  ;;  %v12021_v12 = vld [vmem:[%s26463_s23 + $0x658] sm:$0xf0]  ;;  %v11987_v19 = vld [vmem:[%s26463_s23 + $0x608] sm:$0xf]  ;;  %v16652_v31 = vld [vmem:[%s26463_s23 + $0x62c] sm:$0xf] }
  0xce   :  { %v11936_v45 = vor.u32 %v16635_v23, %v11933_v24  ;;  %v12083_v20 = vld [vmem:[%s26463_s23 + $0x6c8] sm:$0xf] }
  0xcf   :  { %2136 = vmatpush.bf16.msra.mxu0 %v12048_v37  ;;  %v645_v53 = vpop.f32.mrf.mxu0  ;;  %v12064_v37 = vor.u32 %v16667_v51, %v12061_v54  ;;  %v626_v1 = vpop.f32.mrf.mxu3  ;;  %v12019_v51 = vld [vmem:[%s26463_s23 + $0x648] sm:$0xf]  ;;  %v16682_v54 = vld [vmem:[%s26463_s23 + $0x714] sm:$0xf0] }
  0xd0   :  { %2099 = vmatpush.bf16.msra.mxu1 %v12028_v57  ;;  %v11965_v57 = vld [vmem:[%s26463_s23 + $0x5f0] sm:$0xf0]  ;;  %v19144_v4 = vadd.f32 %v626_v1, %v607_v41  ;;  %v12149_v41 = vld [vmem:[%s26463_s23 + $0x758] sm:$0xf0] }
  0xd1   :  { %2124 = vmatpush.bf16.msra.mxu3 %v12060_v33  ;;  %2161 = vmatpush.bf16.msra.mxu2 %v12080_v42  ;;  %v11968_v5 = vor.u32 %v16643_v56, %v11965_v57  ;;  %v16662_v33 = vld [vmem:[%s26463_s23 + $0x674] sm:$0xf0]  ;;  %v12056_v56 = vor.u32 %v16664_v43, %v12053_v44  ;;  %v11971_v44 = vld [vmem:[%s26463_s23 + $0x5e8] sm:$0xf] }
  0xd2   :  { %1662 = vmatmul.bf16.vlgmr.msrb.gmra.mxu0 %v18870_v38  ;;  %11847 = vmatmul.msk.bf16.vlgmr.msrb.gmra.mxu2 %vm515_vm0, %v18868_v35  ;;  %v609_v38 = vpop.f32.mrf.mxu1  ;;  %v11931_v35 = vld [vmem:[%s26463_s23 + $0x5a0] sm:$0xf]  ;;  %v12036_v50 = vor.u32 %v16662_v33, %v12035_v27  ;;  %v16658_v57 = vld [vmem:[%s26463_s23 + $0x654] sm:$0xf0]  ;;  %v12101_v27 = vld [vmem:[%s26463_s23 + $0x6f8] sm:$0xf0] }
  0xd3   :  { %2137 = vmatpush.bf16.msra.mxu0 %v12032_v8  ;;  %v11949_v8 = vld [vmem:[%s26463_s23 + $0x5d0] sm:$0xf0] }
  0xd4   :  { %2100 = vmatpush.bf16.msra.mxu1 %v12012_v10 }
  0xd5   :  { %2162 = vmatpush.bf16.msra.mxu2 %v12064_v37  ;;  %v664_v10 = vpop.f32.mrf.mxu2  ;;  %2194 = vmatpush.bf16.msrb.mxu3 %v12164_v2  ;;  %v12020_v2 = vor.u32 %v16658_v57, %v12019_v51  ;;  %v16646_v51 = vld [vmem:[%s26463_s23 + $0x5f4] sm:$0xf0] }
  0xd6   :  { %v19167_v15 = vadd.f32 %v664_v10, %v645_v53  ;;  %v12115_v53 = vld [vmem:[%s26463_s23 + $0x708] sm:$0xf] }
  0xd7   :  { %2138 = vmatpush.bf16.msra.mxu0 %v12016_v6  ;;  %v647_v16 = vpop.f32.mrf.mxu0  ;;  %v11952_v6 = vor.u32 %v16639_v60, %v11949_v8  ;;  %v628_v32 = vpop.f32.mrf.mxu3  ;;  %v12116_v63 = vor.u32 %v16682_v54, %v12115_v53  ;;  %v12099_v60 = vld [vmem:[%s26463_s23 + $0x6e8] sm:$0xf]  ;;  %v16672_v53 = vld [vmem:[%s26463_s23 + $0x6cc] sm:$0xf]  ;;  %v12085_v54 = vld [vmem:[%s26463_s23 + $0x6d8] sm:$0xf0] }
  0xd8   :  { %2101 = vmatpush.bf16.msra.mxu1 %v11996_v25  ;;  %v11932_v25 = vor.u32 %v16637_v0, %v11931_v35  ;;  %v19202_v42 = vadd.f32 %v628_v32, %v609_v38  ;;  %v12003_v38 = vld [vmem:[%s26463_s23 + $0x628] sm:$0xf]  ;;  %v16680_v35 = vld [vmem:[%s26463_s23 + $0x70c] sm:$0xf]  ;;  %v12117_v0 = vld [vmem:[%s26463_s23 + $0x718] sm:$0xf0] }
  0xd9   :  { %2195 = vmatpush.bf16.msrb.mxu3 %v12148_v18  ;;  %2232 = vmatpush.bf16.msrb.mxu2 %v12168_v22  ;;  %v16674_v22 = vld [vmem:[%s26463_s23 + $0x6d4] sm:$0xf0]  ;;  %v12005_v32 = vld [vmem:[%s26463_s23 + $0x638] sm:$0xf0] }
  0xda   :  { %v12084_v33 = vor.u32 %v16674_v22, %v12083_v20  ;;  %v11939_v20 = vld [vmem:[%s26463_s23 + $0x5a8] sm:$0xf]  ;;  %v16638_v22 = vld [vmem:[%s26463_s23 + $0x5b4] sm:$0xf0] }
  0xdb   :  { %2139 = vmatpush.bf16.msra.mxu0 %v12000_v39  ;;  %v612_v39 = vpop.f32.mrf.mxu1  ;;  %1629 = vmatmul.bf16.gmra.mxu1 %v18988_v36 }
  0xdc   :  { %2102 = vmatpush.bf16.msra.mxu1 %v11980_v28  ;;  %v12152_v28 = vor.u32 %v16688_v40, %v12149_v41  ;;  %11846 = vmatmul.msk.bf16.gmra.mxu3 %vm515_vm0, %v18980_v30  ;;  %v11917_v40 = vld [vmem:[%s26464_s24 + $0x68] sm:$0xf0]  ;;  %v11915_v41 = vld [vmem:[%s26464_s24 + $0x60] sm:$0xf] }
  0xdd   :  { %v666_v47 = vpop.f32.mrf.mxu2  ;;  %2196 = vmatpush.bf16.msrb.mxu3 %v12132_v34  ;;  %v19326_v57 = vor.u32 %v16631_v29, %v11917_v40  ;;  %v16729_v29 = vld [vmem:[%s26463_s23 + $0x86c] sm:$0xf0] }
  0xde   :  { %v19219_v37 = vadd.f32 %v666_v47, %v647_v16  ;;  %2233 = vmatpush.bf16.msrb.mxu2 %v12152_v28  ;;  %v12120_v16 = vor.u32 %v16680_v35, %v12117_v0  ;;  %v12067_v28 = vld [vmem:[%s26463_s23 + $0x6a8] sm:$0xf]  ;;  %v12069_v35 = vld [vmem:[%s26463_s23 + $0x6b8] sm:$0xf0]  ;;  %v16753_v40 = vld [vmem:[%s26463_s23 + $0x92c] sm:$0xf0] }
  0xdf   :  { %2140 = vmatpush.bf16.msra.mxu0 %v11984_v55  ;;  %v650_v55 = vpop.f32.mrf.mxu0  ;;  %v631_v8 = vpop.f32.mrf.mxu3 }
  0xe0   :  { %2103 = vmatpush.bf16.msra.mxu1 %v11964_v58  ;;  %v16684_v58 = vld [vmem:[%s26463_s23 + $0x72c] sm:$0xf]  ;;  %v19260_v10 = vadd.f32 %v631_v8, %v612_v39  ;;  %v16632_v39 = vld [vmem:[%s26464_s24 + $0x64] sm:$0xf0] }
  0xe1   :  { %v12136_v1 = vor.u32 %v16684_v58, %v12133_v59  ;;  %2197 = vmatpush.bf16.msrb.mxu3 %v12116_v63  ;;  %v16648_v58 = vld [vmem:[%s26463_s23 + $0x60c] sm:$0xf]  ;;  %v11989_v59 = vld [vmem:[%s26463_s23 + $0x618] sm:$0xf0]  ;;  %v19335_v63 = vor.u32 %v16632_v39, %v11915_v41 }
  0xe2   :  { %1667 = vmatmul.bf16.gmra.mxu0 %v18988_v36  ;;  %11848 = vmatmul.msk.bf16.gmra.mxu2 %vm515_vm0, %v18980_v30  ;;  %v12040_v36 = vor.u32 %v16660_v61, %v12037_v62  ;;  %v16656_v30 = vld [vmem:[%s26463_s23 + $0x64c] sm:$0xf]  ;;  %v12088_v61 = vor.u32 %v16672_v53, %v12085_v54  ;;  %v11923_v53 = vld [vmem:[%s26464_s24 + $0x70] sm:$0xf]  ;;  %v16634_v54 = vld [vmem:[%s26464_s24 + $0x74] sm:$0x30] }
  0xe3   :  { %2141 = vmatpush.bf16.msra.mxu0 %v11968_v5  ;;  %v16678_v5 = vld [vmem:[%s26463_s23 + $0x6f4] sm:$0xf0]  ;;  %v614_v11 = vpop.f32.mrf.mxu1  ;;  %2234 = vmatpush.bf16.msrb.mxu2 %v12136_v1  ;;  %v12024_v24 = vor.u32 %v16656_v30, %v12021_v12  ;;  %v11973_v30 = vld [vmem:[%s26463_s23 + $0x5f8] sm:$0xf0] }
  0xe4   :  { %2104 = vmatpush.bf16.msra.mxu1 %v11948_v9  ;;  %v16654_v9 = vld [vmem:[%s26463_s23 + $0x634] sm:$0xf0]  ;;  %v12100_v14 = vor.u32 %v16678_v5, %v12099_v60  ;;  %v16668_v60 = vld [vmem:[%s26463_s23 + $0x6ac] sm:$0xf] }
  0xe5   :  { %v669_v3 = vpop.f32.mrf.mxu2  ;;  %v12004_v18 = vor.u32 %v16654_v9, %v12003_v38  ;;  %v11972_v38 = vor.u32 %v16646_v51, %v11971_v44  ;;  %v16642_v9 = vld [vmem:[%s26463_s23 + $0x5d4] sm:$0xf0]  ;;  %v12072_v12 = vor.u32 %v16668_v60, %v12069_v35 }
  0xe6   :  { %2198 = vmatpush.bf16.msrb.mxu3 %v12100_v14 }
  0xe7   :  { %2142 = vmatpush.bf16.msra.mxu0 %v11952_v6  ;;  %v19277_v6 = vadd.f32 %v669_v3, %v650_v55  ;;  %v652_v23 = vpop.f32.mrf.mxu0  ;;  %2235 = vmatpush.bf16.msrb.mxu2 %v12120_v16  ;;  %v633_v47 = vpop.f32.mrf.mxu3  ;;  %v12483_v16 = vld [vmem:[%s26463_s23 + $0x940] sm:$0xf] }
  0xe8   :  { %2105 = vmatpush.bf16.msra.mxu1 %v11932_v25  ;;  %v16650_v25 = vld [vmem:[%s26463_s23 + $0x614] sm:$0xf0]  ;;  %v19324_v55 = vadd.f32 %v633_v47, %v614_v11  ;;  %v16644_v11 = vld [vmem:[%s26463_s23 + $0x5ec] sm:$0xf]  ;;  %v16755_v47 = vld [vmem:[%s26463_s23 + $0x944] sm:$0xf] }
  0xe9   :  { %v11988_v43 = vor.u32 %v16650_v25, %v11987_v19  ;;  %v16640_v19 = vld [vmem:[%s26463_s23 + $0x5cc] sm:$0xf] }
  0xea   :  { %2199 = vmatpush.bf16.msrb.mxu3 %v12084_v33  ;;  %v11940_v33 = vor.u32 %v16638_v22, %v11939_v20  ;;  %v12435_v22 = vld [vmem:[%s26463_s23 + $0x8e0] sm:$0xf] }
  0xeb   :  { %2143 = vmatpush.bf16.msra.mxu0 %v11936_v45  ;;  %v16670_v45 = vld [vmem:[%s26463_s23 + $0x6b4] sm:$0xf0]  ;;  %2106 = vmatmul.bf16.vlgmr.msra.gmra.mxu1 %v19335_v63 }
  0xec   :  { %2174 = vmatpush.bf16.msrb.mxu1 %v12052_v26  ;;  %v16676_v26 = vld [vmem:[%s26463_s23 + $0x6ec] sm:$0xf]  ;;  %v12068_v1 = vor.u32 %v16670_v45, %v12067_v28  ;;  %12169 = vmatmul.msk.bf16.vlgmr.msra.gmra.mxu3 %vm515_vm0, %v19326_v57 }
  0xed   :  { %v12104_v34 = vor.u32 %v16676_v26, %v12101_v27  ;;  %v11957_v26 = vld [vmem:[%s26463_s23 + $0x5d8] sm:$0xf0]  ;;  %v12371_v27 = vld [vmem:[%s26463_s23 + $0x860] sm:$0xf] }
  0xee   :  { %2200 = vmatpush.bf16.msrb.mxu3 %v12068_v1  ;;  %v11960_v44 = vor.u32 %v16640_v19, %v11957_v26  ;;  %v12372_v28 = vor.u32 %v16729_v29, %v12371_v27  ;;  %v16725_v1 = vld [vmem:[%s26463_s23 + $0x84c] sm:$0xf0]  ;;  %v12339_v19 = vld [vmem:[%s26463_s23 + $0x820] sm:$0xf]  ;;  %v16747_v29 = vld [vmem:[%s26463_s23 + $0x904] sm:$0xf] }
  0xef   :  { %2212 = vmatpush.bf16.msrb.mxu0 %v12056_v56  ;;  %v1007_v56 = vpop.f32.mrf.mxu1  ;;  %2236 = vmatpush.bf16.msrb.mxu2 %v12104_v34  ;;  %v1045_v8 = vpop.f32.mrf.mxu0  ;;  %v12467_v34 = vld [vmem:[%s26463_s23 + $0x920] sm:$0xf] }
  0xf0   :  { %2175 = vmatpush.bf16.msrb.mxu1 %v12036_v50  ;;  %v12008_v50 = vor.u32 %v16652_v31, %v12005_v32  ;;  %v1008_v62 = vadd.f32 %v1007_v56, %v18893_v49  ;;  %v11955_v49 = vld [vmem:[%s26463_s23 + $0x5c8] sm:$0xf]  ;;  %v1046_v0 = vadd.f32 %v1045_v8, %v18931_v7  ;;  %v16757_v7 = vld [vmem:[%s26463_s23 + $0x94c] sm:$0xf0]  ;;  %v1026_v3 = vpop.f32.mrf.mxu3  ;;  %v12468_v45 = vor.u32 %v16753_v40, %v12467_v34  ;;  %v16636_v56 = vld [vmem:[%s26463_s23 + $0x5ac] sm:$0xf] }
  0xf1   :  { %v11956_v14 = vor.u32 %v16642_v9, %v11955_v49  ;;  %v16751_v49 = vld [vmem:[%s26463_s23 + $0x924] sm:$0xf]  ;;  %v12469_v9 = vld [vmem:[%s26463_s23 + $0x930] sm:$0xf0] }
  0xf2   :  { %2144 = vmatmul.bf16.vlgmr.msra.gmra.mxu0 %v19335_v63  ;;  %12171 = vmatmul.msk.bf16.vlgmr.msra.gmra.mxu2 %vm515_vm0, %v19326_v57  ;;  %v16719_v40 = vld [vmem:[%s26463_s23 + $0x824] sm:$0xf] }
  0xf3   :  { %2213 = vmatpush.bf16.msrb.mxu0 %v12040_v36  ;;  %v11992_v36 = vor.u32 %v16648_v58, %v11989_v59  ;;  %2237 = vmatpush.bf16.msrb.mxu2 %v12088_v61  ;;  %v11941_v58 = vld [vmem:[%s26463_s23 + $0x5b8] sm:$0xf0]  ;;  %v12373_v61 = vld [vmem:[%s26463_s23 + $0x870] sm:$0xf0] }
  0xf4   :  { %2176 = vmatpush.bf16.msrb.mxu1 %v12020_v2  ;;  %v671_v2 = vpop.f32.mrf.mxu2  ;;  %v11944_v8 = vor.u32 %v16636_v56, %v11941_v58 }
  0xf5   :  { %v19340_v5 = vadd.f32 %v671_v2, %v652_v23  ;;  %v12484_v23 = vor.u32 %v16757_v7, %v12483_v16  ;;  %v12451_v2 = vld [vmem:[%s26463_s23 + $0x900] sm:$0xf]  ;;  %v19453_v16 = vor.u32 %v16634_v54, %v11923_v53  ;;  %v16723_v7 = vld [vmem:[%s26463_s23 + $0x844] sm:$0xf] }
  0xf7   :  { %2214 = vmatpush.bf16.msrb.mxu0 %v12024_v24  ;;  %v19379_v24 = vadd.f32 %v1026_v3, %v1008_v62  ;;  %v1009_v25 = vpop.f32.mrf.mxu1  ;;  %2238 = vmatpush.bf16.msrb.mxu2 %v12072_v12  ;;  %v1047_v39 = vpop.f32.mrf.mxu0  ;;  %v12355_v62 = vld [vmem:[%s26463_s23 + $0x840] sm:$0xf]  ;;  %v12472_v12 = vor.u32 %v16751_v49, %v12469_v9  ;;  %v12357_v3 = vld [vmem:[%s26463_s23 + $0x850] sm:$0xf0]  ;;  %v16739_v9 = vld [vmem:[%s26463_s23 + $0x8c4] sm:$0xf] }
  0xf8   :  { %2177 = vmatpush.bf16.msrb.mxu1 %v12004_v18  ;;  %v11976_v18 = vor.u32 %v16644_v11, %v11973_v30  ;;  %v1010_v31 = vadd.f32 %v1009_v25, %v18945_v13  ;;  %2676 = vmatpush.bf16.msra.mxu3 %v12484_v23  ;;  %v11925_v13 = vld [vmem:[%s26464_s24 + $0x78] sm:$0x30]  ;;  %v1048_v51 = vadd.f32 %v1047_v39, %v19008_v46  ;;  %v16727_v46 = vld [vmem:[%s26463_s23 + $0x864] sm:$0xf]  ;;  %v1028_v60 = vpop.f32.mrf.mxu3  ;;  %v16745_v23 = vld [vmem:[%s26463_s23 + $0x8ec] sm:$0xf0] }
  0xf9   :  { %v12376_v30 = vor.u32 %v16727_v46, %v12373_v61  ;;  %v12436_v27 = vor.u32 %v16745_v23, %v12435_v22  ;;  %v12341_v39 = vld [vmem:[%s26463_s23 + $0x830] sm:$0xf0]  ;;  %v16715_v46 = vld [vmem:[%s26463_s23 + $0x804] sm:$0xf] }
  0xfa   :  { %v19448_v35 = vadd.f32 %v1028_v60, %v1010_v31  ;;  %v12453_v31 = vld [vmem:[%s26463_s23 + $0x910] sm:$0xf0]  ;;  %v12344_v56 = vor.u32 %v16719_v40, %v12341_v39  ;;  %v16737_v60 = vld [vmem:[%s26463_s23 + $0x8ac] sm:$0xf0]  ;;  %v16707_v40 = vld [vmem:[%s26463_s23 + $0x7c4] sm:$0xf] }
  0xfb   :  { %2215 = vmatpush.bf16.msrb.mxu0 %v12008_v50  ;;  %v12485_v50 = vld [vmem:[%s26463_s23 + $0x950] sm:$0xf0]  ;;  %2111 = vmatmul.bf16.gmra.mxu1 %v19453_v16  ;;  %v12456_v34 = vor.u32 %v16747_v29, %v12453_v31 }
  0xfc   :  { %2178 = vmatpush.bf16.msrb.mxu1 %v11988_v43  ;;  %v1064_v32 = vpop.f32.mrf.mxu2  ;;  %v16633_v43 = vld [vmem:[%s26464_s24 + $0x74] sm:$0xf]  ;;  %v12488_v59 = vor.u32 %v16755_v47, %v12485_v50  ;;  %2677 = vmatpush.bf16.msra.mxu3 %v12468_v45  ;;  %v16743_v50 = vld [vmem:[%s26463_s23 + $0x8e4] sm:$0xf] }
  0xfd   :  { %v19397_v41 = vadd.f32 %v1064_v32, %v1046_v0  ;;  %v19450_v11 = vor.u32 %v16633_v43, %v11925_v13  ;;  %v12323_v13 = vld [vmem:[%s26463_s23 + $0x800] sm:$0xf]  ;;  %v12325_v61 = vld [vmem:[%s26463_s23 + $0x810] sm:$0xf0] }
  0xfe   :  { %2714 = vmatpush.bf16.msra.mxu2 %v12488_v59  ;;  %v12293_v39 = vld [vmem:[%s26463_s23 + $0x7d0] sm:$0xf0] }
  0xff   :  { %2216 = vmatpush.bf16.msrb.mxu0 %v11992_v36  ;;  %v1012_v0 = vpop.f32.mrf.mxu1  ;;  %v1050_v26 = vpop.f32.mrf.mxu0  ;;  %12170 = vmatmul.msk.bf16.gmra.mxu3 %vm515_vm0, %v19450_v11 }
 0x100   :  { %2179 = vmatpush.bf16.msrb.mxu1 %v11972_v38  ;;  %v16749_v38 = vld [vmem:[%s26463_s23 + $0x90c] sm:$0xf0]  ;;  %v1051_v32 = vadd.f32 %v1050_v26, %v19066_v17  ;;  %v1031_v45 = vpop.f32.mrf.mxu3  ;;  %v16735_v26 = vld [vmem:[%s26463_s23 + $0x8a4] sm:$0xf] }
 0x101   :  { %v12452_v36 = vor.u32 %v16749_v38, %v12451_v2  ;;  %v16717_v17 = vld [vmem:[%s26463_s23 + $0x80c] sm:$0xf0]  ;;  %v12403_v38 = vld [vmem:[%s26463_s23 + $0x8a0] sm:$0xf] }
 0x102   :  { %2715 = vmatpush.bf16.msra.mxu2 %v12472_v12  ;;  %2149 = vmatmul.bf16.gmra.mxu0 %v19453_v16  ;;  %v12404_v49 = vor.u32 %v16737_v60, %v12403_v38  ;;  %v12328_v12 = vor.u32 %v16715_v46, %v12325_v61  ;;  %v12259_v46 = vld [vmem:[%s26463_s23 + $0x780] sm:$0xf]  ;;  %v12491_v61 = vld [vmem:[%s26463_s23 + $0x948] sm:$0xf] }
 0x103   :  { %2217 = vmatpush.bf16.msrb.mxu0 %v11976_v18  ;;  %v12356_v18 = vor.u32 %v16725_v1, %v12355_v62  ;;  %2678 = vmatpush.bf16.msra.mxu3 %v12452_v36  ;;  %v12324_v62 = vor.u32 %v16717_v17, %v12323_v13  ;;  %v12307_v1 = vld [vmem:[%s26463_s23 + $0x7e0] sm:$0xf]  ;;  %v12379_v60 = vld [vmem:[%s26463_s23 + $0x868] sm:$0xf] }
 0x104   :  { %2180 = vmatpush.bf16.msrb.mxu1 %v11956_v14  ;;  %v1013_v14 = vadd.f32 %v1012_v0, %v19019_v48  ;;  %v1066_v20 = vpop.f32.mrf.mxu2  ;;  %v16721_v48 = vld [vmem:[%s26463_s23 + $0x82c] sm:$0xf0]  ;;  %12172 = vmatmul.msk.bf16.gmra.mxu2 %vm515_vm0, %v19450_v11  ;;  %v12421_v0 = vld [vmem:[%s26463_s23 + $0x8d0] sm:$0xf0]  ;;  %v12275_v17 = vld [vmem:[%s26463_s23 + $0x7a0] sm:$0xf] }
 0x105   :  { %v19473_v25 = vadd.f32 %v1066_v20, %v1048_v51  ;;  %v12340_v43 = vor.u32 %v16721_v48, %v12339_v19  ;;  %v12437_v51 = vld [vmem:[%s26463_s23 + $0x8f0] sm:$0xf0]  ;;  %v12291_v19 = vld [vmem:[%s26463_s23 + $0x7c0] sm:$0xf]  ;;  %v16733_v48 = vld [vmem:[%s26463_s23 + $0x88c] sm:$0xf0] }
 0x106   :  { %2716 = vmatpush.bf16.msra.mxu2 %v12456_v34  ;;  %v19512_v53 = vadd.f32 %v1031_v45, %v1013_v14  ;;  %v12440_v58 = vor.u32 %v16743_v50, %v12437_v51  ;;  %v12424_v14 = vor.u32 %v16739_v9, %v12421_v0  ;;  %v12387_v20 = vld [vmem:[%s26463_s23 + $0x880] sm:$0xf]  ;;  %v12296_v51 = vor.u32 %v16707_v40, %v12293_v39  ;;  %v12261_v9 = vld [vmem:[%s26463_s23 + $0x790] sm:$0xf0]  ;;  %v12459_v40 = vld [vmem:[%s26463_s23 + $0x908] sm:$0xf] }
 0x107   :  { %2218 = vmatpush.bf16.msrb.mxu0 %v11960_v44  ;;  %2679 = vmatpush.bf16.msra.mxu3 %v12436_v27  ;;  %v12419_v44 = vld [vmem:[%s26463_s23 + $0x8c0] sm:$0xf]  ;;  %v1014_v54 = vpop.f32.mrf.mxu1  ;;  %v1052_v36 = vpop.f32.mrf.mxu0  ;;  %v12388_v23 = vor.u32 %v16733_v48, %v12387_v20  ;;  %v12405_v27 = vld [vmem:[%s26463_s23 + $0x8b0] sm:$0xf0]  ;;  %v16756_v20 = vld [vmem:[%s26463_s23 + $0x94c] sm:$0xf] }
 0x108   :  { %2181 = vmatpush.bf16.msrb.mxu1 %v11940_v33  ;;  %v12360_v33 = vor.u32 %v16723_v7, %v12357_v3  ;;  %v1015_v59 = vadd.f32 %v1014_v54, %v19074_v21  ;;  %v16713_v21 = vld [vmem:[%s26463_s23 + $0x7ec] sm:$0xf0]  ;;  %v16711_v7 = vld [vmem:[%s26463_s23 + $0x7e4] sm:$0xf]  ;;  %v12309_v3 = vld [vmem:[%s26463_s23 + $0x7f0] sm:$0xf0]  ;;  %v1033_v22 = vpop.f32.mrf.mxu3 }
 0x109   :  { %v12493_v48 = vld [vmem:[%s26463_s23 + $0x958] sm:$0xf0]  ;;  %v16750_v39 = vld [vmem:[%s26463_s23 + $0x914] sm:$0xf0] }
 0x10a   :  { %2717 = vmatpush.bf16.msra.mxu2 %v12440_v58  ;;  %v19566_v29 = vadd.f32 %v1033_v22, %v1015_v59  ;;  %v12277_v58 = vld [vmem:[%s26463_s23 + $0x7b0] sm:$0xf0] }
 0x10b   :  { %2219 = vmatpush.bf16.msrb.mxu0 %v11944_v8  ;;  %2182 = vmatmul.bf16.vlgmr.msrb.gmra.mxu1 %v19335_v63 }
 0x10c   :  { %2656 = vmatpush.bf16.msra.mxu1 %v12372_v28  ;;  %v16741_v28 = vld [vmem:[%s26463_s23 + $0x8cc] sm:$0xf0]  ;;  %v1069_v2 = vpop.f32.mrf.mxu2 }
 0x10d   :  { %v12420_v47 = vor.u32 %v16741_v28, %v12419_v44  ;;  %v19533_v8 = vadd.f32 %v1069_v2, %v1051_v32  ;;  %v12312_v32 = vor.u32 %v16711_v7, %v12309_v3  ;;  %v16731_v44 = vld [vmem:[%s26463_s23 + $0x884] sm:$0xf]  ;;  %v12475_v7 = vld [vmem:[%s26463_s23 + $0x928] sm:$0xf]  ;;  %v16754_v3 = vld [vmem:[%s26463_s23 + $0x934] sm:$0xf0] }
 0x10e   :  { %2718 = vmatpush.bf16.msra.mxu2 %v12424_v14 }
 0x10f   :  { %2694 = vmatpush.bf16.msra.mxu0 %v12376_v30  ;;  %2680 = vmatpush.bf16.msra.mxu3 %v12420_v47  ;;  %v1053_v30 = vadd.f32 %v1052_v36, %v19115_v52  ;;  %v16709_v52 = vld [vmem:[%s26463_s23 + $0x7cc] sm:$0xf0]  ;;  %v1083_v31 = vpop.f32.mrf.mxu1  ;;  %v1121_v45 = vpop.f32.mrf.mxu0  ;;  %v12389_v47 = vld [vmem:[%s26463_s23 + $0x890] sm:$0xf0]  ;;  %v16730_v36 = vld [vmem:[%s26463_s23 + $0x874] sm:$0xf0] }
 0x110   :  { %2657 = vmatpush.bf16.msra.mxu1 %v12356_v18  ;;  %v12308_v18 = vor.u32 %v16713_v21, %v12307_v1  ;;  %v1084_v34 = vadd.f32 %v1083_v31, %v19144_v4  ;;  %v16705_v4 = vld [vmem:[%s26463_s23 + $0x7ac] sm:$0xf0]  ;;  %12173 = vmatmul.msk.bf16.vlgmr.msrb.gmra.mxu3 %vm515_vm0, %v19326_v57  ;;  %v1122_v50 = vadd.f32 %v1121_v45, %v19167_v15  ;;  %v1102_v1 = vpop.f32.mrf.mxu3  ;;  %v16726_v31 = vld [vmem:[%s26463_s23 + $0x854] sm:$0xf0] }
 0x111   :  { %v12392_v54 = vor.u32 %v16731_v44, %v12389_v47  ;;  %v12276_v59 = vor.u32 %v16705_v4, %v12275_v17  ;;  %v16701_v15 = vld [vmem:[%s26463_s23 + $0x78c] sm:$0xf0]  ;;  %v12380_v14 = vor.u32 %v16730_v36, %v12379_v60  ;;  %v16752_v17 = vld [vmem:[%s26463_s23 + $0x92c] sm:$0xf]  ;;  %v12477_v4 = vld [vmem:[%s26463_s23 + $0x938] sm:$0xf0] }
 0x112   :  { %2220 = vmatmul.bf16.vlgmr.msrb.gmra.mxu0 %v19335_v63  ;;  %v19614_v21 = vadd.f32 %v1102_v1, %v1084_v34  ;;  %v12260_v0 = vor.u32 %v16701_v15, %v12259_v46  ;;  %v12480_v47 = vor.u32 %v16752_v17, %v12477_v4  ;;  %v12349_v46 = vld [vmem:[%s26463_s23 + $0x838] sm:$0xf0]  ;;  %v12245_v4 = vld [vmem:[%s26464_s24 + $0x88] sm:$0xf0] }
 0x113   :  { %2695 = vmatpush.bf16.msra.mxu0 %v12360_v33  ;;  %2681 = vmatpush.bf16.msra.mxu3 %v12404_v49  ;;  %v12408_v33 = vor.u32 %v16735_v26, %v12405_v27  ;;  %v12496_v26 = vor.u32 %v16756_v20, %v12493_v48  ;;  %v12363_v27 = vld [vmem:[%s26463_s23 + $0x848] sm:$0xf] }
 0x114   :  { %2658 = vmatpush.bf16.msra.mxu1 %v12340_v43  ;;  %v12292_v43 = vor.u32 %v16709_v52, %v12291_v19  ;;  %v1071_v13 = vpop.f32.mrf.mxu2  ;;  %12175 = vmatmul.msk.bf16.vlgmr.msrb.gmra.mxu2 %vm515_vm0, %v19326_v57  ;;  %v16699_v57 = vld [vmem:[%s26463_s23 + $0x784] sm:$0xf]  ;;  %v12476_v52 = vor.u32 %v16754_v3, %v12475_v7  ;;  %v12364_v34 = vor.u32 %v16726_v31, %v12363_v27  ;;  %v12445_v3 = vld [vmem:[%s26463_s23 + $0x8f8] sm:$0xf0]  ;;  %v12315_v48 = vld [vmem:[%s26463_s23 + $0x7e8] sm:$0xf] }
 0x115   :  { %2719 = vmatpush.bf16.msra.mxu2 %v12408_v33  ;;  %v19584_v28 = vadd.f32 %v1071_v13, %v1053_v30  ;;  %v16728_v30 = vld [vmem:[%s26463_s23 + $0x86c] sm:$0xf]  ;;  %v12460_v13 = vor.u32 %v16750_v39, %v12459_v40  ;;  %v12317_v31 = vld [vmem:[%s26463_s23 + $0x7f8] sm:$0xf0]  ;;  %v16695_v40 = vld [vmem:[%s26464_s24 + $0x84] sm:$0xf] }
 0x116   :  { %v16724_v33 = vld [vmem:[%s26463_s23 + $0x84c] sm:$0xf] }
 0x117   :  { %2696 = vmatpush.bf16.msra.mxu0 %v12344_v56  ;;  %2682 = vmatpush.bf16.msra.mxu3 %v12388_v23  ;;  %v16703_v56 = vld [vmem:[%s26463_s23 + $0x7a4] sm:$0xf]  ;;  %v1085_v63 = vpop.f32.mrf.mxu1  ;;  %v1123_v19 = vpop.f32.mrf.mxu0  ;;  %v12264_v23 = vor.u32 %v16699_v57, %v12261_v9  ;;  %v16718_v57 = vld [vmem:[%s26463_s23 + $0x814] sm:$0xf0] }
 0x118   :  { %2659 = vmatpush.bf16.msra.mxu1 %v12324_v62  ;;  %v16758_v62 = vld [vmem:[%s26463_s23 + $0x954] sm:$0xf0]  ;;  %v12280_v38 = vor.u32 %v16703_v56, %v12277_v58  ;;  %v1086_v49 = vadd.f32 %v1085_v63, %v19202_v42  ;;  %v12381_v42 = vld [vmem:[%s26463_s23 + $0x878] sm:$0xf0]  ;;  %v1124_v22 = vadd.f32 %v1123_v19, %v19219_v37  ;;  %v16720_v58 = vld [vmem:[%s26463_s23 + $0x82c] sm:$0xf] }
 0x119   :  { %2720 = vmatpush.bf16.msra.mxu2 %v12392_v54  ;;  %v12492_v2 = vor.u32 %v16758_v62, %v12491_v61  ;;  %v12365_v37 = vld [vmem:[%s26463_s23 + $0x858] sm:$0xf0]  ;;  %v12443_v61 = vld [vmem:[%s26463_s23 + $0x8e8] sm:$0xf]  ;;  %v16748_v63 = vld [vmem:[%s26463_s23 + $0x90c] sm:$0xf]  ;;  %v12352_v9 = vor.u32 %v16720_v58, %v12349_v46 }
 0x11a   :  { %v12368_v56 = vor.u32 %v16724_v33, %v12365_v37  ;;  %v12411_v33 = vld [vmem:[%s26463_s23 + $0x8a8] sm:$0xf]  ;;  %v12301_v58 = vld [vmem:[%s26463_s23 + $0x7d8] sm:$0xf0] }
 0x11b   :  { %2697 = vmatpush.bf16.msra.mxu0 %v12328_v12  ;;  %2752 = vmatpush.bf16.msrb.mxu3 %v12492_v2  ;;  %v12395_v46 = vld [vmem:[%s26463_s23 + $0x888] sm:$0xf] }
 0x11c   :  { %2660 = vmatpush.bf16.msra.mxu1 %v12308_v18  ;;  %v1140_v12 = vpop.f32.mrf.mxu2 }
 0x11d   :  { %v19641_v18 = vadd.f32 %v1140_v12, %v1122_v50  ;;  %2790 = vmatpush.bf16.msrb.mxu2 %v12496_v26  ;;  %v12347_v50 = vld [vmem:[%s26463_s23 + $0x828] sm:$0xf]  ;;  %2187 = vmatmul.bf16.gmra.mxu1 %v19453_v16  ;;  %v16712_v26 = vld [vmem:[%s26463_s23 + $0x7ec] sm:$0xf] }
 0x11e   :  { %v12427_v12 = vld [vmem:[%s26463_s23 + $0x8c8] sm:$0xf] }
 0x11f   :  { %2698 = vmatpush.bf16.msra.mxu0 %v12312_v32  ;;  %v12384_v32 = vor.u32 %v16728_v30, %v12381_v42  ;;  %2753 = vmatpush.bf16.msrb.mxu3 %v12476_v52  ;;  %v1088_v45 = vpop.f32.mrf.mxu1  ;;  %v1126_v1 = vpop.f32.mrf.mxu0  ;;  %v16742_v42 = vld [vmem:[%s26463_s23 + $0x8d4] sm:$0xf0] }
 0x120   :  { %2661 = vmatpush.bf16.msra.mxu1 %v12292_v43  ;;  %v1104_v43 = vpop.f32.mrf.mxu3  ;;  %v1089_v54 = vadd.f32 %v1088_v45, %v19260_v10  ;;  %v16746_v10 = vld [vmem:[%s26463_s23 + $0x8f4] sm:$0xf0]  ;;  %12174 = vmatmul.msk.bf16.gmra.mxu3 %vm515_vm0, %v19450_v11  ;;  %v1127_v60 = vadd.f32 %v1126_v1, %v19277_v6  ;;  %v12333_v6 = vld [vmem:[%s26463_s23 + $0x818] sm:$0xf0]  ;;  %v12428_v7 = vor.u32 %v16742_v42, %v12427_v12  ;;  %v16736_v1 = vld [vmem:[%s26463_s23 + $0x8ac] sm:$0xf] }
 0x121   :  { %v19674_v44 = vadd.f32 %v1104_v43, %v1086_v49  ;;  %2791 = vmatpush.bf16.msrb.mxu2 %v12480_v47  ;;  %v12444_v2 = vor.u32 %v16746_v10, %v12443_v61  ;;  %v12331_v49 = vld [vmem:[%s26463_s23 + $0x808] sm:$0xf]  ;;  %v16740_v43 = vld [vmem:[%s26463_s23 + $0x8cc] sm:$0xf]  ;;  %v12285_v12 = vld [vmem:[%s26463_s23 + $0x7b8] sm:$0xf0] }
 0x122   :  { %2225 = vmatmul.bf16.gmra.mxu0 %v19453_v16  ;;  %v12332_v30 = vor.u32 %v16718_v57, %v12331_v49  ;;  %v16744_v16 = vld [vmem:[%s26463_s23 + $0x8ec] sm:$0xf]  ;;  %v12299_v47 = vld [vmem:[%s26463_s23 + $0x7c8] sm:$0xf]  ;;  %v16706_v57 = vld [vmem:[%s26463_s23 + $0x7b4] sm:$0xf0] }
 0x123   :  { %2699 = vmatpush.bf16.msra.mxu0 %v12296_v51  ;;  %v16722_v51 = vld [vmem:[%s26463_s23 + $0x834] sm:$0xf0]  ;;  %2754 = vmatpush.bf16.msrb.mxu3 %v12460_v13  ;;  %v12448_v20 = vor.u32 %v16744_v16, %v12445_v3  ;;  %v12429_v13 = vld [vmem:[%s26463_s23 + $0x8d8] sm:$0xf0]  ;;  %v12283_v49 = vld [vmem:[%s26463_s23 + $0x7a8] sm:$0xf] }
 0x124   :  { %2662 = vmatpush.bf16.msra.mxu1 %v12276_v59  ;;  %v1142_v59 = vpop.f32.mrf.mxu2  ;;  %v12348_v15 = vor.u32 %v16722_v51, %v12347_v50  ;;  %12176 = vmatmul.msk.bf16.gmra.mxu2 %vm515_vm0, %v19450_v11  ;;  %v16714_v11 = vld [vmem:[%s26463_s23 + $0x7f4] sm:$0xf0]  ;;  %v12432_v45 = vor.u32 %v16740_v43, %v12429_v13  ;;  %v12243_v51 = vld [vmem:[%s26464_s24 + $0x80] sm:$0xf]  ;;  %v12284_v42 = vor.u32 %v16706_v57, %v12283_v49  ;;  %v12397_v3 = vld [vmem:[%s26463_s23 + $0x898] sm:$0xf0] }
 0x125   :  { %v19695_v62 = vadd.f32 %v1142_v59, %v1124_v22  ;;  %v16710_v50 = vld [vmem:[%s26463_s23 + $0x7d4] sm:$0xf0]  ;;  %v12699_v43 = vld [vmem:[%s26463_s23 + $0xa40] sm:$0xf]  ;;  %v16793_v13 = vld [vmem:[%s26463_s23 + $0xa4c] sm:$0xf0] }
 0x126   :  { %v12300_v59 = vor.u32 %v16710_v50, %v12299_v47  ;;  %v12251_v49 = vld [vmem:[%s26464_s24 + $0x90] sm:$0xf] }
 0x127   :  { %2700 = vmatpush.bf16.msra.mxu0 %v12280_v38  ;;  %v12461_v38 = vld [vmem:[%s26463_s23 + $0x918] sm:$0xf0]  ;;  %2755 = vmatpush.bf16.msrb.mxu3 %v12444_v2  ;;  %v1090_v52 = vpop.f32.mrf.mxu1 }
 0x128   :  { %2663 = vmatpush.bf16.msra.mxu1 %v12260_v0  ;;  %v12464_v36 = vor.u32 %v16748_v63, %v12461_v38  ;;  %v16716_v0 = vld [vmem:[%s26463_s23 + $0x80c] sm:$0xf]  ;;  %v1091_v22 = vadd.f32 %v1090_v52, %v19324_v55  ;;  %v16738_v55 = vld [vmem:[%s26463_s23 + $0x8b4] sm:$0xf0]  ;;  %v12413_v2 = vld [vmem:[%s26463_s23 + $0x8b8] sm:$0xf0]  ;;  %v19802_v38 = vor.u32 %v16695_v40, %v12245_v4  ;;  %v12700_v4 = vor.u32 %v16793_v13, %v12699_v43 }
 0x129   :  { %v12412_v39 = vor.u32 %v16738_v55, %v12411_v33  ;;  %v16791_v55 = vld [vmem:[%s26463_s23 + $0xa44] sm:$0xf] }
 0x12a   :  { %2792 = vmatpush.bf16.msrb.mxu2 %v12464_v36  ;;  %v12416_v36 = vor.u32 %v16736_v1, %v12413_v2  ;;  %v16789_v1 = vld [vmem:[%s26463_s23 + $0xa2c] sm:$0xf0] }
 0x12b   :  { %2701 = vmatpush.bf16.msra.mxu0 %v12264_v23  ;;  %v12336_v23 = vor.u32 %v16716_v0, %v12333_v6  ;;  %2756 = vmatpush.bf16.msrb.mxu3 %v12428_v7 }
 0x12c   :  { %2732 = vmatpush.bf16.msrb.mxu1 %v12380_v14  ;;  %v1107_v14 = vpop.f32.mrf.mxu3  ;;  %v1145_v27 = vpop.f32.mrf.mxu2 }
 0x12d   :  { %v19734_v19 = vadd.f32 %v1107_v14, %v1089_v54  ;;  %v19755_v37 = vadd.f32 %v1145_v27, %v1127_v60  ;;  %v12320_v54 = vor.u32 %v16712_v26, %v12317_v31  ;;  %v16732_v14 = vld [vmem:[%s26463_s23 + $0x88c] sm:$0xf]  ;;  %v12811_v27 = vld [vmem:[%s26463_s23 + $0xb20] sm:$0xf]  ;;  %v16821_v31 = vld [vmem:[%s26463_s23 + $0xb2c] sm:$0xf0] }
 0x12e   :  { %2793 = vmatpush.bf16.msrb.mxu2 %v12448_v20  ;;  %v12400_v52 = vor.u32 %v16732_v14, %v12397_v3  ;;  %v12267_v20 = vld [vmem:[%s26463_s23 + $0x788] sm:$0xf]  ;;  %v12812_v33 = vor.u32 %v16821_v31, %v12811_v27  ;;  %v16783_v14 = vld [vmem:[%s26463_s23 + $0xa04] sm:$0xf]  ;;  %v12797_v3 = vld [vmem:[%s26463_s23 + $0xb10] sm:$0xf0] }
 0x12f   :  { %2770 = vmatpush.bf16.msrb.mxu0 %v12384_v32  ;;  %v12316_v32 = vor.u32 %v16714_v11, %v12315_v48  ;;  %2757 = vmatpush.bf16.msrb.mxu3 %v12412_v39  ;;  %v1549_v60 = vpop.f32.mrf.mxu1  ;;  %v16702_v48 = vld [vmem:[%s26463_s23 + $0x794] sm:$0xf0] }
 0x130   :  { %2733 = vmatpush.bf16.msrb.mxu1 %v12364_v34  ;;  %v1128_v34 = vpop.f32.mrf.mxu0  ;;  %12497 = vmatmul.msk.bf16.vlgmr.msra.gmra.mxu3 %vm515_vm0, %v19802_v38  ;;  %v12268_v26 = vor.u32 %v16702_v48, %v12267_v20 }
 0x131   :  { %v1129_v17 = vadd.f32 %v1128_v34, %v19340_v5  ;;  %v16696_v5 = vld [vmem:[%s26464_s24 + $0x84] sm:$0xf0]  ;;  %v12701_v34 = vld [vmem:[%s26463_s23 + $0xa50] sm:$0xf0] }
 0x132   :  { %2794 = vmatpush.bf16.msrb.mxu2 %v12432_v45  ;;  %v12704_v50 = vor.u32 %v16791_v55, %v12701_v34  ;;  %v12763_v55 = vld [vmem:[%s26463_s23 + $0xac0] sm:$0xf]  ;;  %v16809_v34 = vld [vmem:[%s26463_s23 + $0xacc] sm:$0xf0] }
 0x133   :  { %2771 = vmatpush.bf16.msrb.mxu0 %v12368_v56  ;;  %v16708_v56 = vld [vmem:[%s26463_s23 + $0x7cc] sm:$0xf]  ;;  %v12764_v13 = vor.u32 %v16809_v34, %v12763_v55  ;;  %v12715_v34 = vld [vmem:[%s26463_s23 + $0xa60] sm:$0xf] }
 0x134   :  { %2734 = vmatpush.bf16.msrb.mxu1 %v12348_v15  ;;  %v16734_v15 = vld [vmem:[%s26463_s23 + $0x894] sm:$0xf0]  ;;  %v1109_v61 = vpop.f32.mrf.mxu3  ;;  %v12304_v0 = vor.u32 %v16708_v56, %v12301_v58  ;;  %v1147_v6 = vpop.f32.mrf.mxu2  ;;  %12499 = vmatmul.msk.bf16.vlgmr.msra.gmra.mxu2 %vm515_vm0, %v19802_v38 }
 0x135   :  { %v12396_v10 = vor.u32 %v16734_v15, %v12395_v46  ;;  %v19800_v63 = vadd.f32 %v1109_v61, %v1091_v22  ;;  %v19821_v7 = vadd.f32 %v1147_v6, %v1129_v17  ;;  %v16700_v22 = vld [vmem:[%s26463_s23 + $0x78c] sm:$0xf]  ;;  %v16819_v46 = vld [vmem:[%s26463_s23 + $0xb24] sm:$0xf]  ;;  %v12813_v15 = vld [vmem:[%s26463_s23 + $0xb30] sm:$0xf0] }
 0x136   :  { %2795 = vmatpush.bf16.msrb.mxu2 %v12416_v36  ;;  %v12816_v61 = vor.u32 %v16819_v46, %v12813_v15  ;;  %v12253_v36 = vld [vmem:[%s26464_s24 + $0x98] sm:$0x30]  ;;  %v12779_v6 = vld [vmem:[%s26463_s23 + $0xae0] sm:$0xf]  ;;  %v16775_v15 = vld [vmem:[%s26463_s23 + $0x9c4] sm:$0xf] }
 0x137   :  { %2772 = vmatpush.bf16.msrb.mxu0 %v12352_v9  ;;  %v19810_v9 = vor.u32 %v16696_v5, %v12243_v51  ;;  %2758 = vmatpush.bf16.msrb.mxu3 %v12396_v10  ;;  %v1551_v39 = vpop.f32.mrf.mxu1  ;;  %v12795_v51 = vld [vmem:[%s26463_s23 + $0xb00] sm:$0xf]  ;;  %v16817_v5 = vld [vmem:[%s26463_s23 + $0xb0c] sm:$0xf0] }
 0x138   :  { %2735 = vmatpush.bf16.msrb.mxu1 %v12332_v30  ;;  %v16704_v30 = vld [vmem:[%s26463_s23 + $0x7ac] sm:$0xf]  ;;  %v1587_v16 = vpop.f32.mrf.mxu0  ;;  %v12683_v10 = vld [vmem:[%s26463_s23 + $0xa20] sm:$0xf] }
 0x139   :  { %2664 = vmatmul.bf16.vlgmr.msra.gmra.mxu1 %v19810_v9  ;;  %v12288_v11 = vor.u32 %v16704_v30, %v12285_v12  ;;  %2702 = vmatmul.bf16.vlgmr.msra.gmra.mxu0 %v19810_v9  ;;  %v12684_v57 = vor.u32 %v16789_v1, %v12683_v10  ;;  %v16813_v30 = vld [vmem:[%s26463_s23 + $0xaec] sm:$0xf0]  ;;  %v12765_v10 = vld [vmem:[%s26463_s23 + $0xad0] sm:$0xf0] }
 0x13a   :  { %2796 = vmatpush.bf16.msrb.mxu2 %v12400_v52 }
 0x13b   :  { %2773 = vmatpush.bf16.msrb.mxu0 %v12336_v23  ;;  %v12269_v23 = vld [vmem:[%s26463_s23 + $0x798] sm:$0xf0]  ;;  %3234 = vmatpush.bf16.msra.mxu3 %v12812_v33 }
 0x13c   :  { %2736 = vmatpush.bf16.msrb.mxu1 %v12316_v32  ;;  %v1568_v32 = vpop.f32.mrf.mxu3  ;;  %v12272_v17 = vor.u32 %v16700_v22, %v12269_v23  ;;  %v1606_v47 = vpop.f32.mrf.mxu2  ;;  %v12667_v23 = vld [vmem:[%s26463_s23 + $0xa00] sm:$0xf] }
 0x13d   :  { %v1569_v40 = vadd.f32 %v1568_v32, %v1549_v60  ;;  %v1607_v56 = vadd.f32 %v1606_v47, %v1587_v16  ;;  %v16697_v60 = vld [vmem:[%s26464_s24 + $0x94] sm:$0xf]  ;;  %v16815_v16 = vld [vmem:[%s26463_s23 + $0xb04] sm:$0xf] }
 0x13e   :  { %3272 = vmatpush.bf16.msra.mxu2 %v12816_v61  ;;  %v19919_v20 = vor.u32 %v16697_v60, %v12253_v36  ;;  %v12800_v22 = vor.u32 %v16815_v16, %v12797_v3  ;;  %v12653_v47 = vld [vmem:[%s26463_s23 + $0x9f0] sm:$0xf0]  ;;  %v16807_v61 = vld [vmem:[%s26463_s23 + $0xac4] sm:$0xf] }
 0x13f   :  { %2774 = vmatpush.bf16.msrb.mxu0 %v12320_v54  ;;  %v19863_v45 = vadd.f32 %v1569_v40, %v19379_v24  ;;  %v16787_v54 = vld [vmem:[%s26463_s23 + $0xa24] sm:$0xf]  ;;  %v12796_v24 = vor.u32 %v16817_v5, %v12795_v51  ;;  %v19890_v2 = vadd.f32 %v1607_v56, %v19397_v41  ;;  %v16698_v41 = vld [vmem:[%s26464_s24 + $0x94] sm:$0x30]  ;;  %v1554_v48 = vpop.f32.mrf.mxu1  ;;  %v12651_v51 = vld [vmem:[%s26463_s23 + $0x9e0] sm:$0xf] }
 0x140   :  { %2737 = vmatpush.bf16.msrb.mxu1 %v12300_v59  ;;  %v1589_v58 = vpop.f32.mrf.mxu0  ;;  %v12685_v59 = vld [vmem:[%s26463_s23 + $0xa30] sm:$0xf0]  ;;  %v19930_v27 = vor.u32 %v16698_v41, %v12251_v49  ;;  %12498 = vmatmul.msk.bf16.gmra.mxu3 %vm515_vm0, %v19919_v20  ;;  %v16781_v5 = vld [vmem:[%s26463_s23 + $0x9ec] sm:$0xf0]  ;;  %v12768_v49 = vor.u32 %v16807_v61, %v12765_v10  ;;  %v16763_v10 = vld [vmem:[%s26463_s23 + $0x964] sm:$0xf] }
 0x141   :  { %3235 = vmatpush.bf16.msra.mxu3 %v12796_v24  ;;  %v12652_v56 = vor.u32 %v16781_v5, %v12651_v51  ;;  %v16805_v24 = vld [vmem:[%s26463_s23 + $0xaac] sm:$0xf0]  ;;  %v12637_v36 = vld [vmem:[%s26463_s23 + $0x9d0] sm:$0xf0]  ;;  %v12603_v5 = vld [vmem:[%s26463_s23 + $0x980] sm:$0xf] }
 0x142   :  { %3273 = vmatpush.bf16.msra.mxu2 %v12800_v22  ;;  %v16777_v41 = vld [vmem:[%s26463_s23 + $0x9cc] sm:$0xf0]  ;;  %v12640_v3 = vor.u32 %v16775_v15, %v12637_v36  ;;  %v12621_v22 = vld [vmem:[%s26463_s23 + $0x9b0] sm:$0xf0]  ;;  %v12587_v36 = vld [vmem:[%s26463_s23 + $0x960] sm:$0xf] }
 0x143   :  { %2775 = vmatpush.bf16.msrb.mxu0 %v12304_v0  ;;  %v12688_v0 = vor.u32 %v16787_v54, %v12685_v59 }
 0x144   :  { %2738 = vmatpush.bf16.msrb.mxu1 %v12284_v42  ;;  %v1570_v12 = vpop.f32.mrf.mxu3  ;;  %v12780_v42 = vor.u32 %v16813_v30, %v12779_v6  ;;  %v1608_v33 = vpop.f32.mrf.mxu2  ;;  %12500 = vmatmul.msk.bf16.gmra.mxu2 %vm515_vm0, %v19919_v20 }
 0x145   :  { %v1571_v52 = vadd.f32 %v1570_v12, %v1551_v39  ;;  %v1609_v40 = vadd.f32 %v1608_v33, %v1589_v58  ;;  %v12747_v58 = vld [vmem:[%s26463_s23 + $0xaa0] sm:$0xf] }
 0x146   :  { %3236 = vmatpush.bf16.msra.mxu3 %v12780_v42  ;;  %v12748_v46 = vor.u32 %v16805_v24, %v12747_v58  ;;  %v12731_v12 = vld [vmem:[%s26463_s23 + $0xa80] sm:$0xf]  ;;  %v16801_v42 = vld [vmem:[%s26463_s23 + $0xa8c] sm:$0xf0] }
 0x147   :  { %2776 = vmatpush.bf16.msrb.mxu0 %v12288_v11  ;;  %v12669_v11 = vld [vmem:[%s26463_s23 + $0xa10] sm:$0xf0]  ;;  %v19933_v32 = vadd.f32 %v1571_v52, %v19448_v35  ;;  %v16779_v35 = vld [vmem:[%s26463_s23 + $0x9e4] sm:$0xf]  ;;  %v19963_v54 = vadd.f32 %v1609_v40, %v19473_v25  ;;  %v1556_v60 = vpop.f32.mrf.mxu1  ;;  %v12732_v52 = vor.u32 %v16801_v42, %v12731_v12  ;;  %v16797_v40 = vld [vmem:[%s26463_s23 + $0xa6c] sm:$0xf0] }
 0x148   :  { %2739 = vmatpush.bf16.msrb.mxu1 %v12268_v26  ;;  %v16785_v26 = vld [vmem:[%s26463_s23 + $0xa0c] sm:$0xf0]  ;;  %v1592_v39 = vpop.f32.mrf.mxu0  ;;  %v12672_v43 = vor.u32 %v16783_v14, %v12669_v11  ;;  %v12656_v25 = vor.u32 %v16779_v35, %v12653_v47  ;;  %v12749_v11 = vld [vmem:[%s26463_s23 + $0xab0] sm:$0xf0]  ;;  %v16799_v35 = vld [vmem:[%s26463_s23 + $0xa84] sm:$0xf] }
 0x149   :  { %v12668_v31 = vor.u32 %v16785_v26, %v12667_v23  ;;  %2669 = vmatmul.bf16.gmra.mxu1 %v19930_v27  ;;  %2707 = vmatmul.bf16.gmra.mxu0 %v19930_v27  ;;  %v12619_v26 = vld [vmem:[%s26463_s23 + $0x9a0] sm:$0xf]  ;;  %v16792_v12 = vld [vmem:[%s26463_s23 + $0xa4c] sm:$0xf] }
 0x14a   :  { %3237 = vmatpush.bf16.msra.mxu3 %v12764_v13  ;;  %v12716_v13 = vor.u32 %v16797_v40, %v12715_v34 }
 0x14b   :  { %2777 = vmatpush.bf16.msrb.mxu0 %v12272_v17  ;;  %v16811_v17 = vld [vmem:[%s26463_s23 + $0xae4] sm:$0xf] }
 0x14c   :  { %3214 = vmatpush.bf16.msra.mxu1 %v12700_v4  ;;  %v12781_v4 = vld [vmem:[%s26463_s23 + $0xaf0] sm:$0xf0]  ;;  %v1573_v59 = vpop.f32.mrf.mxu3  ;;  %v1611_v30 = vpop.f32.mrf.mxu2 }
 0x14d   :  { %v1574_v1 = vadd.f32 %v1573_v59, %v1554_v48  ;;  %v1612_v14 = vadd.f32 %v1611_v30, %v1592_v39  ;;  %v16803_v48 = vld [vmem:[%s26463_s23 + $0xaa4] sm:$0xf]  ;;  %v16822_v30 = vld [vmem:[%s26463_s23 + $0xb34] sm:$0xf0] }
 0x14e   :  { %3238 = vmatpush.bf16.msra.mxu3 %v12748_v46  ;;  %v12752_v23 = vor.u32 %v16803_v48, %v12749_v11  ;;  %v16794_v48 = vld [vmem:[%s26463_s23 + $0xa54] sm:$0xf0] }
 0x14f   :  { %3252 = vmatpush.bf16.msra.mxu0 %v12704_v50  ;;  %v12784_v50 = vor.u32 %v16811_v17, %v12781_v4  ;;  %v19993_v6 = vadd.f32 %v1574_v1, %v19512_v53  ;;  %v16771_v53 = vld [vmem:[%s26463_s23 + $0x9a4] sm:$0xf]  ;;  %v20020_v33 = vadd.f32 %v1612_v14, %v19533_v8  ;;  %v12733_v17 = vld [vmem:[%s26463_s23 + $0xa90] sm:$0xf0]  ;;  %v1625_v47 = vpop.f32.mrf.mxu1  ;;  %v12709_v14 = vld [vmem:[%s26463_s23 + $0xa58] sm:$0xf0] }
 0x150   :  { %3215 = vmatpush.bf16.msra.mxu1 %v12684_v57  ;;  %v12635_v57 = vld [vmem:[%s26463_s23 + $0x9c0] sm:$0xf]  ;;  %v1594_v16 = vpop.f32.mrf.mxu0  ;;  %v16767_v8 = vld [vmem:[%s26463_s23 + $0x984] sm:$0xf]  ;;  %v12736_v51 = vor.u32 %v16799_v35, %v12733_v17  ;;  %12501 = vmatmul.msk.bf16.vlgmr.msrb.gmra.mxu3 %vm515_vm0, %v19802_v38  ;;  %v12589_v1 = vld [vmem:[%s26463_s23 + $0x970] sm:$0xf0] }
 0x151   :  { %3274 = vmatpush.bf16.msra.mxu2 %v12784_v50  ;;  %v12605_v50 = vld [vmem:[%s26463_s23 + $0x990] sm:$0xf0]  ;;  %v12691_v35 = vld [vmem:[%s26463_s23 + $0xa28] sm:$0xf]  ;;  %v16790_v17 = vld [vmem:[%s26463_s23 + $0xa34] sm:$0xf0] }
 0x152   :  { %3239 = vmatpush.bf16.msra.mxu3 %v12732_v52  ;;  %v12608_v61 = vor.u32 %v16767_v8, %v12605_v50  ;;  %v12712_v52 = vor.u32 %v16792_v12, %v12709_v14  ;;  %v12787_v50 = vld [vmem:[%s26463_s23 + $0xae8] sm:$0xf]  ;;  %v12789_v14 = vld [vmem:[%s26463_s23 + $0xaf8] sm:$0xf0] }
 0x153   :  { %3253 = vmatpush.bf16.msra.mxu0 %v12688_v0  ;;  %v12636_v0 = vor.u32 %v16777_v41, %v12635_v57 }
 0x154   :  { %3216 = vmatpush.bf16.msra.mxu1 %v12668_v31  ;;  %v16773_v31 = vld [vmem:[%s26463_s23 + $0x9ac] sm:$0xf0]  ;;  %v1575_v39 = vpop.f32.mrf.mxu3  ;;  %v1613_v59 = vpop.f32.mrf.mxu2  ;;  %12503 = vmatmul.msk.bf16.vlgmr.msrb.gmra.mxu2 %vm515_vm0, %v19802_v38 }
 0x155   :  { %3275 = vmatpush.bf16.msra.mxu2 %v12768_v49  ;;  %v12620_v55 = vor.u32 %v16773_v31, %v12619_v26  ;;  %v1576_v4 = vadd.f32 %v1575_v39, %v1556_v60  ;;  %v1614_v46 = vadd.f32 %v1613_v59, %v1594_v16  ;;  %v16765_v49 = vld [vmem:[%s26463_s23 + $0x96c] sm:$0xf0]  ;;  %v16818_v26 = vld [vmem:[%s26463_s23 + $0xb14] sm:$0xf0]  ;;  %v16788_v31 = vld [vmem:[%s26463_s23 + $0xa2c] sm:$0xf] }
 0x156   :  { %3240 = vmatpush.bf16.msra.mxu3 %v12716_v13  ;;  %v12588_v41 = vor.u32 %v16765_v49, %v12587_v36  ;;  %v16820_v39 = vld [vmem:[%s26463_s23 + $0xb2c] sm:$0xf] }
 0x157   :  { %3254 = vmatpush.bf16.msra.mxu0 %v12672_v43  ;;  %v12624_v43 = vor.u32 %v16771_v53, %v12621_v22  ;;  %v20047_v24 = vadd.f32 %v1576_v4, %v19566_v29  ;;  %v12717_v29 = vld [vmem:[%s26463_s23 + $0xa70] sm:$0xf0]  ;;  %v20071_v57 = vadd.f32 %v1614_v46, %v19584_v28  ;;  %v12592_v28 = vor.u32 %v16763_v10, %v12589_v1  ;;  %v12707_v53 = vld [vmem:[%s26463_s23 + $0xa48] sm:$0xf]  ;;  %v16816_v59 = vld [vmem:[%s26463_s23 + $0xb0c] sm:$0xf] }
 0x158   :  { %3217 = vmatpush.bf16.msra.mxu1 %v12652_v56  ;;  %v16769_v56 = vld [vmem:[%s26463_s23 + $0x98c] sm:$0xf0]  ;;  %v1663_v15 = vpop.f32.mrf.mxu0  ;;  %v12708_v38 = vor.u32 %v16794_v48, %v12707_v53  ;;  %v16786_v1 = vld [vmem:[%s26463_s23 + $0xa14] sm:$0xf0] }
 0x159   :  { %3276 = vmatpush.bf16.msra.mxu2 %v12752_v23  ;;  %v12604_v58 = vor.u32 %v16769_v56, %v12603_v5  ;;  %2740 = vmatmul.bf16.vlgmr.msrb.gmra.mxu1 %v19810_v9  ;;  %v12803_v23 = vld [vmem:[%s26463_s23 + $0xb08] sm:$0xf]  ;;  %v16784_v5 = vld [vmem:[%s26463_s23 + $0xa0c] sm:$0xf]  ;;  %v16782_v53 = vld [vmem:[%s26463_s23 + $0x9f4] sm:$0xf0] }
 0x15a   :  { %2778 = vmatmul.bf16.vlgmr.msrb.gmra.mxu0 %v19810_v9  ;;  %v12804_v40 = vor.u32 %v16818_v26, %v12803_v23  ;;  %v16806_v23 = vld [vmem:[%s26463_s23 + $0xab4] sm:$0xf0]  ;;  %v16776_v26 = vld [vmem:[%s26463_s23 + $0x9cc] sm:$0xf] }
 0x15b   :  { %3255 = vmatpush.bf16.msra.mxu0 %v12656_v25  ;;  %v16795_v25 = vld [vmem:[%s26463_s23 + $0xa64] sm:$0xf] }
 0x15c   :  { %3218 = vmatpush.bf16.msra.mxu1 %v12636_v0  ;;  %v12720_v60 = vor.u32 %v16795_v25, %v12717_v29  ;;  %v12819_v0 = vld [vmem:[%s26463_s23 + $0xb28] sm:$0xf]  ;;  %v1644_v42 = vpop.f32.mrf.mxu3  ;;  %v1682_v22 = vpop.f32.mrf.mxu2  ;;  %v12805_v25 = vld [vmem:[%s26463_s23 + $0xb18] sm:$0xf0] }
 0x15d   :  { %3277 = vmatpush.bf16.msra.mxu2 %v12736_v51  ;;  %v12820_v9 = vor.u32 %v16822_v30, %v12819_v0  ;;  %v1645_v16 = vadd.f32 %v1644_v42, %v1625_v47  ;;  %v12692_v47 = vor.u32 %v16790_v17, %v12691_v35  ;;  %v16814_v51 = vld [vmem:[%s26463_s23 + $0xaf4] sm:$0xf0]  ;;  %v12808_v10 = vor.u32 %v16816_v59, %v12805_v25  ;;  %v12675_v29 = vld [vmem:[%s26463_s23 + $0xa08] sm:$0xf]  ;;  %v16780_v30 = vld [vmem:[%s26463_s23 + $0x9ec] sm:$0xf] }
 0x15e   :  { %v16810_v0 = vld [vmem:[%s26463_s23 + $0xad4] sm:$0xf0]  ;;  %v12757_v59 = vld [vmem:[%s26463_s23 + $0xab8] sm:$0xf0]  ;;  %v16759_v25 = vld [vmem:[%s26464_s24 + $0xa4] sm:$0xf] }
 0x15f   :  { %3256 = vmatpush.bf16.msra.mxu0 %v12640_v3  ;;  %v1627_v3 = vpop.f32.mrf.mxu1  ;;  %3310 = vmatpush.bf16.msrb.mxu3 %v12820_v9  ;;  %v20095_v11 = vadd.f32 %v1645_v16, %v19614_v21  ;;  %v12693_v21 = vld [vmem:[%s26463_s23 + $0xa38] sm:$0xf0]  ;;  %v16812_v9 = vld [vmem:[%s26463_s23 + $0xaec] sm:$0xf] }
 0x160   :  { %3219 = vmatpush.bf16.msra.mxu1 %v12620_v55  ;;  %v1683_v55 = vadd.f32 %v1682_v22, %v1663_v15  ;;  %v1665_v34 = vpop.f32.mrf.mxu0  ;;  %v12696_v13 = vor.u32 %v16788_v31, %v12693_v21  ;;  %12502 = vmatmul.msk.bf16.gmra.mxu3 %vm515_vm0, %v19919_v20  ;;  %v12755_v22 = vld [vmem:[%s26463_s23 + $0xaa8] sm:$0xf] }
 0x161   :  { %3278 = vmatpush.bf16.msra.mxu2 %v12720_v60  ;;  %v12676_v60 = vor.u32 %v16786_v1, %v12675_v29  ;;  %v12756_v31 = vor.u32 %v16806_v23, %v12755_v22  ;;  %v12573_v1 = vld [vmem:[%s26464_s24 + $0xa8] sm:$0xf0]  ;;  %v16770_v22 = vld [vmem:[%s26463_s23 + $0x994] sm:$0xf0] }
 0x162   :  { %v20122_v4 = vadd.f32 %v1683_v55, %v19641_v18  ;;  %v12677_v18 = vld [vmem:[%s26463_s23 + $0xa18] sm:$0xf0]  ;;  %v16808_v55 = vld [vmem:[%s26463_s23 + $0xacc] sm:$0xf] }
 0x163   :  { %3257 = vmatpush.bf16.msra.mxu0 %v12624_v43  ;;  %v12821_v43 = vld [vmem:[%s26463_s23 + $0xb38] sm:$0xf0]  ;;  %3311 = vmatpush.bf16.msrb.mxu3 %v12804_v40 }
 0x164   :  { %3220 = vmatpush.bf16.msra.mxu1 %v12604_v58  ;;  %v12824_v8 = vor.u32 %v16820_v39, %v12821_v43  ;;  %v1646_v56 = vpop.f32.mrf.mxu3  ;;  %v12788_v58 = vor.u32 %v16814_v51, %v12787_v50  ;;  %v1684_v49 = vpop.f32.mrf.mxu2  ;;  %12504 = vmatmul.msk.bf16.gmra.mxu2 %vm515_vm0, %v19919_v20  ;;  %v12643_v20 = vld [vmem:[%s26463_s23 + $0x9c8] sm:$0xf]  ;;  %v16802_v50 = vld [vmem:[%s26463_s23 + $0xa94] sm:$0xf0]  ;;  %v16772_v51 = vld [vmem:[%s26463_s23 + $0x9ac] sm:$0xf] }
 0x165   :  { %v1647_v46 = vadd.f32 %v1646_v56, %v1627_v3  ;;  %v1685_v12 = vadd.f32 %v1684_v49, %v1665_v34  ;;  %v12792_v3 = vor.u32 %v16812_v9, %v12789_v14  ;;  %v12773_v34 = vld [vmem:[%s26463_s23 + $0xad8] sm:$0xf0]  ;;  %v16760_v49 = vld [vmem:[%s26464_s24 + $0xa4] sm:$0xf0] }
 0x166   :  { %3348 = vmatpush.bf16.msrb.mxu2 %v12824_v8  ;;  %v12776_v43 = vor.u32 %v16808_v55, %v12773_v34  ;;  %v12741_v9 = vld [vmem:[%s26463_s23 + $0xa98] sm:$0xf0]  ;;  %v16796_v34 = vld [vmem:[%s26463_s23 + $0xa6c] sm:$0xf] }
 0x167   :  { %3258 = vmatpush.bf16.msra.mxu0 %v12608_v61  ;;  %v1630_v15 = vpop.f32.mrf.mxu1  ;;  %v12680_v61 = vor.u32 %v16784_v5, %v12677_v18  ;;  %3312 = vmatpush.bf16.msrb.mxu3 %v12788_v58  ;;  %v20149_v36 = vadd.f32 %v1647_v46, %v19674_v44  ;;  %v20179_v48 = vadd.f32 %v1685_v12, %v19695_v62  ;;  %v16804_v18 = vld [vmem:[%s26463_s23 + $0xaac] sm:$0xf]  ;;  %v12597_v55 = vld [vmem:[%s26463_s23 + $0x978] sm:$0xf0] }
 0x168   :  { %3221 = vmatpush.bf16.msra.mxu1 %v12588_v41  ;;  %v12771_v41 = vld [vmem:[%s26463_s23 + $0xac8] sm:$0xf]  ;;  %v1668_v42 = vpop.f32.mrf.mxu0 }
 0x169   :  { %2745 = vmatmul.bf16.gmra.mxu1 %v19930_v27  ;;  %v12772_v44 = vor.u32 %v16810_v0, %v12771_v41  ;;  %v16798_v0 = vld [vmem:[%s26463_s23 + $0xa74] sm:$0xf0] }
 0x16a   :  { %3349 = vmatpush.bf16.msrb.mxu2 %v12808_v10  ;;  %2783 = vmatmul.bf16.gmra.mxu0 %v19930_v27  ;;  %v12645_v27 = vld [vmem:[%s26463_s23 + $0x9d8] sm:$0xf0]  ;;  %v16774_v10 = vld [vmem:[%s26463_s23 + $0x9b4] sm:$0xf0] }
 0x16b   :  { %3259 = vmatpush.bf16.msra.mxu0 %v12592_v28  ;;  %v12661_v28 = vld [vmem:[%s26463_s23 + $0x9f8] sm:$0xf0]  ;;  %3313 = vmatpush.bf16.msrb.mxu3 %v12772_v44  ;;  %v12648_v39 = vor.u32 %v16776_v26, %v12645_v27  ;;  %v16764_v27 = vld [vmem:[%s26463_s23 + $0x96c] sm:$0xf] }
 0x16c   :  { %3290 = vmatpush.bf16.msrb.mxu1 %v12708_v38  ;;  %v12664_v16 = vor.u32 %v16780_v30, %v12661_v28  ;;  %v1649_v62 = vpop.f32.mrf.mxu3  ;;  %v1687_v17 = vpop.f32.mrf.mxu2  ;;  %v16768_v30 = vld [vmem:[%s26463_s23 + $0x98c] sm:$0xf]  ;;  %v12613_v44 = vld [vmem:[%s26463_s23 + $0x998] sm:$0xf0] }
 0x16d   :  { %v1650_v40 = vadd.f32 %v1649_v62, %v1630_v15  ;;  %v1688_v5 = vadd.f32 %v1687_v17, %v1668_v42  ;;  %v12760_v15 = vor.u32 %v16804_v18, %v12757_v59  ;;  %v16800_v28 = vld [vmem:[%s26463_s23 + $0xa8c] sm:$0xf]  ;;  %v13027_v59 = vld [vmem:[%s26463_s23 + $0xc20] sm:$0xf] }
 0x16e   :  { %3350 = vmatpush.bf16.msrb.mxu2 %v12792_v3 }
 0x16f   :  { %3328 = vmatpush.bf16.msrb.mxu0 %v12712_v52  ;;  %v12659_v52 = vld [vmem:[%s26463_s23 + $0x9e8] sm:$0xf]  ;;  %v1632_v21 = vpop.f32.mrf.mxu1  ;;  %3314 = vmatpush.bf16.msrb.mxu3 %v12756_v31  ;;  %v20209_v35 = vadd.f32 %v1650_v40, %v19734_v19  ;;  %v12629_v19 = vld [vmem:[%s26463_s23 + $0x9b8] sm:$0xf0]  ;;  %v20239_v29 = vadd.f32 %v1688_v5, %v19755_v37 }
 0x170   :  { %3291 = vmatpush.bf16.msrb.mxu1 %v12692_v47  ;;  %v12660_v38 = vor.u32 %v16782_v53, %v12659_v52  ;;  %v12739_v47 = vld [vmem:[%s26463_s23 + $0xa88] sm:$0xf]  ;;  %v1670_v56 = vpop.f32.mrf.mxu0  ;;  %v12632_v46 = vor.u32 %v16772_v51, %v12629_v19  ;;  %v12616_v52 = vor.u32 %v16768_v30, %v12613_v44  ;;  %v12744_v53 = vor.u32 %v16800_v28, %v12741_v9  ;;  %v16855_v51 = vld [vmem:[%s26463_s23 + $0xc24] sm:$0xf]  ;;  %v13141_v30 = vld [vmem:[%s26463_s23 + $0xd10] sm:$0xf0] }
 0x171   :  { %v12740_v58 = vor.u32 %v16802_v50, %v12739_v47  ;;  %v12723_v37 = vld [vmem:[%s26463_s23 + $0xa68] sm:$0xf]  ;;  %v13139_v47 = vld [vmem:[%s26463_s23 + $0xd00] sm:$0xf]  ;;  %v16885_v50 = vld [vmem:[%s26463_s23 + $0xd0c] sm:$0xf0] }
 0x172   :  { %3351 = vmatpush.bf16.msrb.mxu2 %v12776_v43  ;;  %v12724_v42 = vor.u32 %v16798_v0, %v12723_v37  ;;  %v16883_v0 = vld [vmem:[%s26463_s23 + $0xd04] sm:$0xf]  ;;  %v13011_v28 = vld [vmem:[%s26463_s23 + $0xc00] sm:$0xf]  ;;  %v16853_v9 = vld [vmem:[%s26463_s23 + $0xc0c] sm:$0xf0] }
 0x173   :  { %3329 = vmatpush.bf16.msrb.mxu0 %v12696_v13  ;;  %v16778_v13 = vld [vmem:[%s26463_s23 + $0x9d4] sm:$0xf0]  ;;  %3315 = vmatpush.bf16.msrb.mxu3 %v12740_v58  ;;  %v13144_v44 = vor.u32 %v16883_v0, %v13141_v30  ;;  %v16839_v0 = vld [vmem:[%s26463_s23 + $0xba4] sm:$0xf] }
 0x174   :  { %3292 = vmatpush.bf16.msrb.mxu1 %v12676_v60  ;;  %v12644_v8 = vor.u32 %v16778_v13, %v12643_v20  ;;  %v12571_v60 = vld [vmem:[%s26464_s24 + $0xa0] sm:$0xf]  ;;  %v1651_v12 = vpop.f32.mrf.mxu3  ;;  %v1689_v31 = vpop.f32.mrf.mxu2  ;;  %v12595_v20 = vld [vmem:[%s26463_s23 + $0x968] sm:$0xf]  ;;  %v16766_v13 = vld [vmem:[%s26463_s23 + $0x974] sm:$0xf0] }
 0x175   :  { %v1652_v14 = vadd.f32 %v1651_v12, %v1632_v21  ;;  %v20276_v23 = vor.u32 %v16760_v49, %v12571_v60  ;;  %v1690_v40 = vadd.f32 %v1689_v31, %v1670_v56  ;;  %v12596_v17 = vor.u32 %v16766_v13, %v12595_v20  ;;  %v13029_v56 = vld [vmem:[%s26463_s23 + $0xc30] sm:$0xf0]  ;;  %v16851_v60 = vld [vmem:[%s26463_s23 + $0xc04] sm:$0xf]  ;;  %v12995_v13 = vld [vmem:[%s26463_s23 + $0xbe0] sm:$0xf] }
 0x176   :  { %3352 = vmatpush.bf16.msrb.mxu2 %v12760_v15  ;;  %v13032_v18 = vor.u32 %v16855_v51, %v13029_v56  ;;  %v16761_v12 = vld [vmem:[%s26464_s24 + $0xb4] sm:$0xf]  ;;  %v16873_v56 = vld [vmem:[%s26463_s23 + $0xcac] sm:$0xf0] }
 0x177   :  { %3330 = vmatpush.bf16.msrb.mxu0 %v12680_v61  ;;  %v12627_v61 = vld [vmem:[%s26463_s23 + $0x9a8] sm:$0xf]  ;;  %v2107_v3 = vpop.f32.mrf.mxu1  ;;  %3316 = vmatpush.bf16.msrb.mxu3 %v12724_v42  ;;  %v20279_v62 = vadd.f32 %v1652_v14, %v19800_v63  ;;  %v12725_v63 = vld [vmem:[%s26463_s23 + $0xa78] sm:$0xf0] }
 0x178   :  { %3293 = vmatpush.bf16.msrb.mxu1 %v12660_v38  ;;  %v12628_v41 = vor.u32 %v16774_v10, %v12627_v61  ;;  %v12611_v38 = vld [vmem:[%s26463_s23 + $0x988] sm:$0xf]  ;;  %v2145_v21 = vpop.f32.mrf.mxu0  ;;  %v12728_v43 = vor.u32 %v16796_v34, %v12725_v63  ;;  %v13123_v10 = vld [vmem:[%s26463_s23 + $0xce0] sm:$0xf]  ;;  %v16879_v34 = vld [vmem:[%s26463_s23 + $0xce4] sm:$0xf] }
 0x179   :  { %v12612_v26 = vor.u32 %v16770_v22, %v12611_v38  ;;  %3222 = vmatmul.bf16.vlgmr.msra.gmra.mxu1 %v20276_v23  ;;  %v13012_v38 = vor.u32 %v16853_v9, %v13011_v28  ;;  %v16877_v22 = vld [vmem:[%s26463_s23 + $0xccc] sm:$0xf0] }
 0x17a   :  { %3353 = vmatpush.bf16.msrb.mxu2 %v12744_v53  ;;  %3260 = vmatmul.bf16.vlgmr.msra.gmra.mxu0 %v20276_v23  ;;  %v16762_v53 = vld [vmem:[%s26464_s24 + $0xb4] sm:$0x30] }
 0x17b   :  { %3331 = vmatpush.bf16.msrb.mxu0 %v12664_v16  ;;  %v20268_v16 = vor.u32 %v16759_v25, %v12573_v1  ;;  %v16857_v25 = vld [vmem:[%s26463_s23 + $0xc2c] sm:$0xf0] }
 0x17c   :  { %3294 = vmatpush.bf16.msrb.mxu1 %v12644_v8  ;;  %v20303_v8 = vadd.f32 %v1690_v40, %v19821_v7  ;;  %v2126_v5 = vpop.f32.mrf.mxu3  ;;  %v13140_v7 = vor.u32 %v16885_v50, %v13139_v47  ;;  %v2164_v61 = vpop.f32.mrf.mxu2  ;;  %v16881_v1 = vld [vmem:[%s26463_s23 + $0xcec] sm:$0xf0]  ;;  %v13125_v40 = vld [vmem:[%s26463_s23 + $0xcf0] sm:$0xf0] }
 0x17d   :  { %12825 = vmatmul.msk.bf16.vlgmr.msra.gmra.mxu3 %vm515_vm0, %v20268_v16  ;;  %12827 = vmatmul.msk.bf16.vlgmr.msra.gmra.mxu2 %vm515_vm0, %v20268_v16  ;;  %v2127_v58 = vadd.f32 %v2126_v5, %v2107_v3  ;;  %v2165_v49 = vadd.f32 %v2164_v61, %v2145_v21  ;;  %v13124_v37 = vor.u32 %v16881_v1, %v13123_v10  ;;  %v12581_v3 = vld [vmem:[%s26464_s24 + $0xb8] sm:$0x30]  ;;  %v12979_v1 = vld [vmem:[%s26463_s23 + $0xbc0] sm:$0xf] }
 0x17e   :  { %3354 = vmatpush.bf16.msrb.mxu2 %v12728_v43  ;;  %3792 = vmatpush.bf16.msra.mxu3 %v13140_v7  ;;  %v20386_v63 = vor.u32 %v16761_v12, %v12581_v3  ;;  %v13128_v20 = vor.u32 %v16879_v34, %v13125_v40  ;;  %v13091_v7 = vld [vmem:[%s26463_s23 + $0xca0] sm:$0xf]  ;;  %v12965_v12 = vld [vmem:[%s26463_s23 + $0xbb0] sm:$0xf0] }
 0x17f   :  { %3332 = vmatpush.bf16.msrb.mxu0 %v12648_v39  ;;  %v12600_v39 = vor.u32 %v16764_v27, %v12597_v55  ;;  %v2109_v19 = vpop.f32.mrf.mxu1  ;;  %v20327_v15 = vadd.f32 %v2127_v58, %v19863_v45  ;;  %v13013_v45 = vld [vmem:[%s26463_s23 + $0xc10] sm:$0xf0]  ;;  %v20357_v14 = vadd.f32 %v2165_v49, %v19890_v2  ;;  %v13107_v2 = vld [vmem:[%s26463_s23 + $0xcc0] sm:$0xf]  ;;  %v16843_v58 = vld [vmem:[%s26463_s23 + $0xbc4] sm:$0xf]  ;;  %v12968_v3 = vor.u32 %v16839_v0, %v12965_v12 }
 0x180   :  { %3295 = vmatpush.bf16.msrb.mxu1 %v12628_v41  ;;  %v2147_v41 = vpop.f32.mrf.mxu0  ;;  %v13016_v42 = vor.u32 %v16851_v60, %v13013_v45  ;;  %v13108_v27 = vor.u32 %v16877_v22, %v13107_v2  ;;  %v12997_v55 = vld [vmem:[%s26463_s23 + $0xbf0] sm:$0xf0]  ;;  %v16845_v60 = vld [vmem:[%s26463_s23 + $0xbcc] sm:$0xf0]  ;;  %v16859_v12 = vld [vmem:[%s26463_s23 + $0xc44] sm:$0xf] }
 0x181   :  { %v16869_v45 = vld [vmem:[%s26463_s23 + $0xc8c] sm:$0xf0] }
 0x182   :  { %3793 = vmatpush.bf16.msra.mxu3 %v13124_v37  ;;  %3830 = vmatpush.bf16.msra.mxu2 %v13144_v44  ;;  %v13075_v37 = vld [vmem:[%s26463_s23 + $0xc80] sm:$0xf]  ;;  %v13093_v44 = vld [vmem:[%s26463_s23 + $0xcb0] sm:$0xf0] }
 0x183   :  { %3333 = vmatpush.bf16.msrb.mxu0 %v12632_v46  ;;  %v13028_v46 = vor.u32 %v16857_v25, %v13027_v59  ;;  %v12981_v59 = vld [vmem:[%s26463_s23 + $0xbd0] sm:$0xf0]  ;;  %v16875_v25 = vld [vmem:[%s26463_s23 + $0xcc4] sm:$0xf] }
 0x184   :  { %3296 = vmatpush.bf16.msrb.mxu1 %v12612_v26  ;;  %v16847_v26 = vld [vmem:[%s26463_s23 + $0xbe4] sm:$0xf]  ;;  %v2128_v31 = vpop.f32.mrf.mxu3  ;;  %v2166_v5 = vpop.f32.mrf.mxu2  ;;  %v12984_v61 = vor.u32 %v16843_v58, %v12981_v59  ;;  %v16861_v58 = vld [vmem:[%s26463_s23 + $0xc4c] sm:$0xf0] }
 0x185   :  { %v2129_v21 = vadd.f32 %v2128_v31, %v2109_v19  ;;  %v13000_v43 = vor.u32 %v16847_v26, %v12997_v55  ;;  %v2167_v19 = vadd.f32 %v2166_v5, %v2147_v41  ;;  %v12980_v41 = vor.u32 %v16845_v60, %v12979_v1  ;;  %v13059_v31 = vld [vmem:[%s26463_s23 + $0xc60] sm:$0xf]  ;;  %v16835_v55 = vld [vmem:[%s26463_s23 + $0xb84] sm:$0xf] }
 0x186   :  { %3794 = vmatpush.bf16.msra.mxu3 %v13108_v27  ;;  %3831 = vmatpush.bf16.msra.mxu2 %v13128_v20  ;;  %v16865_v27 = vld [vmem:[%s26463_s23 + $0xc6c] sm:$0xf0]  ;;  %v16863_v59 = vld [vmem:[%s26463_s23 + $0xc64] sm:$0xf]  ;;  %v12931_v60 = vld [vmem:[%s26463_s23 + $0xb60] sm:$0xf] }
 0x187   :  { %3334 = vmatpush.bf16.msrb.mxu0 %v12616_v52  ;;  %v12579_v52 = vld [vmem:[%s26464_s24 + $0xb0] sm:$0xf]  ;;  %v20397_v51 = vadd.f32 %v2129_v21, %v19933_v32  ;;  %v13092_v32 = vor.u32 %v16873_v56, %v13091_v7  ;;  %v20427_v49 = vadd.f32 %v2167_v19, %v19963_v54  ;;  %v13076_v54 = vor.u32 %v16869_v45, %v13075_v37  ;;  %v13043_v56 = vld [vmem:[%s26463_s23 + $0xc40] sm:$0xf]  ;;  %v16831_v19 = vld [vmem:[%s26463_s23 + $0xb64] sm:$0xf] }
 0x188   :  { %3297 = vmatpush.bf16.msrb.mxu1 %v12596_v17  ;;  %v16849_v17 = vld [vmem:[%s26463_s23 + $0xbec] sm:$0xf0]  ;;  %v20394_v47 = vor.u32 %v16762_v53, %v12579_v52  ;;  %v12963_v53 = vld [vmem:[%s26463_s23 + $0xba0] sm:$0xf]  ;;  %v13060_v21 = vor.u32 %v16865_v27, %v13059_v31  ;;  %v16856_v31 = vld [vmem:[%s26463_s23 + $0xc2c] sm:$0xf] }
 0x189   :  { %v12996_v50 = vor.u32 %v16849_v17, %v12995_v13  ;;  %v12947_v17 = vld [vmem:[%s26463_s23 + $0xb80] sm:$0xf] }
 0x18a   :  { %3227 = vmatmul.bf16.gmra.mxu1 %v20394_v47  ;;  %3795 = vmatpush.bf16.msra.mxu3 %v13092_v32  ;;  %v13044_v32 = vor.u32 %v16861_v58, %v13043_v56  ;;  %v16884_v58 = vld [vmem:[%s26463_s23 + $0xd0c] sm:$0xf] }
 0x18b   :  { %3335 = vmatpush.bf16.msrb.mxu0 %v12600_v39  ;;  %v2112_v39 = vpop.f32.mrf.mxu1 }
 0x18c   :  { %3772 = vmatpush.bf16.msra.mxu1 %v13028_v46  ;;  %v13109_v46 = vld [vmem:[%s26463_s23 + $0xcd0] sm:$0xf0]  ;;  %3265 = vmatmul.bf16.gmra.mxu0 %v20394_v47  ;;  %v2131_v30 = vpop.f32.mrf.mxu3  ;;  %v2169_v26 = vpop.f32.mrf.mxu2 }
 0x18d   :  { %12826 = vmatmul.msk.bf16.gmra.mxu3 %vm515_vm0, %v20386_v63  ;;  %v13112_v10 = vor.u32 %v16875_v25, %v13109_v46  ;;  %12828 = vmatmul.msk.bf16.gmra.mxu2 %vm515_vm0, %v20386_v63  ;;  %v2132_v28 = vadd.f32 %v2131_v30, %v2112_v39  ;;  %v16867_v39 = vld [vmem:[%s26463_s23 + $0xc84] sm:$0xf]  ;;  %v13061_v25 = vld [vmem:[%s26463_s23 + $0xc70] sm:$0xf0] }
 0x18e   :  { %3796 = vmatpush.bf16.msra.mxu3 %v13076_v54  ;;  %v13064_v1 = vor.u32 %v16863_v59, %v13061_v25  ;;  %v16827_v30 = vld [vmem:[%s26463_s23 + $0xb44] sm:$0xf]  ;;  %v12917_v54 = vld [vmem:[%s26463_s23 + $0xb50] sm:$0xf0]  ;;  %v16854_v59 = vld [vmem:[%s26463_s23 + $0xc14] sm:$0xf0] }
 0x18f   :  { %3810 = vmatpush.bf16.msra.mxu0 %v13032_v18  ;;  %v2150_v18 = vpop.f32.mrf.mxu0  ;;  %3832 = vmatpush.bf16.msra.mxu2 %v13112_v10  ;;  %v20457_v22 = vadd.f32 %v2132_v28, %v19993_v6  ;;  %v12949_v6 = vld [vmem:[%s26463_s23 + $0xb90] sm:$0xf0] }
 0x190   :  { %3773 = vmatpush.bf16.msra.mxu1 %v13012_v38  ;;  %v16841_v38 = vld [vmem:[%s26463_s23 + $0xbac] sm:$0xf0]  ;;  %v2170_v34 = vadd.f32 %v2169_v26, %v2150_v18  ;;  %v12952_v20 = vor.u32 %v16835_v55, %v12949_v6  ;;  %v13045_v28 = vld [vmem:[%s26463_s23 + $0xc50] sm:$0xf0]  ;;  %v16886_v26 = vld [vmem:[%s26463_s23 + $0xd14] sm:$0xf0] }
 0x191   :  { %v12964_v2 = vor.u32 %v16841_v38, %v12963_v53  ;;  %v16858_v6 = vld [vmem:[%s26463_s23 + $0xc34] sm:$0xf0] }
 0x192   :  { %v20484_v5 = vadd.f32 %v2170_v34, %v20020_v33  ;;  %3797 = vmatpush.bf16.msra.mxu3 %v13060_v21  ;;  %v12933_v33 = vld [vmem:[%s26463_s23 + $0xb70] sm:$0xf0]  ;;  %v13035_v21 = vld [vmem:[%s26463_s23 + $0xc28] sm:$0xf] }
 0x193   :  { %3811 = vmatpush.bf16.msra.mxu0 %v13016_v42  ;;  %v16871_v42 = vld [vmem:[%s26463_s23 + $0xca4] sm:$0xf]  ;;  %v2114_v9 = vpop.f32.mrf.mxu1  ;;  %v12936_v10 = vor.u32 %v16831_v19, %v12933_v33  ;;  %v13149_v19 = vld [vmem:[%s26463_s23 + $0xd18] sm:$0xf0]  ;;  %v13019_v33 = vld [vmem:[%s26463_s23 + $0xc08] sm:$0xf] }
 0x194   :  { %3774 = vmatpush.bf16.msra.mxu1 %v12996_v50  ;;  %v13096_v52 = vor.u32 %v16871_v42, %v13093_v44  ;;  %v16837_v50 = vld [vmem:[%s26463_s23 + $0xb8c] sm:$0xf0]  ;;  %v2133_v18 = vpop.f32.mrf.mxu3  ;;  %v2171_v0 = vpop.f32.mrf.mxu2 }
 0x195   :  { %v12948_v7 = vor.u32 %v16837_v50, %v12947_v17  ;;  %v2134_v46 = vadd.f32 %v2133_v18, %v2114_v9  ;;  %v13048_v9 = vor.u32 %v16859_v12, %v13045_v28  ;;  %v16852_v17 = vld [vmem:[%s26463_s23 + $0xc0c] sm:$0xf] }
 0x196   :  { %3833 = vmatpush.bf16.msra.mxu2 %v13096_v52  ;;  %3798 = vmatpush.bf16.msra.mxu3 %v13044_v32  ;;  %v16829_v52 = vld [vmem:[%s26463_s23 + $0xb4c] sm:$0xf0]  ;;  %v13152_v32 = vor.u32 %v16884_v58, %v13149_v19 }
 0x197   :  { %3812 = vmatpush.bf16.msra.mxu0 %v13000_v43  ;;  %v2152_v40 = vpop.f32.mrf.mxu0  ;;  %v13077_v43 = vld [vmem:[%s26463_s23 + $0xc90] sm:$0xf0]  ;;  %v20511_v45 = vadd.f32 %v2134_v46, %v20047_v24  ;;  %v12920_v24 = vor.u32 %v16827_v30, %v12917_v54  ;;  %v13020_v46 = vor.u32 %v16854_v59, %v13019_v33 }
 0x198   :  { %3775 = vmatpush.bf16.msra.mxu1 %v12980_v41  ;;  %v13080_v13 = vor.u32 %v16867_v39, %v13077_v43  ;;  %v16833_v41 = vld [vmem:[%s26463_s23 + $0xb6c] sm:$0xf0]  ;;  %v2172_v42 = vadd.f32 %v2171_v0, %v2152_v40  ;;  %v13133_v0 = vld [vmem:[%s26463_s23 + $0xcf8] sm:$0xf0] }
 0x199   :  { %v12932_v37 = vor.u32 %v16833_v41, %v12931_v60  ;;  %v13005_v41 = vld [vmem:[%s26463_s23 + $0xbf8] sm:$0xf0] }
 0x19a   :  { %3834 = vmatpush.bf16.msra.mxu2 %v13080_v13  ;;  %3298 = vmatmul.bf16.vlgmr.msrb.gmra.mxu1 %v20276_v23  ;;  %v20535_v53 = vadd.f32 %v2172_v42, %v20071_v57  ;;  %v16882_v13 = vld [vmem:[%s26463_s23 + $0xcf4] sm:$0xf0] }
 0x19b   :  { %3813 = vmatpush.bf16.msra.mxu0 %v12984_v61  ;;  %v2183_v61 = vpop.f32.mrf.mxu1 }
 0x19c   :  { %3776 = vmatpush.bf16.msra.mxu1 %v12964_v2  ;;  %3336 = vmatmul.bf16.vlgmr.msrb.gmra.mxu0 %v20276_v23  ;;  %v13147_v2 = vld [vmem:[%s26463_s23 + $0xd08] sm:$0xf]  ;;  %v2202_v27 = vpop.f32.mrf.mxu3  ;;  %v13037_v23 = vld [vmem:[%s26463_s23 + $0xc38] sm:$0xf0]  ;;  %v2240_v43 = vpop.f32.mrf.mxu2 }
 0x19d   :  { %12829 = vmatmul.msk.bf16.vlgmr.msrb.gmra.mxu3 %vm515_vm0, %v20268_v16  ;;  %12831 = vmatmul.msk.bf16.vlgmr.msrb.gmra.mxu2 %vm515_vm0, %v20268_v16  ;;  %v13148_v57 = vor.u32 %v16886_v26, %v13147_v2  ;;  %v2203_v55 = vadd.f32 %v2202_v27, %v2183_v61  ;;  %v13040_v40 = vor.u32 %v16856_v31, %v13037_v23  ;;  %v13115_v61 = vld [vmem:[%s26463_s23 + $0xcc8] sm:$0xf]  ;;  %v16844_v2 = vld [vmem:[%s26463_s23 + $0xbcc] sm:$0xf]  ;;  %v12989_v27 = vld [vmem:[%s26463_s23 + $0xbd8] sm:$0xf0] }
 0x19e   :  { %3835 = vmatpush.bf16.msra.mxu2 %v13064_v1  ;;  %v13036_v16 = vor.u32 %v16858_v6, %v13035_v21  ;;  %v16848_v1 = vld [vmem:[%s26463_s23 + $0xbec] sm:$0xf]  ;;  %v13117_v23 = vld [vmem:[%s26463_s23 + $0xcd8] sm:$0xf0]  ;;  %v16846_v21 = vld [vmem:[%s26463_s23 + $0xbd4] sm:$0xf0] }
 0x19f   :  { %3814 = vmatpush.bf16.msra.mxu0 %v12968_v3  ;;  %v2221_v44 = vpop.f32.mrf.mxu0  ;;  %v12915_v3 = vld [vmem:[%s26463_s23 + $0xb40] sm:$0xf]  ;;  %3868 = vmatpush.bf16.msrb.mxu3 %v13148_v57  ;;  %v20559_v39 = vadd.f32 %v2203_v55, %v20095_v11  ;;  %v13021_v11 = vld [vmem:[%s26463_s23 + $0xc18] sm:$0xf0]  ;;  %v13008_v12 = vor.u32 %v16848_v1, %v13005_v41  ;;  %v16876_v57 = vld [vmem:[%s26463_s23 + $0xccc] sm:$0xf]  ;;  %v12992_v55 = vor.u32 %v16844_v2, %v12989_v27 }
 0x1a0   :  { %3777 = vmatpush.bf16.msra.mxu1 %v12948_v7  ;;  %v12916_v38 = vor.u32 %v16829_v52, %v12915_v3  ;;  %v2241_v50 = vadd.f32 %v2240_v43, %v2221_v44  ;;  %v13024_v18 = vor.u32 %v16852_v17, %v13021_v11  ;;  %v13003_v44 = vld [vmem:[%s26463_s23 + $0xbe8] sm:$0xf]  ;;  %v16868_v41 = vld [vmem:[%s26463_s23 + $0xc8c] sm:$0xf] }
 0x1a1   :  { %v13099_v52 = vld [vmem:[%s26463_s23 + $0xca8] sm:$0xf]  ;;  %v16832_v2 = vld [vmem:[%s26463_s23 + $0xb6c] sm:$0xf] }
 0x1a2   :  { %3836 = vmatpush.bf16.msra.mxu2 %v13048_v9  ;;  %v20586_v25 = vadd.f32 %v2241_v50, %v20122_v4  ;;  %v13083_v43 = vld [vmem:[%s26463_s23 + $0xc88] sm:$0xf]  ;;  %v16872_v50 = vld [vmem:[%s26463_s23 + $0xcac] sm:$0xf] }
 0x1a3   :  { %3815 = vmatpush.bf16.msra.mxu0 %v12952_v20  ;;  %v2185_v34 = vpop.f32.mrf.mxu1  ;;  %v13131_v20 = vld [vmem:[%s26463_s23 + $0xce8] sm:$0xf]  ;;  %v16864_v27 = vld [vmem:[%s26463_s23 + $0xc6c] sm:$0xf] }
 0x1a4   :  { %3778 = vmatpush.bf16.msra.mxu1 %v12932_v37  ;;  %v13132_v56 = vor.u32 %v16882_v13, %v13131_v20  ;;  %v2204_v60 = vpop.f32.mrf.mxu3  ;;  %v16880_v37 = vld [vmem:[%s26463_s23 + $0xcec] sm:$0xf]  ;;  %v2242_v3 = vpop.f32.mrf.mxu2  ;;  %v16870_v20 = vld [vmem:[%s26463_s23 + $0xc94] sm:$0xf0] }
 0x1a5   :  { %v2205_v30 = vadd.f32 %v2204_v60, %v2185_v34  ;;  %v13136_v42 = vor.u32 %v16880_v37, %v13133_v0  ;;  %v13120_v34 = vor.u32 %v16876_v57, %v13117_v23  ;;  %v16840_v13 = vld [vmem:[%s26463_s23 + $0xbac] sm:$0xf]  ;;  %v13085_v37 = vld [vmem:[%s26463_s23 + $0xc98] sm:$0xf0]  ;;  %v16823_v0 = vld [vmem:[%s26464_s24 + $0xc4] sm:$0xf] }
 0x1a6   :  { %3869 = vmatpush.bf16.msrb.mxu3 %v13132_v56  ;;  %3906 = vmatpush.bf16.msrb.mxu2 %v13152_v32  ;;  %v13069_v57 = vld [vmem:[%s26463_s23 + $0xc78] sm:$0xf0] }
 0x1a7   :  { %3816 = vmatpush.bf16.msra.mxu0 %v12936_v10  ;;  %v2223_v7 = vpop.f32.mrf.mxu0  ;;  %v16878_v10 = vld [vmem:[%s26463_s23 + $0xcd4] sm:$0xf0]  ;;  %v20613_v9 = vadd.f32 %v2205_v30, %v20149_v36 }
 0x1a8   :  { %3779 = vmatpush.bf16.msra.mxu1 %v12916_v38  ;;  %v13116_v4 = vor.u32 %v16878_v10, %v13115_v61  ;;  %v16874_v38 = vld [vmem:[%s26463_s23 + $0xcb4] sm:$0xf0]  ;;  %v2243_v26 = vadd.f32 %v2242_v3, %v2223_v7  ;;  %v13101_v7 = vld [vmem:[%s26463_s23 + $0xcb8] sm:$0xf0]  ;;  %v16836_v10 = vld [vmem:[%s26463_s23 + $0xb8c] sm:$0xf] }
 0x1a9   :  { %v13100_v36 = vor.u32 %v16874_v38, %v13099_v52  ;;  %v13104_v19 = vor.u32 %v16872_v50, %v13101_v7  ;;  %v16866_v61 = vld [vmem:[%s26463_s23 + $0xc74] sm:$0xf0]  ;;  %v16824_v3 = vld [vmem:[%s26464_s24 + $0xc4] sm:$0xf0]  ;;  %v12925_v50 = vld [vmem:[%s26463_s23 + $0xb58] sm:$0xf0] }
 0x1aa   :  { %3870 = vmatpush.bf16.msrb.mxu3 %v13116_v4  ;;  %3907 = vmatpush.bf16.msrb.mxu2 %v13136_v42  ;;  %v20643_v6 = vadd.f32 %v2243_v26, %v20179_v48  ;;  %v13084_v48 = vor.u32 %v16870_v20, %v13083_v43  ;;  %v16838_v42 = vld [vmem:[%s26463_s23 + $0xb94] sm:$0xf0]  ;;  %v16860_v7 = vld [vmem:[%s26463_s23 + $0xc4c] sm:$0xf] }
 0x1ab   :  { %3817 = vmatpush.bf16.msra.mxu0 %v12920_v24  ;;  %v2188_v54 = vpop.f32.mrf.mxu1  ;;  %v16850_v24 = vld [vmem:[%s26463_s23 + $0xbf4] sm:$0xf0]  ;;  %3303 = vmatmul.bf16.gmra.mxu1 %v20394_v47 }
 0x1ac   :  { %3848 = vmatpush.bf16.msrb.mxu1 %v13036_v16  ;;  %v13004_v28 = vor.u32 %v16850_v24, %v13003_v44  ;;  %3341 = vmatmul.bf16.gmra.mxu0 %v20394_v47  ;;  %v2207_v17 = vpop.f32.mrf.mxu3  ;;  %v12973_v47 = vld [vmem:[%s26463_s23 + $0xbb8] sm:$0xf0]  ;;  %v2245_v59 = vpop.f32.mrf.mxu2  ;;  %v12901_v24 = vld [vmem:[%s26464_s24 + $0xc8] sm:$0xf0]  ;;  %v16862_v38 = vld [vmem:[%s26463_s23 + $0xc54] sm:$0xf0] }
 0x1ad   :  { %12830 = vmatmul.msk.bf16.gmra.mxu3 %vm515_vm0, %v20386_v63  ;;  %12832 = vmatmul.msk.bf16.gmra.mxu2 %vm515_vm0, %v20386_v63  ;;  %v2208_v56 = vadd.f32 %v2207_v17, %v2188_v54  ;;  %v12976_v58 = vor.u32 %v16840_v13, %v12973_v47  ;;  %v12971_v63 = vld [vmem:[%s26463_s23 + $0xba8] sm:$0xf]  ;;  %v13088_v54 = vor.u32 %v16868_v41, %v13085_v37  ;;  %v16834_v43 = vld [vmem:[%s26463_s23 + $0xb74] sm:$0xf0]  ;;  %v16828_v47 = vld [vmem:[%s26463_s23 + $0xb4c] sm:$0xf] }
 0x1ae   :  { %3871 = vmatpush.bf16.msrb.mxu3 %v13100_v36  ;;  %3908 = vmatpush.bf16.msrb.mxu2 %v13120_v34  ;;  %v12941_v36 = vld [vmem:[%s26463_s23 + $0xb78] sm:$0xf0]  ;;  %v13355_v37 = vld [vmem:[%s26463_s23 + $0xe00] sm:$0xf] }
 0x1af   :  { %3886 = vmatpush.bf16.msrb.mxu0 %v13040_v40  ;;  %v2226_v31 = vpop.f32.mrf.mxu0  ;;  %v12987_v40 = vld [vmem:[%s26463_s23 + $0xbc8] sm:$0xf]  ;;  %v20673_v33 = vadd.f32 %v2208_v56, %v20209_v35  ;;  %v12957_v35 = vld [vmem:[%s26463_s23 + $0xb98] sm:$0xf0] }
 0x1b0   :  { %3849 = vmatpush.bf16.msrb.mxu1 %v13020_v46  ;;  %v12988_v16 = vor.u32 %v16846_v21, %v12987_v40  ;;  %v13067_v46 = vld [vmem:[%s26463_s23 + $0xc68] sm:$0xf]  ;;  %v2246_v1 = vadd.f32 %v2245_v59, %v2226_v31  ;;  %v12960_v30 = vor.u32 %v16836_v10, %v12957_v35  ;;  %v12944_v40 = vor.u32 %v16832_v2, %v12941_v36  ;;  %v16919_v10 = vld [vmem:[%s26463_s23 + $0xe04] sm:$0xf]  ;;  %v13469_v2 = vld [vmem:[%s26463_s23 + $0xef0] sm:$0xf0] }
 0x1b1   :  { %v13068_v4 = vor.u32 %v16866_v61, %v13067_v46  ;;  %v13072_v21 = vor.u32 %v16864_v27, %v13069_v57  ;;  %v13467_v46 = vld [vmem:[%s26463_s23 + $0xee0] sm:$0xf]  ;;  %v16949_v61 = vld [vmem:[%s26463_s23 + $0xeec] sm:$0xf0] }
 0x1b2   :  { %3872 = vmatpush.bf16.msrb.mxu3 %v13084_v48  ;;  %3909 = vmatpush.bf16.msrb.mxu2 %v13104_v19  ;;  %v20703_v44 = vadd.f32 %v2246_v1, %v20239_v29  ;;  %v13051_v29 = vld [vmem:[%s26463_s23 + $0xc48] sm:$0xf]  ;;  %v13339_v27 = vld [vmem:[%s26463_s23 + $0xde0] sm:$0xf]  ;;  %v16917_v57 = vld [vmem:[%s26463_s23 + $0xdec] sm:$0xf0] }
 0x1b3   :  { %3887 = vmatpush.bf16.msrb.mxu0 %v13024_v18  ;;  %v2190_v11 = vpop.f32.mrf.mxu1  ;;  %v16842_v18 = vld [vmem:[%s26463_s23 + $0xbb4] sm:$0xf0]  ;;  %v13052_v31 = vor.u32 %v16862_v38, %v13051_v29  ;;  %v16947_v38 = vld [vmem:[%s26463_s23 + $0xee4] sm:$0xf] }
 0x1b4   :  { %3850 = vmatpush.bf16.msrb.mxu1 %v13004_v28  ;;  %v12972_v32 = vor.u32 %v16842_v18, %v12971_v63  ;;  %v12899_v28 = vld [vmem:[%s26464_s24 + $0xc0] sm:$0xf]  ;;  %v2209_v26 = vpop.f32.mrf.mxu3  ;;  %v2247_v48 = vpop.f32.mrf.mxu2  ;;  %v12923_v63 = vld [vmem:[%s26463_s23 + $0xb48] sm:$0xf]  ;;  %v16830_v18 = vld [vmem:[%s26463_s23 + $0xb54] sm:$0xf0]  ;;  %v13472_v36 = vor.u32 %v16947_v38, %v13469_v2 }
 0x1b5   :  { %v2210_v23 = vadd.f32 %v2209_v26, %v2190_v11  ;;  %v20740_v20 = vor.u32 %v16824_v3, %v12899_v28  ;;  %v12924_v59 = vor.u32 %v16830_v18, %v12923_v63  ;;  %v16915_v28 = vld [vmem:[%s26463_s23 + $0xde4] sm:$0xf]  ;;  %v16825_v26 = vld [vmem:[%s26464_s24 + $0xd4] sm:$0xf]  ;;  %v13323_v18 = vld [vmem:[%s26463_s23 + $0xdc0] sm:$0xf] }
 0x1b6   :  { %3873 = vmatpush.bf16.msrb.mxu3 %v13068_v4  ;;  %3910 = vmatpush.bf16.msrb.mxu2 %v13088_v54  ;;  %v16903_v38 = vld [vmem:[%s26463_s23 + $0xd84] sm:$0xf] }
 0x1b7   :  { %3888 = vmatpush.bf16.msrb.mxu0 %v13008_v12  ;;  %v2228_v60 = vpop.f32.mrf.mxu0  ;;  %v12955_v12 = vld [vmem:[%s26463_s23 + $0xb88] sm:$0xf]  ;;  %v20743_v17 = vadd.f32 %v2210_v23, %v20279_v62  ;;  %v12928_v62 = vor.u32 %v16828_v47, %v12925_v50  ;;  %v13325_v50 = vld [vmem:[%s26463_s23 + $0xdd0] sm:$0xf0] }
 0x1b8   :  { %3851 = vmatpush.bf16.msrb.mxu1 %v12988_v16  ;;  %v12956_v52 = vor.u32 %v16838_v42, %v12955_v12  ;;  %v12939_v16 = vld [vmem:[%s26463_s23 + $0xb68] sm:$0xf]  ;;  %v2248_v56 = vadd.f32 %v2247_v48, %v2228_v60  ;;  %v13357_v60 = vld [vmem:[%s26463_s23 + $0xe10] sm:$0xf0]  ;;  %v13451_v42 = vld [vmem:[%s26463_s23 + $0xec0] sm:$0xf] }
 0x1b9   :  { %v12940_v13 = vor.u32 %v16834_v43, %v12939_v16  ;;  %v13360_v41 = vor.u32 %v16919_v10, %v13357_v60  ;;  %v13340_v16 = vor.u32 %v16917_v57, %v13339_v27  ;;  %v16941_v43 = vld [vmem:[%s26463_s23 + $0xeac] sm:$0xf0] }
 0x1ba   :  { %3874 = vmatpush.bf16.msrb.mxu3 %v13052_v31  ;;  %3911 = vmatpush.bf16.msrb.mxu2 %v13072_v21  ;;  %v16826_v21 = vld [vmem:[%s26464_s24 + $0xd4] sm:$0x30]  ;;  %v16937_v60 = vld [vmem:[%s26463_s23 + $0xe8c] sm:$0xf0] }
 0x1bb   :  { %3889 = vmatpush.bf16.msrb.mxu0 %v12992_v55  ;;  %v20732_v55 = vor.u32 %v16823_v0, %v12901_v24  ;;  %v2665_v34 = vpop.f32.mrf.mxu1  ;;  %3780 = vmatmul.bf16.vlgmr.msra.gmra.mxu1 %v20740_v20  ;;  %v16921_v0 = vld [vmem:[%s26463_s23 + $0xe0c] sm:$0xf0] }
 0x1bc   :  { %3852 = vmatpush.bf16.msrb.mxu1 %v12972_v32  ;;  %v20767_v32 = vadd.f32 %v2248_v56, %v20303_v8  ;;  %3818 = vmatmul.bf16.vlgmr.msra.gmra.mxu0 %v20740_v20  ;;  %v2684_v1 = vpop.f32.mrf.mxu3  ;;  %v13468_v8 = vor.u32 %v16949_v61, %v13467_v46  ;;  %v2722_v12 = vpop.f32.mrf.mxu2  ;;  %v16945_v24 = vld [vmem:[%s26463_s23 + $0xecc] sm:$0xf0]  ;;  %v13453_v56 = vld [vmem:[%s26463_s23 + $0xed0] sm:$0xf0] }
 0x1bd   :  { %13153 = vmatmul.msk.bf16.vlgmr.msra.gmra.mxu3 %vm515_vm0, %v20732_v55  ;;  %13155 = vmatmul.msk.bf16.vlgmr.msra.gmra.mxu2 %vm515_vm0, %v20732_v55  ;;  %v2685_v4 = vadd.f32 %v2684_v1, %v2665_v34  ;;  %v13452_v29 = vor.u32 %v16945_v24, %v13451_v42  ;;  %v12909_v34 = vld [vmem:[%s26464_s24 + $0xd8] sm:$0x30]  ;;  %v13307_v24 = vld [vmem:[%s26463_s23 + $0xda0] sm:$0xf] }
 0x1be   :  { %4350 = vmatpush.bf16.msra.mxu3 %v13468_v8  ;;  %v13419_v8 = vld [vmem:[%s26463_s23 + $0xe80] sm:$0xf] }
 0x1bf   :  { %3890 = vmatpush.bf16.msrb.mxu0 %v12976_v58  ;;  %v2703_v11 = vpop.f32.mrf.mxu0  ;;  %v13053_v58 = vld [vmem:[%s26463_s23 + $0xc58] sm:$0xf0]  ;;  %v20791_v54 = vadd.f32 %v2685_v4, %v20327_v15  ;;  %v13341_v15 = vld [vmem:[%s26463_s23 + $0xdf0] sm:$0xf0]  ;;  %v16907_v4 = vld [vmem:[%s26463_s23 + $0xda4] sm:$0xf] }
 0x1c0   :  { %3853 = vmatpush.bf16.msrb.mxu1 %v12956_v52  ;;  %v13056_v19 = vor.u32 %v16860_v7, %v13053_v58  ;;  %v2723_v3 = vadd.f32 %v2722_v12, %v2703_v11  ;;  %v13344_v31 = vor.u32 %v16915_v28, %v13341_v15  ;;  %v16943_v7 = vld [vmem:[%s26463_s23 + $0xec4] sm:$0xf]  ;;  %v16909_v28 = vld [vmem:[%s26463_s23 + $0xdac] sm:$0xf0] }
 0x1c1   :  { %v13456_v63 = vor.u32 %v16943_v7, %v13453_v56  ;;  %v16933_v15 = vld [vmem:[%s26463_s23 + $0xe6c] sm:$0xf0] }
 0x1c2   :  { %3912 = vmatpush.bf16.msrb.mxu2 %v13056_v19  ;;  %v20821_v23 = vadd.f32 %v2723_v3, %v20357_v14  ;;  %4351 = vmatpush.bf16.msra.mxu3 %v13452_v29  ;;  %v13435_v14 = vld [vmem:[%s26463_s23 + $0xea0] sm:$0xf] }
 0x1c3   :  { %3891 = vmatpush.bf16.msrb.mxu0 %v12960_v30  ;;  %v2667_v35 = vpop.f32.mrf.mxu1  ;;  %v13356_v30 = vor.u32 %v16921_v0, %v13355_v37  ;;  %v13436_v47 = vor.u32 %v16941_v43, %v13435_v14  ;;  %v13309_v37 = vld [vmem:[%s26463_s23 + $0xdb0] sm:$0xf0]  ;;  %v16939_v0 = vld [vmem:[%s26463_s23 + $0xea4] sm:$0xf]  ;;  %v13403_v29 = vld [vmem:[%s26463_s23 + $0xe60] sm:$0xf] }
 0x1c4   :  { %3854 = vmatpush.bf16.msrb.mxu1 %v12940_v13  ;;  %v16911_v13 = vld [vmem:[%s26463_s23 + $0xdc4] sm:$0xf]  ;;  %v2686_v48 = vpop.f32.mrf.mxu3  ;;  %v2724_v1 = vpop.f32.mrf.mxu2  ;;  %v13312_v12 = vor.u32 %v16907_v4, %v13309_v37  ;;  %v16925_v4 = vld [vmem:[%s26463_s23 + $0xe2c] sm:$0xf0] }
 0x1c5   :  { %v2687_v11 = vadd.f32 %v2686_v48, %v2667_v35  ;;  %v13328_v19 = vor.u32 %v16911_v13, %v13325_v50  ;;  %v13387_v48 = vld [vmem:[%s26463_s23 + $0xe40] sm:$0xf]  ;;  %v16899_v50 = vld [vmem:[%s26463_s23 + $0xd64] sm:$0xf] }
 0x1c6   :  { %4388 = vmatpush.bf16.msra.mxu2 %v13472_v36  ;;  %4352 = vmatpush.bf16.msra.mxu3 %v13436_v47  ;;  %v13421_v36 = vld [vmem:[%s26463_s23 + $0xe90] sm:$0xf0]  ;;  %v16929_v47 = vld [vmem:[%s26463_s23 + $0xe4c] sm:$0xf0]  ;;  %v16927_v37 = vld [vmem:[%s26463_s23 + $0xe44] sm:$0xf] }
 0x1c7   :  { %3892 = vmatpush.bf16.msrb.mxu0 %v12944_v40  ;;  %v2705_v52 = vpop.f32.mrf.mxu0  ;;  %v12907_v40 = vld [vmem:[%s26464_s24 + $0xd0] sm:$0xf]  ;;  %v20861_v10 = vadd.f32 %v2687_v11, %v20397_v51  ;;  %v13420_v51 = vor.u32 %v16937_v60, %v13419_v8  ;;  %v13388_v11 = vor.u32 %v16929_v47, %v13387_v48  ;;  %v13371_v60 = vld [vmem:[%s26463_s23 + $0xe20] sm:$0xf]  ;;  %v16920_v48 = vld [vmem:[%s26463_s23 + $0xe0c] sm:$0xf] }
 0x1c8   :  { %3855 = vmatpush.bf16.msrb.mxu1 %v12924_v59  ;;  %v16913_v59 = vld [vmem:[%s26463_s23 + $0xdcc] sm:$0xf0]  ;;  %v20858_v46 = vor.u32 %v16826_v21, %v12907_v40  ;;  %v2725_v35 = vadd.f32 %v2724_v1, %v2705_v52  ;;  %v13308_v52 = vor.u32 %v16909_v28, %v13307_v24  ;;  %v13291_v21 = vld [vmem:[%s26463_s23 + $0xd80] sm:$0xf] }
 0x1c9   :  { %v13324_v61 = vor.u32 %v16913_v59, %v13323_v18  ;;  %v13275_v59 = vld [vmem:[%s26463_s23 + $0xd60] sm:$0xf] }
 0x1ca   :  { %4389 = vmatpush.bf16.msra.mxu2 %v13456_v63  ;;  %v20891_v3 = vadd.f32 %v2725_v35, %v20427_v49  ;;  %4353 = vmatpush.bf16.msra.mxu3 %v13420_v51  ;;  %v13404_v49 = vor.u32 %v16933_v15, %v13403_v29  ;;  %v16895_v35 = vld [vmem:[%s26463_s23 + $0xd44] sm:$0xf]  ;;  %v13372_v51 = vor.u32 %v16925_v4, %v13371_v60  ;;  %v13259_v28 = vld [vmem:[%s26463_s23 + $0xd40] sm:$0xf]  ;;  %v16948_v4 = vld [vmem:[%s26463_s23 + $0xeec] sm:$0xf] }
 0x1cb   :  { %3893 = vmatpush.bf16.msrb.mxu0 %v12928_v62  ;;  %v20850_v62 = vor.u32 %v16825_v26, %v12909_v34  ;;  %v2670_v58 = vpop.f32.mrf.mxu1  ;;  %3785 = vmatmul.bf16.gmra.mxu1 %v20858_v46  ;;  %v13293_v26 = vld [vmem:[%s26463_s23 + $0xd90] sm:$0xf0] }
 0x1cc   :  { %4330 = vmatpush.bf16.msra.mxu1 %v13356_v30  ;;  %v13437_v30 = vld [vmem:[%s26463_s23 + $0xeb0] sm:$0xf0]  ;;  %3823 = vmatmul.bf16.gmra.mxu0 %v20858_v46  ;;  %v2689_v2 = vpop.f32.mrf.mxu3  ;;  %v13296_v34 = vor.u32 %v16903_v38, %v13293_v26  ;;  %v2727_v13 = vpop.f32.mrf.mxu2  ;;  %v16923_v26 = vld [vmem:[%s26463_s23 + $0xe24] sm:$0xf] }
 0x1cd   :  { %13154 = vmatmul.msk.bf16.gmra.mxu3 %vm515_vm0, %v20850_v62  ;;  %v13440_v42 = vor.u32 %v16939_v0, %v13437_v30  ;;  %13156 = vmatmul.msk.bf16.gmra.mxu2 %vm515_vm0, %v20850_v62  ;;  %v2690_v27 = vadd.f32 %v2689_v2, %v2670_v58  ;;  %v16931_v58 = vld [vmem:[%s26463_s23 + $0xe64] sm:$0xf]  ;;  %v13389_v0 = vld [vmem:[%s26463_s23 + $0xe50] sm:$0xf0] }
 0x1ce   :  { %4354 = vmatpush.bf16.msra.mxu3 %v13404_v49  ;;  %v13392_v24 = vor.u32 %v16927_v37, %v13389_v0  ;;  %v16891_v2 = vld [vmem:[%s26463_s23 + $0xd24] sm:$0xf]  ;;  %v13245_v49 = vld [vmem:[%s26463_s23 + $0xd30] sm:$0xf0]  ;;  %v16918_v37 = vld [vmem:[%s26463_s23 + $0xdf4] sm:$0xf0] }
 0x1cf   :  { %4368 = vmatpush.bf16.msra.mxu0 %v13360_v41  ;;  %v2708_v41 = vpop.f32.mrf.mxu0  ;;  %4390 = vmatpush.bf16.msra.mxu2 %v13440_v42  ;;  %v20921_v43 = vadd.f32 %v2690_v27, %v20457_v22  ;;  %v13277_v22 = vld [vmem:[%s26463_s23 + $0xd70] sm:$0xf0] }
 0x1d0   :  { %4331 = vmatpush.bf16.msra.mxu1 %v13340_v16  ;;  %v16905_v16 = vld [vmem:[%s26463_s23 + $0xd8c] sm:$0xf0]  ;;  %v2728_v7 = vadd.f32 %v2727_v13, %v2708_v41  ;;  %v13280_v63 = vor.u32 %v16899_v50, %v13277_v22  ;;  %v13373_v27 = vld [vmem:[%s26463_s23 + $0xe30] sm:$0xf0]  ;;  %v16950_v13 = vld [vmem:[%s26463_s23 + $0xef4] sm:$0xf0] }
 0x1d1   :  { %v13292_v14 = vor.u32 %v16905_v16, %v13291_v21  ;;  %v16922_v22 = vld [vmem:[%s26463_s23 + $0xe14] sm:$0xf0] }
 0x1d2   :  { %v20948_v1 = vadd.f32 %v2728_v7, %v20484_v5  ;;  %4355 = vmatpush.bf16.msra.mxu3 %v13388_v11  ;;  %v13261_v5 = vld [vmem:[%s26463_s23 + $0xd50] sm:$0xf0]  ;;  %v13363_v11 = vld [vmem:[%s26463_s23 + $0xe08] sm:$0xf] }
 0x1d3   :  { %4369 = vmatpush.bf16.msra.mxu0 %v13344_v31  ;;  %v16935_v31 = vld [vmem:[%s26463_s23 + $0xe84] sm:$0xf]  ;;  %v2672_v57 = vpop.f32.mrf.mxu1  ;;  %v13264_v42 = vor.u32 %v16895_v35, %v13261_v5  ;;  %v13477_v35 = vld [vmem:[%s26463_s23 + $0xef8] sm:$0xf0]  ;;  %v13347_v5 = vld [vmem:[%s26463_s23 + $0xde8] sm:$0xf] }
 0x1d4   :  { %4332 = vmatpush.bf16.msra.mxu1 %v13324_v61  ;;  %v13424_v40 = vor.u32 %v16935_v31, %v13421_v36  ;;  %v16901_v61 = vld [vmem:[%s26463_s23 + $0xd6c] sm:$0xf0]  ;;  %v2691_v41 = vpop.f32.mrf.mxu3  ;;  %v2729_v38 = vpop.f32.mrf.mxu2 }
 0x1d5   :  { %v13276_v8 = vor.u32 %v16901_v61, %v13275_v59  ;;  %v2692_v30 = vadd.f32 %v2691_v41, %v2672_v57  ;;  %v13376_v57 = vor.u32 %v16923_v26, %v13373_v27  ;;  %v16916_v59 = vld [vmem:[%s26463_s23 + $0xdec] sm:$0xf] }
 0x1d6   :  { %4391 = vmatpush.bf16.msra.mxu2 %v13424_v40  ;;  %4356 = vmatpush.bf16.msra.mxu3 %v13372_v51  ;;  %v16893_v40 = vld [vmem:[%s26463_s23 + $0xd2c] sm:$0xf0]  ;;  %v13480_v51 = vor.u32 %v16948_v4, %v13477_v35 }
 0x1d7   :  { %4370 = vmatpush.bf16.msra.mxu0 %v13328_v19  ;;  %v2710_v56 = vpop.f32.mrf.mxu0  ;;  %v13405_v19 = vld [vmem:[%s26463_s23 + $0xe70] sm:$0xf0]  ;;  %v20975_v15 = vadd.f32 %v2692_v30, %v20511_v45  ;;  %v13248_v45 = vor.u32 %v16891_v2, %v13245_v49  ;;  %v13348_v30 = vor.u32 %v16918_v37, %v13347_v5 }
 0x1d8   :  { %4333 = vmatpush.bf16.msra.mxu1 %v13308_v52  ;;  %v13408_v18 = vor.u32 %v16931_v58, %v13405_v19  ;;  %v16897_v52 = vld [vmem:[%s26463_s23 + $0xd4c] sm:$0xf0]  ;;  %v2730_v31 = vadd.f32 %v2729_v38, %v2710_v56  ;;  %v13461_v38 = vld [vmem:[%s26463_s23 + $0xed8] sm:$0xf0] }
 0x1d9   :  { %v13260_v29 = vor.u32 %v16897_v52, %v13259_v28  ;;  %v13333_v52 = vld [vmem:[%s26463_s23 + $0xdd8] sm:$0xf0] }
 0x1da   :  { %4392 = vmatpush.bf16.msra.mxu2 %v13408_v18  ;;  %v20999_v21 = vadd.f32 %v2730_v31, %v20535_v53  ;;  %v16946_v18 = vld [vmem:[%s26463_s23 + $0xed4] sm:$0xf0] }
 0x1db   :  { %4371 = vmatpush.bf16.msra.mxu0 %v13312_v12  ;;  %v2741_v12 = vpop.f32.mrf.mxu1  ;;  %3856 = vmatmul.bf16.vlgmr.msrb.gmra.mxu1 %v20740_v20 }
 0x1dc   :  { %4334 = vmatpush.bf16.msra.mxu1 %v13292_v14  ;;  %3894 = vmatmul.bf16.vlgmr.msrb.gmra.mxu0 %v20740_v20  ;;  %v13475_v14 = vld [vmem:[%s26463_s23 + $0xee8] sm:$0xf]  ;;  %v2760_v47 = vpop.f32.mrf.mxu3  ;;  %v13365_v20 = vld [vmem:[%s26463_s23 + $0xe18] sm:$0xf0]  ;;  %v2798_v19 = vpop.f32.mrf.mxu2 }
 0x1dd   :  { %13157 = vmatmul.msk.bf16.vlgmr.msrb.gmra.mxu3 %vm515_vm0, %v20732_v55  ;;  %13159 = vmatmul.msk.bf16.vlgmr.msrb.gmra.mxu2 %vm515_vm0, %v20732_v55  ;;  %v13476_v53 = vor.u32 %v16950_v13, %v13475_v14  ;;  %v2761_v50 = vadd.f32 %v2760_v47, %v2741_v12  ;;  %v13368_v56 = vor.u32 %v16920_v48, %v13365_v20  ;;  %v13443_v12 = vld [vmem:[%s26463_s23 + $0xea8] sm:$0xf]  ;;  %v16908_v14 = vld [vmem:[%s26463_s23 + $0xdac] sm:$0xf]  ;;  %v13317_v47 = vld [vmem:[%s26463_s23 + $0xdb8] sm:$0xf0] }
 0x1de   :  { %4393 = vmatpush.bf16.msra.mxu2 %v13392_v24  ;;  %v13364_v55 = vor.u32 %v16922_v22, %v13363_v11  ;;  %v16912_v24 = vld [vmem:[%s26463_s23 + $0xdcc] sm:$0xf]  ;;  %v13445_v20 = vld [vmem:[%s26463_s23 + $0xeb8] sm:$0xf0]  ;;  %v16910_v11 = vld [vmem:[%s26463_s23 + $0xdb4] sm:$0xf0] }
 0x1df   :  { %4372 = vmatpush.bf16.msra.mxu0 %v13296_v34  ;;  %v2779_v36 = vpop.f32.mrf.mxu0  ;;  %v13243_v34 = vld [vmem:[%s26463_s23 + $0xd20] sm:$0xf]  ;;  %4426 = vmatpush.bf16.msrb.mxu3 %v13476_v53  ;;  %v21023_v58 = vadd.f32 %v2761_v50, %v20559_v39  ;;  %v13349_v39 = vld [vmem:[%s26463_s23 + $0xdf8] sm:$0xf0]  ;;  %v13336_v26 = vor.u32 %v16912_v24, %v13333_v52  ;;  %v16940_v53 = vld [vmem:[%s26463_s23 + $0xeac] sm:$0xf]  ;;  %v13320_v50 = vor.u32 %v16908_v14, %v13317_v47 }
 0x1e0   :  { %4335 = vmatpush.bf16.msra.mxu1 %v13276_v8  ;;  %v13244_v16 = vor.u32 %v16893_v40, %v13243_v34  ;;  %v2799_v61 = vadd.f32 %v2798_v19, %v2779_v36  ;;  %v13352_v41 = vor.u32 %v16916_v59, %v13349_v39  ;;  %v13331_v36 = vld [vmem:[%s26463_s23 + $0xdc8] sm:$0xf]  ;;  %v16932_v52 = vld [vmem:[%s26463_s23 + $0xe6c] sm:$0xf] }
 0x1e1   :  { %v13427_v40 = vld [vmem:[%s26463_s23 + $0xe88] sm:$0xf]  ;;  %v16896_v14 = vld [vmem:[%s26463_s23 + $0xd4c] sm:$0xf] }
 0x1e2   :  { %4394 = vmatpush.bf16.msra.mxu2 %v13376_v57  ;;  %v21050_v0 = vadd.f32 %v2799_v61, %v20586_v25  ;;  %v13411_v19 = vld [vmem:[%s26463_s23 + $0xe68] sm:$0xf]  ;;  %v16936_v61 = vld [vmem:[%s26463_s23 + $0xe8c] sm:$0xf] }
 0x1e3   :  { %4373 = vmatpush.bf16.msra.mxu0 %v13280_v63  ;;  %v2743_v7 = vpop.f32.mrf.mxu1  ;;  %v13459_v63 = vld [vmem:[%s26463_s23 + $0xec8] sm:$0xf]  ;;  %v16928_v47 = vld [vmem:[%s26463_s23 + $0xe4c] sm:$0xf] }
 0x1e4   :  { %4336 = vmatpush.bf16.msra.mxu1 %v13260_v29  ;;  %v13460_v60 = vor.u32 %v16946_v18, %v13459_v63  ;;  %v2762_v28 = vpop.f32.mrf.mxu3  ;;  %v16944_v29 = vld [vmem:[%s26463_s23 + $0xecc] sm:$0xf]  ;;  %v2800_v34 = vpop.f32.mrf.mxu2  ;;  %v16934_v63 = vld [vmem:[%s26463_s23 + $0xe74] sm:$0xf0] }
 0x1e5   :  { %v2763_v2 = vadd.f32 %v2762_v28, %v2743_v7  ;;  %v13464_v31 = vor.u32 %v16944_v29, %v13461_v38  ;;  %v13448_v7 = vor.u32 %v16940_v53, %v13445_v20  ;;  %v16904_v18 = vld [vmem:[%s26463_s23 + $0xd8c] sm:$0xf]  ;;  %v13413_v29 = vld [vmem:[%s26463_s23 + $0xe78] sm:$0xf0]  ;;  %v16887_v38 = vld [vmem:[%s26464_s24 + $0xe4] sm:$0xf] }
 0x1e6   :  { %4427 = vmatpush.bf16.msrb.mxu3 %v13460_v60  ;;  %4464 = vmatpush.bf16.msrb.mxu2 %v13480_v51  ;;  %v13397_v53 = vld [vmem:[%s26463_s23 + $0xe58] sm:$0xf0] }
 0x1e7   :  { %4374 = vmatpush.bf16.msra.mxu0 %v13264_v42  ;;  %v2781_v8 = vpop.f32.mrf.mxu0  ;;  %v16942_v42 = vld [vmem:[%s26463_s23 + $0xeb4] sm:$0xf0]  ;;  %v21077_v57 = vadd.f32 %v2763_v2, %v20613_v9 }
 0x1e8   :  { %4337 = vmatpush.bf16.msra.mxu1 %v13244_v16  ;;  %v13444_v25 = vor.u32 %v16942_v42, %v13443_v12  ;;  %v16938_v16 = vld [vmem:[%s26463_s23 + $0xe94] sm:$0xf0]  ;;  %v2801_v13 = vadd.f32 %v2800_v34, %v2781_v8  ;;  %v13429_v8 = vld [vmem:[%s26463_s23 + $0xe98] sm:$0xf0]  ;;  %v16900_v42 = vld [vmem:[%s26463_s23 + $0xd6c] sm:$0xf] }
 0x1e9   :  { %v13428_v9 = vor.u32 %v16938_v16, %v13427_v40  ;;  %v13432_v35 = vor.u32 %v16936_v61, %v13429_v8  ;;  %v16930_v12 = vld [vmem:[%s26463_s23 + $0xe54] sm:$0xf0]  ;;  %v16888_v34 = vld [vmem:[%s26464_s24 + $0xe4] sm:$0xf0]  ;;  %v13253_v61 = vld [vmem:[%s26463_s23 + $0xd38] sm:$0xf0] }
 0x1ea   :  { %4428 = vmatpush.bf16.msrb.mxu3 %v13444_v25  ;;  %4465 = vmatpush.bf16.msrb.mxu2 %v13464_v31  ;;  %v21107_v22 = vadd.f32 %v2801_v13, %v20643_v6  ;;  %v13412_v6 = vor.u32 %v16934_v63, %v13411_v19  ;;  %v16902_v31 = vld [vmem:[%s26463_s23 + $0xd74] sm:$0xf0]  ;;  %v16924_v8 = vld [vmem:[%s26463_s23 + $0xe2c] sm:$0xf] }
 0x1eb   :  { %4375 = vmatpush.bf16.msra.mxu0 %v13248_v45  ;;  %v2746_v49 = vpop.f32.mrf.mxu1  ;;  %v16914_v45 = vld [vmem:[%s26463_s23 + $0xdd4] sm:$0xf0]  ;;  %3861 = vmatmul.bf16.gmra.mxu1 %v20858_v46 }
 0x1ec   :  { %4406 = vmatpush.bf16.msrb.mxu1 %v13364_v55  ;;  %v13332_v27 = vor.u32 %v16914_v45, %v13331_v36  ;;  %3899 = vmatmul.bf16.gmra.mxu0 %v20858_v46  ;;  %v2765_v59 = vpop.f32.mrf.mxu3  ;;  %v13301_v46 = vld [vmem:[%s26463_s23 + $0xd98] sm:$0xf0]  ;;  %v2803_v37 = vpop.f32.mrf.mxu2  ;;  %v13229_v45 = vld [vmem:[%s26464_s24 + $0xe8] sm:$0xf0]  ;;  %v16926_v16 = vld [vmem:[%s26463_s23 + $0xe34] sm:$0xf0] }
 0x1ed   :  { %13158 = vmatmul.msk.bf16.gmra.mxu3 %vm515_vm0, %v20850_v62  ;;  %13160 = vmatmul.msk.bf16.gmra.mxu2 %vm515_vm0, %v20850_v62  ;;  %v2766_v60 = vadd.f32 %v2765_v59, %v2746_v49  ;;  %v13304_v4 = vor.u32 %v16904_v18, %v13301_v46  ;;  %v13299_v62 = vld [vmem:[%s26463_s23 + $0xd88] sm:$0xf]  ;;  %v13416_v49 = vor.u32 %v16932_v52, %v13413_v29  ;;  %v16898_v19 = vld [vmem:[%s26463_s23 + $0xd54] sm:$0xf0]  ;;  %v16892_v46 = vld [vmem:[%s26463_s23 + $0xd2c] sm:$0xf] }
 0x1ee   :  { %4429 = vmatpush.bf16.msrb.mxu3 %v13428_v9  ;;  %4466 = vmatpush.bf16.msrb.mxu2 %v13448_v7  ;;  %v13269_v9 = vld [vmem:[%s26463_s23 + $0xd58] sm:$0xf0] }
 0x1ef   :  { %4444 = vmatpush.bf16.msrb.mxu0 %v13368_v56  ;;  %v2784_v48 = vpop.f32.mrf.mxu0  ;;  %v13315_v56 = vld [vmem:[%s26463_s23 + $0xda8] sm:$0xf]  ;;  %v21137_v5 = vadd.f32 %v2766_v60, %v20673_v33  ;;  %v13285_v33 = vld [vmem:[%s26463_s23 + $0xd78] sm:$0xf0] }
 0x1f0   :  { %4407 = vmatpush.bf16.msrb.mxu1 %v13348_v30  ;;  %v13316_v55 = vor.u32 %v16910_v11, %v13315_v56  ;;  %v13395_v30 = vld [vmem:[%s26463_s23 + $0xe48] sm:$0xf]  ;;  %v2804_v24 = vadd.f32 %v2803_v37, %v2784_v48  ;;  %v13288_v2 = vor.u32 %v16900_v42, %v13285_v33  ;;  %v13272_v56 = vor.u32 %v16896_v14, %v13269_v9  ;;  %v16890_v33 = vld [vmem:[%s26464_s24 + $0xf4] sm:$0x30] }
 0x1f1   :  { %v13396_v25 = vor.u32 %v16930_v12, %v13395_v30  ;;  %v13400_v11 = vor.u32 %v16928_v47, %v13397_v53 }
 0x1f2   :  { %4430 = vmatpush.bf16.msrb.mxu3 %v13412_v6  ;;  %4467 = vmatpush.bf16.msrb.mxu2 %v13432_v35  ;;  %v21167_v36 = vadd.f32 %v2804_v24, %v20703_v44  ;;  %v13379_v44 = vld [vmem:[%s26463_s23 + $0xe28] sm:$0xf] }
 0x1f3   :  { %4445 = vmatpush.bf16.msrb.mxu0 %v13352_v41  ;;  %v2748_v39 = vpop.f32.mrf.mxu1  ;;  %v16906_v41 = vld [vmem:[%s26463_s23 + $0xd94] sm:$0xf0]  ;;  %v13380_v48 = vor.u32 %v16926_v16, %v13379_v44 }
 0x1f4   :  { %4408 = vmatpush.bf16.msrb.mxu1 %v13332_v27  ;;  %v13300_v51 = vor.u32 %v16906_v41, %v13299_v62  ;;  %v13227_v27 = vld [vmem:[%s26464_s24 + $0xe0] sm:$0xf]  ;;  %v2767_v13 = vpop.f32.mrf.mxu3  ;;  %v2805_v6 = vpop.f32.mrf.mxu2  ;;  %v13251_v62 = vld [vmem:[%s26463_s23 + $0xd28] sm:$0xf]  ;;  %v16894_v41 = vld [vmem:[%s26463_s23 + $0xd34] sm:$0xf0] }
 0x1f5   :  { %v2768_v20 = vadd.f32 %v2767_v13, %v2748_v39  ;;  %v13228_v63 = vor.u32 %v16888_v34, %v13227_v27  ;;  %v13252_v37 = vor.u32 %v16894_v41, %v13251_v62 }
 0x1f6   :  { %4431 = vmatpush.bf16.msrb.mxu3 %v13396_v25  ;;  %4468 = vmatpush.bf16.msrb.mxu2 %v13416_v49  ;;  %v13235_v25 = vld [vmem:[%s26464_s24 + $0xf0] sm:$0xf] }
 0x1f7   :  { %4446 = vmatpush.bf16.msrb.mxu0 %v13336_v26  ;;  %v2786_v28 = vpop.f32.mrf.mxu0  ;;  %v13283_v26 = vld [vmem:[%s26463_s23 + $0xd68] sm:$0xf]  ;;  %v21207_v59 = vadd.f32 %v2768_v20, %v20743_v17  ;;  %v13256_v17 = vor.u32 %v16892_v46, %v13253_v61 }
 0x1f8   :  { %4409 = vmatpush.bf16.msrb.mxu1 %v13316_v55  ;;  %v13284_v40 = vor.u32 %v16902_v31, %v13283_v26  ;;  %v13267_v55 = vld [vmem:[%s26463_s23 + $0xd48] sm:$0xf]  ;;  %v2806_v60 = vadd.f32 %v2805_v6, %v2786_v28  ;;  %v13237_v28 = vld [vmem:[%s26464_s24 + $0xf8] sm:$0x30] }
 0x1f9   :  { %v13268_v18 = vor.u32 %v16898_v19, %v13267_v55 }
 0x1fa   :  { %4432 = vmatpush.bf16.msrb.mxu3 %v13380_v48  ;;  %4469 = vmatpush.bf16.msrb.mxu2 %v13400_v11 }
 0x1fb   :  { %4447 = vmatpush.bf16.msrb.mxu0 %v13320_v50  ;;  %v21196_v50 = vor.u32 %v16887_v38, %v13229_v45  ;;  %v21198_v7 = vpop.f32.mrf.mxu1  ;;  %4338 = vmatmul.bf16.vlgmr.msra.gmra.mxu1 %v13228_v63 }
 0x1fc   :  { %4410 = vmatpush.bf16.msrb.mxu1 %v13300_v51  ;;  %v21232_v51 = vadd.f32 %v2806_v60, %v20767_v32  ;;  %4376 = vmatmul.bf16.vlgmr.msra.gmra.mxu0 %v13228_v63  ;;  %v16889_v32 = vld [vmem:[%s26464_s24 + $0xf4] sm:$0xf] }
 0x1fd   :  { %13481 = vmatmul.msk.bf16.vlgmr.msra.gmra.mxu3 %vm515_vm0, %v21196_v50  ;;  %13483 = vmatmul.msk.bf16.vlgmr.msra.gmra.mxu2 %vm515_vm0, %v21196_v50  ;;  %v13240_v29 = vor.u32 %v16889_v32, %v13237_v28 }
 0x1ff   :  { %4448 = vmatpush.bf16.msrb.mxu0 %v13304_v4  ;;  %v21218_v39 = vpop.f32.mrf.mxu0  ;;  %v13381_v4 = vld [vmem:[%s26463_s23 + $0xe38] sm:$0xf0] }
 0x200   :  { %4411 = vmatpush.bf16.msrb.mxu1 %v13284_v40  ;;  %v13384_v35 = vor.u32 %v16924_v8, %v13381_v4  ;;  %v21234_v30 = vpop.f32.mrf.mxu3  ;;  %v21240_v42 = vpop.f32.mrf.mxu2 }
 0x202   :  { %4470 = vmatpush.bf16.msrb.mxu2 %v13384_v35 }
 0x203   :  { %4449 = vmatpush.bf16.msrb.mxu0 %v13288_v2  ;;  %v21238_v12 = vpop.f32.mrf.mxu1  ;;  %v13236_v2 = vor.u32 %v16890_v33, %v13235_v25 }
 0x204   :  { %4412 = vmatpush.bf16.msrb.mxu1 %v13268_v18 }
 0x207   :  { %4450 = vmatpush.bf16.msrb.mxu0 %v13272_v56  ;;  %v3263_v24 = vpop.f32.mrf.mxu0 }
 0x208   :  { %4413 = vmatpush.bf16.msrb.mxu1 %v13252_v37  ;;  %v21254_v52 = vpop.f32.mrf.mxu3  ;;  %v3282_v49 = vpop.f32.mrf.mxu2 }
 0x209   :  { %v3283_v26 = vadd.f32 %v3282_v49, %v3263_v24 }
 0x20b   :  { %4451 = vmatpush.bf16.msrb.mxu0 %v13256_v17  ;;  %v3228_v38 = vpop.f32.mrf.mxu1  ;;  %4343 = vmatmul.bf16.gmra.mxu1 %v13236_v2  ;;  %v3371_v45 = vadd.f32 %v3283_v26, %v20891_v3 }
 0x20c   :  { %4381 = vmatmul.bf16.gmra.mxu0 %v13236_v2 }
 0x20d   :  { %13482 = vmatmul.msk.bf16.gmra.mxu3 %vm515_vm0, %v13240_v29  ;;  %13484 = vmatmul.msk.bf16.gmra.mxu2 %vm515_vm0, %v13240_v29 }
 0x20f   :  { %v21256_v31 = vpop.f32.mrf.mxu0 }
 0x210   :  { %v3247_v27 = vpop.f32.mrf.mxu3  ;;  %v21264_v16 = vpop.f32.mrf.mxu2 }
 0x211   :  { %v3248_v34 = vadd.f32 %v3247_v27, %v3228_v38 }
 0x213   :  { %v21261_v40 = vpop.f32.mrf.mxu1  ;;  %v3374_v44 = vadd.f32 %v3248_v34, %v20921_v43 }
 0x217   :  { %v3268_v14 = vpop.f32.mrf.mxu0 }
 0x218   :  { %v21266_v13 = vpop.f32.mrf.mxu3  ;;  %v3287_v9 = vpop.f32.mrf.mxu2 }
 0x219   :  { %v3288_v47 = vadd.f32 %v3287_v9, %v3268_v14 }
 0x21b   :  { %v3299_v48 = vpop.f32.mrf.mxu1  ;;  %4414 = vmatmul.bf16.vlgmr.msrb.gmra.mxu1 %v13228_v63  ;;  %v3379_v3 = vadd.f32 %v3288_v47, %v20999_v21 }
 0x21c   :  { %4452 = vmatmul.bf16.vlgmr.msrb.gmra.mxu0 %v13228_v63 }
 0x21d   :  { %13485 = vmatmul.msk.bf16.vlgmr.msrb.gmra.mxu3 %vm515_vm0, %v21196_v50  ;;  %13487 = vmatmul.msk.bf16.vlgmr.msrb.gmra.mxu2 %vm515_vm0, %v21196_v50 }
 0x21f   :  { %v21268_v53 = vpop.f32.mrf.mxu0 }
 0x220   :  { %v3318_v20 = vpop.f32.mrf.mxu3  ;;  %v21278_v55 = vpop.f32.mrf.mxu2 }
 0x221   :  { %v3319_v43 = vadd.f32 %v3318_v20, %v3299_v48 }
 0x223   :  { %v21275_v56 = vpop.f32.mrf.mxu1  ;;  %v3368_v11 = vadd.f32 %v3319_v43, %v21023_v58 }
 0x227   :  { %v3339_v19 = vpop.f32.mrf.mxu0 }
 0x228   :  { %v21280_v18 = vpop.f32.mrf.mxu3  ;;  %v3358_v46 = vpop.f32.mrf.mxu2 }
 0x229   :  { %v3359_v61 = vadd.f32 %v3358_v46, %v3339_v19 }
 0x22b   :  { %v3304_v6 = vpop.f32.mrf.mxu1  ;;  %4419 = vmatmul.bf16.gmra.mxu1 %v13236_v2  ;;  %v3373_v21 = vadd.f32 %v3359_v61, %v21107_v22  ;;  %v3243_v22 = vadd.f32 %v21234_v30, %v21198_v7 }
 0x22c   :  { %4457 = vmatmul.bf16.gmra.mxu0 %v13236_v2 }
 0x22d   :  { %13486 = vmatmul.msk.bf16.gmra.mxu3 %vm515_vm0, %v13240_v29  ;;  %13488 = vmatmul.msk.bf16.gmra.mxu2 %vm515_vm0, %v13240_v29  ;;  %v3366_v25 = vadd.f32 %v3243_v22, %v20791_v54 }
 0x22f   :  { %v21282_v8 = vpop.f32.mrf.mxu0 }
 0x230   :  { %v3323_v50 = vpop.f32.mrf.mxu3  ;;  %v21290_v17 = vpop.f32.mrf.mxu2 }
 0x231   :  { %v3324_v58 = vadd.f32 %v3323_v50, %v3304_v6 }
 0x233   :  { %v21287_v63 = vpop.f32.mrf.mxu1  ;;  %v3376_v60 = vadd.f32 %v3324_v58, %v21137_v5 }
 0x237   :  { %v3344_v4 = vpop.f32.mrf.mxu0 }
 0x238   :  { %v21292_v35 = vpop.f32.mrf.mxu3  ;;  %v3363_v41 = vpop.f32.mrf.mxu2 }
 0x239   :  { %v3364_v37 = vadd.f32 %v3363_v41, %v3344_v4 }
 0x23b   :  { %v3781_v62 = vpop.f32.mrf.mxu1  ;;  %v21299_v32 = vadd.f32 %v3364_v37, %v21232_v51 }
 0x23d   :  { %26465 = vst [vmem:[#allocation5_spill] sm:$0xff] %v21299_v32 }
 0x23f   :  { %v21294_v24 = vpop.f32.mrf.mxu0 }
 0x240   :  { %v3800_v28 = vpop.f32.mrf.mxu3  ;;  %v21306_v38 = vpop.f32.mrf.mxu2 }
 0x241   :  { %v3801_v5 = vadd.f32 %v3800_v28, %v3781_v62 }
 0x243   :  { %v21302_v33 = vpop.f32.mrf.mxu1  ;;  %v21304_v29 = vadd.f32 %v3801_v5, %v3366_v25 }
 0x247   :  { %v3821_v2 = vpop.f32.mrf.mxu0 }
 0x248   :  { %v21308_v49 = vpop.f32.mrf.mxu3  ;;  %v3840_v27 = vpop.f32.mrf.mxu2 }
 0x249   :  { %v3841_v34 = vadd.f32 %v3840_v27, %v3821_v2 }
 0x24b   :  { %v3786_v26 = vpop.f32.mrf.mxu1  ;;  %v21312_v51 = vadd.f32 %v3841_v34, %v3371_v45 }
 0x24f   :  { %v21310_v7 = vpop.f32.mrf.mxu0 }
 0x250   :  { %v3805_v30 = vpop.f32.mrf.mxu3  ;;  %v21318_v9 = vpop.f32.mrf.mxu2 }
 0x251   :  { %v3806_v14 = vadd.f32 %v3805_v30, %v3786_v26  ;;  %v4758_v30 = vld [vmem:[%s26466_s21 + $0x78] sm:$0xff] }
 0x252   :  { %4802 = vmatpush.msra.mxu1 %v4758_v30  ;;  %v4770_v30 = vld [vmem:[%s26466_s21 + $0xd8] sm:$0xff] }
 0x253   :  { %v21314_v54 = vpop.f32.mrf.mxu1  ;;  %v21316_v48 = vadd.f32 %v3806_v14, %v3374_v44 }
 0x257   :  { %v3826_v47 = vpop.f32.mrf.mxu0 }
 0x258   :  { %v21320_v20 = vpop.f32.mrf.mxu3  ;;  %v3845_v19 = vpop.f32.mrf.mxu2 }
 0x259   :  { %v3846_v6 = vadd.f32 %v3845_v19, %v3826_v47  ;;  %v4774_v47 = vld [vmem:[%s26466_s21 + $0xf8] sm:$0xff]  ;;  %v4755_v19 = vld [vmem:[%s26466_s21 + $0x60] sm:$0xff] }
 0x25a   :  { %4822 = vmatpush.msra.mxu3 %v4774_v47  ;;  %v4769_v47 = vld [vmem:[%s26466_s21 + $0xd0] sm:$0xff] }
 0x25b   :  { %v3857_v43 = vpop.f32.mrf.mxu1  ;;  %v21324_v61 = vadd.f32 %v3846_v6, %v3379_v3  ;;  %v4773_v6 = vld [vmem:[%s26466_s21 + $0xf0] sm:$0xff] }
 0x25c   :  { %4823 = vmatpush.msra.mxu3 %v4773_v6 }
 0x25f   :  { %v21322_v46 = vpop.f32.mrf.mxu0 }
 0x260   :  { %v3876_v45 = vpop.f32.mrf.mxu3  ;;  %v21330_v44 = vpop.f32.mrf.mxu2 }
 0x261   :  { %v3877_v50 = vadd.f32 %v3876_v45, %v3857_v43 }
 0x263   :  { %v21326_v58 = vpop.f32.mrf.mxu1  ;;  %v21328_v4 = vadd.f32 %v3877_v50, %v3368_v11 }
 0x267   :  { %v3897_v62 = vpop.f32.mrf.mxu0 }
 0x268   :  { %v21332_v41 = vpop.f32.mrf.mxu3  ;;  %v3916_v22 = vpop.f32.mrf.mxu2 }
 0x269   :  { %v3917_v28 = vadd.f32 %v3916_v22, %v3897_v62  ;;  %v4754_v62 = vld [vmem:[%s26466_s21 + $0x58] sm:$0xff]  ;;  %v4753_v22 = vld [vmem:[%s26466_s21 + $0x50] sm:$0xff] }
 0x26b   :  { %v3862_v37 = vpop.f32.mrf.mxu1  ;;  %v21336_v5 = vadd.f32 %v3917_v28, %v3373_v21  ;;  %v4757_v21 = vld [vmem:[%s26466_s21 + $0x70] sm:$0xff]  ;;  %v4771_v28 = vld [vmem:[%s26466_s21 + $0xe0] sm:$0xff] }
 0x26c   :  { %4803 = vmatpush.msra.mxu1 %v4757_v21 }
 0x26f   :  { %v21334_v25 = vpop.f32.mrf.mxu0 }
 0x270   :  { %v3881_v3 = vpop.f32.mrf.mxu3  ;;  %v21342_v11 = vpop.f32.mrf.mxu2 }
 0x271   :  { %v3882_v2 = vadd.f32 %v3881_v3, %v3862_v37  ;;  %v4772_v37 = vld [vmem:[%s26466_s21 + $0xe8] sm:$0xff] }
 0x272   :  { %4824 = vmatpush.msra.mxu3 %v4772_v37  ;;  %v4750_v37 = vld [vmem:[%s26466_s21 + $0x38] sm:$0xff] }
 0x273   :  { %v21338_v26 = vpop.f32.mrf.mxu1  ;;  %v21340_v27 = vadd.f32 %v3882_v2, %v3376_v60  ;;  %v4756_v60 = vld [vmem:[%s26466_s21 + $0x68] sm:$0xff] }
 0x274   :  { %4804 = vmatpush.msra.mxu1 %v4756_v60  ;;  %4825 = vmatpush.msra.mxu3 %v4771_v28  ;;  %v4752_v2 = vld [vmem:[%s26466_s21 + $0x48] sm:$0xff]  ;;  %v4751_v60 = vld [vmem:[%s26466_s21 + $0x40] sm:$0xff]  ;;  %v3803_v28 = vadd.f32 %v21308_v49, %v21302_v33  ;;  %v4766_v33 = vld [vmem:[%s26466_s21 + $0xb8] sm:$0xff]  ;;  %v3281_v49 = vadd.f32 %v21240_v42, %v21218_v39  ;;  %v3286_v42 = vadd.f32 %v21264_v16, %v21256_v31 }
 0x275   :  { %v4745_v16 = vld [vmem:[%s26466_s21 + $0x10] sm:$0xff] }
 0x276   :  { %4805 = vmatpush.msra.mxu1 %v4755_v19  ;;  %4826 = vmatpush.msra.mxu3 %v4770_v30  ;;  %v3245_v19 = vadd.f32 %v21254_v52, %v21238_v12  ;;  %v4749_v12 = vld [vmem:[%s26466_s21 + $0x30] sm:$0xff]  ;;  %v4767_v52 = vld [vmem:[%s26466_s21 + $0xc0] sm:$0xff] }
 0x277   :  { %v21344_v34 = vpop.f32.mrf.mxu0 }
 0x278   :  { %v21352_v14 = vpop.f32.mrf.mxu3  ;;  %v21366_v45 = vpop.f32.mrf.mxu2  ;;  %4806 = vmatpush.msra.mxu1 %v4754_v62  ;;  %4827 = vmatpush.msra.mxu3 %v4769_v47 }
 0x27a   :  { %4807 = vmatpush.msra.mxu1 %v4753_v22  ;;  %v4768_v22 = vld [vmem:[%s26466_s21 + $0xc8] sm:$0xff] }
 0x27b   :  { %v4339_v43 = vpop.f32.mrf.mxu1  ;;  %4828 = vmatpush.msra.mxu3 %v4768_v22 }
 0x27c   :  { %4808 = vmatpush.msra.mxu1 %v4752_v2  ;;  %v3370_v2 = vadd.f32 %v3245_v19, %v20861_v10  ;;  %v4747_v10 = vld [vmem:[%s26466_s21 + $0x20] sm:$0xff]  ;;  %v4765_v19 = vld [vmem:[%s26466_s21 + $0xb0] sm:$0xff] }
 0x27d   :  { %4829 = vmatpush.msra.mxu3 %v4767_v52 }
 0x27e   :  { %4809 = vmatpush.msra.mxu1 %v4751_v60  ;;  %v4748_v60 = vld [vmem:[%s26466_s21 + $0x28] sm:$0xff]  ;;  %v3928_v47 = vadd.f32 %v3803_v28, %v3370_v2 }
 0x27f   :  { %v4377_v50 = vpop.f32.mrf.mxu0  ;;  %4830 = vmatpush.msra.mxu3 %v4766_v33  ;;  %v4744_v33 = vld [vmem:[%s26466_s21 + $0x8] sm:$0xff] }
 0x280   :  { %v4358_v3 = vpop.f32.mrf.mxu3  ;;  %v4396_v6 = vpop.f32.mrf.mxu2  ;;  %4810 = vmatpush.msra.mxu1 %v4750_v37 }
 0x281   :  { %v4359_v52 = vadd.f32 %v4358_v3, %v4339_v43  ;;  %4831 = vmatpush.msra.mxu3 %v4765_v19  ;;  %v4397_v43 = vadd.f32 %v4396_v6, %v4377_v50 }
 0x282   :  { %4811 = vmatpush.msra.mxu1 %v4749_v12  ;;  %v3839_v12 = vadd.f32 %v21306_v38, %v21294_v24  ;;  %v4764_v24 = vld [vmem:[%s26466_s21 + $0xa8] sm:$0xff]  ;;  %v3367_v38 = vadd.f32 %v3281_v49, %v20821_v23  ;;  %v3357_v49 = vadd.f32 %v21278_v55, %v21268_v53  ;;  %v4743_v53 = vld [vmem:[%s26466_s21] sm:$0xff]  ;;  %v3326_v55 = vadd.f32 %v21292_v35, %v21287_v63 }
 0x283   :  { %v4341_v21 = vpop.f32.mrf.mxu1  ;;  %4832 = vmatpush.msra.mxu3 %v4764_v24  ;;  %v21452_v23 = vadd.f32 %v4359_v52, %v21304_v29  ;;  %v4762_v29 = vld [vmem:[%s26466_s21 + $0x98] sm:$0xff]  ;;  %v3808_v52 = vadd.f32 %v21320_v20, %v21314_v54  ;;  %v3879_v63 = vadd.f32 %v21332_v41, %v21326_v58 }
 0x284   :  { %4812 = vmatpush.msra.mxu1 %v4748_v60  ;;  %v3925_v3 = vadd.f32 %v3839_v12, %v3367_v38 }
 0x286   :  { %4813 = vmatpush.msra.mxu1 %v4747_v10 }
 0x287   :  { %v4379_v62 = vpop.f32.mrf.mxu0 }
 0x288   :  { %v4360_v30 = vpop.f32.mrf.mxu3  ;;  %v4398_v39 = vpop.f32.mrf.mxu2 }
 0x289   :  { %v4361_v37 = vadd.f32 %v4360_v30, %v4341_v21  ;;  %v3250_v21 = vadd.f32 %v21266_v13, %v21261_v40  ;;  %v4399_v28 = vadd.f32 %v4398_v39, %v4379_v62  ;;  %v4746_v30 = vld [vmem:[%s26466_s21 + $0x18] sm:$0xff]  ;;  %v4763_v13 = vld [vmem:[%s26466_s21 + $0xa0] sm:$0xff]  ;;  %v3915_v39 = vadd.f32 %v21330_v44, %v21322_v46 }
 0x28a   :  { %4814 = vmatpush.msra.mxu1 %v4746_v30  ;;  %4833 = vmatpush.msra.mxu3 %v4763_v13  ;;  %v21513_v44 = vadd.f32 %v3326_v55, %v21207_v59  ;;  %v21527_v59 = vadd.f32 %v21342_v11, %v21334_v25 }
 0x28b   :  { %v4344_v22 = vpop.f32.mrf.mxu1  ;;  %v21425_v32 = vadd.f32 %v4361_v37, %v3928_v47  ;;  %v21443_v40 = vadd.f32 %v4399_v28, %v21312_v51  ;;  %v3375_v51 = vadd.f32 %v3286_v42, %v20948_v1  ;;  %v3378_v6 = vadd.f32 %v3250_v21, %v20975_v15 }
 0x28c   :  { %4815 = vmatpush.msra.mxu1 %v4745_v16  ;;  %v3321_v1 = vadd.f32 %v21280_v18, %v21275_v56  ;;  %v21472_v15 = vadd.f32 %v4397_v43, %v3925_v3  ;;  %4834 = vmatpush.msra.mxu3 %v4762_v29  ;;  %v3362_v37 = vadd.f32 %v21290_v17, %v21282_v8  ;;  %v4761_v56 = vld [vmem:[%s26466_s21 + $0x90] sm:$0xff] }
 0x28d   :  { %v21440_v31 = vmul.f32 %v21425_v32, %v21425_v32  ;;  %v4499_v50 = vsel %vm4498_vm1, %v21425_v32, 0.0  ;;  %v21460_v62 = vmul.f32 %v21443_v40, %v21443_v40  ;;  %v3844_v18 = vadd.f32 %v21318_v9, %v21310_v7 }
 0x28e   :  { %4816 = vmatpush.msra.mxu1 %v4744_v33  ;;  %v4500_v10 = vadd.f32 %v4499_v50, %v21452_v23  ;;  %v4534_v8 = vmul.f32 %v21452_v23, %v21452_v23  ;;  %v4507_v17 = vsel %vm4498_vm1, %v21443_v40, 0.0  ;;  %4835 = vmatpush.msra.mxu3 %v4761_v56  ;;  %v3369_v9 = vadd.f32 %v3357_v49, %v21050_v0  ;;  %v4759_v50 = vld [vmem:[%s26466_s21 + $0x80] sm:$0xff] }
 0x28f   :  { %v4382_v2 = vpop.f32.mrf.mxu0  ;;  %v4542_v19 = vsel %vm4498_vm1, %v21440_v31, 0.0  ;;  %v4550_v35 = vsel %vm4498_vm1, %v21460_v62, 0.0  ;;  %v4535_v42 = vmul.f32 %v21472_v15, %v21472_v15  ;;  %v3372_v30 = vadd.f32 %v3321_v1, %v21077_v57  ;;  %v4790_v57 = vld [vmem:[%s26466_s21 + $0x178] sm:$0xff] }
 0x290   :  { %v4363_v60 = vpop.f32.mrf.mxu3  ;;  %4817 = vmatpush.msra.mxu1 %v4743_v53  ;;  %v4543_v21 = vadd.f32 %v4542_v19, %v4534_v8  ;;  %v4501_v54 = vrot.slane %v4500_v10, 4  ;;  %v4508_v20 = vadd.f32 %v4507_v17, %v21472_v15  ;;  %v21510_v58 = vadd.f32 %v3362_v37, %v21167_v36  ;;  %4842 = vmatpush.msra.mxu0 %v4790_v57  ;;  %v4787_v8 = vld [vmem:[%s26466_s21 + $0x160] sm:$0xff] }
 0x291   :  { %v4364_v12 = vadd.f32 %v4363_v60, %v4344_v22  ;;  %v4401_v22 = vpop.f32.mrf.mxu2  ;;  %v3933_v0 = vadd.f32 %v3844_v18, %v3375_v51  ;;  %v4551_v41 = vadd.f32 %v4550_v35, %v4535_v42  ;;  %v3936_v24 = vadd.f32 %v3808_v52, %v3378_v6  ;;  %v4789_v51 = vld [vmem:[%s26466_s21 + $0x170] sm:$0xff] }
 0x292   :  { %v4402_v28 = vadd.f32 %v4401_v22, %v4382_v2  ;;  %v4760_v2 = vld [vmem:[%s26466_s21 + $0x88] sm:$0xff]  ;;  %v21521_v38 = vadd.f32 %v3915_v39, %v3369_v9  ;;  %v4544_v43 = vrot.slane %v4543_v21, 4  ;;  %v21539_v6 = vadd.f32 %v4501_v54, %v4500_v10  ;;  %4843 = vmatpush.msra.mxu0 %v4789_v51  ;;  %v4786_v9 = vld [vmem:[%s26466_s21 + $0x158] sm:$0xff] }
 0x293   :  { %v4346_v47 = vpop.f32.mrf.mxu1  ;;  %v21507_v46 = vadd.f32 %v4364_v12, %v21316_v48  ;;  %v21523_v48 = vadd.f32 %v3879_v63, %v3372_v30  ;;  %4836 = vmatpush.msra.mxu3 %v4760_v2  ;;  %v4509_v60 = vrot.slane %v4508_v20, 4  ;;  %v4588_v11 = vrot.slane %v21425_v32, 6  ;;  %v4785_v2 = vld [vmem:[%s26466_s21 + $0x150] sm:$0xff] }
 0x294   :  { %v21529_v16 = vadd.f32 %v4402_v28, %v3933_v0  ;;  %v4669_v33 = vrot.slane %v21440_v31, 6  ;;  %v4552_v29 = vrot.slane %v4551_v41, 4  ;;  %v4591_v37 = vrot.slane %v21443_v40, 6 }
 0x295   :  { %v4649_v25 = vmul.f32 %v21507_v46, %v21507_v46  ;;  %4837 = vmatpush.msra.mxu3 %v4759_v50  ;;  %v4672_v10 = vrot.slane %v21460_v62, 6  ;;  %v4589_v19 = vrot.slane %v21507_v46, 6  ;;  %v4545_v18 = vadd.f32 %v4544_v43, %v4543_v21 }
 0x296   :  { %v4650_v53 = vmul.f32 %v21529_v16, %v21529_v16  ;;  %v4510_v62 = vadd.f32 %v4509_v60, %v4508_v20  ;;  %v4503_v52 = vrot.slane %v21539_v6, 2  ;;  %v4553_v39 = vadd.f32 %v4552_v29, %v4551_v41  ;;  %v4784_v29 = vld [vmem:[%s26466_s21 + $0x148] sm:$0xff] }
 0x297   :  { %v4384_v7 = vpop.f32.mrf.mxu0  ;;  %v4670_v17 = vrot.slane %v4649_v25, 6  ;;  %v4592_v63 = vrot.slane %v21529_v16, 6  ;;  %v4590_v42 = vsel %vm4587_vm2, %v4588_v11, %v4589_v19  ;;  %v4546_v41 = vrot.slane %v4545_v18, 2 }
 0x298   :  { %v4365_v36 = vpop.f32.mrf.mxu3  ;;  %v4673_v54 = vrot.slane %v4650_v53, 6 }
 0x299   :  { %v4366_v13 = vadd.f32 %v4365_v36, %v4346_v47  ;;  %v4403_v1 = vpop.f32.mrf.mxu2  ;;  %v4788_v47 = vld [vmem:[%s26466_s21 + $0x168] sm:$0xff]  ;;  %v4671_v57 = vsel %vm4587_vm2, %v4669_v33, %v4670_v17  ;;  %v4593_v50 = vsel %vm4587_vm2, %v4591_v37, %v4592_v63 }
 0x29a   :  { %v4404_v12 = vadd.f32 %v4403_v1, %v4384_v7  ;;  %4844 = vmatpush.msra.mxu0 %v4788_v47  ;;  %v4511_v1 = vrot.slane %v4510_v62, 2 }
 0x29b   :  { %v21531_v3 = vpop.f32.mrf.mxu1  ;;  %v21545_v49 = vadd.f32 %v4366_v13, %v3936_v24 }
 0x29c   :  { %v21564_v22 = vadd.f32 %v4404_v12, %v21324_v61  ;;  %4845 = vmatpush.msra.mxu0 %v4787_v8  ;;  %v4674_v12 = vsel %vm4587_vm2, %v4672_v10, %v4673_v54  ;;  %v21597_v8 = vadd.f32 %v21527_v59, %v21510_v58 }
 0x29d   :  { %v4600_v31 = vrot.slane %v21545_v49, 6  ;;  %v4653_v56 = vmul.f32 %v21545_v49, %v21545_v49 }
 0x29e   :  { %v4602_v61 = vrot.slane %v21564_v22, 6  ;;  %v4654_v28 = vmul.f32 %v21564_v22, %v21564_v22  ;;  %4846 = vmatpush.msra.mxu0 %v4786_v9  ;;  %v4547_v9 = vadd.f32 %v4546_v41, %v4545_v18  ;;  %v4781_v18 = vld [vmem:[%s26466_s21 + $0x130] sm:$0xff] }
 0x29f   :  { %v21558_v55 = vpop.f32.mrf.mxu0  ;;  %v4601_v35 = vsel %vm4587_vm2, %v4589_v19, %v4600_v31  ;;  %v4681_v7 = vrot.slane %v4653_v56, 6  ;;  %v4554_v19 = vrot.slane %v4553_v39, 2  ;;  %v4783_v56 = vld [vmem:[%s26466_s21 + $0x140] sm:$0xff] }
 0x2a0   :  { %v4616_v21 = vsel %vm4498_vm1, %v4601_v35, 0.0  ;;  %v4434_v30 = vpop.f32.mrf.mxu3  ;;  %v4603_v36 = vsel %vm4587_vm2, %v4592_v63, %v4602_v61  ;;  %v4683_v43 = vrot.slane %v4654_v28, 6  ;;  %4847 = vmatpush.msra.mxu0 %v4785_v2  ;;  %v4782_v61 = vld [vmem:[%s26466_s21 + $0x138] sm:$0xff] }
 0x2a1   :  { %v4617_v20 = vadd.f32 %v4616_v21, %v4590_v42  ;;  %v4682_v0 = vsel %vm4587_vm2, %v4670_v17, %v4681_v7  ;;  %v4624_v25 = vsel %vm4498_vm1, %v4603_v36, 0.0  ;;  %v4472_v11 = vpop.f32.mrf.mxu2  ;;  %v21601_v17 = vadd.f32 %v21352_v14, %v21338_v26 }
 0x2a2   :  { %v4697_v24 = vsel %vm4498_vm1, %v4682_v0, 0.0  ;;  %v4625_v33 = vadd.f32 %v4624_v25, %v4593_v50  ;;  %v4684_v47 = vsel %vm4587_vm2, %v4673_v54, %v4683_v43  ;;  %4848 = vmatpush.msra.mxu0 %v4784_v29  ;;  %v4504_v7 = vadd.f32 %v4503_v52, %v21539_v6  ;;  %v4780_v43 = vld [vmem:[%s26466_s21 + $0x128] sm:$0xff]  ;;  %v4778_v29 = vld [vmem:[%s26466_s21 + $0x118] sm:$0xff] }
 0x2a3   :  { %v4417_v13 = vpop.f32.mrf.mxu1  ;;  %v4618_v51 = vrot.slane %v4617_v20, 4  ;;  %v4698_v60 = vadd.f32 %v4697_v24, %v4671_v57  ;;  %v4705_v37 = vsel %vm4498_vm1, %v4684_v47, 0.0  ;;  %v21607_v54 = vadd.f32 %v4511_v1, %v4510_v62  ;;  %v4796_v1 = vld [vmem:[%s26466_s21 + $0x1a8] sm:$0xff] }
 0x2a4   :  { %v4626_v63 = vrot.slane %v4625_v33, 4  ;;  %v4706_v35 = vadd.f32 %v4705_v37, %v4674_v12  ;;  %4849 = vmatpush.msra.mxu0 %v4783_v56  ;;  %v21609_v26 = vadd.f32 %v4554_v19, %v4553_v39  ;;  %v4473_v14 = vadd.f32 %v4472_v11, %v21558_v55 }
 0x2a5   :  { %v4699_v53 = vrot.slane %v4698_v60, 4  ;;  %v4619_v31 = vadd.f32 %v4618_v51, %v4617_v20  ;;  %v21617_v52 = vadd.f32 %v21366_v45, %v21344_v34  ;;  %v4435_v62 = vadd.f32 %v4434_v30, %v21531_v3  ;;  %v4798_v34 = vld [vmem:[%s26466_s21 + $0x1b8] sm:$0xff]  ;;  %v4797_v51 = vld [vmem:[%s26466_s21 + $0x1b0] sm:$0xff] }
 0x2a6   :  { %v4627_v28 = vadd.f32 %v4626_v63, %v4625_v33  ;;  %v4707_v58 = vrot.slane %v4706_v35, 4  ;;  %4850 = vmatpush.msra.mxu0 %v4782_v61  ;;  %v4505_v57 = vrot.slane %v4504_v7, 1  ;;  %v4548_v3 = vrot.slane %v4547_v9, 1  ;;  %4870 = vmatpush.msra.mxu2 %v4798_v34 }
 0x2a7   :  { %v4455_v10 = vpop.f32.mrf.mxu0  ;;  %v4620_v42 = vrot.slane %v4619_v31, 2  ;;  %v4700_v21 = vadd.f32 %v4699_v53, %v4698_v60  ;;  %v21636_v60 = vadd.f32 %v4473_v14, %v21521_v38  ;;  %v4513_v25 = vrot.slane %v21607_v54, 1 }
 0x2a8   :  { %v4436_v59 = vpop.f32.mrf.mxu3  ;;  %v4708_v41 = vadd.f32 %v4707_v58, %v4706_v35  ;;  %v4628_v2 = vrot.slane %v4627_v28, 2  ;;  %4851 = vmatpush.msra.mxu0 %v4781_v18  ;;  %v4556_v11 = vrot.slane %v21609_v26, 1  ;;  %v21647_v33 = vadd.f32 %v4435_v62, %v21328_v4  ;;  %4871 = vmatpush.msra.mxu2 %v4797_v51  ;;  %v4777_v4 = vld [vmem:[%s26466_s21 + $0x110] sm:$0xff]  ;;  %v4776_v58 = vld [vmem:[%s26466_s21 + $0x108] sm:$0xff] }
 0x2a9   :  { %v4437_v20 = vadd.f32 %v4436_v59, %v4417_v13  ;;  %v4621_v0 = vadd.f32 %v4620_v42, %v4619_v31  ;;  %v4701_v6 = vrot.slane %v4700_v21, 2  ;;  %v4474_v55 = vpop.f32.mrf.mxu2  ;;  %v4506_v53 = vadd.f32 %v4505_v57, %v4504_v7  ;;  %v4795_v31 = vld [vmem:[%s26466_s21 + $0x1a0] sm:$0xff]  ;;  %v4792_v51 = vld [vmem:[%s26466_s21 + $0x188] sm:$0xff] }
 0x2aa   :  { %v4475_v45 = vadd.f32 %v4474_v55, %v4455_v10  ;;  %v4629_v30 = vadd.f32 %v4628_v2, %v4627_v28  ;;  %v4709_v50 = vrot.slane %v4708_v41, 2  ;;  %4852 = vmatpush.msra.mxu0 %v4780_v43  ;;  %v4549_v63 = vadd.f32 %v4548_v3, %v4547_v9  ;;  %4872 = vmatpush.msra.mxu2 %v4796_v1  ;;  %v4794_v9 = vld [vmem:[%s26466_s21 + $0x198] sm:$0xff]  ;;  %v4775_v2 = vld [vmem:[%s26466_s21 + $0x100] sm:$0xff] }
 0x2ab   :  { %v21621_v39 = vadd.f32 %v4437_v20, %v21523_v48  ;;  %v4622_v24 = vrot.slane %v4621_v0, 1  ;;  %v4702_v36 = vadd.f32 %v4701_v6, %v4700_v21  ;;  %v4420_v13 = vpop.f32.mrf.mxu1  ;;  %v4779_v48 = vld [vmem:[%s26466_s21 + $0x120] sm:$0xff]  ;;  %v4537_v7 = vmul.f32 %v21636_v60, %v21636_v60 }
 0x2ac   :  { %v21652_v47 = vadd.f32 %v4475_v45, %v21336_v5  ;;  %4853 = vmatpush.msra.mxu0 %v4779_v48  ;;  %v4630_v35 = vrot.slane %v4629_v30, 1  ;;  %v4710_v10 = vadd.f32 %v4709_v50, %v4708_v41  ;;  %v4536_v59 = vmul.f32 %v21647_v33, %v21647_v33  ;;  %4873 = vmatpush.msra.mxu2 %v4795_v31 }
 0x2ad   :  { %v4515_v38 = vsel %vm4498_vm1, %v21621_v39, 0.0  ;;  %v4703_v19 = vrot.slane %v4702_v36, 1  ;;  %v21656_v12 = vmul.f32 %v21621_v39, %v21621_v39  ;;  %v4623_v37 = vadd.f32 %v4622_v24, %v4621_v0  ;;  %v4793_v24 = vld [vmem:[%s26466_s21 + $0x190] sm:$0xff] }
 0x2ae   :  { %v21666_v5 = vmul.f32 %v21652_v47, %v21652_v47  ;;  %4854 = vmatpush.msra.mxu0 %v4778_v29  ;;  %v4516_v42 = vadd.f32 %v4515_v38, %v21647_v33  ;;  %v4514_v14 = vadd.f32 %v4513_v25, %v21607_v54  ;;  %v4557_v20 = vadd.f32 %v4556_v11, %v21609_v26  ;;  %v26467_v29 = vld [vmem:[#allocation5_spill] sm:$0xff] }
 0x2af   :  { %v4458_v21 = vpop.f32.mrf.mxu0  ;;  %v4704_v28 = vadd.f32 %v4703_v19, %v4702_v36  ;;  %v4558_v0 = vsel %vm4498_vm1, %v21656_v12, 0.0  ;;  %v4526_v6 = vsel %vm4525_vm4, %v21652_v47, 0.0  ;;  %v4730_v41 = vadd.f32 %v4623_v37, %v4506_v53  ;;  %4874 = vmatpush.msra.mxu2 %v4794_v9  ;;  %v4791_v53 = vld [vmem:[%s26466_s21 + $0x180] sm:$0xff] }
 0x2b0   :  { %v4439_v56 = vpop.f32.mrf.mxu3  ;;  %4855 = vmatpush.msra.mxu0 %v4777_v4  ;;  %v4567_v54 = vsel %vm4525_vm4, %v21666_v5, 0.0  ;;  %v4631_v26 = vadd.f32 %v4630_v35, %v4629_v30  ;;  %v4711_v57 = vrot.slane %v4710_v10, 1  ;;  %v4524_v36 = vsel %vm4523_vm3, %v21636_v60, 0.0 }
 0x2b1   :  { %v4440_v61 = vadd.f32 %v4439_v56, %v4420_v13  ;;  %v4477_v18 = vpop.f32.mrf.mxu2  ;;  %v4734_v62 = vadd.f32 %v4704_v28, %v4549_v63  ;;  %v4566_v43 = vsel %vm4523_vm3, %v4537_v7, 0.0  ;;  %v4517_v34 = vrot.slane %v4516_v42, 4  ;;  %4875 = vmatpush.msra.mxu2 %v4793_v24 }
 0x2b2   :  { %v4478_v55 = vadd.f32 %v4477_v18, %v4458_v21  ;;  %4856 = vmatpush.msra.mxu0 %v4776_v58  ;;  %v4527_v13 = vadd.f32 %v4526_v6, %v4524_v36  ;;  %v4712_v48 = vadd.f32 %v4711_v57, %v4710_v10  ;;  %v4559_v25 = vadd.f32 %v4558_v0, %v4536_v59 }
 0x2b3   :  { %v21697_v45 = vadd.f32 %v4440_v61, %v21340_v27  ;;  %v4739_v30 = vsel %vm4738_vm5, %v4730_v41, %v4734_v62  ;;  %v4422_v50 = vpop.f32.mrf.mxu1  ;;  %v4568_v11 = vadd.f32 %v4567_v54, %v4566_v43  ;;  %v3938_v27 = vadd.f32 %v21601_v17, %v21513_v44  ;;  %4876 = vmatpush.msra.mxu2 %v4792_v51 }
 0x2b4   :  { %v21700_v3 = vadd.f32 %v4478_v55, %v21597_v8  ;;  %4857 = vmatpush.msra.mxu0 %v4775_v2  ;;  %4818 = vmatmul.f32.vlgmr.msra.gmra.mxu1 %v4739_v30  ;;  %v3939_v8 = vadd.f32 %v21617_v52, %v26467_v29  ;;  %v4731_v38 = vadd.f32 %v4631_v26, %v4514_v14  ;;  %v4594_v4 = vrot.slane %v21621_v39, 6 }
 0x2b5   :  { %v4735_v19 = vadd.f32 %v4712_v48, %v4557_v20  ;;  %v4518_v37 = vadd.f32 %v4517_v34, %v4516_v42  ;;  %v4651_v31 = vmul.f32 %v21697_v45, %v21697_v45  ;;  %v4528_v63 = vrot.slane %v4527_v13, 4  ;;  %4877 = vmatpush.msra.mxu2 %v4791_v53 }
 0x2b6   :  { %v4598_v44 = vrot.slane %v21700_v3, 6  ;;  %v4652_v17 = vmul.f32 %v21700_v3, %v21700_v3  ;;  %v4560_v35 = vrot.slane %v4559_v25, 4  ;;  %v4675_v10 = vrot.slane %v21656_v12, 6 }
 0x2b7   :  { %v4740_v52 = vsel %vm4738_vm5, %v4731_v38, %v4735_v19  ;;  %v4569_v7 = vrot.slane %v4568_v11, 4  ;;  %v4460_v42 = vpop.f32.mrf.mxu0  ;;  %v4597_v28 = vrot.slane %v21652_v47, 6  ;;  %v4678_v58 = vrot.slane %v21666_v5, 6 }
 0x2b8   :  { %v4441_v1 = vpop.f32.mrf.mxu3  ;;  %4838 = vmatmul.f32.vlgmr.msra.gmra.mxu3 %v4740_v52  ;;  %v4595_v9 = vrot.slane %v21697_v45, 6  ;;  %v4676_v14 = vrot.slane %v4651_v31, 6  ;;  %v4519_v0 = vrot.slane %v4518_v37, 2  ;;  %v4529_v6 = vadd.f32 %v4528_v63, %v4527_v13 }
 0x2b9   :  { %v4442_v56 = vadd.f32 %v4441_v1, %v4422_v50  ;;  %v4479_v61 = vpop.f32.mrf.mxu2  ;;  %v4599_v18 = vsel %vm4587_vm2, %v4597_v28, %v4598_v44  ;;  %v4679_v41 = vrot.slane %v4652_v17, 6  ;;  %v4570_v2 = vadd.f32 %v4569_v7, %v4568_v11 }
 0x2ba   :  { %v4480_v59 = vadd.f32 %v4479_v61, %v4460_v42  ;;  %v4561_v55 = vadd.f32 %v4560_v35, %v4559_v25  ;;  %v4596_v26 = vsel %vm4587_vm2, %v4594_v4, %v4595_v9  ;;  %v4677_v43 = vsel %vm4587_vm2, %v4675_v10, %v4676_v14 }
 0x2bb   :  { %v21721_v21 = vadd.f32 %v4442_v56, %v3938_v27  ;;  %v4640_v34 = vsel %vm4523_vm3, %v4599_v18, 0.0  ;;  %v4680_v50 = vsel %vm4587_vm2, %v4678_v58, %v4679_v41  ;;  %v4530_v56 = vrot.slane %v4529_v6, 2 }
 0x2bc   :  { %v21730_v62 = vadd.f32 %v4480_v59, %v3939_v8  ;;  %v4562_v8 = vrot.slane %v4561_v55, 2  ;;  %v4721_v19 = vsel %vm4523_vm3, %v4680_v50, 0.0  ;;  %v4571_v63 = vrot.slane %v4570_v2, 2 }
 0x2bd   :  { %v4604_v20 = vrot.slane %v21721_v21, 6  ;;  %v4655_v12 = vmul.f32 %v21721_v21, %v21721_v21 }
 0x2be   :  { %v4606_v24 = vrot.slane %v21730_v62, 6  ;;  %v4656_v36 = vmul.f32 %v21730_v62, %v21730_v62  ;;  %v4563_v35 = vadd.f32 %v4562_v8, %v4561_v55 }
 0x2bf   :  { %v4605_v54 = vsel %vm4587_vm2, %v4595_v9, %v4604_v20  ;;  %v4685_v5 = vrot.slane %v4655_v12, 6  ;;  %v4531_v9 = vadd.f32 %v4530_v56, %v4529_v6  ;;  %v4572_v20 = vadd.f32 %v4571_v63, %v4570_v2 }
 0x2c0   :  { %v4632_v57 = vsel %vm4498_vm1, %v4605_v54, 0.0  ;;  %v4607_v51 = vsel %vm4587_vm2, %v4598_v44, %v4606_v24  ;;  %v4687_v25 = vrot.slane %v4656_v36, 6  ;;  %v4520_v44 = vadd.f32 %v4519_v0, %v4518_v37 }
 0x2c1   :  { %v4633_v13 = vadd.f32 %v4632_v57, %v4596_v26  ;;  %v4686_v30 = vsel %vm4587_vm2, %v4676_v14, %v4685_v5  ;;  %v4641_v29 = vsel %vm4525_vm4, %v4607_v51, 0.0  ;;  %v4564_v18 = vrot.slane %v4563_v35, 1 }
 0x2c2   :  { %v4713_v48 = vsel %vm4498_vm1, %v4686_v30, 0.0  ;;  %v4642_v1 = vadd.f32 %v4641_v29, %v4640_v34  ;;  %v4688_v38 = vsel %vm4587_vm2, %v4679_v41, %v4687_v25  ;;  %v4521_v12 = vrot.slane %v4520_v44, 1 }
 0x2c3   :  { %v4634_v11 = vrot.slane %v4633_v13, 4  ;;  %v4714_v27 = vadd.f32 %v4713_v48, %v4677_v43  ;;  %v4722_v4 = vsel %vm4525_vm4, %v4688_v38, 0.0  ;;  %v4532_v37 = vrot.slane %v4531_v9, 1 }
 0x2c4   :  { %v4643_v17 = vrot.slane %v4642_v1, 4  ;;  %v4723_v52 = vadd.f32 %v4722_v4, %v4721_v19  ;;  %v4573_v0 = vrot.slane %v4572_v20, 1  ;;  %v4522_v43 = vadd.f32 %v4521_v12, %v4520_v44  ;;  %v4914_v12 = vld [vmem:[%s26439_s5 + $0x8] sm:$0xff] }
 0x2c5   :  { %v4715_v53 = vrot.slane %v4714_v27, 4  ;;  %v4635_v31 = vadd.f32 %v4634_v11, %v4633_v13  ;;  %v4565_v34 = vadd.f32 %v4564_v18, %v4563_v35  ;;  %v4533_v2 = vadd.f32 %v4532_v37, %v4531_v9  ;;  %v4917_v9 = vld [vmem:[%s26439_s5 + $0x20] sm:$0xff]  ;;  %v4915_v18 = vld [vmem:[%s26439_s5 + $0x10] sm:$0xff] }
 0x2c6   :  { %v4644_v42 = vadd.f32 %v4643_v17, %v4642_v1  ;;  %v4724_v61 = vrot.slane %v4723_v52, 4  ;;  %v4574_v51 = vadd.f32 %v4573_v0, %v4572_v20  ;;  %v4913_v20 = vld [vmem:[%s26439_s5] sm:$0xff]  ;;  %v4916_v0 = vld [vmem:[%s26439_s5 + $0x18] sm:$0xff]  ;;  %vm10906_vm4 = vcmask 41984  }
 0x2c7   :  { %v4636_v10 = vrot.slane %v4635_v31, 2  ;;  %v4716_v7 = vadd.f32 %v4715_v53, %v4714_v27 }
 0x2c8   :  { %v4645_v59 = vrot.slane %v4644_v42, 2  ;;  %v4725_v14 = vadd.f32 %v4724_v61, %v4723_v52  ;;  %v4921_v61 = vld [vmem:[%s26439_s5 + $0x40] sm:$0xff] }
 0x2c9   :  { %v4637_v28 = vadd.f32 %v4636_v10, %v4635_v31  ;;  %v4717_v58 = vrot.slane %v4716_v7, 2  ;;  %v4925_v10 = vld [vmem:[%s26439_s5 + $0x60] sm:$0xff] }
 0x2ca   :  { %v4726_v5 = vrot.slane %v4725_v14, 2  ;;  %v4646_v26 = vadd.f32 %v4645_v59, %v4644_v42  ;;  %v4927_v42 = vld [vmem:[%s26439_s5 + $0x70] sm:$0xff]  ;;  %4945 = vmatpush.msrb.mxu1 %v4925_v10  ;;  %v4918_v59 = vld [vmem:[%s26439_s5 + $0x28] sm:$0xff] }
 0x2cb   :  { %v4638_v41 = vrot.slane %v4637_v28, 1  ;;  %v4718_v54 = vadd.f32 %v4717_v58, %v4716_v7  ;;  %v4926_v7 = vld [vmem:[%s26439_s5 + $0x68] sm:$0xff]  ;;  %v4923_v58 = vld [vmem:[%s26439_s5 + $0x50] sm:$0xff]  ;;  %4985 = vmatpush.msrb.mxu0 %v4927_v42  ;;  %v17114_v42 = vld [vmem:[%s26440_s6 + $0x518] sm:$0xf0] }
 0x2cc   :  { %v4647_v55 = vrot.slane %v4646_v26, 1  ;;  %v4727_v36 = vadd.f32 %v4726_v5, %v4725_v14  ;;  %4965 = vmatpush.msrb.mxu3 %v4926_v7  ;;  %4946 = vmatpush.msrb.mxu1 %v4921_v61  ;;  %v4919_v14 = vld [vmem:[%s26439_s5 + $0x30] sm:$0xff]  ;;  %v17072_v10 = vld [vmem:[%s26440_s6 + $0x3c8] sm:$0xf0]  ;;  %v4888_v61 = vld [vmem:[%s26468_s28] sm:$0x1] }
 0x2cd   :  { %v4639_v57 = vadd.f32 %v4638_v41, %v4637_v28  ;;  %v4719_v24 = vrot.slane %v4718_v54, 1  ;;  %v4922_v28 = vld [vmem:[%s26439_s5 + $0x48] sm:$0xff]  ;;  %4986 = vmatpush.msrb.mxu0 %v4923_v58  ;;  %v13920_v7 = vld [vmem:[%s26440_s6 + $0x510] sm:$0xf] }
 0x2ce   :  { %v4648_v30 = vadd.f32 %v4647_v55, %v4646_v26  ;;  %v4728_v6 = vrot.slane %v4727_v36, 1  ;;  %4966 = vmatpush.msrb.mxu3 %v4922_v28  ;;  %4947 = vmatpush.msrb.mxu1 %v4917_v9  ;;  %v4924_v26 = vld [vmem:[%s26439_s5 + $0x58] sm:$0xff]  ;;  %v13692_v55 = vld [vmem:[%s26440_s6 + $0x348] sm:$0xf]  ;;  %v13921_v9 = vor.u32 %v17114_v42, %v13920_v7  ;;  %v17036_v7 = vld [vmem:[%s26440_s6 + $0x2a8] sm:$0xf0] }
 0x2cf   :  { %v4720_v13 = vadd.f32 %v4719_v24, %v4718_v54  ;;  %v4732_v50 = vadd.f32 %v4639_v57, %v4522_v43  ;;  %4987 = vmatpush.msrb.mxu0 %v4919_v14  ;;  %v4928_v54 = vld [vmem:[%s26439_s5 + $0x78] sm:$0xff]  ;;  %v13788_v43 = vld [vmem:[%s26440_s6 + $0x408] sm:$0xf]  ;;  %v17045_v14 = vld [vmem:[%s26440_s6 + $0x2f0] sm:$0xf0] }
 0x2d0   :  { %v4729_v25 = vadd.f32 %v4728_v6, %v4727_v36  ;;  %v4733_v27 = vadd.f32 %v4648_v30, %v4533_v2  ;;  %4967 = vmatpush.msrb.mxu3 %v4918_v59  ;;  %4948 = vmatpush.msrb.mxu1 %v4913_v20  ;;  %v4920_v24 = vld [vmem:[%s26439_s5 + $0x38] sm:$0xff]  ;;  %v17057_v36 = vld [vmem:[%s26440_s6 + $0x350] sm:$0xf0]  ;;  %v13680_v6 = vld [vmem:[%s26440_s6 + $0x330] sm:$0xf] }
 0x2d1   :  { %v4736_v48 = vadd.f32 %v4720_v13, %v4565_v34  ;;  %4988 = vmatpush.msrb.mxu0 %v4915_v18  ;;  %v13693_v13 = vor.u32 %v17057_v36, %v13692_v55  ;;  %v17081_v30 = vld [vmem:[%s26440_s6 + $0x410] sm:$0xf0]  ;;  %v13776_v2 = vld [vmem:[%s26440_s6 + $0x3f0] sm:$0xf]  ;;  %v13644_v58 = vld [vmem:[%s26440_s6 + $0x2e8] sm:$0xf] }
 0x2d2   :  { %v4737_v29 = vadd.f32 %v4729_v25, %v4574_v51  ;;  %4968 = vmatpush.msrb.mxu3 %v4914_v12  ;;  %v17078_v51 = vld [vmem:[%s26440_s6 + $0x3f8] sm:$0xf0]  ;;  %v13740_v20 = vld [vmem:[%s26440_s6 + $0x3a8] sm:$0xf]  ;;  %v13908_v12 = vld [vmem:[%s26440_s6 + $0x4f8] sm:$0xf] }
 0x2d3   :  { %v4741_v11 = vsel %vm4738_vm5, %v4732_v50, %v4736_v48  ;;  %v13789_v50 = vor.u32 %v17081_v30, %v13788_v43  ;;  %v17054_v48 = vld [vmem:[%s26440_s6 + $0x338] sm:$0xf0]  ;;  %5795 = vmatpush.bf16.msra.mxu1 %v13693_v13  ;;  %v13896_v55 = vld [vmem:[%s26440_s6 + $0x4e0] sm:$0xf]  ;;  %v17108_v36 = vld [vmem:[%s26440_s6 + $0x4e8] sm:$0xf0] }
 0x2d4   :  { %4858 = vmatmul.f32.vlgmr.msra.gmra.mxu0 %v4741_v11  ;;  %v4742_v8 = vsel %vm4738_vm5, %v4733_v27, %v4737_v29  ;;  %v13681_v11 = vor.u32 %v17054_v48, %v13680_v6  ;;  %v13777_v27 = vor.u32 %v17078_v51, %v13776_v2  ;;  %v13668_v29 = vld [vmem:[%s26440_s6 + $0x318] sm:$0xf]  ;;  %v13884_v43 = vld [vmem:[%s26440_s6 + $0x4c8] sm:$0xf]  ;;  %v17105_v30 = vld [vmem:[%s26440_s6 + $0x4d0] sm:$0xf0]  ;;  %v13897_v48 = vor.u32 %v17108_v36, %v13896_v55 }
 0x2d5   :  { %13489 = vmatmul.msk.f32.vlgmr.msra.gmra.mxu2 %vm4523_vm3, %v4742_v8  ;;  %5005 = vmatpush.msra.mxu0 %v4928_v54  ;;  %v17051_v8 = vld [vmem:[%s26440_s6 + $0x320] sm:$0xf0]  ;;  %v13728_v6 = vld [vmem:[%s26440_s6 + $0x390] sm:$0xf]  ;;  %v17056_v2 = vld [vmem:[%s26440_s6 + $0x34c] sm:$0xf] }
 0x2d6   :  { %5809 = vmatpush.bf16.msra.mxu3 %v13789_v50  ;;  %v17111_v54 = vld [vmem:[%s26440_s6 + $0x500] sm:$0xf0]  ;;  %v17066_v50 = vld [vmem:[%s26440_s6 + $0x398] sm:$0xf0]  ;;  %v13694_v51 = vld [vmem:[%s26440_s6 + $0x354] sm:$0xf0] }
 0x2d7   :  { %5006 = vmatpush.msra.mxu0 %v4924_v26  ;;  %5796 = vmatpush.bf16.msra.mxu1 %v13681_v11  ;;  %v13909_v26 = vor.u32 %v17111_v54, %v13908_v12  ;;  %v17099_v42 = vld [vmem:[%s26440_s6 + $0x4a0] sm:$0xf0]  ;;  %v17096_v54 = vld [vmem:[%s26440_s6 + $0x488] sm:$0xf0]  ;;  %v13836_v55 = vld [vmem:[%s26440_s6 + $0x468] sm:$0xf] }
 0x2d8   :  { %v17093_v36 = vld [vmem:[%s26440_s6 + $0x470] sm:$0xf0] }
 0x2d9   :  { %5007 = vmatpush.msra.mxu0 %v4920_v24  ;;  %v13645_v24 = vor.u32 %v17045_v14, %v13644_v58  ;;  %v13704_v58 = vld [vmem:[%s26440_s6 + $0x360] sm:$0xf]  ;;  %v17104_v14 = vld [vmem:[%s26440_s6 + $0x4cc] sm:$0xf] }
 0x2da   :  { %5810 = vmatpush.bf16.msra.mxu3 %v13777_v27  ;;  %v13885_v27 = vor.u32 %v17105_v30, %v13884_v43  ;;  %v13837_v43 = vor.u32 %v17093_v36, %v13836_v55  ;;  %v17101_v30 = vld [vmem:[%s26440_s6 + $0x4b4] sm:$0xf]  ;;  %v13730_v36 = vld [vmem:[%s26440_s6 + $0x39c] sm:$0xf0] }
 0x2db   :  { %5008 = vmatpush.msra.mxu0 %v4916_v0  ;;  %v17065_v55 = vld [vmem:[%s26440_s6 + $0x394] sm:$0xf] }
 0x331   :  { %v4819_v38 = vpop.f32.mrf.mxu1 }
 0x33b   :  { %v4839_v1 = vpop.f32.mrf.mxu3 }
 0x33c   :  { %v4840_v53 = vadd.f32 %v4839_v1, %v4819_v38  ;;  %v13764_v38 = vld [vmem:[%s26440_s6 + $0x3d8] sm:$0xf] }
 0x351   :  { %v4859_v19 = vpop.f32.mrf.mxu0 }
 0x352   :  { %v4860_v4 = vadd.f32 %v4859_v19, %v4840_v53  ;;  %v17075_v19 = vld [vmem:[%s26440_s6 + $0x3e0] sm:$0xf0]  ;;  %v13669_v53 = vor.u32 %v17051_v8, %v13668_v29  ;;  %v13872_v29 = vld [vmem:[%s26440_s6 + $0x4b0] sm:$0xf]  ;;  %v13729_v8 = vor.u32 %v17066_v50, %v13728_v6  ;;  %v13874_v6 = vld [vmem:[%s26440_s6 + $0x4bc] sm:$0xf0] }
 0x353   :  { %v13877_v50 = vor.u32 %v17101_v30, %v13874_v6  ;;  %v13922_v30 = vld [vmem:[%s26440_s6 + $0x51c] sm:$0xf0] }
 0x354   :  { %5797 = vmatpush.bf16.msra.mxu1 %v13669_v53  ;;  %v17102_v53 = vld [vmem:[%s26440_s6 + $0x4b8] sm:$0xf0] }
 0x358   :  { %v4879_v31 = vpop.f32.mrf.mxu2 }
 0x359   :  { %v4880_v56 = vadd.f32 %v4879_v31, %v4860_v4  ;;  %v13932_v4 = vld [vmem:[%s26440_s6 + $0x528] sm:$0xf]  ;;  %v17117_v31 = vld [vmem:[%s26440_s6 + $0x530] sm:$0xf0] }
 0x35b   :  { %v21751_v63 = vmul.f32 0.0025510204, %v4880_v56  ;;  %v13765_v56 = vor.u32 %v17075_v19, %v13764_v38  ;;  %v17039_v38 = vld [vmem:[%s26440_s6 + $0x2c0] sm:$0xf0] }
 0x35d   :  { %v4883_v17 = vmul.f32 %v21751_v63, %v21751_v63  ;;  %5811 = vmatpush.bf16.msra.mxu3 %v13765_v56  ;;  %v13697_v56 = vor.u32 %v17056_v2, %v13694_v51  ;;  %v13766_v2 = vld [vmem:[%s26440_s6 + $0x3e4] sm:$0xf0]  ;;  %v13824_v51 = vld [vmem:[%s26440_s6 + $0x450] sm:$0xf] }
 0x35f   :  { %v4885_v52 = vrot.slane %v4883_v17, 7  ;;  %v13656_v17 = vld [vmem:[%s26440_s6 + $0x300] sm:$0xf] }
 0x361   :  { %v4887_v44 = vsub.f32 %v21751_v63, %v4885_v52  ;;  %v17048_v52 = vld [vmem:[%s26440_s6 + $0x308] sm:$0xf0] }
 0x362   :  { %v13657_v28 = vor.u32 %v17048_v52, %v13656_v17  ;;  %v13873_v52 = vor.u32 %v17102_v53, %v13872_v29  ;;  %v13670_v29 = vld [vmem:[%s26440_s6 + $0x324] sm:$0xf0] }
 0x363   :  { %v4889_v35 = vadd.f32 1e-05, %v4887_v44  ;;  %v13933_v44 = vor.u32 %v17117_v31, %v13932_v4  ;;  %v13716_v4 = vld [vmem:[%s26440_s6 + $0x378] sm:$0xf]  ;;  %v17063_v31 = vld [vmem:[%s26440_s6 + $0x380] sm:$0xf0] }
 0x364   :  { %5798 = vmatpush.bf16.msra.mxu1 %v13657_v28  ;;  %v13790_v28 = vld [vmem:[%s26440_s6 + $0x414] sm:$0xf0] }
 0x365   :  { %17579 = vrsqrt.f32 %v4889_v35  ;;  %vm4896_vm7 = vweird.f32 %v4889_v35  ;;  %5841 = vmatpush.bf16.msrb.mxu2 %v13933_v44  ;;  %v13860_v44 = vld [vmem:[%s26440_s6 + $0x498] sm:$0xf] }
 0x366   :  { %v13861_v12 = vor.u32 %v17099_v42, %v13860_v44  ;;  %v17095_v42 = vld [vmem:[%s26440_s6 + $0x484] sm:$0xf] }
 0x368   :  { %5799 = vmatpush.bf16.msra.mxu1 %v13645_v24 }
 0x369   :  { %5842 = vmatpush.bf16.msrb.mxu2 %v13921_v9  ;;  %v17060_v9 = vld [vmem:[%s26440_s6 + $0x368] sm:$0xf0] }
 0x36b   :  { %v17580_v41 = vpop.eup %17579 }
 0x36c   :  { %v4891_v5 = vmul.f32 %v17580_v41, %v4889_v35  ;;  %vm4897_vm6 = vweird.f32 %v17580_v41  ;;  %v13752_v35 = vld [vmem:[%s26440_s6 + $0x3c0] sm:$0xf] }
 0x36d   :  { %vm4898_vm8 = vmor %vm4896_vm7, %vm4897_vm6  ;;  %v13753_v59 = vor.u32 %v17072_v10, %v13752_v35  ;;  %5843 = vmatpush.bf16.msrb.mxu2 %v13909_v26  ;;  %v13717_v35 = vor.u32 %v17063_v31, %v13716_v4  ;;  %v13608_v10 = vld [vmem:[%s26440_s6 + $0x2a0] sm:$0xf]  ;;  %v17077_v26 = vld [vmem:[%s26440_s6 + $0x3f4] sm:$0xf] }
 0x36e   :  { %v4892_v57 = vmul.f32 %v17580_v41, %v4891_v5  ;;  %v17071_v4 = vld [vmem:[%s26440_s6 + $0x3c4] sm:$0xf]  ;;  %v13754_v31 = vld [vmem:[%s26440_s6 + $0x3cc] sm:$0xf0] }
 0x36f   :  { %5812 = vmatpush.bf16.msra.mxu3 %v13753_v59  ;;  %v13609_v59 = vor.u32 %v17036_v7, %v13608_v10  ;;  %v13658_v10 = vld [vmem:[%s26440_s6 + $0x30c] sm:$0xf0] }
 0x370   :  { %v4893_v37 = vmul.f32 0.5, %v4892_v57  ;;  %v4906_v57 = vld [vmem:[%s26469_s27] sm:$0x1] }
 0x371   :  { %5844 = vmatpush.bf16.msrb.mxu2 %v13897_v48  ;;  %v17074_v48 = vld [vmem:[%s26440_s6 + $0x3dc] sm:$0xf] }
 0x372   :  { %v4894_v34 = vsub.f32 1.5, %v4893_v37 }
 0x374   :  { %v4895_v25 = vmul.f32 %v17580_v41, %v4894_v34  ;;  %v13632_v34 = vld [vmem:[%s26440_s6 + $0x2d0] sm:$0xf] }
 0x375   :  { %5851 = vmatpush.bf16.msra.mxu2 %v13697_v56  ;;  %v13757_v56 = vor.u32 %v17071_v4, %v13754_v31  ;;  %v13814_v4 = vld [vmem:[%s26440_s6 + $0x444] sm:$0xf0]  ;;  %v17059_v31 = vld [vmem:[%s26440_s6 + $0x364] sm:$0xf] }
 0x376   :  { %v4899_v1 = vsel %vm4898_vm8, %v17580_v41, %v4895_v25  ;;  %v17069_v41 = vld [vmem:[%s26440_s6 + $0x3b0] sm:$0xf0] }
 0x377   :  { %4901 = vst [vmem:[#allocation1] sm:$0xff] %v4899_v1  ;;  %v13741_v0 = vor.u32 %v17069_v41, %v13740_v20  ;;  %v13620_v1 = vld [vmem:[%s26440_s6 + $0x2b8] sm:$0xf]  ;;  %v13848_v41 = vld [vmem:[%s26440_s6 + $0x480] sm:$0xf] }
 0x378   :  { %v13621_v17 = vor.u32 %v17039_v38, %v13620_v1  ;;  %v13886_v20 = vld [vmem:[%s26440_s6 + $0x4d4] sm:$0xf0]  ;;  %v17098_v38 = vld [vmem:[%s26440_s6 + $0x49c] sm:$0xf] }
 0x379   :  { %5813 = vmatpush.bf16.msra.mxu3 %v13741_v0  ;;  %v13889_v24 = vor.u32 %v17104_v14, %v13886_v20  ;;  %v13800_v14 = vld [vmem:[%s26440_s6 + $0x420] sm:$0xf]  ;;  %v17084_v20 = vld [vmem:[%s26440_s6 + $0x428] sm:$0xf0] }
 0x37d   :  { %5814 = vmatpush.bf16.msra.mxu3 %v13729_v8 }
 0x37e   :  { %v4903_v18 = vld [vmem:[#allocation1 + $0x1] ss:$9 sm:$0xff] }
 0x37f   :  { %v4905_v5 = vmul.f32 %v4903_v18, %v4888_v61  ;;  %v17080_v61 = vld [vmem:[%s26440_s6 + $0x40c] sm:$0xf] }
 0x380   :  { %v13793_v18 = vor.u32 %v17080_v61, %v13790_v28  ;;  %v13850_v61 = vld [vmem:[%s26440_s6 + $0x48c] sm:$0xf0] }
 0x381   :  { %v4907_v37 = vmul.f32 %v4905_v5, %v21751_v63  ;;  %v17042_v63 = vld [vmem:[%s26440_s6 + $0x2d8] sm:$0xf0]  ;;  %5815 = vmatpush.bf16.msra.mxu3 %v13717_v35  ;;  %v17047_v35 = vld [vmem:[%s26440_s6 + $0x304] sm:$0xf]  ;;  %v13853_v28 = vor.u32 %v17095_v42, %v13850_v61  ;;  %v13898_v42 = vld [vmem:[%s26440_s6 + $0x4ec] sm:$0xf0] }
 0x382   :  { %v13633_v11 = vor.u32 %v17042_v63, %v13632_v34  ;;  %v17053_v34 = vld [vmem:[%s26440_s6 + $0x334] sm:$0xf]  ;;  %v13682_v63 = vld [vmem:[%s26440_s6 + $0x33c] sm:$0xf0]  ;;  %v13661_v7 = vor.u32 %v17047_v35, %v13658_v10  ;;  %v17035_v35 = vld [vmem:[%s26440_s6 + $0x2a4] sm:$0xf] }
 0x383   :  { %v4908_v13 = vsub.f32 %v4906_v57, %v4907_v37  ;;  %v13778_v57 = vld [vmem:[%s26440_s6 + $0x3fc] sm:$0xf0]  ;;  %v13849_v37 = vor.u32 %v17096_v54, %v13848_v41  ;;  %v13646_v41 = vld [vmem:[%s26440_s6 + $0x2f4] sm:$0xf0]  ;;  %v17116_v54 = vld [vmem:[%s26440_s6 + $0x52c] sm:$0xf] }
 0x384   :  { %5800 = vmatpush.bf16.msra.mxu1 %v13633_v11  ;;  %v13781_v0 = vor.u32 %v17077_v26, %v13778_v57  ;;  %v17090_v11 = vld [vmem:[%s26440_s6 + $0x458] sm:$0xf0]  ;;  %v13934_v26 = vld [vmem:[%s26440_s6 + $0x534] sm:$0xf0]  ;;  %v17092_v57 = vld [vmem:[%s26440_s6 + $0x46c] sm:$0xf] }
 0x385   :  { %v4910_v25 = vperm.slane %v4908_v13, 0  ;;  %v13685_v13 = vor.u32 %v17053_v34, %v13682_v63  ;;  %v13825_v8 = vor.u32 %v17090_v11, %v13824_v51  ;;  %v13733_v34 = vor.u32 %v17065_v55, %v13730_v36  ;;  %v13634_v63 = vld [vmem:[%s26440_s6 + $0x2dc] sm:$0xf0]  ;;  %v17062_v51 = vld [vmem:[%s26440_s6 + $0x37c] sm:$0xf] }
 0x386   :  { %v13718_v11 = vld [vmem:[%s26440_s6 + $0x384] sm:$0xf0]  ;;  %v13610_v10 = vld [vmem:[%s26440_s6 + $0x2ac] sm:$0xf0] }
 0x387   :  { %v4912_v19 = vsel %vm4738_vm5, %v4905_v5, %v4910_v25  ;;  %v13705_v5 = vor.u32 %v17060_v9, %v13704_v58  ;;  %5852 = vmatpush.bf16.msra.mxu2 %v13685_v13  ;;  %v13769_v25 = vor.u32 %v17074_v48, %v13766_v2  ;;  %v17068_v58 = vld [vmem:[%s26440_s6 + $0x3ac] sm:$0xf]  ;;  %v13742_v9 = vld [vmem:[%s26440_s6 + $0x3b4] sm:$0xf0]  ;;  %v17113_v13 = vld [vmem:[%s26440_s6 + $0x514] sm:$0xf]  ;;  %v13613_v61 = vor.u32 %v17035_v35, %v13610_v10 }
 0x388   :  { %13490 = vmatmul.msk.f32.vlgmr.msrb.gmra.mxu1 %vm4929_vm9, %v4912_v19  ;;  %13491 = vmatmul.msk.f32.vlgmr.msrb.gmra.mxu3 %vm4929_vm9, %v4912_v19  ;;  %v17089_v48 = vld [vmem:[%s26440_s6 + $0x454] sm:$0xf]  ;;  %v13826_v2 = vld [vmem:[%s26440_s6 + $0x45c] sm:$0xf0] }
 0x389   :  { %13492 = vmatmul.msk.f32.vlgmr.msrb.gmra.mxu0 %vm4929_vm9, %v4912_v19  ;;  %5801 = vmatpush.bf16.msra.mxu1 %v13621_v17  ;;  %v13812_v17 = vld [vmem:[%s26440_s6 + $0x438] sm:$0xf] }
 0x38a   :  { %5823 = vmatpush.bf16.msrb.mxu0 %v13885_v27  ;;  %5816 = vmatpush.bf16.msra.mxu3 %v13705_v5  ;;  %v17050_v27 = vld [vmem:[%s26440_s6 + $0x31c] sm:$0xf] }
 0x38b   :  { %v13673_v1 = vor.u32 %v17050_v27, %v13670_v29  ;;  %v17038_v27 = vld [vmem:[%s26440_s6 + $0x2bc] sm:$0xf]  ;;  %v13622_v29 = vld [vmem:[%s26440_s6 + $0x2c4] sm:$0xf0] }
 0x38d   :  { %5802 = vmatpush.bf16.msra.mxu1 %v13609_v59  ;;  %5853 = vmatpush.bf16.msra.mxu2 %v13673_v1  ;;  %v13745_v59 = vor.u32 %v17068_v58, %v13742_v9  ;;  %v17110_v1 = vld [vmem:[%s26440_s6 + $0x4fc] sm:$0xf]  ;;  %v17083_v58 = vld [vmem:[%s26440_s6 + $0x424] sm:$0xf]  ;;  %v13802_v9 = vld [vmem:[%s26440_s6 + $0x42c] sm:$0xf0] }
 0x38e   :  { %5824 = vmatpush.bf16.msrb.mxu0 %v13873_v52  ;;  %5879 = vmatpush.bf16.msrb.mxu3 %v13889_v24  ;;  %v17087_v52 = vld [vmem:[%s26440_s6 + $0x440] sm:$0xf0]  ;;  %v13838_v24 = vld [vmem:[%s26440_s6 + $0x474] sm:$0xf0] }
 0x38f   :  { %v13813_v44 = vor.u32 %v17087_v52, %v13812_v17 }
 0x391   :  { %13493 = vmatmul.msk.f32.vlgmr.msra.gmra.mxu0 %vm4929_vm9, %v4912_v19  ;;  %5865 = vmatpush.bf16.msrb.mxu1 %v13793_v18  ;;  %v13862_v19 = vld [vmem:[%s26440_s6 + $0x4a4] sm:$0xf0]  ;;  %v17044_v18 = vld [vmem:[%s26440_s6 + $0x2ec] sm:$0xf] }
 0x392   :  { %5825 = vmatpush.bf16.msrb.mxu0 %v13861_v12  ;;  %5880 = vmatpush.bf16.msrb.mxu3 %v13877_v50  ;;  %v13865_v53 = vor.u32 %v17098_v38, %v13862_v19  ;;  %v13801_v12 = vor.u32 %v17084_v20, %v13800_v14  ;;  %v13649_v5 = vor.u32 %v17044_v18, %v13646_v41  ;;  %v13910_v38 = vld [vmem:[%s26440_s6 + $0x504] sm:$0xf0]  ;;  %v17086_v19 = vld [vmem:[%s26440_s6 + $0x43c] sm:$0xf] }
 0x393   :  { %5854 = vmatpush.bf16.msra.mxu2 %v13661_v7  ;;  %v13925_v50 = vor.u32 %v17113_v13, %v13922_v30  ;;  %v13913_v17 = vor.u32 %v17110_v1, %v13910_v38  ;;  %v13817_v52 = vor.u32 %v17086_v19, %v13814_v4  ;;  %v17107_v7 = vld [vmem:[%s26440_s6 + $0x4e4] sm:$0xf]  ;;  %v13805_v14 = vor.u32 %v17083_v58, %v13802_v9  ;;  %v13940_v9 = vld [vmem:[%s26440_s6 + $0x530] sm:$0xf] }
 0x395   :  { %5866 = vmatpush.bf16.msrb.mxu1 %v13781_v0  ;;  %v13841_v0 = vor.u32 %v17092_v57, %v13838_v24 }
 0x396   :  { %5826 = vmatpush.bf16.msrb.mxu0 %v13849_v37  ;;  %5881 = vmatpush.bf16.msrb.mxu3 %v13865_v53  ;;  %v13937_v37 = vor.u32 %v17116_v54, %v13934_v26  ;;  %v13625_v53 = vor.u32 %v17038_v27, %v13622_v29 }
 0x397   :  { %5855 = vmatpush.bf16.msra.mxu2 %v13649_v5 }
 0x399   :  { %5867 = vmatpush.bf16.msrb.mxu1 %v13769_v25  ;;  %v13829_v25 = vor.u32 %v17089_v48, %v13826_v2 }
 0x39a   :  { %5827 = vmatpush.bf16.msrb.mxu0 %v13837_v43  ;;  %5882 = vmatpush.bf16.msrb.mxu3 %v13853_v28  ;;  %v17041_v43 = vld [vmem:[%s26440_s6 + $0x2d4] sm:$0xf]  ;;  %v13901_v28 = vor.u32 %v17107_v7, %v13898_v42 }
 0x39b   :  { %v13637_v6 = vor.u32 %v17041_v43, %v13634_v63 }
 0x39d   :  { %5868 = vmatpush.bf16.msrb.mxu1 %v13757_v56  ;;  %5856 = vmatpush.bf16.msra.mxu2 %v13637_v6  ;;  %v13706_v56 = vld [vmem:[%s26440_s6 + $0x36c] sm:$0xf0] }
 0x39e   :  { %5828 = vmatpush.bf16.msrb.mxu0 %v13825_v8  ;;  %5883 = vmatpush.bf16.msrb.mxu3 %v13841_v0  ;;  %v13721_v8 = vor.u32 %v17062_v51, %v13718_v11 }
 0x3a1   :  { %5869 = vmatpush.bf16.msrb.mxu1 %v13745_v59  ;;  %5857 = vmatpush.bf16.msra.mxu2 %v13625_v53 }
 0x3a2   :  { %5829 = vmatpush.bf16.msrb.mxu0 %v13813_v44  ;;  %5884 = vmatpush.bf16.msrb.mxu3 %v13829_v25  ;;  %v13709_v44 = vor.u32 %v17059_v31, %v13706_v56 }
 0x3a5   :  { %5870 = vmatpush.bf16.msrb.mxu1 %v13733_v34  ;;  %5858 = vmatpush.bf16.msra.mxu2 %v13613_v61 }
 0x3a6   :  { %5830 = vmatpush.bf16.msrb.mxu0 %v13801_v12  ;;  %5885 = vmatpush.bf16.msrb.mxu3 %v13817_v52 }
 0x3a9   :  { %5871 = vmatpush.bf16.msrb.mxu1 %v13721_v8 }
 0x3aa   :  { %5897 = vmatpush.bf16.msra.mxu0 %v13937_v37  ;;  %5886 = vmatpush.bf16.msrb.mxu3 %v13805_v14 }
 0x3ad   :  { %5872 = vmatpush.bf16.msrb.mxu1 %v13709_v44 }
 0x3ae   :  { %5898 = vmatpush.bf16.msra.mxu0 %v13925_v50 }
 0x3b2   :  { %5899 = vmatpush.bf16.msra.mxu0 %v13913_v17 }
 0x3b6   :  { %5900 = vmatpush.bf16.msra.mxu0 %v13901_v28 }
 0x405   :  { %v4950_v59 = vpop.f32.mrf.mxu1 }
 0x406   :  { %v22152_v20 = vperm.slane %v4950_v59, 0  ;;  %v4990_v12 = vpop.f32.mrf.mxu0  ;;  %v22154_v18 = vperm.slane %v4950_v59, 1  ;;  %v17118_v59 = vld [vmem:[%s26440_s6 + $0x538] sm:$0xf0] }
 0x407   :  { %v5015_v41 = vperm.slane %v4990_v12, 0  ;;  %v5027_v57 = vperm.slane %v4990_v12, 1 }
 0x408   :  { %v5021_v54 = vmul.f32 %v22152_v20, %v21425_v32  ;;  %v5045_v5 = vmul.f32 %v22152_v20, %v21507_v46  ;;  %v5049_v26 = vmul.f32 %v22152_v20, %v21545_v49 }
 0x409   :  { %v5019_v24 = vmul.f32 %v5015_v41, %v21647_v33  ;;  %v5023_v37 = vmul.f32 %v5015_v41, %v21621_v39  ;;  %v5047_v0 = vmul.f32 %v5015_v41, %v21697_v45  ;;  %v5051_v55 = vmul.f32 %v5015_v41, %v21721_v21 }
 0x40a   :  { %v5033_v36 = vadd.f32 %v22154_v18, %v5021_v54  ;;  %v5053_v43 = vadd.f32 %v5045_v5, %v22154_v18  ;;  %v5057_v32 = vadd.f32 %v5049_v26, %v22154_v18 }
 0x40b   :  { %v5031_v34 = vadd.f32 %v5027_v57, %v5019_v24  ;;  %v5035_v46 = vadd.f32 %v5027_v57, %v5023_v37  ;;  %v4970_v63 = vpop.f32.mrf.mxu3  ;;  %v5055_v13 = vadd.f32 %v5047_v0, %v5027_v57  ;;  %v5059_v49 = vadd.f32 %v5051_v55, %v5027_v57 }
 0x40c   :  { %v5041_v30 = vmax.f32 %v5033_v36, 0.0  ;;  %v5061_v6 = vmax.f32 %v5053_v43, 0.0  ;;  %v5065_v33 = vmax.f32 %v5057_v32, 0.0  ;;  %v22169_v50 = vperm.slane %v4970_v63, 0 }
 0x40d   :  { %v5039_v45 = vmax.f32 %v5031_v34, 0.0  ;;  %v5043_v48 = vmax.f32 %v5035_v46, 0.0  ;;  %v22171_v21 = vperm.slane %v4970_v63, 1  ;;  %v5063_v19 = vmax.f32 %v5055_v13, 0.0 }
 0x40e   :  { %v5010_v39 = vpop.f32.mrf.mxu0  ;;  %v5022_v51 = vmul.f32 %v22169_v50, %v21443_v40  ;;  %v5046_v25 = vmul.f32 %v22169_v50, %v21529_v16  ;;  %v5050_v11 = vmul.f32 %v22169_v50, %v21564_v22  ;;  %v13941_v36 = vor.u32 %v17118_v59, %v13940_v9  ;;  %v17079_v9 = vld [vmem:[%s26440_s6 + $0x400] sm:$0xf0]  ;;  %v13916_v59 = vld [vmem:[%s26440_s6 + $0x500] sm:$0xf] }
 0x40f   :  { %v5016_v2 = vperm.slane %v5010_v39, 0  ;;  %v5028_v27 = vperm.slane %v5010_v39, 1 }
 0x410   :  { %v5034_v53 = vadd.f32 %v22171_v21, %v5022_v51  ;;  %v5054_v40 = vadd.f32 %v5046_v25, %v22171_v21  ;;  %v5058_v4 = vadd.f32 %v5050_v11, %v22171_v21  ;;  %v13796_v51 = vld [vmem:[%s26440_s6 + $0x410] sm:$0xf]  ;;  %v17082_v25 = vld [vmem:[%s26440_s6 + $0x418] sm:$0xf0] }
 0x411   :  { %v5020_v29 = vmul.f32 %v5016_v2, %v21636_v60  ;;  %v5024_v8 = vmul.f32 %v5016_v2, %v21652_v47  ;;  %v5048_v1 = vmul.f32 %v5016_v2, %v21700_v3  ;;  %v5052_v38 = vmul.f32 %v5016_v2, %v21730_v62  ;;  %v22189_v60 = vld [vmem:[%s26440_s6 + $0x4d0] sm:$0xf]  ;;  %v17106_v47 = vld [vmem:[%s26440_s6 + $0x4d8] sm:$0xf0] }
 0x412   :  { %v5067_v3 = vmax.f32 %v5059_v49, 0.0  ;;  %v5042_v62 = vmax.f32 %v5034_v53, 0.0  ;;  %v5062_v17 = vmax.f32 %v5054_v40, 0.0  ;;  %v5066_v52 = vmax.f32 %v5058_v4, 0.0 }
 0x413   :  { %v5032_v16 = vadd.f32 %v5028_v27, %v5020_v29  ;;  %v5036_v31 = vadd.f32 %v5028_v27, %v5024_v8  ;;  %v5056_v56 = vadd.f32 %v5048_v1, %v5028_v27  ;;  %v5060_v22 = vadd.f32 %v5052_v38, %v5028_v27  ;;  %v13880_v1 = vld [vmem:[%s26440_s6 + $0x4b8] sm:$0xf]  ;;  %v17103_v38 = vld [vmem:[%s26440_s6 + $0x4c0] sm:$0xf0] }
 0x414   :  { %v22194_v42 = vpack.c.bf16 %v5042_v62, %v5041_v30  ;;  %v22196_v61 = vpack.c.bf16 %v5062_v17, %v5061_v6  ;;  %v5075_v28 = vpack.c.bf16 %v5066_v52, %v5065_v33  ;;  %v13893_v58 = vor.u32 %v17106_v47, %v22189_v60  ;;  %v13700_v6 = vld [vmem:[%s26440_s6 + $0x350] sm:$0xf]  ;;  %v17058_v33 = vld [vmem:[%s26440_s6 + $0x358] sm:$0xf0]  ;;  %v13688_v47 = vld [vmem:[%s26440_s6 + $0x338] sm:$0xf] }
 0x415   :  { %v5040_v44 = vmax.f32 %v5032_v16, 0.0  ;;  %v5044_v35 = vmax.f32 %v5036_v31, 0.0  ;;  %v5064_v10 = vmax.f32 %v5056_v56, 0.0  ;;  %v5068_v7 = vmax.f32 %v5060_v22, 0.0  ;;  %v13928_v16 = vld [vmem:[%s26440_s6 + $0x518] sm:$0xf] }
 0x416   :  { %v5308_v5 = vunpack.c.l.b16 %v22194_v42  ;;  %v5312_v26 = vunpack.c.l.b16 %v22196_v61  ;;  %v22213_v57 = vunpack.c.l.b16 %v5075_v28  ;;  %v5309_v24 = vunpack.c.h.b16 %v22194_v42  ;;  %v17115_v31 = vld [vmem:[%s26440_s6 + $0x520] sm:$0xf0]  ;;  %v13784_v52 = vld [vmem:[%s26440_s6 + $0x3f8] sm:$0xf] }
 0x417   :  { %v22205_v14 = vpack.c.bf16 %v5040_v44, %v5039_v45  ;;  %v22207_v12 = vpack.c.bf16 %v5044_v35, %v5043_v48  ;;  %v22209_v41 = vpack.c.bf16 %v5064_v10, %v5063_v19  ;;  %v5076_v54 = vpack.c.bf16 %v5068_v7, %v5067_v3  ;;  %v17055_v3 = vld [vmem:[%s26440_s6 + $0x340] sm:$0xf0]  ;;  %v13868_v7 = vld [vmem:[%s26440_s6 + $0x4a0] sm:$0xf] }
 0x418   :  { %v5313_v37 = vunpack.c.h.b16 %v22196_v61  ;;  %v22217_v0 = vunpack.c.h.b16 %v5075_v28  ;;  %v5320_v43 = vpack.c.b16 %v5312_v26, %v5308_v5  ;;  %v5324_v32 = vpack.c.b16 %v22213_v57, %v22213_v57  ;;  %v17100_v28 = vld [vmem:[%s26440_s6 + $0x4a8] sm:$0xf0] }
 0x419   :  { %v5310_v55 = vunpack.c.l.b16 %v22207_v12  ;;  %v5314_v34 = vunpack.c.l.b16 %v22209_v41  ;;  %v22227_v46 = vunpack.c.l.b16 %v5076_v54  ;;  %v5311_v49 = vunpack.c.h.b16 %v22207_v12  ;;  %v13652_v12 = vld [vmem:[%s26440_s6 + $0x2f0] sm:$0xf] }
 0x41a   :  { %v5321_v63 = vpack.c.b16 %v5313_v37, %v5309_v24  ;;  %v5325_v13 = vpack.c.b16 %v22217_v0, %v22217_v0  ;;  %v5315_v30 = vunpack.c.h.b16 %v22209_v41  ;;  %v5329_v39 = vrot.slane %v5320_v43, 3  ;;  %v13676_v43 = vld [vmem:[%s26440_s6 + $0x320] sm:$0xf] }
 0x41b   :  { %v5330_v45 = vrot.slane %v5324_v32, 3  ;;  %v5322_v48 = vpack.c.b16 %v5314_v34, %v5310_v55  ;;  %v5326_v2 = vpack.c.b16 %v22227_v46, %v22227_v46  ;;  %v22255_v29 = vunpack.c.h.b16 %v5076_v54  ;;  %v17112_v54 = vld [vmem:[%s26440_s6 + $0x508] sm:$0xf0] }
 0x41c   :  { %v5332_v11 = vrot.slane %v5321_v63, 3  ;;  %v5333_v27 = vrot.slane %v5325_v13, 3  ;;  %v5323_v8 = vpack.c.b16 %v5315_v30, %v5311_v49  ;;  %v13701_v4 = vor.u32 %v17058_v33, %v13700_v6  ;;  %v17052_v32 = vld [vmem:[%s26440_s6 + $0x328] sm:$0xf0]  ;;  %v13772_v6 = vld [vmem:[%s26440_s6 + $0x3e0] sm:$0xf] }
 0x41d   :  { %v22268_v19 = vsel %vm5328_vm10, %v5329_v39, %v5330_v45  ;;  %v5335_v53 = vrot.slane %v5322_v48, 3  ;;  %v5336_v40 = vrot.slane %v5326_v2, 3  ;;  %v5327_v22 = vpack.c.b16 %v22255_v29, %v22255_v29  ;;  %v13856_v39 = vld [vmem:[%s26440_s6 + $0x488] sm:$0xf]  ;;  %v17097_v45 = vld [vmem:[%s26440_s6 + $0x490] sm:$0xf0] }
 0x41e   :  { %5803 = vmatmul.bf16.vlgmr.msra.gmra.mxu1 %v22268_v19  ;;  %v22278_v56 = vsel %vm5328_vm10, %v5332_v11, %v5333_v27  ;;  %v5338_v60 = vrot.slane %v5323_v8, 3  ;;  %v13881_v17 = vor.u32 %v17103_v38, %v13880_v1  ;;  %v13797_v35 = vor.u32 %v17082_v25, %v13796_v51  ;;  %v17076_v51 = vld [vmem:[%s26440_s6 + $0x3e8] sm:$0xf0]  ;;  %v13904_v25 = vld [vmem:[%s26440_s6 + $0x4e8] sm:$0xf] }
 0x41f   :  { %5817 = vmatmul.bf16.vlgmr.msra.gmra.mxu3 %v22278_v56  ;;  %5935 = vmatpush.bf16.msra.mxu1 %v13893_v58  ;;  %v22290_v62 = vsel %vm5328_vm10, %v5335_v53, %v5336_v40  ;;  %v5339_v44 = vrot.slane %v5327_v22, 3  ;;  %v13929_v10 = vor.u32 %v17115_v31, %v13928_v16  ;;  %v13689_v58 = vor.u32 %v17055_v3, %v13688_v47  ;;  %v17109_v11 = vld [vmem:[%s26440_s6 + $0x4f0] sm:$0xf0]  ;;  %v13664_v8 = vld [vmem:[%s26440_s6 + $0x308] sm:$0xf] }
 0x420   :  { %5831 = vmatmul.bf16.vlgmr.msrb.gmra.mxu0 %v22290_v62  ;;  %5953 = vmatpush.bf16.msra.mxu3 %v13941_v36  ;;  %v13869_v63 = vor.u32 %v17100_v28, %v13868_v7  ;;  %v13785_v13 = vor.u32 %v17079_v9, %v13784_v52  ;;  %v13917_v33 = vor.u32 %v17112_v54, %v13916_v59  ;;  %v5968_v48 = vunpack.c.h.b16 %v22205_v14  ;;  %v17049_v1 = vld [vmem:[%s26440_s6 + $0x310] sm:$0xf0]  ;;  %v13760_v40 = vld [vmem:[%s26440_s6 + $0x3c8] sm:$0xf]  ;;  %v17094_v16 = vld [vmem:[%s26440_s6 + $0x478] sm:$0xf0] }
 0x421   :  { %5907 = vmatpush.bf16.msrb.mxu0 %v13701_v4  ;;  %v22312_v36 = vsel %vm5328_vm10, %v5338_v60, %v5339_v44  ;;  %v13677_v2 = vor.u32 %v17052_v32, %v13676_v43  ;;  %v5967_v27 = vunpack.c.l.b16 %v22205_v14  ;;  %v13857_v38 = vor.u32 %v17097_v45, %v13856_v39  ;;  %v13844_v14 = vld [vmem:[%s26440_s6 + $0x470] sm:$0xf]  ;;  %v17073_v22 = vld [vmem:[%s26440_s6 + $0x3d0] sm:$0xf0]  ;;  %v14031_v60 = vld [vmem:[%s26440_s6 + $0xa8] sm:$0xf] }
 0x422   :  { %13942 = vmatmul.msk.bf16.vlgmr.msrb.gmra.mxu2 %vm4523_vm3, %v22312_v36  ;;  %v13773_v53 = vor.u32 %v17076_v51, %v13772_v6  ;;  %v13905_v4 = vor.u32 %v17109_v11, %v13904_v25  ;;  %v13665_v31 = vor.u32 %v17049_v1, %v13664_v8  ;;  %v16973_v47 = vld [vmem:[%s26440_s6 + $0xb0] sm:$0xf0]  ;;  %v22377_v52 = vpack.c.b16 %v22217_v0, %v5313_v37  ;;  %v17046_v37 = vld [vmem:[%s26440_s6 + $0x2f8] sm:$0xf0]  ;;  %v13832_v0 = vld [vmem:[%s26440_s6 + $0x458] sm:$0xf] }
 0x423   :  { %5936 = vmatpush.bf16.msra.mxu1 %v13881_v17  ;;  %5921 = vmatpush.bf16.msrb.mxu2 %v13797_v35  ;;  %v22368_v3 = vpack.c.b16 %v5310_v55, %v5967_v27  ;;  %v22372_v17 = vpack.c.b16 %v5311_v49, %v5968_v48  ;;  %v22382_v44 = vpack.c.b16 %v22213_v57, %v5312_v26  ;;  %v13748_v57 = vld [vmem:[%s26440_s6 + $0x3b0] sm:$0xf]  ;;  %v17091_v49 = vld [vmem:[%s26440_s6 + $0x460] sm:$0xf0]  ;;  %v16970_v7 = vld [vmem:[%s26440_s6 + $0x98] sm:$0xf0] }
 0x424   :  { %5954 = vmatpush.bf16.msra.mxu3 %v13929_v10  ;;  %v22387_v35 = vpack.c.b16 %v22255_v29, %v5315_v30  ;;  %v13845_v55 = vor.u32 %v17094_v16, %v13844_v14  ;;  %v13761_v61 = vor.u32 %v17073_v22, %v13760_v40  ;;  %v14032_v26 = vor.u32 %v16973_v47, %v14031_v60  ;;  %v17070_v29 = vld [vmem:[%s26440_s6 + $0x3b8] sm:$0xf0]  ;;  %v14019_v10 = vld [vmem:[%s26440_s6 + $0x90] sm:$0xf]  ;;  %v13736_v59 = vld [vmem:[%s26440_s6 + $0x398] sm:$0xf] }
 0x425   :  { %5908 = vmatpush.bf16.msrb.mxu0 %v13689_v58  ;;  %v22407_v30 = vpack.c.b16 %v22227_v46, %v5314_v34  ;;  %v13653_v28 = vor.u32 %v17046_v37, %v13652_v12  ;;  %v13833_v41 = vor.u32 %v17091_v49, %v13832_v0  ;;  %v13640_v34 = vld [vmem:[%s26440_s6 + $0x2d8] sm:$0xf]  ;;  %v17043_v46 = vld [vmem:[%s26440_s6 + $0x2e0] sm:$0xf0]  ;;  %v13749_v58 = vor.u32 %v17070_v29, %v13748_v57  ;;  %v13820_v54 = vld [vmem:[%s26440_s6 + $0x440] sm:$0xf] }
 0x426   :  { %v14020_v9 = vor.u32 %v16970_v7, %v14019_v10  ;;  %v17088_v43 = vld [vmem:[%s26440_s6 + $0x448] sm:$0xf0]  ;;  %v17067_v32 = vld [vmem:[%s26440_s6 + $0x3a0] sm:$0xf0]  ;;  %v13641_v6 = vor.u32 %v17043_v46, %v13640_v34  ;;  %v13628_v39 = vld [vmem:[%s26440_s6 + $0x2c0] sm:$0xf]  ;;  %v5018_v22 = vmul.f32 %v22169_v50, %v21472_v15  ;;  %v5017_v10 = vmul.f32 %v22152_v20, %v21452_v23 }
 0x427   :  { %5937 = vmatpush.bf16.msra.mxu1 %v13869_v63  ;;  %5922 = vmatpush.bf16.msrb.mxu2 %v13785_v13  ;;  %v14007_v63 = vld [vmem:[%s26440_s6 + $0x78] sm:$0xf]  ;;  %v16967_v13 = vld [vmem:[%s26440_s6 + $0x80] sm:$0xf0]  ;;  %v17040_v45 = vld [vmem:[%s26440_s6 + $0x2c8] sm:$0xf0]  ;;  %v13737_v48 = vor.u32 %v17067_v32, %v13736_v59 }
 0x428   :  { %5955 = vmatpush.bf16.msra.mxu3 %v13917_v33  ;;  %v13821_v33 = vor.u32 %v17088_v43, %v13820_v54  ;;  %v13724_v51 = vld [vmem:[%s26440_s6 + $0x380] sm:$0xf]  ;;  %v13808_v25 = vld [vmem:[%s26440_s6 + $0x428] sm:$0xf]  ;;  %v17085_v11 = vld [vmem:[%s26440_s6 + $0x430] sm:$0xf0] }
 0x429   :  { %5909 = vmatpush.bf16.msrb.mxu0 %v13677_v2  ;;  %v14008_v2 = vor.u32 %v16967_v13, %v14007_v63  ;;  %v17064_v27 = vld [vmem:[%s26440_s6 + $0x388] sm:$0xf0]  ;;  %v13995_v8 = vld [vmem:[%s26440_s6 + $0x60] sm:$0xf]  ;;  %v14033_v40 = vld [vmem:[%s26440_s6 + $0xb4] sm:$0xf0]  ;;  %v5029_v63 = vadd.f32 %v22154_v18, %v5017_v10 }
 0x42a   :  { %v16964_v1 = vld [vmem:[%s26440_s6 + $0x68] sm:$0xf0]  ;;  %v13616_v14 = vld [vmem:[%s26440_s6 + $0x2a8] sm:$0xf]  ;;  %v17037_v16 = vld [vmem:[%s26440_s6 + $0x2b0] sm:$0xf0]  ;;  %v13725_v60 = vor.u32 %v17064_v27, %v13724_v51 }
 0x42b   :  { %5938 = vmatpush.bf16.msra.mxu1 %v13857_v38  ;;  %5923 = vmatpush.bf16.msrb.mxu2 %v13773_v53  ;;  %v13629_v38 = vor.u32 %v17040_v45, %v13628_v39  ;;  %v16972_v53 = vld [vmem:[%s26440_s6 + $0xac] sm:$0xf]  ;;  %v13996_v47 = vor.u32 %v16964_v1, %v13995_v8  ;;  %v14127_v12 = vld [vmem:[%s26440_s6 + $0x168] sm:$0xf]  ;;  %v16997_v37 = vld [vmem:[%s26440_s6 + $0x170] sm:$0xf0]  ;;  %v13617_v57 = vor.u32 %v17037_v16, %v13616_v14 }
 0x42c   :  { %5956 = vmatpush.bf16.msra.mxu3 %v13905_v4  ;;  %v13809_v4 = vor.u32 %v17085_v11, %v13808_v25  ;;  %v14223_v15 = vld [vmem:[%s26440_s6 + $0x228] sm:$0xf]  ;;  %v17021_v0 = vld [vmem:[%s26440_s6 + $0x230] sm:$0xf0]  ;;  %v14021_v29 = vld [vmem:[%s26440_s6 + $0x9c] sm:$0xf0]  ;;  %v14128_v7 = vor.u32 %v16997_v37, %v14127_v12 }
 0x42d   :  { %5910 = vmatpush.bf16.msrb.mxu0 %v13665_v31  ;;  %v13712_v31 = vld [vmem:[%s26440_s6 + $0x368] sm:$0xf]  ;;  %v16969_v49 = vld [vmem:[%s26440_s6 + $0x94] sm:$0xf]  ;;  %v14115_v46 = vld [vmem:[%s26440_s6 + $0x150] sm:$0xf] }
 0x42e   :  { %5873 = vmatmul.bf16.vlgmr.msrb.gmra.mxu1 %v22278_v56  ;;  %v13983_v50 = vld [vmem:[%s26440_s6 + $0x48] sm:$0xf]  ;;  %v14024_v59 = vor.u32 %v16969_v49, %v14021_v29  ;;  %v14211_v23 = vld [vmem:[%s26440_s6 + $0x210] sm:$0xf]  ;;  %v17018_v54 = vld [vmem:[%s26440_s6 + $0x218] sm:$0xf0] }
 0x42f   :  { %5887 = vmatmul.bf16.vlgmr.msrb.gmra.mxu3 %v22290_v62  ;;  %5939 = vmatpush.bf16.msra.mxu1 %v13845_v55  ;;  %v17061_v55 = vld [vmem:[%s26440_s6 + $0x370] sm:$0xf0]  ;;  %v13971_v20 = vld [vmem:[%s26440_s6 + $0x30] sm:$0xf]  ;;  %v16966_v43 = vld [vmem:[%s26440_s6 + $0x7c] sm:$0xf]  ;;  %v14212_v18 = vor.u32 %v17018_v54, %v14211_v23 }
 0x430   :  { %5924 = vmatpush.bf16.msrb.mxu2 %v13761_v61  ;;  %6427 = vmatpush.bf16.msrb.mxu3 %v14032_v26  ;;  %v14036_v61 = vor.u32 %v16972_v53, %v14033_v40  ;;  %v16961_v26 = vld [vmem:[%s26440_s6 + $0x50] sm:$0xf0]  ;;  %v14009_v32 = vld [vmem:[%s26440_s6 + $0x84] sm:$0xf0]  ;;  %v16991_v39 = vld [vmem:[%s26440_s6 + $0x140] sm:$0xf0] }
 0x431   :  { %13943 = vmatmul.msk.bf16.vlgmr.msra.gmra.mxu0 %vm4523_vm3, %v22312_v36  ;;  %v13984_v34 = vor.u32 %v16961_v26, %v13983_v50  ;;  %v14012_v45 = vor.u32 %v16966_v43, %v14009_v32  ;;  %v17015_v51 = vld [vmem:[%s26440_s6 + $0x200] sm:$0xf0]  ;;  %v13997_v11 = vld [vmem:[%s26440_s6 + $0x6c] sm:$0xf0]  ;;  %v5037_v27 = vmax.f32 %v5029_v63, 0.0 }
 0x432   :  { %5911 = vmatpush.bf16.msrb.mxu0 %v13653_v28  ;;  %5859 = vmatmul.bf16.vlgmr.msra.gmra.mxu2 %v22268_v19  ;;  %v5030_v28 = vadd.f32 %v22171_v21, %v5018_v22  ;;  %v16958_v21 = vld [vmem:[%s26440_s6 + $0x38] sm:$0xf0]  ;;  %v16963_v25 = vld [vmem:[%s26440_s6 + $0x64] sm:$0xf]  ;;  %v13947_v14 = vld [vmem:[%s26440_s6] sm:$0xf] }
 0x433   :  { %5940 = vmatpush.bf16.msra.mxu1 %v13833_v41  ;;  %v13713_v41 = vor.u32 %v17061_v55, %v13712_v31  ;;  %v16952_v16 = vld [vmem:[%s26440_s6 + $0x8] sm:$0xf0]  ;;  %v14271_v22 = vld [vmem:[%s26440_s6 + $0x288] sm:$0xf]  ;;  %v13985_v12 = vld [vmem:[%s26440_s6 + $0x54] sm:$0xf0] }
 0x434   :  { %5925 = vmatpush.bf16.msrb.mxu2 %v13749_v58  ;;  %6428 = vmatpush.bf16.msrb.mxu3 %v14020_v9  ;;  %v16994_v58 = vld [vmem:[%s26440_s6 + $0x158] sm:$0xf0]  ;;  %v14224_v9 = vor.u32 %v17021_v0, %v14223_v15  ;;  %v17012_v31 = vld [vmem:[%s26440_s6 + $0x1e8] sm:$0xf0]  ;;  %v13948_v37 = vor.u32 %v16952_v16, %v13947_v14  ;;  %v16985_v15 = vld [vmem:[%s26440_s6 + $0x110] sm:$0xf0] }
 0x435   :  { %v14116_v13 = vor.u32 %v16994_v58, %v14115_v46  ;;  %v16960_v55 = vld [vmem:[%s26440_s6 + $0x4c] sm:$0xf]  ;;  %v17009_v29 = vld [vmem:[%s26440_s6 + $0x1d0] sm:$0xf0]  ;;  %v14259_v10 = vld [vmem:[%s26440_s6 + $0x270] sm:$0xf] }
 0x436   :  { %5912 = vmatpush.bf16.msrb.mxu0 %v13641_v6  ;;  %v13972_v6 = vor.u32 %v16958_v21, %v13971_v20  ;;  %v13988_v49 = vor.u32 %v16960_v55, %v13985_v12  ;;  %v14067_v46 = vld [vmem:[%s26440_s6 + $0xf0] sm:$0xf]  ;;  %v16982_v58 = vld [vmem:[%s26440_s6 + $0xf8] sm:$0xf0]  ;;  %v14247_v43 = vld [vmem:[%s26440_s6 + $0x258] sm:$0xf] }
 0x437   :  { %5941 = vmatpush.bf16.msra.mxu1 %v13821_v33  ;;  %v14103_v33 = vld [vmem:[%s26440_s6 + $0x138] sm:$0xf]  ;;  %v14163_v20 = vld [vmem:[%s26440_s6 + $0x1b0] sm:$0xf]  ;;  %v17006_v54 = vld [vmem:[%s26440_s6 + $0x1b8] sm:$0xf0]  ;;  %v14068_v32 = vor.u32 %v16982_v58, %v14067_v46 }
 0x438   :  { %5926 = vmatpush.bf16.msrb.mxu2 %v13737_v48  ;;  %6429 = vmatpush.bf16.msrb.mxu3 %v14008_v2  ;;  %v13959_v48 = vld [vmem:[%s26440_s6 + $0x18] sm:$0xf]  ;;  %v16955_v2 = vld [vmem:[%s26440_s6 + $0x20] sm:$0xf0]  ;;  %v14104_v8 = vor.u32 %v16991_v39, %v14103_v33  ;;  %v16954_v63 = vld [vmem:[%s26440_s6 + $0x1c] sm:$0xf]  ;;  %v14164_v33 = vor.u32 %v17006_v54, %v14163_v20 }
 0x439   :  { %v13960_v1 = vor.u32 %v16955_v2, %v13959_v48  ;;  %v17024_v2 = vld [vmem:[%s26440_s6 + $0x248] sm:$0xf0]  ;;  %v14225_v16 = vld [vmem:[%s26440_s6 + $0x234] sm:$0xf0]  ;;  %v14261_v46 = vld [vmem:[%s26440_s6 + $0x27c] sm:$0xf0] }
 0x43a   :  { %5913 = vmatpush.bf16.msrb.mxu0 %v13629_v38  ;;  %v16988_v38 = vld [vmem:[%s26440_s6 + $0x128] sm:$0xf0]  ;;  %v16990_v58 = vld [vmem:[%s26440_s6 + $0x13c] sm:$0xf]  ;;  %v14111_v20 = vld [vmem:[%s26440_s6 + $0x140] sm:$0xf] }
 0x43b   :  { %5942 = vmatpush.bf16.msra.mxu1 %v13809_v4  ;;  %v14000_v4 = vor.u32 %v16963_v25, %v13997_v11  ;;  %v13949_v25 = vld [vmem:[%s26440_s6 + $0xc] sm:$0xf0]  ;;  %v17020_v14 = vld [vmem:[%s26440_s6 + $0x22c] sm:$0xf] }
 0x43c   :  { %5927 = vmatpush.bf16.msrb.mxu2 %v13725_v60  ;;  %6430 = vmatpush.bf16.msrb.mxu3 %v13996_v47  ;;  %v17033_v60 = vld [vmem:[%s26440_s6 + $0x290] sm:$0xf0] }
 0x43d   :  { %v14272_v26 = vor.u32 %v17033_v60, %v14271_v22  ;;  %v14139_v60 = vld [vmem:[%s26440_s6 + $0x180] sm:$0xf] }
 0x43e   :  { %5914 = vmatpush.bf16.msrb.mxu0 %v13617_v57  ;;  %5943 = vmatmul.bf16.vlgmr.msra.gmra.mxu1 %v22290_v62  ;;  %v5038_v62 = vmax.f32 %v5030_v28, 0.0  ;;  %v14175_v57 = vld [vmem:[%s26440_s6 + $0x1c8] sm:$0xf] }
 0x43f   :  { %6483 = vmatpush.bf16.msrb.mxu1 %v14036_v61  ;;  %13944 = vmatmul.msk.bf16.vlgmr.msra.gmra.mxu3 %vm4523_vm3, %v22312_v36  ;;  %v14199_v36 = vld [vmem:[%s26440_s6 + $0x1f8] sm:$0xf]  ;;  %v14079_v61 = vld [vmem:[%s26440_s6 + $0x108] sm:$0xf] }
 0x440   :  { %5928 = vmatpush.bf16.msrb.mxu2 %v13713_v41  ;;  %6431 = vmatpush.bf16.msrb.mxu3 %v13984_v34  ;;  %v22578_v53 = vpack.c.bf16 %v5038_v62, %v5037_v27  ;;  %v14200_v40 = vor.u32 %v17015_v51, %v14199_v36  ;;  %v14080_v28 = vor.u32 %v16985_v15, %v14079_v61  ;;  %v16957_v41 = vld [vmem:[%s26440_s6 + $0x34] sm:$0xf]  ;;  %v13973_v34 = vld [vmem:[%s26440_s6 + $0x3c] sm:$0xf0]  ;;  %v14055_v62 = vld [vmem:[%s26440_s6 + $0xd8] sm:$0xf] }
 0x441   :  { %5915 = vmatmul.bf16.vlgmr.msrb.gmra.mxu0 %v22268_v19  ;;  %v14091_v19 = vld [vmem:[%s26440_s6 + $0x120] sm:$0xf]  ;;  %v13976_v21 = vor.u32 %v16957_v41, %v13973_v34  ;;  %v16951_v51 = vld [vmem:[%s26440_s6 + $0x4] sm:$0xf]  ;;  %v16996_v27 = vld [vmem:[%s26440_s6 + $0x16c] sm:$0xf] }
 0x442   :  { %6441 = vmatpush.bf16.msra.mxu0 %v14128_v7  ;;  %v14092_v47 = vor.u32 %v16988_v38, %v14091_v19  ;;  %v5965_v0 = vunpack.c.l.b16 %v22578_v53  ;;  %v17030_v7 = vld [vmem:[%s26440_s6 + $0x278] sm:$0xf0]  ;;  %v14235_v36 = vld [vmem:[%s26440_s6 + $0x240] sm:$0xf]  ;;  %v14273_v61 = vld [vmem:[%s26440_s6 + $0x294] sm:$0xf0] }
 0x443   :  { %6484 = vmatpush.bf16.msrb.mxu1 %v14024_v59  ;;  %5929 = vmatmul.bf16.vlgmr.msrb.gmra.mxu2 %v22278_v56  ;;  %v14187_v56 = vld [vmem:[%s26440_s6 + $0x1e0] sm:$0xf]  ;;  %v14260_v23 = vor.u32 %v17030_v7, %v14259_v10  ;;  %v16998_v19 = vld [vmem:[%s26440_s6 + $0x178] sm:$0xf0]  ;;  %v16993_v15 = vld [vmem:[%s26440_s6 + $0x154] sm:$0xf] }
 0x444   :  { %6455 = vmatpush.bf16.msra.mxu2 %v14224_v9  ;;  %6432 = vmatpush.bf16.msrb.mxu3 %v13972_v6  ;;  %v14188_v50 = vor.u32 %v17012_v31, %v14187_v56  ;;  %v14176_v9 = vor.u32 %v17009_v29, %v14175_v57  ;;  %v22637_v59 = vpack.c.b16 %v5308_v5, %v5965_v0  ;;  %v17027_v5 = vld [vmem:[%s26440_s6 + $0x260] sm:$0xf0]  ;;  %v14043_v38 = vld [vmem:[%s26440_s6 + $0xc0] sm:$0xf]  ;;  %v14123_v0 = vld [vmem:[%s26440_s6 + $0x158] sm:$0xf] }
 0x445   :  { %v16979_v6 = vld [vmem:[%s26440_s6 + $0xe0] sm:$0xf0]  ;;  %v14248_v39 = vor.u32 %v17027_v5, %v14247_v43  ;;  %v14236_v56 = vor.u32 %v17024_v2, %v14235_v36  ;;  %v13952_v31 = vor.u32 %v16951_v51, %v13949_v25  ;;  %v14117_v57 = vld [vmem:[%s26440_s6 + $0x15c] sm:$0xf0]  ;;  %v17029_v34 = vld [vmem:[%s26440_s6 + $0x274] sm:$0xf] }
 0x446   :  { %6442 = vmatpush.bf16.msra.mxu0 %v14116_v13  ;;  %v13961_v13 = vld [vmem:[%s26440_s6 + $0x24] sm:$0xf0]  ;;  %v14056_v11 = vor.u32 %v16979_v6, %v14055_v62  ;;  %v14213_v7 = vld [vmem:[%s26440_s6 + $0x21c] sm:$0xf0]  ;;  %v14264_v42 = vor.u32 %v17029_v34, %v14261_v46  ;;  %v16987_v62 = vld [vmem:[%s26440_s6 + $0x124] sm:$0xf] }
 0x447   :  { %6485 = vmatpush.bf16.msrb.mxu1 %v14012_v45  ;;  %v17003_v45 = vld [vmem:[%s26440_s6 + $0x1a0] sm:$0xf0]  ;;  %v13964_v48 = vor.u32 %v16954_v63, %v13961_v13  ;;  %v14201_v43 = vld [vmem:[%s26440_s6 + $0x204] sm:$0xf0]  ;;  %v17026_v63 = vld [vmem:[%s26440_s6 + $0x25c] sm:$0xf] }
 0x448   :  { %6456 = vmatpush.bf16.msra.mxu2 %v14212_v18  ;;  %6433 = vmatpush.bf16.msrb.mxu3 %v13960_v1  ;;  %v14151_v18 = vld [vmem:[%s26440_s6 + $0x198] sm:$0xf]  ;;  %v14135_v1 = vld [vmem:[%s26440_s6 + $0x170] sm:$0xf]  ;;  %v14249_v13 = vld [vmem:[%s26440_s6 + $0x264] sm:$0xf0] }
 0x449   :  { %v14136_v55 = vor.u32 %v16998_v19, %v14135_v1  ;;  %v14093_v6 = vld [vmem:[%s26440_s6 + $0x12c] sm:$0xf0]  ;;  %v17011_v36 = vld [vmem:[%s26440_s6 + $0x1e4] sm:$0xf]  ;;  %v16984_v1 = vld [vmem:[%s26440_s6 + $0x10c] sm:$0xf] }
 0x44a   :  { %6443 = vmatpush.bf16.msra.mxu0 %v14104_v8  ;;  %v14129_v8 = vld [vmem:[%s26440_s6 + $0x174] sm:$0xf0]  ;;  %v14096_v2 = vor.u32 %v16987_v62, %v14093_v6  ;;  %v17023_v25 = vld [vmem:[%s26440_s6 + $0x244] sm:$0xf]  ;;  %v14063_v34 = vld [vmem:[%s26440_s6 + $0xe0] sm:$0xf] }
 0x44b   :  { %6486 = vmatpush.bf16.msrb.mxu1 %v14000_v4  ;;  %v14152_v4 = vor.u32 %v17003_v45, %v14151_v18  ;;  %v14132_v22 = vor.u32 %v16996_v27, %v14129_v8  ;;  %v14252_v45 = vor.u32 %v17026_v63, %v14249_v13  ;;  %v14039_v27 = vld [vmem:[%s26440_s6 + $0xb0] sm:$0xf]  ;;  %v16974_v8 = vld [vmem:[%s26440_s6 + $0xb8] sm:$0xf0]  ;;  %v14081_v19 = vld [vmem:[%s26440_s6 + $0x114] sm:$0xf0] }
 0x44c   :  { %6457 = vmatpush.bf16.msra.mxu2 %v14200_v40  ;;  %6434 = vmatpush.bf16.msrb.mxu3 %v13948_v37  ;;  %v16976_v40 = vld [vmem:[%s26440_s6 + $0xc8] sm:$0xf0]  ;;  %v16977_v63 = vld [vmem:[%s26440_s6 + $0xd0] sm:$0xf0]  ;;  %v14231_v62 = vld [vmem:[%s26440_s6 + $0x230] sm:$0xf] }
 0x44d   :  { %v14044_v12 = vor.u32 %v16976_v40, %v14043_v38  ;;  %v17032_v37 = vld [vmem:[%s26440_s6 + $0x28c] sm:$0xf]  ;;  %v14087_v40 = vld [vmem:[%s26440_s6 + $0x110] sm:$0xf]  ;;  %v17022_v6 = vld [vmem:[%s26440_s6 + $0x238] sm:$0xf0] }
 0x44e   :  { %6444 = vmatpush.bf16.msra.mxu0 %v14092_v47  ;;  %v17000_v47 = vld [vmem:[%s26440_s6 + $0x188] sm:$0xf0]  ;;  %v14276_v10 = vor.u32 %v17032_v37, %v14273_v61  ;;  %v14069_v37 = vld [vmem:[%s26440_s6 + $0xfc] sm:$0xf0] }
 0x44f   :  { %6487 = vmatpush.bf16.msrb.mxu1 %v13988_v49  ;;  %6435 = vmatmul.bf16.vlgmr.msrb.gmra.mxu3 %v22637_v59  ;;  %v16995_v49 = vld [vmem:[%s26440_s6 + $0x160] sm:$0xf0]  ;;  %v14140_v29 = vor.u32 %v17000_v47, %v14139_v60  ;;  %v14027_v60 = vld [vmem:[%s26440_s6 + $0x98] sm:$0xf]  ;;  %v16980_v46 = vld [vmem:[%s26440_s6 + $0xe8] sm:$0xf0] }
 0x450   :  { %6458 = vmatpush.bf16.msra.mxu2 %v14188_v50  ;;  %6473 = vmatpush.bf16.msra.mxu3 %v14272_v26  ;;  %v14228_v50 = vor.u32 %v17020_v14, %v14225_v16  ;;  %v5966_v26 = vunpack.c.h.b16 %v22578_v53  ;;  %v17017_v53 = vld [vmem:[%s26440_s6 + $0x214] sm:$0xf]  ;;  %v14124_v41 = vor.u32 %v16995_v49, %v14123_v0  ;;  %v17008_v14 = vld [vmem:[%s26440_s6 + $0x1cc] sm:$0xf]  ;;  %v14177_v16 = vld [vmem:[%s26440_s6 + $0x1d4] sm:$0xf0] }
 0x451   :  { %v14216_v54 = vor.u32 %v17017_v53, %v14213_v7  ;;  %v14180_v61 = vor.u32 %v17008_v14, %v14177_v16  ;;  %v16968_v53 = vld [vmem:[%s26440_s6 + $0x88] sm:$0xf0]  ;;  %v16978_v7 = vld [vmem:[%s26440_s6 + $0xdc] sm:$0xf] }
 0x452   :  { %6445 = vmatpush.bf16.msra.mxu0 %v14080_v28  ;;  %v14120_v28 = vor.u32 %v16993_v15, %v14117_v57  ;;  %v14075_v15 = vld [vmem:[%s26440_s6 + $0xf8] sm:$0xf]  ;;  %v14165_v57 = vld [vmem:[%s26440_s6 + $0x1bc] sm:$0xf0]  ;;  %v17186_v14 = vld [vmem:[%s26440_s6 + $0x758] sm:$0xf0] }
 0x453   :  { %6488 = vmatpush.bf16.msrb.mxu1 %v13976_v21  ;;  %v16992_v21 = vld [vmem:[%s26440_s6 + $0x148] sm:$0xf0] }
 0x454   :  { %6459 = vmatpush.bf16.msra.mxu2 %v14176_v9  ;;  %6474 = vmatpush.bf16.msra.mxu3 %v14260_v23  ;;  %v22748_v9 = vpack.c.b16 %v5309_v24, %v5966_v26  ;;  %v14105_v23 = vld [vmem:[%s26440_s6 + $0x144] sm:$0xf0]  ;;  %v17014_v24 = vld [vmem:[%s26440_s6 + $0x1fc] sm:$0xf]  ;;  %v17005_v26 = vld [vmem:[%s26440_s6 + $0x1b4] sm:$0xf] }
 0x455   :  { %v14108_v5 = vor.u32 %v16990_v58, %v14105_v23  ;;  %v14204_v18 = vor.u32 %v17014_v24, %v14201_v43  ;;  %v17002_v58 = vld [vmem:[%s26440_s6 + $0x19c] sm:$0xf]  ;;  %v14153_v23 = vld [vmem:[%s26440_s6 + $0x1a4] sm:$0xf0]  ;;  %v16975_v24 = vld [vmem:[%s26440_s6 + $0xc4] sm:$0xf]  ;;  %v14064_v43 = vor.u32 %v16980_v46, %v14063_v34 }
 0x456   :  { %6446 = vmatpush.bf16.msra.mxu0 %v14068_v32  ;;  %v14112_v32 = vor.u32 %v16992_v21, %v14111_v20  ;;  %v14156_v13 = vor.u32 %v17002_v58, %v14153_v23  ;;  %v14638_v46 = vld [vmem:[%s26440_s6 + $0x720] sm:$0xf]  ;;  %v17180_v58 = vld [vmem:[%s26440_s6 + $0x728] sm:$0xf0]  ;;  %v13955_v23 = vld [vmem:[%s26440_s6 + $0x8] sm:$0xf] }
 0x457   :  { %6489 = vmatpush.bf16.msrb.mxu1 %v13964_v48  ;;  %v14189_v48 = vld [vmem:[%s26440_s6 + $0x1ec] sm:$0xf0] }
 0x458   :  { %6460 = vmatpush.bf16.msra.mxu2 %v14164_v33  ;;  %6475 = vmatpush.bf16.msra.mxu3 %v14248_v39  ;;  %v14099_v33 = vld [vmem:[%s26440_s6 + $0x128] sm:$0xf]  ;;  %v16989_v39 = vld [vmem:[%s26440_s6 + $0x130] sm:$0xf0]  ;;  %v14192_v38 = vor.u32 %v17011_v36, %v14189_v48 }
 0x459   :  { %v14100_v51 = vor.u32 %v16989_v39, %v14099_v33  ;;  %v14674_v33 = vld [vmem:[%s26440_s6 + $0x768] sm:$0xf]  ;;  %v17189_v39 = vld [vmem:[%s26440_s6 + $0x770] sm:$0xf0] }
 0x45a   :  { %6447 = vmatpush.bf16.msra.mxu0 %v14056_v11  ;;  %v14237_v11 = vld [vmem:[%s26440_s6 + $0x24c] sm:$0xf0] }
 0x45b   :  { %6490 = vmatpush.bf16.msrb.mxu1 %v13952_v31  ;;  %v14040_v31 = vor.u32 %v16974_v8, %v14039_v27  ;;  %v13991_v27 = vld [vmem:[%s26440_s6 + $0x50] sm:$0xf]  ;;  %v16962_v8 = vld [vmem:[%s26440_s6 + $0x58] sm:$0xf0] }
 0x45c   :  { %6461 = vmatpush.bf16.msra.mxu2 %v14152_v4  ;;  %6476 = vmatpush.bf16.msra.mxu3 %v14236_v56  ;;  %v16986_v4 = vld [vmem:[%s26440_s6 + $0x118] sm:$0xf0]  ;;  %v14240_v56 = vor.u32 %v17023_v25, %v14237_v11  ;;  %v14232_v11 = vor.u32 %v17022_v6, %v14231_v62  ;;  %v13992_v16 = vor.u32 %v16962_v8, %v13991_v27  ;;  %v14183_v62 = vld [vmem:[%s26440_s6 + $0x1d0] sm:$0xf] }
 0x45d   :  { %v14088_v47 = vor.u32 %v16986_v4, %v14087_v40  ;;  %v17019_v40 = vld [vmem:[%s26440_s6 + $0x220] sm:$0xf0]  ;;  %v17010_v6 = vld [vmem:[%s26440_s6 + $0x1d8] sm:$0xf0] }
 0x45e   :  { %6448 = vmatpush.bf16.msra.mxu0 %v14044_v12  ;;  %6491 = vmatmul.bf16.vlgmr.msrb.gmra.mxu1 %v22637_v59  ;;  %v16981_v12 = vld [vmem:[%s26440_s6 + $0xf4] sm:$0xf]  ;;  %v17162_v8 = vld [vmem:[%s26440_s6 + $0x698] sm:$0xf0] }
 0x45f   :  { %6553 = vmatpush.bf16.msra.mxu1 %v14136_v55  ;;  %14281 = vmatmul.msk.bf16.vlgmr.msra.gmra.mxu3 %vm4523_vm3, %v22372_v17  ;;  %v16971_v55 = vld [vmem:[%s26440_s6 + $0xa0] sm:$0xf0]  ;;  %v14072_v49 = vor.u32 %v16981_v12, %v14069_v37  ;;  %v14207_v37 = vld [vmem:[%s26440_s6 + $0x200] sm:$0xf] }
 0x460   :  { %6497 = vmatpush.bf16.msrb.mxu3 %v14132_v22  ;;  %6462 = vmatpush.bf16.msra.mxu2 %v14140_v29  ;;  %v14084_v22 = vor.u32 %v16984_v1, %v14081_v19  ;;  %v14028_v0 = vor.u32 %v16971_v55, %v14027_v60  ;;  %v14015_v29 = vld [vmem:[%s26440_s6 + $0x80] sm:$0xf]  ;;  %v14675_v1 = vor.u32 %v17189_v39, %v14674_v33  ;;  %v16959_v55 = vld [vmem:[%s26440_s6 + $0x40] sm:$0xf0]  ;;  %v14626_v39 = vld [vmem:[%s26440_s6 + $0x708] sm:$0xf] }
 0x461   :  { %6449 = vmatmul.bf16.vlgmr.msra.gmra.mxu0 %v22748_v9  ;;  %v14016_v20 = vor.u32 %v16968_v53, %v14015_v29  ;;  %v16956_v53 = vld [vmem:[%s26440_s6 + $0x28] sm:$0xf0] }
 0x462   :  { %6511 = vmatpush.bf16.msrb.mxu0 %v14228_v50  ;;  %v16983_v50 = vld [vmem:[%s26440_s6 + $0x100] sm:$0xf0] }
 0x463   :  { %6554 = vmatpush.bf16.msra.mxu1 %v14124_v41  ;;  %6463 = vmatmul.bf16.vlgmr.msra.gmra.mxu2 %v22368_v3  ;;  %v14168_v41 = vor.u32 %v17005_v26, %v14165_v57  ;;  %v17183_v26 = vld [vmem:[%s26440_s6 + $0x740] sm:$0xf0] }
 0x464   :  { %6529 = vmatpush.bf16.msrb.mxu2 %v14276_v10  ;;  %6498 = vmatpush.bf16.msrb.mxu3 %v14120_v28  ;;  %v14076_v10 = vor.u32 %v16983_v50, %v14075_v15  ;;  %v14057_v28 = vld [vmem:[%s26440_s6 + $0xe4] sm:$0xf0]  ;;  %v14650_v50 = vld [vmem:[%s26440_s6 + $0x738] sm:$0xf] }
 0x465   :  { %v14060_v21 = vor.u32 %v16978_v7, %v14057_v28  ;;  %v14651_v7 = vor.u32 %v17183_v26, %v14650_v50  ;;  %v14195_v28 = vld [vmem:[%s26440_s6 + $0x1e8] sm:$0xf]  ;;  %v14446_v50 = vld [vmem:[%s26440_s6 + $0x5a0] sm:$0xf] }
 0x466   :  { %6512 = vmatpush.bf16.msrb.mxu0 %v14216_v54  ;;  %v14003_v54 = vld [vmem:[%s26440_s6 + $0x68] sm:$0xf] }
 0x467   :  { %6555 = vmatpush.bf16.msra.mxu1 %v14112_v32  ;;  %v14051_v32 = vld [vmem:[%s26440_s6 + $0xc8] sm:$0xf] }
 0x468   :  { %6530 = vmatpush.bf16.msrb.mxu2 %v14264_v42  ;;  %6499 = vmatpush.bf16.msrb.mxu3 %v14108_v5  ;;  %v16965_v42 = vld [vmem:[%s26440_s6 + $0x70] sm:$0xf0]  ;;  %v14045_v5 = vld [vmem:[%s26440_s6 + $0xcc] sm:$0xf0]  ;;  %v14052_v25 = vor.u32 %v16977_v63, %v14051_v32  ;;  %v14578_v32 = vld [vmem:[%s26440_s6 + $0x6a8] sm:$0xf]  ;;  %v14639_v63 = vor.u32 %v17180_v58, %v14638_v46 }
 0x469   :  { %v14004_v36 = vor.u32 %v16965_v42, %v14003_v54  ;;  %v14048_v48 = vor.u32 %v16975_v24, %v14045_v5  ;;  %v14243_v54 = vld [vmem:[%s26440_s6 + $0x248] sm:$0xf]  ;;  %v17025_v42 = vld [vmem:[%s26440_s6 + $0x250] sm:$0xf0] }
 0x46a   :  { %6513 = vmatpush.bf16.msrb.mxu0 %v14204_v18  ;;  %v16999_v18 = vld [vmem:[%s26440_s6 + $0x184] sm:$0xf]  ;;  %v17141_v5 = vld [vmem:[%s26440_s6 + $0x5f0] sm:$0xf0]  ;;  %v14244_v33 = vor.u32 %v17025_v42, %v14243_v54  ;;  %v14434_v42 = vld [vmem:[%s26440_s6 + $0x588] sm:$0xf] }
 0x46b   :  { %6556 = vmatpush.bf16.msra.mxu1 %v14100_v51  ;;  %v17034_v51 = vld [vmem:[%s26440_s6 + $0x298] sm:$0xf0]  ;;  %v17201_v46 = vld [vmem:[%s26440_s6 + $0x7d0] sm:$0xf0] }
 0x46c   :  { %6531 = vmatpush.bf16.msrb.mxu2 %v14252_v45  ;;  %6500 = vmatpush.bf16.msrb.mxu3 %v14096_v2  ;;  %v14141_v45 = vld [vmem:[%s26440_s6 + $0x18c] sm:$0xf0] }
 0x46d   :  { %v14279_v2 = vld [vmem:[%s26440_s6 + $0x290] sm:$0xf]  ;;  %v14144_v19 = vor.u32 %v16999_v18, %v14141_v45  ;;  %v17177_v18 = vld [vmem:[%s26440_s6 + $0x710] sm:$0xf0] }
 0x46e   :  { %6514 = vmatpush.bf16.msrb.mxu0 %v14192_v38  ;;  %v14219_v38 = vld [vmem:[%s26440_s6 + $0x218] sm:$0xf]  ;;  %v14280_v4 = vor.u32 %v17034_v51, %v14279_v2  ;;  %v14184_v2 = vor.u32 %v17010_v6, %v14183_v62  ;;  %v14470_v51 = vld [vmem:[%s26440_s6 + $0x5d0] sm:$0xf]  ;;  %v14627_v27 = vor.u32 %v17177_v18, %v14626_v39  ;;  %v17198_v6 = vld [vmem:[%s26440_s6 + $0x7b8] sm:$0xf0] }
 0x46f   :  { %6557 = vmatpush.bf16.msra.mxu1 %v14088_v47  ;;  %v14220_v60 = vor.u32 %v17019_v40, %v14219_v38  ;;  %v13979_v47 = vld [vmem:[%s26440_s6 + $0x38] sm:$0xf]  ;;  %v14614_v38 = vld [vmem:[%s26440_s6 + $0x6f0] sm:$0xf]  ;;  %v17174_v40 = vld [vmem:[%s26440_s6 + $0x6f8] sm:$0xf0] }
 0x470   :  { %6532 = vmatpush.bf16.msrb.mxu2 %v14240_v56  ;;  %6501 = vmatpush.bf16.msrb.mxu3 %v14084_v22  ;;  %v14662_v56 = vld [vmem:[%s26440_s6 + $0x750] sm:$0xf]  ;;  %v17031_v22 = vld [vmem:[%s26440_s6 + $0x280] sm:$0xf0]  ;;  %v13980_v57 = vor.u32 %v16959_v55, %v13979_v47  ;;  %v14159_v55 = vld [vmem:[%s26440_s6 + $0x1a0] sm:$0xf] }
 0x471   :  { %v14663_v12 = vor.u32 %v17186_v14, %v14662_v56  ;;  %v17159_v47 = vld [vmem:[%s26440_s6 + $0x680] sm:$0xf0]  ;;  %v14710_v62 = vld [vmem:[%s26440_s6 + $0x7b0] sm:$0xf]  ;;  %v17197_v39 = vld [vmem:[%s26440_s6 + $0x7b4] sm:$0xf] }
 0x472   :  { %6515 = vmatpush.bf16.msrb.mxu0 %v14180_v61  ;;  %v17016_v61 = vld [vmem:[%s26440_s6 + $0x208] sm:$0xf0]  ;;  %v14712_v18 = vld [vmem:[%s26440_s6 + $0x7bc] sm:$0xf0] }
 0x473   :  { %14282 = vmatmul.msk.bf16.vlgmr.msrb.gmra.mxu2 %vm4523_vm3, %v22372_v17  ;;  %6558 = vmatpush.bf16.msra.mxu1 %v14076_v10  ;;  %v14208_v29 = vor.u32 %v17016_v61, %v14207_v37  ;;  %v13967_v10 = vld [vmem:[%s26440_s6 + $0x20] sm:$0xf]  ;;  %v14602_v37 = vld [vmem:[%s26440_s6 + $0x6d8] sm:$0xf]  ;;  %v17171_v61 = vld [vmem:[%s26440_s6 + $0x6e0] sm:$0xf0] }
 0x474   :  { %6539 = vmatpush.bf16.msra.mxu2 %v14040_v31  ;;  %6502 = vmatpush.bf16.msrb.mxu3 %v14072_v49  ;;  %v14267_v31 = vld [vmem:[%s26440_s6 + $0x278] sm:$0xf]  ;;  %v17028_v49 = vld [vmem:[%s26440_s6 + $0x268] sm:$0xf0] }
 0x475   :  { %v14268_v15 = vor.u32 %v17031_v22, %v14267_v31  ;;  %v17135_v31 = vld [vmem:[%s26440_s6 + $0x5c0] sm:$0xf0]  ;;  %v14554_v22 = vld [vmem:[%s26440_s6 + $0x678] sm:$0xf] }
 0x476   :  { %6516 = vmatpush.bf16.msrb.mxu0 %v14168_v41  ;;  %v17013_v41 = vld [vmem:[%s26440_s6 + $0x1f0] sm:$0xf0]  ;;  %v14555_v26 = vor.u32 %v17159_v47, %v14554_v22  ;;  %v14686_v22 = vld [vmem:[%s26440_s6 + $0x780] sm:$0xf] }
 0x477   :  { %6559 = vmatpush.bf16.msra.mxu1 %v14064_v43  ;;  %v14196_v24 = vor.u32 %v17013_v41, %v14195_v28  ;;  %v14482_v43 = vld [vmem:[%s26440_s6 + $0x5e8] sm:$0xf]  ;;  %v14590_v28 = vld [vmem:[%s26440_s6 + $0x6c0] sm:$0xf]  ;;  %v17168_v41 = vld [vmem:[%s26440_s6 + $0x6c8] sm:$0xf0] }
 0x478   :  { %6540 = vmatpush.bf16.msra.mxu2 %v14028_v0  ;;  %6503 = vmatpush.bf16.msrb.mxu3 %v14060_v21  ;;  %v14255_v0 = vld [vmem:[%s26440_s6 + $0x260] sm:$0xf]  ;;  %v16953_v21 = vld [vmem:[%s26440_s6 + $0x10] sm:$0xf0] }
 0x479   :  { %v14256_v34 = vor.u32 %v17028_v49, %v14255_v0  ;;  %v13956_v45 = vor.u32 %v16953_v21, %v13955_v23  ;;  %v17132_v0 = vld [vmem:[%s26440_s6 + $0x5a8] sm:$0xf0]  ;;  %v14542_v49 = vld [vmem:[%s26440_s6 + $0x660] sm:$0xf] }
 0x47a   :  { %6517 = vmatpush.bf16.msrb.mxu0 %v14156_v13  ;;  %v17165_v13 = vld [vmem:[%s26440_s6 + $0x6b0] sm:$0xf0]  ;;  %v14447_v58 = vor.u32 %v17132_v0, %v14446_v50  ;;  %v17200_v23 = vld [vmem:[%s26440_s6 + $0x7cc] sm:$0xf]  ;;  %v14490_v50 = vld [vmem:[%s26440_s6 + $0x5f0] sm:$0xf] }
 0x47b   :  { %6560 = vmatpush.bf16.msra.mxu1 %v14052_v25  ;;  %v17138_v25 = vld [vmem:[%s26440_s6 + $0x5d8] sm:$0xf0]  ;;  %v14398_v0 = vld [vmem:[%s26440_s6 + $0x540] sm:$0xf] }
 0x47c   :  { %6541 = vmatpush.bf16.msra.mxu2 %v14016_v20  ;;  %6504 = vmatpush.bf16.msrb.mxu3 %v14048_v48  ;;  %v13968_v20 = vor.u32 %v16956_v53, %v13967_v10  ;;  %v14579_v48 = vor.u32 %v17165_v13, %v14578_v32  ;;  %v14603_v10 = vor.u32 %v17171_v61, %v14602_v37  ;;  %v14147_v53 = vld [vmem:[%s26440_s6 + $0x188] sm:$0xf]  ;;  %v17140_v37 = vld [vmem:[%s26440_s6 + $0x5ec] sm:$0xf] }
 0x47d   :  { %v14530_v32 = vld [vmem:[%s26440_s6 + $0x648] sm:$0xf] }
 0x47e   :  { %6518 = vmatpush.bf16.msrb.mxu0 %v14144_v19  ;;  %6561 = vmatmul.bf16.vlgmr.msra.gmra.mxu1 %v22748_v9  ;;  %v17007_v19 = vld [vmem:[%s26440_s6 + $0x1c0] sm:$0xf0] }
 0x47f   :  { %7194 = vmatpush.bf16.msrb.mxu1 %v14675_v1  ;;  %6505 = vmatmul.bf16.vlgmr.msrb.gmra.mxu3 %v22748_v9  ;;  %v14171_v1 = vld [vmem:[%s26440_s6 + $0x1b8] sm:$0xf] }
 0x480   :  { %6542 = vmatpush.bf16.msra.mxu2 %v14004_v36  ;;  %6567 = vmatpush.bf16.msra.mxu3 %v14232_v11  ;;  %v14483_v36 = vor.u32 %v17141_v5, %v14482_v43  ;;  %v14566_v11 = vld [vmem:[%s26440_s6 + $0x690] sm:$0xf]  ;;  %v14172_v14 = vor.u32 %v17007_v19, %v14171_v1  ;;  %v14591_v43 = vor.u32 %v17168_v41, %v14590_v28  ;;  %v17195_v1 = vld [vmem:[%s26440_s6 + $0x7a0] sm:$0xf0]  ;;  %v17164_v28 = vld [vmem:[%s26440_s6 + $0x6ac] sm:$0xf] }
 0x481   :  { %6519 = vmatmul.bf16.vlgmr.msrb.gmra.mxu0 %v22368_v3  ;;  %v14567_v56 = vor.u32 %v17162_v8, %v14566_v11  ;;  %v23145_v11 = vrot.slane %v22368_v3, 1  ;;  %v14698_v8 = vld [vmem:[%s26440_s6 + $0x798] sm:$0xf] }
 0x482   :  { %6585 = vmatpush.bf16.msra.mxu0 %v14280_v4  ;;  %v14471_v4 = vor.u32 %v17138_v25, %v14470_v51  ;;  %v14518_v51 = vld [vmem:[%s26440_s6 + $0x630] sm:$0xf]  ;;  %v17150_v25 = vld [vmem:[%s26440_s6 + $0x638] sm:$0xf0]  ;;  %v14580_v41 = vld [vmem:[%s26440_s6 + $0x6b4] sm:$0xf0] }
 0x483   :  { %7195 = vmatpush.bf16.msrb.mxu1 %v14663_v12  ;;  %v17004_v12 = vld [vmem:[%s26440_s6 + $0x1a8] sm:$0xf0] }
 0x484   :  { %6543 = vmatpush.bf16.msra.mxu2 %v13992_v16  ;;  %6568 = vmatpush.bf16.msra.mxu3 %v14220_v60  ;;  %v14458_v16 = vld [vmem:[%s26440_s6 + $0x5b8] sm:$0xf]  ;;  %v14615_v60 = vor.u32 %v17174_v40, %v14614_v38  ;;  %v17194_v38 = vld [vmem:[%s26440_s6 + $0x79c] sm:$0xf]  ;;  %v14700_v40 = vld [vmem:[%s26440_s6 + $0x7a4] sm:$0xf0] }
 0x485   :  { %v14703_v47 = vor.u32 %v17194_v38, %v14700_v40 }
 0x486   :  { %6586 = vmatpush.bf16.msra.mxu0 %v14268_v15  ;;  %v14459_v15 = vor.u32 %v17135_v31, %v14458_v16  ;;  %v14699_v16 = vor.u32 %v17195_v1, %v14698_v8  ;;  %v17147_v31 = vld [vmem:[%s26440_s6 + $0x620] sm:$0xf0]  ;;  %v17136_v8 = vld [vmem:[%s26440_s6 + $0x5c8] sm:$0xf0]  ;;  %v23265_v1 = vrot.slane %v22748_v9, 1 }
 0x487   :  { %7196 = vmatpush.bf16.msrb.mxu1 %v14651_v7  ;;  %v17001_v7 = vld [vmem:[%s26440_s6 + $0x190] sm:$0xf0]  ;;  %v14556_v9 = vld [vmem:[%s26440_s6 + $0x684] sm:$0xf0] }
 0x488   :  { %6544 = vmatpush.bf16.msra.mxu2 %v13980_v57  ;;  %6569 = vmatpush.bf16.msra.mxu3 %v14208_v29  ;;  %v14160_v57 = vor.u32 %v17004_v12, %v14159_v55  ;;  %v17156_v29 = vld [vmem:[%s26440_s6 + $0x668] sm:$0xf0]  ;;  %v14148_v54 = vor.u32 %v17001_v7, %v14147_v53  ;;  %v17191_v55 = vld [vmem:[%s26440_s6 + $0x784] sm:$0xf]  ;;  %v14688_v12 = vld [vmem:[%s26440_s6 + $0x78c] sm:$0xf0] }
 0x489   :  { %v14543_v21 = vor.u32 %v17156_v29, %v14542_v49  ;;  %v17120_v49 = vld [vmem:[%s26440_s6 + $0x548] sm:$0xf0]  ;;  %v14494_v29 = vld [vmem:[%s26440_s6 + $0x600] sm:$0xf] }
 0x48a   :  { %6587 = vmatpush.bf16.msra.mxu0 %v14256_v34  ;;  %v14722_v34 = vld [vmem:[%s26440_s6 + $0x7c8] sm:$0xf]  ;;  %v17144_v7 = vld [vmem:[%s26440_s6 + $0x608] sm:$0xf0] }
 0x48b   :  { %7197 = vmatpush.bf16.msrb.mxu1 %v14639_v63  ;;  %v14723_v5 = vor.u32 %v17201_v46, %v14722_v34  ;;  %v17153_v63 = vld [vmem:[%s26440_s6 + $0x650] sm:$0xf0]  ;;  %v14691_v46 = vor.u32 %v17191_v55, %v14688_v12 }
 0x48c   :  { %6545 = vmatpush.bf16.msra.mxu2 %v13968_v20  ;;  %6570 = vmatpush.bf16.msra.mxu3 %v14196_v24  ;;  %v14724_v20 = vld [vmem:[%s26440_s6 + $0x7d4] sm:$0xf0]  ;;  %v17129_v24 = vld [vmem:[%s26440_s6 + $0x590] sm:$0xf0] }
 0x48d   :  { %v14727_v13 = vor.u32 %v17200_v23, %v14724_v20  ;;  %v17188_v23 = vld [vmem:[%s26440_s6 + $0x76c] sm:$0xf]  ;;  %v14676_v20 = vld [vmem:[%s26440_s6 + $0x774] sm:$0xf0]  ;;  %v17133_v55 = vld [vmem:[%s26440_s6 + $0x5b0] sm:$0xf0] }
 0x48e   :  { %6588 = vmatpush.bf16.msra.mxu0 %v14244_v33  ;;  %v14435_v33 = vor.u32 %v17129_v24, %v14434_v42  ;;  %v17137_v42 = vld [vmem:[%s26440_s6 + $0x5d4] sm:$0xf]  ;;  %v14472_v24 = vld [vmem:[%s26440_s6 + $0x5dc] sm:$0xf0] }
 0x48f   :  { %7198 = vmatpush.bf16.msrb.mxu1 %v14627_v27  ;;  %v14715_v27 = vor.u32 %v17197_v39, %v14712_v18  ;;  %v14568_v39 = vld [vmem:[%s26440_s6 + $0x69c] sm:$0xf0]  ;;  %v17185_v18 = vld [vmem:[%s26440_s6 + $0x754] sm:$0xf] }
 0x490   :  { %6546 = vmatpush.bf16.msra.mxu2 %v13956_v45  ;;  %6571 = vmatpush.bf16.msra.mxu3 %v14184_v2  ;;  %v14531_v45 = vor.u32 %v17153_v63, %v14530_v32  ;;  %v14711_v2 = vor.u32 %v17198_v6, %v14710_v62  ;;  %v14478_v32 = vld [vmem:[%s26440_s6 + $0x5d8] sm:$0xf]  ;;  %v17139_v63 = vld [vmem:[%s26440_s6 + $0x5e0] sm:$0xf0]  ;;  %v17161_v62 = vld [vmem:[%s26440_s6 + $0x694] sm:$0xf] }
 0x491   :  { %14283 = vmatmul.msk.bf16.vlgmr.msra.gmra.mxu0 %vm4523_vm3, %v22372_v17  ;;  %v14571_v38 = vor.u32 %v17161_v62, %v14568_v39 }
 0x492   :  { %7166 = vmatpush.bf16.msrb.mxu0 %v14483_v36  ;;  %v14422_v36 = vld [vmem:[%s26440_s6 + $0x570] sm:$0xf] }
 0x493   :  { %6547 = vmatmul.bf16.vlgmr.msra.gmra.mxu2 %v22637_v59  ;;  %7199 = vmatpush.bf16.msrb.mxu1 %v14615_v60  ;;  %v17192_v60 = vld [vmem:[%s26440_s6 + $0x788] sm:$0xf0] }
 0x494   :  { %7180 = vmatpush.bf16.msrb.mxu2 %v14579_v48  ;;  %6572 = vmatpush.bf16.msra.mxu3 %v14172_v14  ;;  %v17126_v48 = vld [vmem:[%s26440_s6 + $0x578] sm:$0xf0]  ;;  %v14506_v14 = vld [vmem:[%s26440_s6 + $0x618] sm:$0xf]  ;;  %v14687_v53 = vor.u32 %v17192_v60, %v14686_v22  ;;  %v14448_v22 = vld [vmem:[%s26440_s6 + $0x5ac] sm:$0xf0] }
 0x495   :  { %v14423_v19 = vor.u32 %v17126_v48, %v14422_v36  ;;  %v14479_v48 = vor.u32 %v17139_v63, %v14478_v32  ;;  %v14430_v32 = vld [vmem:[%s26440_s6 + $0x578] sm:$0xf]  ;;  %v17127_v63 = vld [vmem:[%s26440_s6 + $0x580] sm:$0xf0] }
 0x496   :  { %7167 = vmatpush.bf16.msrb.mxu0 %v14471_v4  ;;  %v14519_v4 = vor.u32 %v17150_v25, %v14518_v51  ;;  %v14460_v51 = vld [vmem:[%s26440_s6 + $0x5c4] sm:$0xf0]  ;;  %v23256_v25 = vrot.slane %v22637_v59, 1  ;;  %v17158_v59 = vld [vmem:[%s26440_s6 + $0x67c] sm:$0xf] }
 0x497   :  { %7200 = vmatpush.bf16.msrb.mxu1 %v14603_v10  ;;  %v14559_v12 = vor.u32 %v17158_v59, %v14556_v9  ;;  %v17146_v9 = vld [vmem:[%s26440_s6 + $0x61c] sm:$0xf] }
 0x498   :  { %7181 = vmatpush.bf16.msrb.mxu2 %v14567_v56  ;;  %6573 = vmatpush.bf16.msra.mxu3 %v14160_v57  ;;  %v14410_v56 = vld [vmem:[%s26440_s6 + $0x558] sm:$0xf]  ;;  %v14507_v57 = vor.u32 %v17147_v31, %v14506_v14  ;;  %v14652_v14 = vld [vmem:[%s26440_s6 + $0x744] sm:$0xf0]  ;;  %v17131_v31 = vld [vmem:[%s26440_s6 + $0x5a4] sm:$0xf] }
 0x49a   :  { %7168 = vmatpush.bf16.msrb.mxu0 %v14459_v15  ;;  %v14484_v15 = vld [vmem:[%s26440_s6 + $0x5f4] sm:$0xf0] }
 0x49b   :  { %7201 = vmatpush.bf16.msrb.mxu1 %v14591_v43  ;;  %v5804_v34 = vpop.f32.mrf.mxu1  ;;  %v14495_v43 = vor.u32 %v17144_v7, %v14494_v29  ;;  %v17128_v29 = vld [vmem:[%s26440_s6 + $0x58c] sm:$0xf]  ;;  %v14442_v7 = vld [vmem:[%s26440_s6 + $0x590] sm:$0xf] }
 0x49c   :  { %7182 = vmatpush.bf16.msrb.mxu2 %v14555_v26  ;;  %6574 = vmatpush.bf16.msra.mxu3 %v14148_v54  ;;  %v17142_v26 = vld [vmem:[%s26440_s6 + $0x5f8] sm:$0xf0]  ;;  %v14399_v54 = vor.u32 %v17120_v49, %v14398_v0  ;;  %v14640_v0 = vld [vmem:[%s26440_s6 + $0x72c] sm:$0xf0] }
 0x49d   :  { %v23206_v10 = vpop.f32.mrf.mxu0 }
 0x49e   :  { %7169 = vmatpush.bf16.msrb.mxu0 %v14447_v58  ;;  %7202 = vmatmul.bf16.vlgmr.msrb.gmra.mxu1 %v23145_v11  ;;  %v14487_v58 = vor.u32 %v17140_v37, %v14484_v15 }
 0x49f   :  { %7268 = vmatpush.bf16.msra.mxu1 %v14727_v13  ;;  %6575 = vmatmul.bf16.vlgmr.msra.gmra.mxu3 %v22368_v3  ;;  %v17123_v3 = vld [vmem:[%s26440_s6 + $0x560] sm:$0xf0]  ;;  %v14679_v13 = vor.u32 %v17188_v23, %v14676_v20  ;;  %v14532_v20 = vld [vmem:[%s26440_s6 + $0x654] sm:$0xf0] }
 0x4a0   :  { %7183 = vmatpush.bf16.msrb.mxu2 %v14543_v21  ;;  %7212 = vmatpush.bf16.msrb.mxu3 %v14723_v5  ;;  %v14411_v61 = vor.u32 %v17123_v3, %v14410_v56  ;;  %v14491_v21 = vor.u32 %v17142_v26, %v14490_v50  ;;  %v14583_v5 = vor.u32 %v17164_v28, %v14580_v41  ;;  %v14544_v26 = vld [vmem:[%s26440_s6 + $0x66c] sm:$0xf0]  ;;  %v17130_v28 = vld [vmem:[%s26440_s6 + $0x598] sm:$0xf0] }
 0x4a1   :  { %v14451_v50 = vor.u32 %v17131_v31, %v14448_v22  ;;  %v17170_v31 = vld [vmem:[%s26440_s6 + $0x6dc] sm:$0xf]  ;;  %v14604_v22 = vld [vmem:[%s26440_s6 + $0x6e4] sm:$0xf0] }
 0x4a2   :  { %7170 = vmatpush.bf16.msrb.mxu0 %v14435_v33  ;;  %v5818_v6 = vpop.f32.mrf.mxu3  ;;  %v14475_v33 = vor.u32 %v17137_v42, %v14472_v24  ;;  %v14443_v42 = vor.u32 %v17130_v28, %v14442_v7  ;;  %v17125_v24 = vld [vmem:[%s26440_s6 + $0x574] sm:$0xf]  ;;  %v17143_v7 = vld [vmem:[%s26440_s6 + $0x604] sm:$0xf] }
 0x4a3   :  { %7269 = vmatpush.bf16.msra.mxu1 %v14715_v27  ;;  %v23247_v36 = vadd.f32 %v5818_v6, %v5804_v34  ;;  %v14466_v27 = vld [vmem:[%s26440_s6 + $0x5c0] sm:$0xf]  ;;  %v23294_v60 = vpop.f32.mrf.mxu1  ;;  %v17149_v6 = vld [vmem:[%s26440_s6 + $0x634] sm:$0xf] }
 0x4a4   :  { %7184 = vmatpush.bf16.msrb.mxu2 %v14531_v45  ;;  %7213 = vmatpush.bf16.msrb.mxu3 %v14711_v2  ;;  %v14664_v45 = vld [vmem:[%s26440_s6 + $0x75c] sm:$0xf0]  ;;  %v17134_v2 = vld [vmem:[%s26440_s6 + $0x5bc] sm:$0xf] }
 0x4a5   :  { %v14667_v40 = vor.u32 %v17185_v18, %v14664_v45  ;;  %v23276_v56 = vpop.f32.mrf.mxu0  ;;  %v14463_v3 = vor.u32 %v17134_v2, %v14460_v51  ;;  %v14520_v45 = vld [vmem:[%s26440_s6 + $0x63c] sm:$0xf0]  ;;  %v14431_v51 = vor.u32 %v17127_v63, %v14430_v32  ;;  %v17190_v32 = vld [vmem:[%s26440_s6 + $0x778] sm:$0xf0]  ;;  %v14730_v63 = vld [vmem:[%s26440_s6 + $0x7d0] sm:$0xf] }
 0x4a6   :  { %7171 = vmatpush.bf16.msrb.mxu0 %v14423_v19  ;;  %v23268_v19 = vrot.slane %v22372_v17, 1  ;;  %v17182_v17 = vld [vmem:[%s26440_s6 + $0x73c] sm:$0xf]  ;;  %v14616_v2 = vld [vmem:[%s26440_s6 + $0x6fc] sm:$0xf0]  ;;  %v14523_v59 = vor.u32 %v17149_v6, %v14520_v45 }
 0x4a7   :  { %7270 = vmatpush.bf16.msra.mxu1 %v14703_v47  ;;  %v14454_v47 = vld [vmem:[%s26440_s6 + $0x5a8] sm:$0xf]  ;;  %v14655_v37 = vor.u32 %v17182_v17, %v14652_v14  ;;  %v17163_v45 = vld [vmem:[%s26440_s6 + $0x6a0] sm:$0xf0] }
 0x4a8   :  { %7185 = vmatpush.bf16.msrb.mxu2 %v14519_v4  ;;  %7214 = vmatpush.bf16.msrb.mxu3 %v14699_v16  ;;  %v23273_v4 = vpop.f32.mrf.mxu2  ;;  %v14467_v16 = vor.u32 %v17136_v8, %v14466_v27  ;;  %v14455_v49 = vor.u32 %v17133_v55, %v14454_v47  ;;  %v17122_v27 = vld [vmem:[%s26440_s6 + $0x55c] sm:$0xf]  ;;  %v14412_v8 = vld [vmem:[%s26440_s6 + $0x564] sm:$0xf0] }
 0x4a9   :  { %v14415_v14 = vor.u32 %v17122_v27, %v14412_v8 }
 0x4aa   :  { %7172 = vmatpush.bf16.msrb.mxu0 %v14411_v61  ;;  %v17155_v61 = vld [vmem:[%s26440_s6 + $0x664] sm:$0xf]  ;;  %v23309_v15 = vpop.f32.mrf.mxu3 }
 0x4ab   :  { %7271 = vmatpush.bf16.msra.mxu1 %v14691_v46  ;;  %v14547_v41 = vor.u32 %v17155_v61, %v14544_v26  ;;  %v17152_v46 = vld [vmem:[%s26440_s6 + $0x64c] sm:$0xf]  ;;  %v14406_v61 = vld [vmem:[%s26440_s6 + $0x548] sm:$0xf]  ;;  %v14586_v26 = vld [vmem:[%s26440_s6 + $0x6b0] sm:$0xf] }
 0x4ac   :  { %7186 = vmatpush.bf16.msrb.mxu2 %v14507_v57  ;;  %7215 = vmatpush.bf16.msrb.mxu3 %v14687_v53  ;;  %v17179_v57 = vld [vmem:[%s26440_s6 + $0x724] sm:$0xf]  ;;  %v14436_v53 = vld [vmem:[%s26440_s6 + $0x594] sm:$0xf0] }
 0x4ad   :  { %v14643_v34 = vor.u32 %v17179_v57, %v14640_v0  ;;  %v14439_v23 = vor.u32 %v17128_v29, %v14436_v53  ;;  %v17166_v57 = vld [vmem:[%s26440_s6 + $0x6b8] sm:$0xf0]  ;;  %v15029_v29 = vld [vmem:[%s26440_s6 + $0x948] sm:$0xf]  ;;  %v17249_v53 = vld [vmem:[%s26440_s6 + $0x950] sm:$0xf0] }
 0x4ae   :  { %7173 = vmatpush.bf16.msrb.mxu0 %v14399_v54  ;;  %14733 = vmatmul.msk.bf16.vlgmr.msra.gmra.mxu1 %vm4523_vm3, %v23268_v19  ;;  %v14628_v54 = vld [vmem:[%s26440_s6 + $0x714] sm:$0xf0] }
 0x4af   :  { %7278 = vmatpush.bf16.msrb.mxu1 %v14491_v21  ;;  %14732 = vmatmul.msk.bf16.vlgmr.msrb.gmra.mxu3 %vm4523_vm3, %v23268_v19  ;;  %v17176_v21 = vld [vmem:[%s26440_s6 + $0x70c] sm:$0xf] }
 0x4b0   :  { %7222 = vmatpush.bf16.msra.mxu3 %v14487_v58  ;;  %7187 = vmatpush.bf16.msrb.mxu2 %v14495_v43  ;;  %v23335_v58 = vpop.f32.mrf.mxu2  ;;  %v14424_v43 = vld [vmem:[%s26440_s6 + $0x57c] sm:$0xf0]  ;;  %v14631_v62 = vor.u32 %v17176_v21, %v14628_v54  ;;  %v14587_v54 = vor.u32 %v17166_v57, %v14586_v26  ;;  %v17184_v57 = vld [vmem:[%s26440_s6 + $0x748] sm:$0xf0] }
 0x4b1   :  { %7174 = vmatmul.bf16.vlgmr.msrb.gmra.mxu0 %v23256_v25  ;;  %v14427_v18 = vor.u32 %v17125_v24, %v14424_v43  ;;  %v15030_v43 = vor.u32 %v17249_v53, %v15029_v29 }
 0x4b2   :  { %7236 = vmatpush.bf16.msra.mxu0 %v14583_v5  ;;  %v23352_v5 = vpop.f32.mrf.mxu0  ;;  %v23363_v39 = vpop.f32.mrf.mxu3 }
 0x4b3   :  { %7188 = vmatmul.bf16.vlgmr.msrb.gmra.mxu2 %v23265_v1  ;;  %7279 = vmatpush.bf16.msrb.mxu1 %v14479_v48  ;;  %v17173_v48 = vld [vmem:[%s26440_s6 + $0x6f4] sm:$0xf] }
 0x4b4   :  { %7250 = vmatpush.bf16.msra.mxu2 %v14679_v13  ;;  %7223 = vmatpush.bf16.msra.mxu3 %v14475_v33  ;;  %v14535_v13 = vor.u32 %v17152_v46, %v14532_v20  ;;  %v5874_v33 = vpop.f32.mrf.mxu1  ;;  %v14496_v46 = vld [vmem:[%s26440_s6 + $0x60c] sm:$0xf0] }
 0x4b5   :  { %v14592_v20 = vld [vmem:[%s26440_s6 + $0x6cc] sm:$0xf0] }
 0x4b6   :  { %7237 = vmatpush.bf16.msra.mxu0 %v14571_v38  ;;  %v14418_v38 = vld [vmem:[%s26440_s6 + $0x560] sm:$0xf] }
 0x4b7   :  { %7280 = vmatpush.bf16.msrb.mxu1 %v14467_v16  ;;  %v14508_v16 = vld [vmem:[%s26440_s6 + $0x624] sm:$0xf0] }
 0x4b8   :  { %7251 = vmatpush.bf16.msra.mxu2 %v14667_v40  ;;  %7224 = vmatpush.bf16.msra.mxu3 %v14463_v3  ;;  %v17124_v40 = vld [vmem:[%s26440_s6 + $0x568] sm:$0xf0]  ;;  %v14619_v3 = vor.u32 %v17173_v48, %v14616_v2  ;;  %v5860_v17 = vpop.f32.mrf.mxu2  ;;  %v14511_v0 = vor.u32 %v17146_v9, %v14508_v16  ;;  %v15017_v48 = vld [vmem:[%s26440_s6 + $0x930] sm:$0xf]  ;;  %v17246_v2 = vld [vmem:[%s26440_s6 + $0x938] sm:$0xf0] }
 0x4b9   :  { %v23398_v47 = vadd.f32 %v5874_v33, %v5860_v17  ;;  %v14419_v55 = vor.u32 %v17124_v40, %v14418_v38  ;;  %v14574_v33 = vld [vmem:[%s26440_s6 + $0x698] sm:$0xf]  ;;  %v17187_v40 = vld [vmem:[%s26440_s6 + $0x760] sm:$0xf0]  ;;  %v14562_v16 = vld [vmem:[%s26440_s6 + $0x680] sm:$0xf] }
 0x4ba   :  { %7238 = vmatpush.bf16.msra.mxu0 %v14559_v12  ;;  %v17119_v12 = vld [vmem:[%s26440_s6 + $0x544] sm:$0xf]  ;;  %v5904_v28 = vpop.f32.mrf.mxu0  ;;  %v14670_v38 = vld [vmem:[%s26440_s6 + $0x758] sm:$0xf]  ;;  %v14575_v17 = vor.u32 %v17163_v45, %v14574_v33  ;;  %v17225_v33 = vld [vmem:[%s26440_s6 + $0x890] sm:$0xf0] }
 0x4bb   :  { %7281 = vmatpush.bf16.msrb.mxu1 %v14455_v49  ;;  %v14607_v49 = vor.u32 %v17170_v31, %v14604_v22  ;;  %v17160_v22 = vld [vmem:[%s26440_s6 + $0x688] sm:$0xf0] }
 0x4bc   :  { %7252 = vmatpush.bf16.msra.mxu2 %v14655_v37  ;;  %7225 = vmatpush.bf16.msra.mxu3 %v14451_v50  ;;  %v14400_v37 = vld [vmem:[%s26440_s6 + $0x54c] sm:$0xf0]  ;;  %v17121_v50 = vld [vmem:[%s26440_s6 + $0x550] sm:$0xf0]  ;;  %v5876_v24 = vpop.f32.mrf.mxu1  ;;  %v14563_v29 = vor.u32 %v17160_v22, %v14562_v16 }
 0x4bd   :  { %v14407_v21 = vor.u32 %v17121_v50, %v14406_v61 }
 0x4be   :  { %7239 = vmatpush.bf16.msra.mxu0 %v14547_v41  ;;  %v5890_v41 = vpop.f32.mrf.mxu3 }
 0x4bf   :  { %7282 = vmatpush.bf16.msrb.mxu1 %v14443_v42  ;;  %v14682_v42 = vld [vmem:[%s26440_s6 + $0x770] sm:$0xf] }
 0x4c0   :  { %7253 = vmatpush.bf16.msra.mxu2 %v14643_v34  ;;  %7226 = vmatpush.bf16.msra.mxu3 %v14439_v23  ;;  %v14403_v34 = vor.u32 %v17119_v12, %v14400_v37  ;;  %v17167_v23 = vld [vmem:[%s26440_s6 + $0x6c4] sm:$0xf]  ;;  %v14683_v27 = vor.u32 %v17190_v32, %v14682_v42  ;;  %v14671_v37 = vor.u32 %v17187_v40, %v14670_v38  ;;  %v14646_v42 = vld [vmem:[%s26440_s6 + $0x728] sm:$0xf]  ;;  %v17193_v32 = vld [vmem:[%s26440_s6 + $0x790] sm:$0xf0] }
 0x4c1   :  { %v14595_v6 = vor.u32 %v17167_v23, %v14592_v20  ;;  %v17243_v12 = vld [vmem:[%s26440_s6 + $0x920] sm:$0xf0]  ;;  %v17240_v23 = vld [vmem:[%s26440_s6 + $0x908] sm:$0xf0]  ;;  %v14634_v40 = vld [vmem:[%s26440_s6 + $0x710] sm:$0xf] }
 0x4c2   :  { %7240 = vmatpush.bf16.msra.mxu0 %v14535_v13  ;;  %v17202_v13 = vld [vmem:[%s26440_s6 + $0x7d8] sm:$0xf0]  ;;  %v5916_v26 = vpop.f32.mrf.mxu0 }
 0x4c3   :  { %7283 = vmatpush.bf16.msrb.mxu1 %v14431_v51  ;;  %v14731_v8 = vor.u32 %v17202_v13, %v14730_v63 }
 0x4c4   :  { %7254 = vmatpush.bf16.msra.mxu2 %v14631_v62  ;;  %7227 = vmatpush.bf16.msra.mxu3 %v14427_v18  ;;  %v14499_v62 = vor.u32 %v17143_v7, %v14496_v46  ;;  %v5862_v18 = vpop.f32.mrf.mxu2  ;;  %v14550_v7 = vld [vmem:[%s26440_s6 + $0x668] sm:$0xf]  ;;  %v14993_v46 = vld [vmem:[%s26440_s6 + $0x900] sm:$0xf] }
 0x4c5   :  { %v5877_v51 = vadd.f32 %v5876_v24, %v5862_v18  ;;  %v17181_v24 = vld [vmem:[%s26440_s6 + $0x730] sm:$0xf0]  ;;  %v14538_v18 = vld [vmem:[%s26440_s6 + $0x650] sm:$0xf] }
 0x4c6   :  { %7241 = vmatpush.bf16.msra.mxu0 %v14523_v59  ;;  %v14718_v59 = vld [vmem:[%s26440_s6 + $0x7b8] sm:$0xf]  ;;  %v23477_v31 = vpop.f32.mrf.mxu3 }
 0x4c7   :  { %7284 = vmatpush.bf16.msrb.mxu1 %v14419_v55  ;;  %v5891_v9 = vadd.f32 %v5890_v41, %v5877_v51  ;;  %v15005_v55 = vld [vmem:[%s26440_s6 + $0x918] sm:$0xf]  ;;  %v17237_v51 = vld [vmem:[%s26440_s6 + $0x8f0] sm:$0xf0] }
 0x4c8   :  { %7255 = vmatpush.bf16.msra.mxu2 %v14619_v3  ;;  %7228 = vmatpush.bf16.msra.mxu3 %v14415_v14  ;;  %v17199_v3 = vld [vmem:[%s26440_s6 + $0x7c0] sm:$0xf0]  ;;  %v15018_v14 = vor.u32 %v17246_v2, %v15017_v48  ;;  %v15006_v53 = vor.u32 %v17243_v12, %v15005_v55  ;;  %v17154_v48 = vld [vmem:[%s26440_s6 + $0x658] sm:$0xf0]  ;;  %v14981_v2 = vld [vmem:[%s26440_s6 + $0x8e8] sm:$0xf] }
 0x4c9   :  { %v14719_v61 = vor.u32 %v17199_v3, %v14718_v59  ;;  %v23491_v50 = vadd.f32 %v5904_v28, %v5891_v9  ;;  %v5944_v28 = vpop.f32.mrf.mxu1  ;;  %v17178_v59 = vld [vmem:[%s26440_s6 + $0x718] sm:$0xf0]  ;;  %v14539_v3 = vor.u32 %v17154_v48, %v14538_v18  ;;  %v14982_v9 = vor.u32 %v17237_v51, %v14981_v2  ;;  %v14526_v55 = vld [vmem:[%s26440_s6 + $0x638] sm:$0xf]  ;;  %v17151_v12 = vld [vmem:[%s26440_s6 + $0x640] sm:$0xf0] }
 0x4ca   :  { %7242 = vmatpush.bf16.msra.mxu0 %v14511_v0  ;;  %v14706_v0 = vld [vmem:[%s26440_s6 + $0x7a0] sm:$0xf]  ;;  %v5918_v16 = vpop.f32.mrf.mxu0  ;;  %v17216_v18 = vld [vmem:[%s26440_s6 + $0x848] sm:$0xf0]  ;;  %v15125_v2 = vld [vmem:[%s26440_s6 + $0xa08] sm:$0xf] }
 0x4cb   :  { %7285 = vmatpush.bf16.msrb.mxu1 %v14407_v21  ;;  %v17273_v51 = vld [vmem:[%s26440_s6 + $0xa10] sm:$0xf0] }
 0x4cc   :  { %7256 = vmatpush.bf16.msra.mxu2 %v14607_v49  ;;  %7229 = vmatpush.bf16.msra.mxu3 %v14403_v34  ;;  %v17196_v49 = vld [vmem:[%s26440_s6 + $0x7a8] sm:$0xf0]  ;;  %v5930_v41 = vpop.f32.mrf.mxu2  ;;  %v17157_v34 = vld [vmem:[%s26440_s6 + $0x670] sm:$0xf0] }
 0x4cd   :  { %v5931_v20 = vadd.f32 %v5930_v41, %v5916_v26  ;;  %v14551_v13 = vor.u32 %v17157_v34, %v14550_v7  ;;  %v17234_v26 = vld [vmem:[%s26440_s6 + $0x8d8] sm:$0xf0]  ;;  %v14909_v41 = vld [vmem:[%s26440_s6 + $0x858] sm:$0xf]  ;;  %v17219_v34 = vld [vmem:[%s26440_s6 + $0x860] sm:$0xf0] }
 0x4ce   :  { %7243 = vmatpush.bf16.msra.mxu0 %v14499_v62  ;;  %7286 = vmatmul.bf16.vlgmr.msrb.gmra.mxu1 %v23256_v25  ;;  %v14994_v62 = vor.u32 %v17240_v23, %v14993_v46  ;;  %v5960_v45 = vpop.f32.mrf.mxu3 }
 0x4cf   :  { %7925 = vmatpush.bf16.msra.mxu1 %v15030_v43  ;;  %7230 = vmatmul.bf16.vlgmr.msra.gmra.mxu3 %v23256_v25  ;;  %v14658_v25 = vld [vmem:[%s26440_s6 + $0x740] sm:$0xf]  ;;  %v14694_v43 = vld [vmem:[%s26440_s6 + $0x788] sm:$0xf]  ;;  %v23528_v63 = vadd.f32 %v5944_v28, %v5931_v20  ;;  %v14527_v28 = vor.u32 %v17151_v12, %v14526_v55 }
 0x4d0   :  { %7292 = vmatpush.bf16.msrb.mxu3 %v14587_v54  ;;  %7257 = vmatpush.bf16.msra.mxu2 %v14595_v6  ;;  %v14659_v21 = vor.u32 %v17184_v57, %v14658_v25  ;;  %v14707_v54 = vor.u32 %v17196_v49, %v14706_v0  ;;  %v14933_v6 = vld [vmem:[%s26440_s6 + $0x888] sm:$0xf]  ;;  %v14969_v25 = vld [vmem:[%s26440_s6 + $0x8d0] sm:$0xf]  ;;  %v14622_v49 = vld [vmem:[%s26440_s6 + $0x6f8] sm:$0xf] }
 0x4d1   :  { %7244 = vmatmul.bf16.vlgmr.msra.gmra.mxu0 %v23265_v1  ;;  %v14934_v38 = vor.u32 %v17225_v33, %v14933_v6  ;;  %v5946_v57 = vpop.f32.mrf.mxu1  ;;  %v14970_v46 = vor.u32 %v17234_v26, %v14969_v25  ;;  %v14514_v20 = vld [vmem:[%s26440_s6 + $0x620] sm:$0xf] }
 0x4d2   :  { %7306 = vmatpush.bf16.msrb.mxu0 %v14683_v27  ;;  %v14647_v27 = vor.u32 %v17181_v24, %v14646_v42  ;;  %v14910_v24 = vor.u32 %v17219_v34, %v14909_v41  ;;  %v14897_v33 = vld [vmem:[%s26440_s6 + $0x840] sm:$0xf]  ;;  %v14873_v41 = vld [vmem:[%s26440_s6 + $0x810] sm:$0xf]  ;;  %v17210_v34 = vld [vmem:[%s26440_s6 + $0x818] sm:$0xf0] }
 0x4d3   :  { %7258 = vmatmul.bf16.vlgmr.msra.gmra.mxu2 %v23145_v11  ;;  %7926 = vmatpush.bf16.msra.mxu1 %v15018_v14  ;;  %v17222_v14 = vld [vmem:[%s26440_s6 + $0x878] sm:$0xf0] }
 0x4d4   :  { %7324 = vmatpush.bf16.msrb.mxu2 %v14731_v8  ;;  %7293 = vmatpush.bf16.msrb.mxu3 %v14575_v17  ;;  %v14695_v8 = vor.u32 %v17193_v32, %v14694_v43  ;;  %v14921_v17 = vld [vmem:[%s26440_s6 + $0x870] sm:$0xf]  ;;  %v5932_v22 = vpop.f32.mrf.mxu2  ;;  %v14610_v43 = vld [vmem:[%s26440_s6 + $0x6e0] sm:$0xf]  ;;  %v17172_v32 = vld [vmem:[%s26440_s6 + $0x6e8] sm:$0xf0] }
 0x4d5   :  { %v14922_v0 = vor.u32 %v17222_v14, %v14921_v17  ;;  %v14611_v48 = vor.u32 %v17172_v32, %v14610_v43  ;;  %v14885_v14 = vld [vmem:[%s26440_s6 + $0x828] sm:$0xf]  ;;  %v14874_v43 = vor.u32 %v17210_v34, %v14873_v41  ;;  %v17266_v32 = vld [vmem:[%s26440_s6 + $0x9dc] sm:$0xf]  ;;  %v14923_v34 = vld [vmem:[%s26440_s6 + $0x87c] sm:$0xf0] }
 0x4d6   :  { %7307 = vmatpush.bf16.msrb.mxu0 %v14671_v37  ;;  %v5933_v37 = vadd.f32 %v5932_v22, %v5918_v16  ;;  %v23586_v23 = vpop.f32.mrf.mxu3  ;;  %v17213_v16 = vld [vmem:[%s26440_s6 + $0x830] sm:$0xf0]  ;;  %v5833_v22 = vadd.f32 %v23206_v10, %v23247_v36  ;;  %v15113_v36 = vld [vmem:[%s26440_s6 + $0x9f0] sm:$0xf] }
 0x4d7   :  { %7927 = vmatpush.bf16.msra.mxu1 %v15006_v53  ;;  %v5821_v53 = vadd.f32 %v23309_v15, %v23294_v60  ;;  %v17148_v60 = vld [vmem:[%s26440_s6 + $0x628] sm:$0xf0] }
 0x4d8   :  { %7325 = vmatpush.bf16.msrb.mxu2 %v14719_v61  ;;  %7294 = vmatpush.bf16.msrb.mxu3 %v14563_v29  ;;  %v14635_v61 = vor.u32 %v17178_v59, %v14634_v40  ;;  %v17175_v29 = vld [vmem:[%s26440_s6 + $0x700] sm:$0xf0]  ;;  %v5947_v7 = vadd.f32 %v5946_v57, %v5933_v37  ;;  %v14515_v6 = vor.u32 %v17148_v60, %v14514_v20  ;;  %v14598_v40 = vld [vmem:[%s26440_s6 + $0x6c8] sm:$0xf]  ;;  %v17169_v59 = vld [vmem:[%s26440_s6 + $0x6d0] sm:$0xf0] }
 0x4d9   :  { %v14623_v15 = vor.u32 %v17175_v29, %v14622_v49  ;;  %v14599_v10 = vor.u32 %v17169_v59, %v14598_v40  ;;  %v17270_v49 = vld [vmem:[%s26440_s6 + $0x9f8] sm:$0xf0]  ;;  %v14886_v29 = vor.u32 %v17213_v16, %v14885_v14  ;;  %v15161_v60 = vld [vmem:[%s26440_s6 + $0xa50] sm:$0xf]  ;;  %v14849_v40 = vld [vmem:[%s26440_s6 + $0x7e0] sm:$0xf] }
 0x4da   :  { %7308 = vmatpush.bf16.msrb.mxu0 %v14659_v21  ;;  %v14957_v21 = vld [vmem:[%s26440_s6 + $0x8b8] sm:$0xf]  ;;  %v23600_v42 = vadd.f32 %v5960_v45, %v5947_v7  ;;  %v15115_v7 = vld [vmem:[%s26440_s6 + $0x9fc] sm:$0xf0]  ;;  %v15114_v20 = vor.u32 %v17270_v49, %v15113_v36  ;;  %v17224_v16 = vld [vmem:[%s26440_s6 + $0x88c] sm:$0xf] }
 0x4db   :  { %7928 = vmatpush.bf16.msra.mxu1 %v14994_v62  ;;  %v5889_v62 = vadd.f32 %v23363_v39, %v23398_v47  ;;  %v17145_v39 = vld [vmem:[%s26440_s6 + $0x610] sm:$0xf0]  ;;  %v17228_v47 = vld [vmem:[%s26440_s6 + $0x8a8] sm:$0xf0]  ;;  %v6492_v55 = vpop.f32.mrf.mxu1 }
 0x4dc   :  { %7326 = vmatpush.bf16.msrb.mxu2 %v14707_v54  ;;  %7295 = vmatpush.bf16.msrb.mxu3 %v14551_v13  ;;  %v17231_v54 = vld [vmem:[%s26440_s6 + $0x8c0] sm:$0xf0]  ;;  %v5835_v13 = vadd.f32 %v23276_v56, %v5821_v53  ;;  %v14502_v56 = vld [vmem:[%s26440_s6 + $0x608] sm:$0xf]  ;;  %v17269_v53 = vld [vmem:[%s26440_s6 + $0x9f4] sm:$0xf] }
 0x4dd   :  { %v14958_v45 = vor.u32 %v17231_v54, %v14957_v21  ;;  %v14503_v17 = vor.u32 %v17145_v39, %v14502_v56  ;;  %v15118_v21 = vor.u32 %v17269_v53, %v15115_v7  ;;  %v15101_v54 = vld [vmem:[%s26440_s6 + $0x9d8] sm:$0xf]  ;;  %v17279_v56 = vld [vmem:[%s26440_s6 + $0xa40] sm:$0xf0]  ;;  %v17245_v53 = vld [vmem:[%s26440_s6 + $0x934] sm:$0xf] }
 0x4de   :  { %7309 = vmatpush.bf16.msrb.mxu0 %v14647_v27  ;;  %v17272_v27 = vld [vmem:[%s26440_s6 + $0xa0c] sm:$0xf]  ;;  %v6438_v37 = vpop.f32.mrf.mxu3  ;;  %v6450_v57 = vpop.f32.mrf.mxu0  ;;  %v15019_v7 = vld [vmem:[%s26440_s6 + $0x93c] sm:$0xf0] }
 0x4df   :  { %7929 = vmatpush.bf16.msra.mxu1 %v14982_v9  ;;  %v5903_v9 = vadd.f32 %v23352_v5, %v5889_v62  ;;  %v15173_v5 = vld [vmem:[%s26440_s6 + $0xa68] sm:$0xf] }
 0x4e0   :  { %7327 = vmatpush.bf16.msrb.mxu2 %v14695_v8  ;;  %7296 = vmatpush.bf16.msrb.mxu3 %v14539_v3  ;;  %v14898_v8 = vor.u32 %v17216_v18, %v14897_v33  ;;  %v5849_v3 = vadd.f32 %v23335_v58, %v5835_v13  ;;  %v15126_v58 = vor.u32 %v17273_v51, %v15125_v2  ;;  %v15103_v13 = vld [vmem:[%s26440_s6 + $0x9e4] sm:$0xf0]  ;;  %v15149_v18 = vld [vmem:[%s26440_s6 + $0xa38] sm:$0xf] }
 0x4e1   :  { %v23665_v25 = vadd.f32 %v6492_v55, %v5903_v9  ;;  %v15150_v59 = vor.u32 %v17279_v56, %v15149_v18  ;;  %v15137_v9 = vld [vmem:[%s26440_s6 + $0xa20] sm:$0xf]  ;;  %v15031_v55 = vld [vmem:[%s26440_s6 + $0x954] sm:$0xf0]  ;;  %v17255_v18 = vld [vmem:[%s26440_s6 + $0x980] sm:$0xf0] }
 0x4e2   :  { %7310 = vmatpush.bf16.msrb.mxu0 %v14635_v61  ;;  %v17285_v61 = vld [vmem:[%s26440_s6 + $0xa70] sm:$0xf0]  ;;  %v6439_v26 = vadd.f32 %v6438_v37, %v5849_v3  ;;  %v17204_v3 = vld [vmem:[%s26440_s6 + $0x7e8] sm:$0xf0]  ;;  %v14935_v37 = vld [vmem:[%s26440_s6 + $0x894] sm:$0xf0] }
 0x4e3   :  { %14734 = vmatmul.msk.bf16.vlgmr.msrb.gmra.mxu2 %vm4523_vm3, %v23268_v19  ;;  %7930 = vmatpush.bf16.msra.mxu1 %v14970_v46  ;;  %v14945_v19 = vld [vmem:[%s26440_s6 + $0x8a0] sm:$0xf]  ;;  %v5847_v46 = vadd.f32 %v23273_v4, %v5833_v22  ;;  %v17267_v4 = vld [vmem:[%s26440_s6 + $0x9e0] sm:$0xf0]  ;;  %v17248_v22 = vld [vmem:[%s26440_s6 + $0x94c] sm:$0xf]  ;;  %v14938_v36 = vor.u32 %v17224_v16, %v14935_v37 }
 0x4e4   :  { %7911 = vmatpush.bf16.msra.mxu2 %v14934_v38  ;;  %7297 = vmatpush.bf16.msrb.mxu3 %v14527_v28  ;;  %v15127_v38 = vld [vmem:[%s26440_s6 + $0xa14] sm:$0xf0]  ;;  %v14946_v12 = vor.u32 %v17228_v47, %v14945_v19  ;;  %v15174_v28 = vor.u32 %v17285_v61, %v15173_v5  ;;  %v15102_v33 = vor.u32 %v17267_v4, %v15101_v54  ;;  %v15089_v47 = vld [vmem:[%s26440_s6 + $0x9c0] sm:$0xf]  ;;  %v17261_v5 = vld [vmem:[%s26440_s6 + $0x9b0] sm:$0xf0] }
 0x4e5   :  { %v15106_v19 = vor.u32 %v17266_v32, %v15103_v13  ;;  %v14850_v61 = vor.u32 %v17204_v3, %v14849_v40  ;;  %v15067_v54 = vld [vmem:[%s26440_s6 + $0x99c] sm:$0xf0]  ;;  %v15022_v4 = vor.u32 %v17245_v53, %v15019_v7  ;;  %v17218_v13 = vld [vmem:[%s26440_s6 + $0x85c] sm:$0xf]  ;;  %v17251_v3 = vld [vmem:[%s26440_s6 + $0x964] sm:$0xf] }
 0x4e6   :  { %7311 = vmatpush.bf16.msrb.mxu0 %v14623_v15  ;;  %v17282_v15 = vld [vmem:[%s26440_s6 + $0xa58] sm:$0xf0]  ;;  %v6452_v39 = vpop.f32.mrf.mxu0  ;;  %v23728_v51 = vpop.f32.mrf.mxu3  ;;  %v15041_v40 = vld [vmem:[%s26440_s6 + $0x960] sm:$0xf]  ;;  %v15169_v53 = vld [vmem:[%s26440_s6 + $0xa58] sm:$0xf] }
 0x4e7   :  { %7931 = vmatpush.bf16.msra.mxu1 %v14958_v45  ;;  %v15162_v62 = vor.u32 %v17282_v15, %v15161_v60  ;;  %v6464_v45 = vpop.f32.mrf.mxu2  ;;  %v6453_v2 = vadd.f32 %v6452_v39, %v6439_v26  ;;  %v17260_v26 = vld [vmem:[%s26440_s6 + $0x9ac] sm:$0xf]  ;;  %v17254_v56 = vld [vmem:[%s26440_s6 + $0x97c] sm:$0xf]  ;;  %v17283_v7 = vld [vmem:[%s26440_s6 + $0xa60] sm:$0xf0] }
 0x4e8   :  { %7912 = vmatpush.bf16.msra.mxu2 %v14922_v0  ;;  %7298 = vmatpush.bf16.msrb.mxu3 %v14515_v6  ;;  %v15130_v0 = vor.u32 %v17272_v27, %v15127_v38  ;;  %v15091_v38 = vld [vmem:[%s26440_s6 + $0x9cc] sm:$0xf0] }
 0x4ea   :  { %7312 = vmatpush.bf16.msrb.mxu0 %v14611_v48 }
 0x4eb   :  { %7932 = vmatpush.bf16.msra.mxu1 %v14946_v12 }
 0x4ec   :  { %7913 = vmatpush.bf16.msra.mxu2 %v14910_v24  ;;  %7299 = vmatpush.bf16.msrb.mxu3 %v14503_v17  ;;  %v6437_v24 = vadd.f32 %v23586_v23, %v5847_v46  ;;  %v14861_v23 = vld [vmem:[%s26440_s6 + $0x7f8] sm:$0xf]  ;;  %v17276_v17 = vld [vmem:[%s26440_s6 + $0xa28] sm:$0xf0]  ;;  %v15065_v46 = vld [vmem:[%s26440_s6 + $0x990] sm:$0xf] }
 0x4ee   :  { %7313 = vmatpush.bf16.msrb.mxu0 %v14599_v10  ;;  %7933 = vmatmul.bf16.vlgmr.msra.gmra.mxu1 %v22377_v52  ;;  %v6451_v6 = vadd.f32 %v6450_v57, %v6437_v24  ;;  %v15079_v57 = vld [vmem:[%s26440_s6 + $0x9b4] sm:$0xf0]  ;;  %v15034_v10 = vor.u32 %v17248_v22, %v15031_v55  ;;  %v6480_v15 = vpop.f32.mrf.mxu3  ;;  %v15181_v22 = vld [vmem:[%s26440_s6 + $0xa70] sm:$0xf]  ;;  %v17286_v55 = vld [vmem:[%s26440_s6 + $0xa78] sm:$0xf0] }
 0x4ef   :  { %7995 = vmatpush.bf16.msrb.mxu1 %v15130_v0  ;;  %7300 = vmatmul.bf16.vlgmr.msrb.gmra.mxu3 %v23265_v1  ;;  %v17207_v1 = vld [vmem:[%s26440_s6 + $0x800] sm:$0xf0]  ;;  %v15138_v0 = vor.u32 %v17276_v17, %v15137_v9  ;;  %v15082_v41 = vor.u32 %v17260_v26, %v15079_v57  ;;  %v15043_v9 = vld [vmem:[%s26440_s6 + $0x96c] sm:$0xf0]  ;;  %v17284_v17 = vld [vmem:[%s26440_s6 + $0xa6c] sm:$0xf] }
 0x4f0   :  { %7914 = vmatpush.bf16.msra.mxu2 %v14898_v8  ;;  %7939 = vmatpush.bf16.msra.mxu3 %v15126_v58  ;;  %v23726_v48 = vadd.f32 %v6464_v45, %v6451_v6  ;;  %v14862_v27 = vor.u32 %v17207_v1, %v14861_v23  ;;  %v17263_v8 = vld [vmem:[%s26440_s6 + $0x9c4] sm:$0xf]  ;;  %v15077_v58 = vld [vmem:[%s26440_s6 + $0x9a8] sm:$0xf]  ;;  %v17212_v57 = vld [vmem:[%s26440_s6 + $0x82c] sm:$0xf] }
 0x4f1   :  { %7314 = vmatmul.bf16.vlgmr.msrb.gmra.mxu0 %v23145_v11  ;;  %v17264_v11 = vld [vmem:[%s26440_s6 + $0x9c8] sm:$0xf0]  ;;  %v15094_v12 = vor.u32 %v17263_v8, %v15091_v38  ;;  %v15078_v49 = vor.u32 %v17261_v5, %v15077_v58  ;;  %v15007_v23 = vld [vmem:[%s26440_s6 + $0x924] sm:$0xf0]  ;;  %v14995_v8 = vld [vmem:[%s26440_s6 + $0x90c] sm:$0xf0] }
 0x4f2   :  { %7957 = vmatpush.bf16.msra.mxu0 %v15174_v28  ;;  %v15090_v14 = vor.u32 %v17264_v11, %v15089_v47  ;;  %v6466_v28 = vpop.f32.mrf.mxu2  ;;  %v14911_v6 = vld [vmem:[%s26440_s6 + $0x864] sm:$0xf0]  ;;  %v17236_v58 = vld [vmem:[%s26440_s6 + $0x8ec] sm:$0xf]  ;;  %v14983_v5 = vld [vmem:[%s26440_s6 + $0x8f4] sm:$0xf0] }
 0x4f3   :  { %7996 = vmatpush.bf16.msrb.mxu1 %v15118_v21  ;;  %v6467_v60 = vadd.f32 %v6466_v28, %v6453_v2  ;;  %v17257_v21 = vld [vmem:[%s26440_s6 + $0x994] sm:$0xf]  ;;  %v15055_v45 = vld [vmem:[%s26440_s6 + $0x984] sm:$0xf0]  ;;  %v14914_v47 = vor.u32 %v17218_v13, %v14911_v6  ;;  %v14899_v2 = vld [vmem:[%s26440_s6 + $0x84c] sm:$0xf0] }
 0x4f4   :  { %7915 = vmatpush.bf16.msra.mxu2 %v14886_v29  ;;  %7940 = vmatpush.bf16.msra.mxu3 %v15114_v20  ;;  %v17221_v29 = vld [vmem:[%s26440_s6 + $0x874] sm:$0xf]  ;;  %v17258_v20 = vld [vmem:[%s26440_s6 + $0x998] sm:$0xf0]  ;;  %v15070_v1 = vor.u32 %v17257_v21, %v15067_v54  ;;  %v15058_v38 = vor.u32 %v17254_v56, %v15055_v45  ;;  %v15170_v21 = vor.u32 %v17283_v7, %v15169_v53 }
 0x4f5   :  { %v23796_v24 = vadd.f32 %v6480_v15, %v6467_v60  ;;  %v15066_v32 = vor.u32 %v17258_v20, %v15065_v46  ;;  %v17209_v60 = vld [vmem:[%s26440_s6 + $0x814] sm:$0xf]  ;;  %v14875_v15 = vld [vmem:[%s26440_s6 + $0x81c] sm:$0xf0]  ;;  %v17278_v54 = vld [vmem:[%s26440_s6 + $0xa3c] sm:$0xf] }
 0x4f6   :  { %7958 = vmatpush.bf16.msra.mxu0 %v15162_v62  ;;  %v17242_v62 = vld [vmem:[%s26440_s6 + $0x91c] sm:$0xf]  ;;  %v14878_v6 = vor.u32 %v17209_v60, %v14875_v15  ;;  %v15025_v15 = vld [vmem:[%s26440_s6 + $0x938] sm:$0xf] }
 0x4f7   :  { %7997 = vmatpush.bf16.msrb.mxu1 %v15106_v19  ;;  %v15010_v39 = vor.u32 %v17242_v62, %v15007_v23  ;;  %v17215_v19 = vld [vmem:[%s26440_s6 + $0x844] sm:$0xf]  ;;  %v15157_v62 = vld [vmem:[%s26440_s6 + $0xa40] sm:$0xf]  ;;  %v17280_v23 = vld [vmem:[%s26440_s6 + $0xa48] sm:$0xf0] }
 0x4f8   :  { %7916 = vmatpush.bf16.msra.mxu2 %v14874_v43  ;;  %7941 = vmatpush.bf16.msra.mxu3 %v15102_v33  ;;  %v14926_v43 = vor.u32 %v17221_v29, %v14923_v34  ;;  %v15053_v33 = vld [vmem:[%s26440_s6 + $0x978] sm:$0xf]  ;;  %v14986_v29 = vor.u32 %v17236_v58, %v14983_v5  ;;  %v14971_v34 = vld [vmem:[%s26440_s6 + $0x8dc] sm:$0xf0]  ;;  %v17206_v45 = vld [vmem:[%s26440_s6 + $0x7fc] sm:$0xf] }
 0x4f9   :  { %v15054_v11 = vor.u32 %v17255_v18, %v15053_v33  ;;  %v17230_v33 = vld [vmem:[%s26440_s6 + $0x8bc] sm:$0xf]  ;;  %v14959_v18 = vld [vmem:[%s26440_s6 + $0x8c4] sm:$0xf0] }
 0x4fa   :  { %7959 = vmatpush.bf16.msra.mxu0 %v15150_v59  ;;  %v17252_v59 = vld [vmem:[%s26440_s6 + $0x968] sm:$0xf0]  ;;  %v6534_v46 = vpop.f32.mrf.mxu2 }
 0x4fb   :  { %7998 = vmatpush.bf16.msrb.mxu1 %v15094_v12  ;;  %v14902_v12 = vor.u32 %v17215_v19, %v14899_v2  ;;  %v15042_v37 = vor.u32 %v17252_v59, %v15041_v40  ;;  %v15158_v19 = vor.u32 %v17280_v23, %v15157_v62  ;;  %v14941_v2 = vld [vmem:[%s26440_s6 + $0x890] sm:$0xf]  ;;  %v15145_v40 = vld [vmem:[%s26440_s6 + $0xa28] sm:$0xf]  ;;  %v17277_v59 = vld [vmem:[%s26440_s6 + $0xa30] sm:$0xf0] }
 0x4fc   :  { %7917 = vmatpush.bf16.msra.mxu2 %v14862_v27  ;;  %7942 = vmatpush.bf16.msra.mxu3 %v15090_v14  ;;  %v17239_v27 = vld [vmem:[%s26440_s6 + $0x904] sm:$0xf]  ;;  %v15175_v14 = vld [vmem:[%s26440_s6 + $0xa74] sm:$0xf0]  ;;  %v17268_v62 = vld [vmem:[%s26440_s6 + $0x9e8] sm:$0xf0] }
 0x4fd   :  { %v14998_v16 = vor.u32 %v17239_v27, %v14995_v8  ;;  %v15178_v26 = vor.u32 %v17284_v17, %v15175_v14  ;;  %v6494_v27 = vpop.f32.mrf.mxu1  ;;  %v14962_v8 = vor.u32 %v17230_v33, %v14959_v18  ;;  %v17203_v17 = vld [vmem:[%s26440_s6 + $0x7e4] sm:$0xf] }
 0x4fe   :  { %7960 = vmatpush.bf16.msra.mxu0 %v15138_v0  ;;  %v14887_v0 = vld [vmem:[%s26440_s6 + $0x834] sm:$0xf0]  ;;  %v17227_v14 = vld [vmem:[%s26440_s6 + $0x8a4] sm:$0xf]  ;;  %v6495_v58 = vadd.f32 %v6494_v27, %v23491_v50  ;;  %v14893_v27 = vld [vmem:[%s26440_s6 + $0x830] sm:$0xf] }
 0x4ff   :  { %7999 = vmatpush.bf16.msrb.mxu1 %v15082_v41  ;;  %v14890_v28 = vor.u32 %v17212_v57, %v14887_v0  ;;  %v17233_v41 = vld [vmem:[%s26440_s6 + $0x8d4] sm:$0xf]  ;;  %v15146_v57 = vor.u32 %v17277_v59, %v15145_v40  ;;  %v14929_v50 = vld [vmem:[%s26440_s6 + $0x878] sm:$0xf]  ;;  %v15085_v59 = vld [vmem:[%s26440_s6 + $0x9b0] sm:$0xf] }
 0x500   :  { %7918 = vmatpush.bf16.msra.mxu2 %v14850_v61  ;;  %7943 = vmatpush.bf16.msra.mxu3 %v15078_v49  ;;  %v15046_v61 = vor.u32 %v17251_v3, %v15043_v9  ;;  %v15163_v49 = vld [vmem:[%s26440_s6 + $0xa5c] sm:$0xf0]  ;;  %v14974_v13 = vor.u32 %v17233_v41, %v14971_v34  ;;  %v15121_v34 = vld [vmem:[%s26440_s6 + $0x9f8] sm:$0xf] }
 0x501   :  { %15183 = vmatmul.msk.bf16.vlgmr.msra.gmra.mxu0 %vm4523_vm3, %v22387_v35 }
 0x502   :  { %7967 = vmatpush.bf16.msrb.mxu0 %v14938_v36  ;;  %v17281_v36 = vld [vmem:[%s26440_s6 + $0xa54] sm:$0xf]  ;;  %v23969_v0 = vpop.f32.mrf.mxu2 }
 0x503   :  { %7919 = vmatmul.bf16.vlgmr.msra.gmra.mxu2 %v22382_v44  ;;  %8000 = vmatpush.bf16.msrb.mxu1 %v15070_v1  ;;  %v15166_v20 = vor.u32 %v17281_v36, %v15163_v49  ;;  %v17223_v49 = vld [vmem:[%s26440_s6 + $0x880] sm:$0xf0] }
 0x504   :  { %7981 = vmatpush.bf16.msrb.mxu2 %v15034_v10  ;;  %7944 = vmatpush.bf16.msra.mxu3 %v15066_v32  ;;  %v15182_v10 = vor.u32 %v17286_v55, %v15181_v22  ;;  %v6506_v32 = vpop.f32.mrf.mxu3  ;;  %v14851_v55 = vld [vmem:[%s26440_s6 + $0x7ec] sm:$0xf0]  ;;  %v14930_v60 = vor.u32 %v17223_v49, %v14929_v50  ;;  %v17235_v50 = vld [vmem:[%s26440_s6 + $0x8e0] sm:$0xf0]  ;;  %v14869_v49 = vld [vmem:[%s26440_s6 + $0x800] sm:$0xf] }
 0x505   :  { %v6507_v1 = vadd.f32 %v6506_v32, %v23665_v25  ;;  %v14854_v53 = vor.u32 %v17203_v17, %v14851_v55  ;;  %v24010_v33 = vpop.f32.mrf.mxu1  ;;  %v14881_v55 = vld [vmem:[%s26440_s6 + $0x818] sm:$0xf] }
 0x506   :  { %7968 = vmatpush.bf16.msrb.mxu0 %v14926_v43  ;;  %v6520_v43 = vpop.f32.mrf.mxu0 }
 0x507   :  { %8001 = vmatpush.bf16.msrb.mxu1 %v15058_v38  ;;  %v6521_v25 = vadd.f32 %v6520_v43, %v6507_v1  ;;  %v17226_v38 = vld [vmem:[%s26440_s6 + $0x898] sm:$0xf0]  ;;  %v15013_v1 = vld [vmem:[%s26440_s6 + $0x920] sm:$0xf] }
 0x508   :  { %7982 = vmatpush.bf16.msrb.mxu2 %v15022_v4  ;;  %7945 = vmatpush.bf16.msra.mxu3 %v15054_v11  ;;  %v15151_v4 = vld [vmem:[%s26440_s6 + $0xa44] sm:$0xf0]  ;;  %v15139_v11 = vld [vmem:[%s26440_s6 + $0xa2c] sm:$0xf0]  ;;  %v14942_v5 = vor.u32 %v17226_v38, %v14941_v2 }
 0x509   :  { %v15154_v56 = vor.u32 %v17278_v54, %v15151_v4  ;;  %v23942_v3 = vadd.f32 %v6534_v46, %v6521_v25  ;;  %v17271_v46 = vld [vmem:[%s26440_s6 + $0xa00] sm:$0xf0]  ;;  %v14917_v54 = vld [vmem:[%s26440_s6 + $0x860] sm:$0xf]  ;;  %v17220_v4 = vld [vmem:[%s26440_s6 + $0x868] sm:$0xf0] }
 0x50a   :  { %7969 = vmatpush.bf16.msrb.mxu0 %v14914_v47  ;;  %v17275_v47 = vld [vmem:[%s26440_s6 + $0xa24] sm:$0xf]  ;;  %v15122_v43 = vor.u32 %v17271_v46, %v15121_v34  ;;  %v14918_v23 = vor.u32 %v17220_v4, %v14917_v54  ;;  %v15001_v2 = vld [vmem:[%s26440_s6 + $0x908] sm:$0xf]  ;;  %v14965_v46 = vld [vmem:[%s26440_s6 + $0x8c0] sm:$0xf] }
 0x50b   :  { %8002 = vmatpush.bf16.msrb.mxu1 %v15046_v61  ;;  %v15142_v22 = vor.u32 %v17275_v47, %v15139_v11  ;;  %v15037_v61 = vld [vmem:[%s26440_s6 + $0x950] sm:$0xf]  ;;  %v17265_v47 = vld [vmem:[%s26440_s6 + $0x9d0] sm:$0xf0] }
 0x50c   :  { %7983 = vmatpush.bf16.msrb.mxu2 %v15010_v39  ;;  %7946 = vmatpush.bf16.msra.mxu3 %v15042_v37  ;;  %v14863_v39 = vld [vmem:[%s26440_s6 + $0x804] sm:$0xf0]  ;;  %v17274_v37 = vld [vmem:[%s26440_s6 + $0xa18] sm:$0xf0] }
 0x50d   :  { %v14866_v9 = vor.u32 %v17206_v45, %v14863_v39  ;;  %v17217_v45 = vld [vmem:[%s26440_s6 + $0x850] sm:$0xf0] }
 0x50e   :  { %7970 = vmatpush.bf16.msrb.mxu0 %v14902_v12  ;;  %8003 = vmatmul.bf16.vlgmr.msrb.gmra.mxu1 %v22407_v30  ;;  %v15133_v12 = vld [vmem:[%s26440_s6 + $0xa10] sm:$0xf] }
 0x50f   :  { %8069 = vmatpush.bf16.msra.mxu1 %v15182_v10  ;;  %7947 = vmatmul.bf16.vlgmr.msra.gmra.mxu3 %v22407_v30  ;;  %v6508_v10 = vpop.f32.mrf.mxu3  ;;  %v15134_v7 = vor.u32 %v17274_v37, %v15133_v12  ;;  %v17211_v12 = vld [vmem:[%s26440_s6 + $0x820] sm:$0xf0] }
 0x510   :  { %7984 = vmatpush.bf16.msrb.mxu2 %v14998_v16  ;;  %8013 = vmatpush.bf16.msrb.mxu3 %v15178_v26  ;;  %v14947_v16 = vld [vmem:[%s26440_s6 + $0x8ac] sm:$0xf0]  ;;  %v17250_v26 = vld [vmem:[%s26440_s6 + $0x958] sm:$0xf0] }
 0x511   :  { %v14950_v36 = vor.u32 %v17227_v14, %v14947_v16  ;;  %v15038_v41 = vor.u32 %v17250_v26, %v15037_v61  ;;  %v14989_v14 = vld [vmem:[%s26440_s6 + $0x8f0] sm:$0xf]  ;;  %v17238_v16 = vld [vmem:[%s26440_s6 + $0x8f8] sm:$0xf0]  ;;  %v15073_v26 = vld [vmem:[%s26440_s6 + $0x998] sm:$0xf] }
 0x512   :  { %7971 = vmatpush.bf16.msrb.mxu0 %v14890_v28  ;;  %v6522_v28 = vpop.f32.mrf.mxu0  ;;  %v14990_v61 = vor.u32 %v17238_v16, %v14989_v14 }
 0x513   :  { %8070 = vmatpush.bf16.msra.mxu1 %v15170_v21  ;;  %v17247_v21 = vld [vmem:[%s26440_s6 + $0x940] sm:$0xf0] }
 0x514   :  { %7985 = vmatpush.bf16.msrb.mxu2 %v14986_v29  ;;  %8014 = vmatpush.bf16.msrb.mxu3 %v15166_v20  ;;  %v6509_v29 = vadd.f32 %v6508_v10, %v6495_v58  ;;  %v15026_v32 = vor.u32 %v17247_v21, %v15025_v15  ;;  %v14857_v15 = vld [vmem:[%s26440_s6 + $0x7e8] sm:$0xf]  ;;  %v17205_v21 = vld [vmem:[%s26440_s6 + $0x7f0] sm:$0xf0] }
 0x516   :  { %7972 = vmatpush.bf16.msrb.mxu0 %v14878_v6  ;;  %v23983_v20 = vadd.f32 %v6522_v28, %v6509_v29  ;;  %v17244_v6 = vld [vmem:[%s26440_s6 + $0x928] sm:$0xf0]  ;;  %v24015_v18 = vpop.f32.mrf.mxu2  ;;  %v15061_v28 = vld [vmem:[%s26440_s6 + $0x980] sm:$0xf] }
 0x517   :  { %8071 = vmatpush.bf16.msra.mxu1 %v15158_v19  ;;  %v15014_v25 = vor.u32 %v17244_v6, %v15013_v1  ;;  %v15097_v19 = vld [vmem:[%s26440_s6 + $0x9c8] sm:$0xf]  ;;  %v17208_v29 = vld [vmem:[%s26440_s6 + $0x808] sm:$0xf0] }
 0x518   :  { %7986 = vmatpush.bf16.msrb.mxu2 %v14974_v13  ;;  %8015 = vmatpush.bf16.msrb.mxu3 %v15154_v56  ;;  %v15109_v13 = vld [vmem:[%s26440_s6 + $0x9e0] sm:$0xf]  ;;  %v14905_v56 = vld [vmem:[%s26440_s6 + $0x848] sm:$0xf]  ;;  %v15098_v38 = vor.u32 %v17265_v47, %v15097_v19  ;;  %v14870_v34 = vor.u32 %v17208_v29, %v14869_v49 }
 0x519   :  { %v15110_v39 = vor.u32 %v17268_v62, %v15109_v13  ;;  %v14906_v11 = vor.u32 %v17217_v45, %v14905_v56  ;;  %v14858_v13 = vor.u32 %v17205_v21, %v14857_v15  ;;  %v14953_v62 = vld [vmem:[%s26440_s6 + $0x8a8] sm:$0xf]  ;;  %v8155_v29 = vld [vmem:[%s26443_s9 + $0x60] sm:$0xff]  ;;  %v8173_v15 = vld [vmem:[%s26443_s9 + $0xf0] sm:$0xff] }
 0x51a   :  { %7973 = vmatpush.bf16.msrb.mxu0 %v14866_v9  ;;  %v17262_v9 = vld [vmem:[%s26440_s6 + $0x9b8] sm:$0xf0]  ;;  %v6590_v45 = vpop.f32.mrf.mxu0 }
 0x51b   :  { %8072 = vmatpush.bf16.msra.mxu1 %v15146_v57  ;;  %v15086_v58 = vor.u32 %v17262_v9, %v15085_v59  ;;  %v17259_v57 = vld [vmem:[%s26440_s6 + $0x9a0] sm:$0xf0] }
 0x51c   :  { %7987 = vmatpush.bf16.msrb.mxu2 %v14962_v8  ;;  %8016 = vmatpush.bf16.msrb.mxu3 %v15142_v22  ;;  %v17214_v8 = vld [vmem:[%s26440_s6 + $0x838] sm:$0xf0] }
 0x51d   :  { %v14894_v17 = vor.u32 %v17214_v8, %v14893_v27 }
 0x51e   :  { %7974 = vmatpush.bf16.msrb.mxu0 %v14854_v53  ;;  %15185 = vmatmul.msk.bf16.vlgmr.msra.gmra.mxu1 %vm4523_vm3, %v22387_v35  ;;  %v6550_v22 = vpop.f32.mrf.mxu2  ;;  %v15074_v53 = vor.u32 %v17259_v57, %v15073_v26 }
 0x51f   :  { %15184 = vmatmul.msk.bf16.vlgmr.msrb.gmra.mxu3 %vm4523_vm3, %v22387_v35  ;;  %v17241_v35 = vld [vmem:[%s26440_s6 + $0x910] sm:$0xf0]  ;;  %v6551_v37 = vadd.f32 %v6550_v22, %v23600_v42  ;;  %v14977_v42 = vld [vmem:[%s26440_s6 + $0x8d8] sm:$0xf] }
 0x520   :  { %8023 = vmatpush.bf16.msra.mxu3 %v14942_v5  ;;  %7988 = vmatpush.bf16.msrb.mxu2 %v14950_v36  ;;  %v15002_v40 = vor.u32 %v17241_v35, %v15001_v2  ;;  %v6564_v5 = vpop.f32.mrf.mxu1  ;;  %v14882_v36 = vor.u32 %v17211_v12, %v14881_v55 }
 0x521   :  { %7975 = vmatmul.bf16.vlgmr.msrb.gmra.mxu0 %v22382_v44  ;;  %v24068_v10 = vadd.f32 %v6564_v5, %v6551_v37 }
 0x522   :  { %8037 = vmatpush.bf16.msra.mxu0 %v15038_v41  ;;  %v17256_v41 = vld [vmem:[%s26440_s6 + $0x988] sm:$0xf0]  ;;  %v6576_v56 = vpop.f32.mrf.mxu3 }
 0x523   :  { %7989 = vmatmul.bf16.vlgmr.msrb.gmra.mxu2 %v22377_v52  ;;  %v15062_v54 = vor.u32 %v17256_v41, %v15061_v28  ;;  %v8153_v28 = vld [vmem:[%s26443_s9 + $0x50] sm:$0xff]  ;;  %v8152_v41 = vld [vmem:[%s26443_s9 + $0x48] sm:$0xff] }
 0x524   :  { %8051 = vmatpush.bf16.msra.mxu2 %v15134_v7  ;;  %8024 = vmatpush.bf16.msra.mxu3 %v14930_v60  ;;  %v14978_v7 = vor.u32 %v17235_v50, %v14977_v42  ;;  %v17232_v60 = vld [vmem:[%s26440_s6 + $0x8c8] sm:$0xf0] }
 0x525   :  { %v14966_v4 = vor.u32 %v17232_v60, %v14965_v46  ;;  %v8174_v46 = vld [vmem:[%s26443_s9 + $0xf8] sm:$0xff]  ;;  %v8151_v60 = vld [vmem:[%s26443_s9 + $0x40] sm:$0xff] }
 0x526   :  { %8038 = vmatpush.bf16.msra.mxu0 %v15026_v32  ;;  %v17253_v32 = vld [vmem:[%s26440_s6 + $0x970] sm:$0xf0] }
 0x528   :  { %8052 = vmatpush.bf16.msra.mxu2 %v15122_v43  ;;  %8025 = vmatpush.bf16.msra.mxu3 %v14918_v23  ;;  %v15049_v43 = vld [vmem:[%s26440_s6 + $0x968] sm:$0xf]  ;;  %v17229_v23 = vld [vmem:[%s26440_s6 + $0x8b0] sm:$0xf0]  ;;  %v24119_v19 = vpop.f32.mrf.mxu1 }
 0x529   :  { %v15050_v1 = vor.u32 %v17253_v32, %v15049_v43  ;;  %v14954_v6 = vor.u32 %v17229_v23, %v14953_v62  ;;  %v8150_v43 = vld [vmem:[%s26443_s9 + $0x38] sm:$0xff] }
 0x52a   :  { %8039 = vmatpush.bf16.msra.mxu0 %v15014_v25  ;;  %v24117_v25 = vpop.f32.mrf.mxu0 }
 0x52c   :  { %8053 = vmatpush.bf16.msra.mxu2 %v15110_v39  ;;  %8026 = vmatpush.bf16.msra.mxu3 %v14906_v11  ;;  %v24115_v39 = vpop.f32.mrf.mxu3 }
 0x52e   :  { %8040 = vmatpush.bf16.msra.mxu0 %v15002_v40 }
 0x530   :  { %8054 = vmatpush.bf16.msra.mxu2 %v15098_v38  ;;  %8027 = vmatpush.bf16.msra.mxu3 %v14894_v17  ;;  %v24123_v35 = vpop.f32.mrf.mxu1  ;;  %v5959_v17 = vadd.f32 %v23477_v31, %v23528_v63  ;;  %v8157_v31 = vld [vmem:[%s26443_s9 + $0x70] sm:$0xff] }
 0x532   :  { %8041 = vmatpush.bf16.msra.mxu0 %v14990_v61  ;;  %v7175_v11 = vpop.f32.mrf.mxu0  ;;  %v6549_v22 = vadd.f32 %v24015_v18, %v5959_v17 }
 0x534   :  { %8055 = vmatpush.bf16.msra.mxu2 %v15086_v58  ;;  %8028 = vmatpush.bf16.msra.mxu3 %v14882_v36  ;;  %v24121_v47 = vpop.f32.mrf.mxu3  ;;  %v6563_v55 = vadd.f32 %v24010_v33, %v6549_v22  ;;  %v8158_v36 = vld [vmem:[%s26443_s9 + $0x78] sm:$0xff]  ;;  %v8156_v33 = vld [vmem:[%s26443_s9 + $0x68] sm:$0xff]  ;;  %v8147_v22 = vld [vmem:[%s26443_s9 + $0x20] sm:$0xff] }
 0x535   :  { %8191 = vmatpush.msrb.mxu1 %v8158_v36 }
 0x536   :  { %8042 = vmatpush.bf16.msra.mxu0 %v14978_v7  ;;  %v7189_v2 = vpop.f32.mrf.mxu2  ;;  %v6577_v58 = vadd.f32 %v6576_v56, %v6563_v55  ;;  %v8154_v7 = vld [vmem:[%s26443_s9 + $0x58] sm:$0xff] }
 0x537   :  { %8192 = vmatpush.msrb.mxu1 %v8157_v31  ;;  %v7190_v62 = vadd.f32 %v7189_v2, %v7175_v11  ;;  %v8171_v2 = vld [vmem:[%s26443_s9 + $0xe0] sm:$0xff]  ;;  %v8168_v31 = vld [vmem:[%s26443_s9 + $0xc8] sm:$0xff] }
 0x538   :  { %8056 = vmatpush.bf16.msra.mxu2 %v15074_v53  ;;  %8029 = vmatpush.bf16.msra.mxu3 %v14870_v34  ;;  %v24127_v8 = vpop.f32.mrf.mxu1  ;;  %v6591_v63 = vadd.f32 %v6590_v45, %v6577_v58 }
 0x539   :  { %8193 = vmatpush.msrb.mxu1 %v8156_v33  ;;  %v7204_v56 = vadd.f32 %v24119_v19, %v7190_v62  ;;  %v8146_v19 = vld [vmem:[%s26443_s9 + $0x18] sm:$0xff] }
 0x53a   :  { %8043 = vmatpush.bf16.msra.mxu0 %v14966_v4 }
 0x53b   :  { %8194 = vmatpush.msrb.mxu1 %v8155_v29 }
 0x53c   :  { %8057 = vmatpush.bf16.msra.mxu2 %v15062_v54  ;;  %8030 = vmatpush.bf16.msra.mxu3 %v14858_v13  ;;  %v24125_v27 = vpop.f32.mrf.mxu3  ;;  %v8172_v54 = vld [vmem:[%s26443_s9 + $0xe8] sm:$0xff]  ;;  %v8149_v13 = vld [vmem:[%s26443_s9 + $0x30] sm:$0xff] }
 0x53d   :  { %8195 = vmatpush.msrb.mxu1 %v8154_v7  ;;  %v8166_v7 = vld [vmem:[%s26443_s9 + $0xb8] sm:$0xff] }
 0x53e   :  { %8044 = vmatpush.bf16.msra.mxu0 %v14954_v6 }
 0x53f   :  { %8031 = vmatmul.bf16.vlgmr.msra.gmra.mxu3 %v22382_v44  ;;  %v7177_v44 = vpop.f32.mrf.mxu0  ;;  %8196 = vmatpush.msrb.mxu1 %v8153_v28 }
 0x540   :  { %8058 = vmatpush.bf16.msra.mxu2 %v15050_v1  ;;  %v24135_v59 = vpop.f32.mrf.mxu1  ;;  %8211 = vmatpush.msrb.mxu3 %v8174_v46  ;;  %v8148_v1 = vld [vmem:[%s26443_s9 + $0x28] sm:$0xff]  ;;  %v8165_v46 = vld [vmem:[%s26443_s9 + $0xb0] sm:$0xff] }
 0x541   :  { %8045 = vmatmul.bf16.vlgmr.msra.gmra.mxu0 %v22377_v52  ;;  %8197 = vmatpush.msrb.mxu1 %v8152_v41 }
 0x542   :  { %8212 = vmatpush.msrb.mxu3 %v8173_v15 }
 0x543   :  { %8059 = vmatmul.bf16.vlgmr.msra.gmra.mxu2 %v22407_v30  ;;  %v7191_v30 = vpop.f32.mrf.mxu2  ;;  %8198 = vmatpush.msrb.mxu1 %v8151_v60 }
 0x544   :  { %8213 = vmatpush.msrb.mxu3 %v8172_v54  ;;  %v7192_v23 = vadd.f32 %v7191_v30, %v7177_v44  ;;  %v7218_v30 = vadd.f32 %v24121_v47, %v7204_v56  ;;  %v8169_v47 = vld [vmem:[%s26443_s9 + $0xd0] sm:$0xff] }
 0x545   :  { %8199 = vmatpush.msrb.mxu1 %v8150_v43 }
 0x546   :  { %v7206_v17 = vadd.f32 %v24123_v35, %v7192_v23  ;;  %8214 = vmatpush.msrb.mxu3 %v8171_v2 }
 0x547   :  { %8200 = vmatpush.msrb.mxu1 %v8149_v13 }
 0x549   :  { %8201 = vmatpush.msrb.mxu1 %v8148_v1 }
 0x54b   :  { %v7287_v12 = vpop.f32.mrf.mxu1  ;;  %8202 = vmatpush.msrb.mxu1 %v8147_v22  ;;  %v8162_v22 = vld [vmem:[%s26443_s9 + $0x98] sm:$0xff] }
 0x54d   :  { %8203 = vmatpush.msrb.mxu1 %v8146_v19 }
 0x54e   :  { %v24131_v38 = vpop.f32.mrf.mxu0 }
 0x552   :  { %v24129_v52 = vpop.f32.mrf.mxu3 }
 0x553   :  { %v24165_v53 = vpop.f32.mrf.mxu1 }
 0x556   :  { %v24133_v40 = vpop.f32.mrf.mxu2  ;;  %v24141_v14 = vpop.f32.mrf.mxu0 }
 0x55a   :  { %v24137_v9 = vpop.f32.mrf.mxu3 }
 0x55e   :  { %v24143_v16 = vpop.f32.mrf.mxu2 }
 0x566   :  { %v7329_v57 = vpop.f32.mrf.mxu2 }
 0x56b   :  { %v7934_v32 = vpop.f32.mrf.mxu1 }
 0x56e   :  { %v7315_v61 = vpop.f32.mrf.mxu0  ;;  %v24160_v49 = vpop.f32.mrf.mxu2 }
 0x572   :  { %v7301_v37 = vpop.f32.mrf.mxu3 }
 0x573   :  { %v7302_v5 = vadd.f32 %v7301_v37, %v7287_v12  ;;  %v7936_v35 = vpop.f32.mrf.mxu1  ;;  %v8170_v12 = vld [vmem:[%s26443_s9 + $0xd8] sm:$0xff]  ;;  %v7220_v37 = vadd.f32 %v24125_v27, %v7206_v17  ;;  %v8144_v27 = vld [vmem:[%s26443_s9 + $0x8] sm:$0xff] }
 0x574   :  { %8215 = vmatpush.msrb.mxu3 %v8170_v12 }
 0x575   :  { %v7316_v26 = vadd.f32 %v7315_v61, %v7302_v5  ;;  %v8145_v5 = vld [vmem:[%s26443_s9 + $0x10] sm:$0xff]  ;;  %v6479_v61 = vadd.f32 %v23728_v51, %v23726_v48  ;;  %v8143_v48 = vld [vmem:[%s26443_s9] sm:$0xff] }
 0x576   :  { %v24158_v50 = vpop.f32.mrf.mxu0  ;;  %8204 = vmatpush.msrb.mxu1 %v8145_v5  ;;  %8216 = vmatpush.msrb.mxu3 %v8169_v47  ;;  %v6537_v47 = vadd.f32 %v23969_v0, %v23983_v20 }
 0x577   :  { %v7330_v42 = vadd.f32 %v7329_v57, %v7316_v26  ;;  %v7334_v51 = vadd.f32 %v7218_v30, %v6479_v61  ;;  %v8160_v61 = vld [vmem:[%s26443_s9 + $0x88] sm:$0xff] }
 0x578   :  { %8205 = vmatpush.msrb.mxu1 %v8144_v27  ;;  %8217 = vmatpush.msrb.mxu3 %v8168_v31 }
 0x579   :  { %v24156_v18 = vadd.f32 %v7330_v42, %v6591_v63  ;;  %v8167_v63 = vld [vmem:[%s26443_s9 + $0xc0] sm:$0xff]  ;;  %v7337_v42 = vadd.f32 %v7220_v37, %v23796_v24  ;;  %v7246_v24 = vadd.f32 %v24131_v38, %v24129_v52  ;;  %v8164_v52 = vld [vmem:[%s26443_s9 + $0xa8] sm:$0xff] }
 0x57a   :  { %v24176_v34 = vpop.f32.mrf.mxu3  ;;  %8206 = vmatpush.msrb.mxu1 %v8143_v48  ;;  %8218 = vmatpush.msrb.mxu3 %v8167_v63 }
 0x57c   :  { %8219 = vmatpush.msrb.mxu3 %v8166_v7 }
 0x57e   :  { %v7962_v4 = vpop.f32.mrf.mxu0  ;;  %8220 = vmatpush.msrb.mxu3 %v8165_v46 }
 0x580   :  { %8221 = vmatpush.msrb.mxu3 %v8164_v52  ;;  %v8184_v52 = vld [vmem:[%s26443_s9 + $0x148] sm:$0xff] }
 0x586   :  { %v7920_v21 = vpop.f32.mrf.mxu2  ;;  %v7964_v44 = vpop.f32.mrf.mxu0 }
 0x587   :  { %v7935_v45 = vadd.f32 %v7934_v32, %v7920_v21 }
 0x58b   :  { %v8004_v60 = vpop.f32.mrf.mxu1 }
 0x58e   :  { %v7922_v55 = vpop.f32.mrf.mxu2 }
 0x58f   :  { %v7937_v58 = vadd.f32 %v7936_v35, %v7922_v55  ;;  %v8189_v55 = vld [vmem:[%s26443_s9 + $0x170] sm:$0xff] }
 0x592   :  { %v7948_v6 = vpop.f32.mrf.mxu3 }
 0x593   :  { %v7949_v11 = vadd.f32 %v7948_v6, %v7935_v45  ;;  %v8190_v6 = vld [vmem:[%s26443_s9 + $0x178] sm:$0xff] }
 0x594   :  { %8231 = vmatpush.msrb.mxu0 %v8190_v6 }
 0x595   :  { %v7963_v26 = vadd.f32 %v7962_v4, %v7949_v11  ;;  %v7248_v4 = vadd.f32 %v24141_v14, %v24137_v9  ;;  %v8163_v9 = vld [vmem:[%s26443_s9 + $0xa0] sm:$0xff]  ;;  %v7260_v14 = vadd.f32 %v24133_v40, %v7246_v24  ;;  %v8188_v40 = vld [vmem:[%s26443_s9 + $0x168] sm:$0xff] }
 0x596   :  { %8222 = vmatpush.msrb.mxu3 %v8163_v9  ;;  %8232 = vmatpush.msrb.mxu0 %v8189_v55  ;;  %v8182_v9 = vld [vmem:[%s26443_s9 + $0x138] sm:$0xff] }
 0x597   :  { %v24236_v29 = vadd.f32 %v7963_v26, %v7334_v51  ;;  %v7262_v56 = vadd.f32 %v24143_v16, %v7248_v4  ;;  %v8161_v16 = vld [vmem:[%s26443_s9 + $0x90] sm:$0xff]  ;;  %v7274_v19 = vadd.f32 %v24127_v8, %v7260_v14  ;;  %v8006_v26 = vpop.f32.mrf.mxu1 }
 0x598   :  { %8223 = vmatpush.msrb.mxu3 %v8162_v22  ;;  %8233 = vmatpush.msrb.mxu0 %v8188_v40  ;;  %v8185_v4 = vld [vmem:[%s26443_s9 + $0x150] sm:$0xff]  ;;  %v7304_v22 = vadd.f32 %v24176_v34, %v24165_v53  ;;  %v8180_v40 = vld [vmem:[%s26443_s9 + $0x128] sm:$0xff]  ;;  %v8178_v34 = vld [vmem:[%s26443_s9 + $0x118] sm:$0xff] }
 0x599   :  { %v8110_v43 = vmul.f32 %v24236_v29, %v24236_v29  ;;  %v7276_v12 = vadd.f32 %v24135_v59, %v7262_v56  ;;  %v8159_v59 = vld [vmem:[%s26443_s9 + $0x80] sm:$0xff]  ;;  %v7335_v31 = vadd.f32 %v7274_v19, %v23942_v3 }
 0x59a   :  { %v7950_v57 = vpop.f32.mrf.mxu3  ;;  %8224 = vmatpush.msrb.mxu3 %v8161_v16 }
 0x59b   :  { %v7951_v36 = vadd.f32 %v7950_v57, %v7937_v58  ;;  %v7338_v51 = vadd.f32 %v7276_v12, %v6537_v47 }
 0x59c   :  { %8225 = vmatpush.msrb.mxu3 %v8160_v61  ;;  %v8177_v61 = vld [vmem:[%s26443_s9 + $0x110] sm:$0xff] }
 0x59d   :  { %v7965_v33 = vadd.f32 %v7964_v44, %v7951_v36 }
 0x59e   :  { %v7976_v41 = vpop.f32.mrf.mxu0  ;;  %8226 = vmatpush.msrb.mxu3 %v8159_v59  ;;  %v8175_v59 = vld [vmem:[%s26443_s9 + $0x100] sm:$0xff] }
 0x59f   :  { %v24241_v28 = vadd.f32 %v7965_v33, %v7337_v42 }
 0x5a1   :  { %v8086_v15 = vsel %vm8085_vm11, %v24241_v28, 0.0  ;;  %v8113_v21 = vmul.f32 %v24241_v28, %v24241_v28 }
 0x5a2   :  { %v8087_v32 = vadd.f32 %v8086_v15, %v24236_v29  ;;  %v8018_v62 = vpop.f32.mrf.mxu3 }
 0x5a3   :  { %v8116_v38 = vsel %vm8085_vm11, %v8113_v21, 0.0  ;;  %v8186_v21 = vld [vmem:[%s26443_s9 + $0x158] sm:$0xff] }
 0x5a4   :  { %v8088_v23 = vrot.slane %v8087_v32, 4  ;;  %v8117_v1 = vadd.f32 %v8116_v38, %v8110_v43 }
 0x5a6   :  { %v7990_v54 = vpop.f32.mrf.mxu2  ;;  %v8089_v45 = vadd.f32 %v8088_v23, %v8087_v32  ;;  %v8118_v17 = vrot.slane %v8117_v1, 4  ;;  %v7978_v30 = vpop.f32.mrf.mxu0 }
 0x5a7   :  { %v7991_v13 = vadd.f32 %v7990_v54, %v7976_v41  ;;  %v8187_v41 = vld [vmem:[%s26443_s9 + $0x160] sm:$0xff] }
 0x5a8   :  { %v8090_v2 = vrot.slane %v8089_v45, 2  ;;  %v8119_v44 = vadd.f32 %v8118_v17, %v8117_v1  ;;  %8234 = vmatpush.msrb.mxu0 %v8187_v41 }
 0x5a9   :  { %v8005_v11 = vadd.f32 %v8004_v60, %v7991_v13 }
 0x5aa   :  { %v8091_v58 = vadd.f32 %v8090_v2, %v8089_v45  ;;  %v8120_v5 = vrot.slane %v8119_v44, 2  ;;  %v8020_v48 = vpop.f32.mrf.mxu3  ;;  %8235 = vmatpush.msrb.mxu0 %v8186_v21  ;;  %v8181_v45 = vld [vmem:[%s26443_s9 + $0x130] sm:$0xff]  ;;  %v8074_v2 = vpop.f32.mrf.mxu1 }
 0x5ab   :  { %v8019_v57 = vadd.f32 %v8018_v62, %v8005_v11  ;;  %v8183_v62 = vld [vmem:[%s26443_s9 + $0x140] sm:$0xff] }
 0x5ac   :  { %v8092_v36 = vrot.slane %v8091_v58, 1  ;;  %v8121_v27 = vadd.f32 %v8120_v5, %v8119_v44  ;;  %8236 = vmatpush.msrb.mxu0 %v8185_v4 }
 0x5ad   :  { %v24292_v33 = vadd.f32 %v8019_v57, %v7335_v31 }
 0x5ae   :  { %v7992_v35 = vpop.f32.mrf.mxu2  ;;  %v8122_v42 = vrot.slane %v8121_v27, 1  ;;  %v8093_v0 = vadd.f32 %v8092_v36, %v8091_v58  ;;  %8237 = vmatpush.msrb.mxu0 %v8184_v52  ;;  %v6579_v58 = vadd.f32 %v24115_v39, %v24068_v10 }
 0x5af   :  { %v7993_v37 = vadd.f32 %v7992_v35, %v7978_v30  ;;  %v8111_v60 = vmul.f32 %v24292_v33, %v24292_v33  ;;  %v8179_v30 = vld [vmem:[%s26443_s9 + $0x120] sm:$0xff]  ;;  %v7318_v35 = vadd.f32 %v24158_v50, %v7304_v22  ;;  %v8300_v22 = vld [vmem:[%s26444_s10 + $0x90] sm:$0xff] }
 0x5b0   :  { %v8123_v20 = vadd.f32 %v8122_v42, %v8121_v27  ;;  %8238 = vmatpush.msrb.mxu0 %v8183_v62  ;;  %v6593_v10 = vadd.f32 %v24117_v25, %v6579_v58  ;;  %v8293_v58 = vld [vmem:[%s26444_s10 + $0x58] sm:$0xff] }
 0x5b1   :  { %v8007_v8 = vadd.f32 %v8006_v26, %v7993_v37  ;;  %v7332_v50 = vadd.f32 %v24160_v49, %v7318_v35  ;;  %v8299_v35 = vld [vmem:[%s26444_s10 + $0x88] sm:$0xff] }
 0x5b2   :  { %v8140_v24 = vsel %vm4738_vm5, %v8093_v0, %v8123_v20  ;;  %8239 = vmatpush.msrb.mxu0 %v8182_v9  ;;  %v8076_v31 = vpop.f32.mrf.mxu1 }
 0x5b3   :  { %v8021_v63 = vadd.f32 %v8020_v48, %v8007_v8  ;;  %8207 = vmatmul.f32.vlgmr.msrb.gmra.mxu1 %v8140_v24  ;;  %v8176_v8 = vld [vmem:[%s26443_s9 + $0x108] sm:$0xff]  ;;  %v7339_v48 = vadd.f32 %v7332_v50, %v6593_v10  ;;  %v8284_v10 = vld [vmem:[%s26444_s10 + $0x10] sm:$0xff] }
 0x5b4   :  { %8240 = vmatpush.msrb.mxu0 %v8181_v45  ;;  %v8303_v45 = vld [vmem:[%s26444_s10 + $0xa8] sm:$0xff] }
 0x5b5   :  { %v24294_v7 = vadd.f32 %v8021_v63, %v7338_v51  ;;  %8317 = vmatpush.msrb.mxu2 %v8303_v45 }
 0x5b6   :  { %8241 = vmatpush.msrb.mxu0 %v8180_v40 }
 0x5b7   :  { %v8094_v46 = vsel %vm8085_vm11, %v24294_v7, 0.0  ;;  %v8114_v3 = vmul.f32 %v24294_v7, %v24294_v7  ;;  %8318 = vmatpush.msrb.mxu2 %v8300_v22  ;;  %v17345_v22 = vld [vmem:[%s26445_s11 + $0x1d4] sm:$0xf] }
 0x5b8   :  { %v8095_v15 = vadd.f32 %v8094_v46, %v24292_v33  ;;  %8242 = vmatpush.msrb.mxu0 %v8179_v30  ;;  %v8288_v30 = vld [vmem:[%s26444_s10 + $0x30] sm:$0xff] }
 0x5b9   :  { %v8124_v54 = vsel %vm8085_vm11, %v8114_v3, 0.0 }
 0x5ba   :  { %v8096_v43 = vrot.slane %v8095_v15, 4  ;;  %v8125_v32 = vadd.f32 %v8124_v54, %v8111_v60  ;;  %8243 = vmatpush.msrb.mxu0 %v8178_v34  ;;  %v8282_v34 = vld [vmem:[%s26444_s10] sm:$0xff] }
 0x5bc   :  { %v8097_v38 = vadd.f32 %v8096_v43, %v8095_v15  ;;  %v8126_v13 = vrot.slane %v8125_v32, 4  ;;  %8244 = vmatpush.msrb.mxu0 %v8177_v61 }
 0x5be   :  { %v8098_v23 = vrot.slane %v8097_v38, 2  ;;  %v8127_v1 = vadd.f32 %v8126_v13, %v8125_v32  ;;  %v8046_v14 = vpop.f32.mrf.mxu0  ;;  %8245 = vmatpush.msrb.mxu0 %v8176_v8  ;;  %v8287_v8 = vld [vmem:[%s26444_s10 + $0x28] sm:$0xff] }
 0x5c0   :  { %v8099_v6 = vadd.f32 %v8098_v23, %v8097_v38  ;;  %v8128_v56 = vrot.slane %v8127_v1, 2  ;;  %8246 = vmatpush.msrb.mxu0 %v8175_v59  ;;  %v8292_v59 = vld [vmem:[%s26444_s10 + $0x50] sm:$0xff] }
 0x5c2   :  { %v8032_v17 = vpop.f32.mrf.mxu3  ;;  %v8100_v55 = vrot.slane %v8099_v6, 1  ;;  %v8129_v11 = vadd.f32 %v8128_v56, %v8127_v1 }
 0x5c3   :  { %v8047_v44 = vadd.f32 %v8046_v14, %v8032_v17 }
 0x5c4   :  { %v8130_v19 = vrot.slane %v8129_v11, 1  ;;  %v8101_v12 = vadd.f32 %v8100_v55, %v8099_v6 }
 0x5c6   :  { %v8060_v16 = vpop.f32.mrf.mxu2  ;;  %v8131_v53 = vadd.f32 %v8130_v19, %v8129_v11  ;;  %v8048_v26 = vpop.f32.mrf.mxu0  ;;  %v8297_v11 = vld [vmem:[%s26444_s10 + $0x78] sm:$0xff]  ;;  %v8302_v19 = vld [vmem:[%s26444_s10 + $0xa0] sm:$0xff] }
 0x5c7   :  { %v8061_v37 = vadd.f32 %v8060_v16, %v8047_v44  ;;  %8319 = vmatpush.msrb.mxu2 %v8297_v11  ;;  %v8305_v44 = vld [vmem:[%s26444_s10 + $0xb8] sm:$0xff]  ;;  %v8291_v16 = vld [vmem:[%s26444_s10 + $0x48] sm:$0xff] }
 0x5c8   :  { %v8141_v5 = vsel %vm4738_vm5, %v8101_v12, %v8131_v53  ;;  %8357 = vmatpush.msra.mxu1 %v8305_v44  ;;  %v8285_v12 = vld [vmem:[%s26444_s10 + $0x18] sm:$0xff]  ;;  %v8296_v53 = vld [vmem:[%s26444_s10 + $0x70] sm:$0xff] }
 0x5c9   :  { %8227 = vmatmul.f32.vlgmr.msrb.gmra.mxu3 %v8141_v5  ;;  %v8075_v36 = vadd.f32 %v8074_v2, %v8061_v37  ;;  %v8294_v2 = vld [vmem:[%s26444_s10 + $0x60] sm:$0xff]  ;;  %v8304_v37 = vld [vmem:[%s26444_s10 + $0xb0] sm:$0xff] }
 0x5ca   :  { %v8034_v57 = vpop.f32.mrf.mxu3  ;;  %8320 = vmatpush.msrb.mxu2 %v8294_v2  ;;  %8358 = vmatpush.msra.mxu1 %v8302_v19  ;;  %v8275_v2 = vld [vmem:[%s26442_s8] sm:$0x1]  ;;  %v15423_v44 = vld [vmem:[%s26445_s11 + $0x2f0] sm:$0xf]  ;;  %s17612_s8 = smov [#allocation2]  }
 0x5cb   :  { %v8049_v47 = vadd.f32 %v8048_v26, %v8034_v57  ;;  %v24353_v49 = vadd.f32 %v8075_v36, %v24156_v18  ;;  %v8301_v26 = vld [vmem:[%s26444_s10 + $0x98] sm:$0xff]  ;;  %v8290_v57 = vld [vmem:[%s26444_s10 + $0x40] sm:$0xff]  ;;  %s10918_s22 = sshll.u32 %s17612_s8, 4  ;;  %s10919_s22 = int_to_ptr.vmem [resolvable:$true] %s10918_s22 }
 0x5cc   :  { %8321 = vmatpush.msrb.mxu2 %v8291_v16  ;;  %8359 = vmatpush.msra.mxu1 %v8299_v35  ;;  %v17382_v16 = vld [vmem:[%s26445_s11 + $0x2f4] sm:$0xf0]  ;;  %v15271_v35 = vld [vmem:[%s26445_s11 + $0x1c0] sm:$0xf] }
 0x5cd   :  { %v8112_v0 = vmul.f32 %v24353_v49, %v24353_v49 }
 0x5ce   :  { %v8062_v27 = vpop.f32.mrf.mxu2  ;;  %8322 = vmatpush.msrb.mxu2 %v8288_v30  ;;  %8360 = vmatpush.msra.mxu1 %v8296_v53  ;;  %v15335_v53 = vld [vmem:[%s26445_s11 + $0x240] sm:$0xf] }
 0x5cf   :  { %v8063_v39 = vadd.f32 %v8062_v27, %v8049_v47  ;;  %v8298_v47 = vld [vmem:[%s26444_s10 + $0x80] sm:$0xff]  ;;  %v8295_v27 = vld [vmem:[%s26444_s10 + $0x68] sm:$0xff] }
 0x5d0   :  { %8323 = vmatpush.msrb.mxu2 %v8285_v12  ;;  %8361 = vmatpush.msra.mxu1 %v8293_v58  ;;  %v17344_v12 = vld [vmem:[%s26445_s11 + $0x1c4] sm:$0xf0]  ;;  %v15273_v58 = vld [vmem:[%s26445_s11 + $0x1c8] sm:$0xf0] }
 0x5d1   :  { %v8077_v51 = vadd.f32 %v8076_v31, %v8063_v39 }
 0x5d2   :  { %8324 = vmatpush.msrb.mxu2 %v8282_v34  ;;  %8362 = vmatpush.msra.mxu1 %v8290_v57  ;;  %v15272_v34 = vor.u32 %v17344_v12, %v15271_v35  ;;  %v15367_v35 = vld [vmem:[%s26445_s11 + $0x280] sm:$0xf]  ;;  %v17368_v12 = vld [vmem:[%s26445_s11 + $0x284] sm:$0xf0] }
 0x5d3   :  { %v24355_v63 = vadd.f32 %v8077_v51, %v7339_v48  ;;  %v8289_v48 = vld [vmem:[%s26444_s10 + $0x38] sm:$0xff]  ;;  %v8286_v51 = vld [vmem:[%s26444_s10 + $0x20] sm:$0xff] }
 0x5d4   :  { %8337 = vmatpush.msra.mxu2 %v8304_v37  ;;  %8363 = vmatpush.msra.mxu1 %v8287_v8  ;;  %v17360_v37 = vld [vmem:[%s26445_s11 + $0x244] sm:$0xf0] }
 0x5d5   :  { %v8102_v42 = vsel %vm8085_vm11, %v24355_v63, 0.0  ;;  %v8115_v25 = vmul.f32 %v24355_v63, %v24355_v63  ;;  %v17380_v8 = vld [vmem:[%s26445_s11 + $0x2e4] sm:$0xf0] }
 0x5d6   :  { %v8103_v20 = vadd.f32 %v8102_v42, %v24353_v49  ;;  %8338 = vmatpush.msra.mxu2 %v8301_v26  ;;  %8364 = vmatpush.msra.mxu1 %v8284_v10  ;;  %v15295_v42 = vld [vmem:[%s26445_s11 + $0x1f0] sm:$0xf] }
 0x5d7   :  { %v8132_v41 = vsel %vm8085_vm11, %v8115_v25, 0.0  ;;  %v17350_v25 = vld [vmem:[%s26445_s11 + $0x1f4] sm:$0xf0]  ;;  %v15327_v10 = vld [vmem:[%s26445_s11 + $0x230] sm:$0xf] }
 0x5d8   :  { %v8104_v46 = vrot.slane %v8103_v20, 4  ;;  %v8133_v3 = vadd.f32 %v8132_v41, %v8112_v0  ;;  %8339 = vmatpush.msra.mxu2 %v8298_v47  ;;  %v15359_v0 = vld [vmem:[%s26445_s11 + $0x270] sm:$0xf]  ;;  %v15296_v41 = vor.u32 %v17350_v25, %v15295_v42  ;;  %v15415_v47 = vld [vmem:[%s26445_s11 + $0x2e0] sm:$0xf] }
 0x5da   :  { %v8105_v18 = vadd.f32 %v8104_v46, %v8103_v20  ;;  %v8134_v24 = vrot.slane %v8133_v3, 4  ;;  %8340 = vmatpush.msra.mxu2 %v8295_v27  ;;  %v17366_v46 = vld [vmem:[%s26445_s11 + $0x274] sm:$0xf0]  ;;  %8753 = vmatpush.bf16.msra.mxu3 %v15296_v41 }
 0x5db   :  { %v17342_v27 = vld [vmem:[%s26445_s11 + $0x1b4] sm:$0xf0] }
 0x5dc   :  { %v8106_v60 = vrot.slane %v8105_v18, 2  ;;  %v8135_v15 = vadd.f32 %v8134_v24, %v8133_v3  ;;  %8341 = vmatpush.msra.mxu2 %v8292_v59  ;;  %v17349_v3 = vld [vmem:[%s26445_s11 + $0x1f4] sm:$0xf]  ;;  %v15360_v24 = vor.u32 %v17366_v46, %v15359_v0  ;;  %v15416_v0 = vor.u32 %v17380_v8, %v15415_v47  ;;  %v17378_v41 = vld [vmem:[%s26445_s11 + $0x2d4] sm:$0xf0] }
 0x5dd   :  { %v15255_v46 = vld [vmem:[%s26445_s11 + $0x1a0] sm:$0xf]  ;;  %v17296_v8 = vld [vmem:[%s26445_s11 + $0x44] sm:$0xf0] }
 0x5de   :  { %v8107_v21 = vadd.f32 %v8106_v60, %v8105_v18  ;;  %v8136_v54 = vrot.slane %v8135_v15, 2  ;;  %v15297_v18 = vld [vmem:[%s26445_s11 + $0x1f8] sm:$0xf0]  ;;  %8342 = vmatpush.msra.mxu2 %v8289_v48  ;;  %8766 = vmatpush.bf16.msra.mxu0 %v15360_v24  ;;  %v17341_v48 = vld [vmem:[%s26445_s11 + $0x1b4] sm:$0xf] }
 0x5df   :  { %v15300_v60 = vor.u32 %v17349_v3, %v15297_v18  ;;  %v17340_v3 = vld [vmem:[%s26445_s11 + $0x1a4] sm:$0xf0]  ;;  %v15319_v18 = vld [vmem:[%s26445_s11 + $0x220] sm:$0xf] }
 0x5e0   :  { %v8108_v4 = vrot.slane %v8107_v21, 1  ;;  %v8137_v43 = vadd.f32 %v8136_v54, %v8135_v15  ;;  %v8283_v15 = vld [vmem:[%s26444_s10 + $0x8] sm:$0xff]  ;;  %8343 = vmatpush.msra.mxu2 %v8286_v51  ;;  %v15265_v51 = vld [vmem:[%s26445_s11 + $0x1b8] sm:$0xf0]  ;;  %v15256_v24 = vor.u32 %v17340_v3, %v15255_v46  ;;  %v15463_v47 = vld [vmem:[%s26445_s11 + $0x40] sm:$0xf] }
 0x5e1   :  { %v17348_v54 = vld [vmem:[%s26445_s11 + $0x1e4] sm:$0xf0]  ;;  %8792 = vmatpush.bf16.msrb.mxu1 %v15300_v60  ;;  %v15268_v25 = vor.u32 %v17341_v48, %v15265_v51  ;;  %v17335_v48 = vld [vmem:[%s26445_s11 + $0x184] sm:$0xf]  ;;  %v15241_v51 = vld [vmem:[%s26445_s11 + $0x188] sm:$0xf0] }
 0x5e2   :  { %v8138_v32 = vrot.slane %v8137_v43, 1  ;;  %v8109_v52 = vadd.f32 %v8108_v4, %v8107_v21  ;;  %v15287_v21 = vld [vmem:[%s26445_s11 + $0x1e0] sm:$0xf]  ;;  %8344 = vmatpush.msra.mxu2 %v8283_v15  ;;  %v17356_v60 = vld [vmem:[%s26445_s11 + $0x224] sm:$0xf0] }
 0x5e3   :  { %v15351_v4 = vld [vmem:[%s26445_s11 + $0x260] sm:$0xf]  ;;  %v17339_v15 = vld [vmem:[%s26445_s11 + $0x1a4] sm:$0xf]  ;;  %v15425_v3 = vld [vmem:[%s26445_s11 + $0x2f8] sm:$0xf0] }
 0x5e4   :  { %v8139_v38 = vadd.f32 %v8138_v32, %v8137_v43  ;;  %v15288_v43 = vor.u32 %v17348_v54, %v15287_v21  ;;  %v17364_v32 = vld [vmem:[%s26445_s11 + $0x264] sm:$0xf0]  ;;  %v15257_v21 = vld [vmem:[%s26445_s11 + $0x1a8] sm:$0xf0]  ;;  %v15320_v54 = vor.u32 %v17356_v60, %v15319_v18  ;;  %v15551_v18 = vld [vmem:[%s26445_s11 + $0xf0] sm:$0xf] }
 0x5e6   :  { %v8142_v13 = vsel %vm4738_vm5, %v8109_v52, %v8139_v38  ;;  %v17347_v52 = vld [vmem:[%s26445_s11 + $0x1e4] sm:$0xf]  ;;  %v15289_v38 = vld [vmem:[%s26445_s11 + $0x1e8] sm:$0xf0]  ;;  %8754 = vmatpush.bf16.msra.mxu3 %v15288_v43 }
 0x5e7   :  { %8247 = vmatmul.f32.vlgmr.msrb.gmra.mxu0 %v8142_v13  ;;  %v15352_v13 = vor.u32 %v17364_v32, %v15351_v4  ;;  %v15260_v4 = vor.u32 %v17339_v15, %v15257_v21  ;;  %v15399_v32 = vld [vmem:[%s26445_s11 + $0x2c0] sm:$0xf]  ;;  %v15455_v21 = vld [vmem:[%s26445_s11 + $0x30] sm:$0xf] }
 0x5e9   :  { %8767 = vmatpush.bf16.msra.mxu0 %v15352_v13  ;;  %v17338_v13 = vld [vmem:[%s26445_s11 + $0x194] sm:$0xf0] }
 0x630   :  { %v8208_v23 = vpop.f32.mrf.mxu1 }
 0x64c   :  { %v8228_v62 = vpop.f32.mrf.mxu3 }
 0x64d   :  { %v8229_v1 = vadd.f32 %v8228_v62, %v8208_v23  ;;  %v15292_v62 = vor.u32 %v17347_v52, %v15289_v38  ;;  %v8257_v23 = vld [vmem:[%s26441_s7] sm:$0x1]  ;;  %v17376_v52 = vld [vmem:[%s26445_s11 + $0x2c4] sm:$0xf0]  ;;  %v15247_v38 = vld [vmem:[%s26445_s11 + $0x190] sm:$0xf] }
 0x64f   :  { %8793 = vmatpush.bf16.msrb.mxu1 %v15292_v62  ;;  %v15311_v62 = vld [vmem:[%s26445_s11 + $0x210] sm:$0xf] }
 0x664   :  { %v8248_v9 = vpop.f32.mrf.mxu0 }
 0x665   :  { %v8249_v14 = vadd.f32 %v8248_v9, %v8229_v1  ;;  %v15279_v1 = vld [vmem:[%s26445_s11 + $0x1d0] sm:$0xf]  ;;  %v17346_v9 = vld [vmem:[%s26445_s11 + $0x1d4] sm:$0xf0] }
 0x666   :  { %v15280_v45 = vor.u32 %v17346_v9, %v15279_v1  ;;  %v17354_v1 = vld [vmem:[%s26445_s11 + $0x214] sm:$0xf0]  ;;  %v17337_v9 = vld [vmem:[%s26445_s11 + $0x194] sm:$0xf] }
 0x667   :  { %v24366_v6 = vmul.f32 0.013888889, %v8249_v14  ;;  %v15343_v14 = vld [vmem:[%s26445_s11 + $0x250] sm:$0xf] }
 0x668   :  { %8755 = vmatpush.bf16.msra.mxu3 %v15280_v45 }
 0x669   :  { %v8252_v56 = vmul.f32 %v24366_v6, %v24366_v6 }
 0x66b   :  { %v8254_v17 = vrot.slane %v8252_v56, 7 }
 0x66c   :  { %8756 = vmatpush.bf16.msra.mxu3 %v15272_v34  ;;  %v17302_v34 = vld [vmem:[%s26445_s11 + $0x74] sm:$0xf0] }
 0x66d   :  { %v8256_v55 = vsub.f32 %v24366_v6, %v8254_v17  ;;  %v17362_v17 = vld [vmem:[%s26445_s11 + $0x254] sm:$0xf0] }
 0x66e   :  { %v15344_v11 = vor.u32 %v17362_v17, %v15343_v14  ;;  %v15249_v14 = vld [vmem:[%s26445_s11 + $0x198] sm:$0xf0]  ;;  %v15400_v17 = vor.u32 %v17376_v52, %v15399_v32  ;;  %v15353_v32 = vld [vmem:[%s26445_s11 + $0x268] sm:$0xf0]  ;;  %v17379_v52 = vld [vmem:[%s26445_s11 + $0x2e4] sm:$0xf] }
 0x66f   :  { %v8258_v40 = vadd.f32 1e-05, %v8256_v55  ;;  %v15252_v45 = vor.u32 %v17337_v9, %v15249_v14  ;;  %v15447_v14 = vld [vmem:[%s26445_s11 + $0x20] sm:$0xf] }
 0x670   :  { %8768 = vmatpush.bf16.msra.mxu0 %v15344_v11 }
 0x671   :  { %17581 = vrsqrt.f32 %v8258_v40  ;;  %vm8265_vm13 = vweird.f32 %v8258_v40 }
 0x677   :  { %v17582_v5 = vpop.eup %17581 }
 0x678   :  { %v8260_v61 = vmul.f32 %v17582_v5, %v8258_v40  ;;  %vm8266_vm12 = vweird.f32 %v17582_v5  ;;  %v15281_v40 = vld [vmem:[%s26445_s11 + $0x1d8] sm:$0xf0] }
 0x679   :  { %vm8267_vm14 = vmor %vm8265_vm13, %vm8266_vm12  ;;  %v15284_v19 = vor.u32 %v17345_v22, %v15281_v40  ;;  %v15391_v22 = vld [vmem:[%s26445_s11 + $0x2b0] sm:$0xf]  ;;  %v15383_v40 = vld [vmem:[%s26445_s11 + $0x2a0] sm:$0xf] }
 0x67a   :  { %v8261_v50 = vmul.f32 %v17582_v5, %v8260_v61  ;;  %v15336_v61 = vor.u32 %v17360_v37, %v15335_v53  ;;  %v15487_v53 = vld [vmem:[%s26445_s11 + $0x70] sm:$0xf]  ;;  %v15368_v37 = vor.u32 %v17368_v12, %v15367_v35  ;;  %v17290_v35 = vld [vmem:[%s26445_s11 + $0x14] sm:$0xf0] }
 0x67b   :  { %8794 = vmatpush.bf16.msrb.mxu1 %v15284_v19  ;;  %v17370_v19 = vld [vmem:[%s26445_s11 + $0x294] sm:$0xf0] }
 0x67c   :  { %v8262_v36 = vmul.f32 0.5, %v8261_v50  ;;  %v15424_v50 = vor.u32 %v17382_v16, %v15423_v44  ;;  %8769 = vmatpush.bf16.msra.mxu0 %v15336_v61  ;;  %v15375_v16 = vld [vmem:[%s26445_s11 + $0x290] sm:$0xf] }
 0x67e   :  { %v8263_v39 = vsub.f32 1.5, %v8262_v36  ;;  %v15263_v36 = vld [vmem:[%s26445_s11 + $0x1b0] sm:$0xf] }
 0x67f   :  { %v15264_v59 = vor.u32 %v17342_v27, %v15263_v36  ;;  %v15464_v36 = vor.u32 %v17296_v8, %v15463_v47  ;;  %v15239_v27 = vld [vmem:[%s26445_s11 + $0x180] sm:$0xf]  ;;  %v17288_v47 = vld [vmem:[%s26445_s11 + $0x4] sm:$0xf0] }
 0x680   :  { %v8264_v31 = vmul.f32 %v17582_v5, %v8263_v39 }
 0x681   :  { %8757 = vmatpush.bf16.msra.mxu3 %v15264_v59 }
 0x682   :  { %v8268_v20 = vsel %vm8267_vm14, %v17582_v5, %v8264_v31  ;;  %v17358_v31 = vld [vmem:[%s26445_s11 + $0x234] sm:$0xf0] }
 0x683   :  { %8270 = vst [vmem:[#allocation1] sm:$0xff] %v8268_v20  ;;  %v15328_v42 = vor.u32 %v17358_v31, %v15327_v10  ;;  %v15407_v20 = vld [vmem:[%s26445_s11 + $0x2d0] sm:$0xf]  ;;  %v17336_v10 = vld [vmem:[%s26445_s11 + $0x184] sm:$0xf0] }
 0x684   :  { %v15408_v43 = vor.u32 %v17378_v41, %v15407_v20  ;;  %v15240_v59 = vor.u32 %v17336_v10, %v15239_v27  ;;  %v17352_v31 = vld [vmem:[%s26445_s11 + $0x204] sm:$0xf0]  ;;  %v15361_v20 = vld [vmem:[%s26445_s11 + $0x278] sm:$0xf0]  ;;  %v17381_v41 = vld [vmem:[%s26445_s11 + $0x2f4] sm:$0xf] }
 0x685   :  { %8770 = vmatpush.bf16.msra.mxu0 %v15328_v42  ;;  %8758 = vmatpush.bf16.msra.mxu3 %v15256_v24  ;;  %v17318_v24 = vld [vmem:[%s26445_s11 + $0xf4] sm:$0xf0]  ;;  %v15428_v60 = vor.u32 %v17381_v41, %v15425_v3  ;;  %v15329_v27 = vld [vmem:[%s26445_s11 + $0x238] sm:$0xf0]  ;;  %v17373_v10 = vld [vmem:[%s26445_s11 + $0x2b4] sm:$0xf] }
 0x686   :  { %v15552_v15 = vor.u32 %v17318_v24, %v15551_v18  ;;  %v15385_v41 = vld [vmem:[%s26445_s11 + $0x2a8] sm:$0xf0]  ;;  %v15511_v3 = vld [vmem:[%s26445_s11 + $0xa0] sm:$0xf]  ;;  %v17308_v18 = vld [vmem:[%s26445_s11 + $0xa4] sm:$0xf0] }
 0x689   :  { %8771 = vmatpush.bf16.msra.mxu0 %v15320_v54  ;;  %v17294_v54 = vld [vmem:[%s26445_s11 + $0x34] sm:$0xf0] }
 0x68a   :  { %v8272_v56 = vld [vmem:[#allocation1 + $0x1] ss:$9 sm:$0xff] }
 0x68b   :  { %v8274_v55 = vmul.f32 %v8272_v56, %v8257_v23  ;;  %v15248_v23 = vor.u32 %v17338_v13, %v15247_v38  ;;  %v15312_v56 = vor.u32 %v17354_v1, %v15311_v62  ;;  %v15417_v13 = vld [vmem:[%s26445_s11 + $0x2e8] sm:$0xf0]  ;;  %v15543_v62 = vld [vmem:[%s26445_s11 + $0xe0] sm:$0xf] }
 0x68c   :  { %v15420_v1 = vor.u32 %v17379_v52, %v15417_v13  ;;  %v15503_v52 = vld [vmem:[%s26445_s11 + $0x90] sm:$0xf] }
 0x68d   :  { %v8276_v30 = vmul.f32 %v8274_v55, %v24366_v6  ;;  %v17343_v6 = vld [vmem:[%s26445_s11 + $0x1c4] sm:$0xf]  ;;  %8759 = vmatpush.bf16.msra.mxu3 %v15248_v23  ;;  %8772 = vmatpush.bf16.msra.mxu0 %v15312_v56  ;;  %v17316_v23 = vld [vmem:[%s26445_s11 + $0xe4] sm:$0xf0] }
 0x68e   :  { %v15276_v26 = vor.u32 %v17343_v6, %v15273_v58  ;;  %v15488_v6 = vor.u32 %v17302_v34, %v15487_v53  ;;  %v15479_v58 = vld [vmem:[%s26445_s11 + $0x60] sm:$0xf]  ;;  %v15544_v9 = vor.u32 %v17316_v23, %v15543_v62  ;;  %v17292_v56 = vld [vmem:[%s26445_s11 + $0x24] sm:$0xf0]  ;;  %v17359_v53 = vld [vmem:[%s26445_s11 + $0x244] sm:$0xf] }
 0x68f   :  { %v8277_v5 = vsub.f32 %v8275_v2, %v8276_v30  ;;  %v17372_v2 = vld [vmem:[%s26445_s11 + $0x2a4] sm:$0xf0]  ;;  %v15376_v30 = vor.u32 %v17370_v19, %v15375_v16  ;;  %v15439_v16 = vld [vmem:[%s26445_s11 + $0x10] sm:$0xf]  ;;  %v15337_v34 = vld [vmem:[%s26445_s11 + $0x248] sm:$0xf0] }
 0x690   :  { %8795 = vmatpush.bf16.msrb.mxu1 %v15276_v26  ;;  %v15384_v44 = vor.u32 %v17372_v2, %v15383_v40  ;;  %v15471_v26 = vld [vmem:[%s26445_s11 + $0x50] sm:$0xf]  ;;  %v15440_v12 = vor.u32 %v17290_v35, %v15439_v16 }
 0x691   :  { %v8279_v57 = vperm.slane %v8277_v5, 0  ;;  %v17300_v5 = vld [vmem:[%s26445_s11 + $0x64] sm:$0xf0]  ;;  %8760 = vmatpush.bf16.msra.mxu3 %v15240_v59  ;;  %v15535_v2 = vld [vmem:[%s26445_s11 + $0xd0] sm:$0xf] }
 0x692   :  { %v15480_v61 = vor.u32 %v17300_v5, %v15479_v58  ;;  %v15401_v58 = vld [vmem:[%s26445_s11 + $0x2c8] sm:$0xf0]  ;;  %v15527_v5 = vld [vmem:[%s26445_s11 + $0xc0] sm:$0xf]  ;;  %v15393_v59 = vld [vmem:[%s26445_s11 + $0x2b8] sm:$0xf0] }
 0x693   :  { %v8281_v39 = vsel %vm4738_vm5, %v8274_v55, %v8279_v57  ;;  %v17374_v55 = vld [vmem:[%s26445_s11 + $0x2b4] sm:$0xf0] }
 0x694   :  { %15186 = vmatmul.msk.f32.vlgmr.msrb.gmra.mxu2 %vm4523_vm3, %v8281_v39  ;;  %15188 = vmatmul.msk.f32.vlgmr.msra.gmra.mxu1 %vm4523_vm3, %v8281_v39  ;;  %v15392_v11 = vor.u32 %v17374_v55, %v15391_v22  ;;  %v17298_v57 = vld [vmem:[%s26445_s11 + $0x54] sm:$0xf0]  ;;  %v15345_v22 = vld [vmem:[%s26445_s11 + $0x258] sm:$0xf0]  ;;  %v17377_v55 = vld [vmem:[%s26445_s11 + $0x2d4] sm:$0xf] }
 0x695   :  { %8779 = vmatpush.bf16.msrb.mxu2 %v15424_v50  ;;  %8796 = vmatpush.bf16.msrb.mxu1 %v15268_v25  ;;  %v15472_v50 = vor.u32 %v17298_v57, %v15471_v26  ;;  %v15244_v25 = vor.u32 %v17335_v48, %v15241_v51  ;;  %v17310_v48 = vld [vmem:[%s26445_s11 + $0xb4] sm:$0xf0]  ;;  %v15396_v51 = vor.u32 %v17373_v10, %v15393_v59 }
 0x699   :  { %8780 = vmatpush.bf16.msrb.mxu2 %v15416_v0  ;;  %8797 = vmatpush.bf16.msrb.mxu1 %v15260_v4  ;;  %v17365_v0 = vld [vmem:[%s26445_s11 + $0x274] sm:$0xf]  ;;  %v15456_v4 = vor.u32 %v17294_v54, %v15455_v21  ;;  %v15313_v54 = vld [vmem:[%s26445_s11 + $0x218] sm:$0xf0] }
 0x69a   :  { %v15364_v46 = vor.u32 %v17365_v0, %v15361_v20  ;;  %v15321_v0 = vld [vmem:[%s26445_s11 + $0x228] sm:$0xf0]  ;;  %v17371_v20 = vld [vmem:[%s26445_s11 + $0x2a4] sm:$0xf]  ;;  %v17353_v21 = vld [vmem:[%s26445_s11 + $0x214] sm:$0xf] }
 0x69c   :  { %15187 = vmatmul.msk.f32.vlgmr.msra.gmra.mxu2 %vm4523_vm3, %v8281_v39  ;;  %v15303_v39 = vld [vmem:[%s26445_s11 + $0x200] sm:$0xf]  ;;  %8805 = vmatpush.bf16.msrb.mxu3 %v15364_v46 }
 0x69d   :  { %8781 = vmatpush.bf16.msrb.mxu2 %v15408_v43  ;;  %8798 = vmatpush.bf16.msrb.mxu1 %v15252_v45  ;;  %v15304_v42 = vor.u32 %v17352_v31, %v15303_v39  ;;  %v17363_v43 = vld [vmem:[%s26445_s11 + $0x264] sm:$0xf]  ;;  %v17361_v45 = vld [vmem:[%s26445_s11 + $0x254] sm:$0xf]  ;;  %v15519_v31 = vld [vmem:[%s26445_s11 + $0xb0] sm:$0xf] }
 0x69e   :  { %v15356_v38 = vor.u32 %v17363_v43, %v15353_v32  ;;  %v15348_v40 = vor.u32 %v17361_v45, %v15345_v22  ;;  %v17369_v43 = vld [vmem:[%s26445_s11 + $0x294] sm:$0xf]  ;;  %v15377_v32 = vld [vmem:[%s26445_s11 + $0x298] sm:$0xf0]  ;;  %v15305_v45 = vld [vmem:[%s26445_s11 + $0x208] sm:$0xf0] }
 0x69f   :  { %8773 = vmatpush.bf16.msra.mxu0 %v15304_v42  ;;  %v15520_v42 = vor.u32 %v17310_v48, %v15519_v31  ;;  %v15369_v22 = vld [vmem:[%s26445_s11 + $0x288] sm:$0xf0] }
 0x6a0   :  { %8806 = vmatpush.bf16.msrb.mxu3 %v15356_v38  ;;  %v17306_v38 = vld [vmem:[%s26445_s11 + $0x94] sm:$0xf0] }
 0x6a1   :  { %8782 = vmatpush.bf16.msrb.mxu2 %v15400_v17  ;;  %8799 = vmatpush.bf16.msrb.mxu1 %v15244_v25  ;;  %v15448_v17 = vor.u32 %v17292_v56, %v15447_v14  ;;  %v17355_v25 = vld [vmem:[%s26445_s11 + $0x224] sm:$0xf]  ;;  %v15504_v14 = vor.u32 %v17306_v38, %v15503_v52  ;;  %v17301_v52 = vld [vmem:[%s26445_s11 + $0x74] sm:$0xf] }
 0x6a2   :  { %v15324_v46 = vor.u32 %v17355_v25, %v15321_v0  ;;  %v17351_v56 = vld [vmem:[%s26445_s11 + $0x204] sm:$0xf]  ;;  %v17313_v25 = vld [vmem:[%s26445_s11 + $0xd4] sm:$0xf]  ;;  %v15537_v0 = vld [vmem:[%s26445_s11 + $0xd8] sm:$0xf0] }
 0x6a3   :  { %8818 = vmatpush.bf16.msrb.mxu0 %v15428_v60  ;;  %v15388_v60 = vor.u32 %v17371_v20, %v15385_v41  ;;  %v15308_v16 = vor.u32 %v17351_v56, %v15305_v45  ;;  %v17309_v56 = vld [vmem:[%s26445_s11 + $0xb4] sm:$0xf]  ;;  %v15521_v45 = vld [vmem:[%s26445_s11 + $0xb8] sm:$0xf0] }
 0x6a4   :  { %8807 = vmatpush.bf16.msrb.mxu3 %v15348_v40 }
 0x6a5   :  { %8783 = vmatpush.bf16.msrb.mxu2 %v15392_v11  ;;  %9090 = vmatpush.bf16.msra.mxu1 %v15552_v15  ;;  %v15409_v11 = vld [vmem:[%s26445_s11 + $0x2d8] sm:$0xf0]  ;;  %v15512_v15 = vor.u32 %v17308_v18, %v15511_v3 }
 0x6a6   :  { %v15412_v19 = vor.u32 %v17377_v55, %v15409_v11  ;;  %v15495_v55 = vld [vmem:[%s26445_s11 + $0x80] sm:$0xf]  ;;  %v17304_v11 = vld [vmem:[%s26445_s11 + $0x84] sm:$0xf0] }
 0x6a7   :  { %8819 = vmatpush.bf16.msrb.mxu0 %v15420_v1  ;;  %v15316_v1 = vor.u32 %v17353_v21, %v15313_v54  ;;  %v15496_v35 = vor.u32 %v17304_v11, %v15495_v55  ;;  %v17332_v11 = vld [vmem:[%s26445_s11 + $0x164] sm:$0xf0] }
 0x6a9   :  { %8784 = vmatpush.bf16.msrb.mxu2 %v15384_v44  ;;  %v17314_v44 = vld [vmem:[%s26445_s11 + $0xd4] sm:$0xf0]  ;;  %9091 = vmatpush.bf16.msra.mxu1 %v15544_v9  ;;  %v15380_v9 = vor.u32 %v17369_v43, %v15377_v32  ;;  %v15615_v43 = vld [vmem:[%s26445_s11 + $0x170] sm:$0xf] }
 0x6aa   :  { %v17334_v32 = vld [vmem:[%s26445_s11 + $0x174] sm:$0xf0] }
 0x6ab   :  { %8820 = vmatpush.bf16.msrb.mxu0 %v15412_v19 }
 0x6ad   :  { %8785 = vmatpush.bf16.msrb.mxu2 %v15376_v30  ;;  %v15536_v30 = vor.u32 %v17314_v44, %v15535_v2 }
 0x6af   :  { %9092 = vmatpush.bf16.msra.mxu1 %v15536_v30 }
 0x6b1   :  { %8786 = vmatpush.bf16.msrb.mxu2 %v15368_v37  ;;  %v17375_v37 = vld [vmem:[%s26445_s11 + $0x2c4] sm:$0xf] }
 0x6b2   :  { %v15404_v26 = vor.u32 %v17375_v37, %v15401_v58  ;;  %v15553_v58 = vld [vmem:[%s26445_s11 + $0xf8] sm:$0xf0] }
 0x6b4   :  { %8821 = vmatpush.bf16.msrb.mxu0 %v15404_v26 }
 0x6b5   :  { %9077 = vmatpush.bf16.msra.mxu2 %v15488_v6  ;;  %v15340_v6 = vor.u32 %v17359_v53, %v15337_v34 }
 0x6b7   :  { %8808 = vmatpush.bf16.msrb.mxu3 %v15340_v6  ;;  %v17317_v6 = vld [vmem:[%s26445_s11 + $0xf4] sm:$0xf] }
 0x6b8   :  { %8822 = vmatpush.bf16.msrb.mxu0 %v15396_v51 }
 0x6b9   :  { %9078 = vmatpush.bf16.msra.mxu2 %v15480_v61  ;;  %v17312_v61 = vld [vmem:[%s26445_s11 + $0xc4] sm:$0xf0] }
 0x6ba   :  { %v15528_v57 = vor.u32 %v17312_v61, %v15527_v5 }
 0x6bc   :  { %9093 = vmatpush.bf16.msra.mxu1 %v15528_v57  ;;  %8823 = vmatpush.bf16.msrb.mxu0 %v15388_v60  ;;  %v15529_v60 = vld [vmem:[%s26445_s11 + $0xc8] sm:$0xf0] }
 0x6bd   :  { %9079 = vmatpush.bf16.msra.mxu2 %v15472_v50  ;;  %v15431_v50 = vld [vmem:[%s26445_s11] sm:$0xf] }
 0x6be   :  { %v15432_v8 = vor.u32 %v17288_v47, %v15431_v50  ;;  %v15556_v47 = vor.u32 %v17317_v6, %v15553_v58  ;;  %v15599_v58 = vld [vmem:[%s26445_s11 + $0x150] sm:$0xf] }
 0x6c0   :  { %9094 = vmatpush.bf16.msra.mxu1 %v15520_v42  ;;  %8824 = vmatpush.bf16.msrb.mxu0 %v15380_v9 }
 0x6c1   :  { %9080 = vmatpush.bf16.msra.mxu2 %v15464_v36  ;;  %v17357_v36 = vld [vmem:[%s26445_s11 + $0x234] sm:$0xf] }
 0x6c2   :  { %v15332_v39 = vor.u32 %v17357_v36, %v15329_v27  ;;  %v17315_v27 = vld [vmem:[%s26445_s11 + $0xe4] sm:$0xf] }
 0x6c4   :  { %8809 = vmatpush.bf16.msrb.mxu3 %v15332_v39  ;;  %9095 = vmatpush.bf16.msra.mxu1 %v15512_v15 }
 0x6c5   :  { %9081 = vmatpush.bf16.msra.mxu2 %v15456_v4 }
 0x6c8   :  { %8810 = vmatpush.bf16.msrb.mxu3 %v15324_v46  ;;  %9096 = vmatpush.bf16.msra.mxu1 %v15504_v14  ;;  %v15540_v46 = vor.u32 %v17313_v25, %v15537_v0  ;;  %v15616_v14 = vor.u32 %v17334_v32, %v15615_v43  ;;  %v15593_v25 = vld [vmem:[%s26445_s11 + $0x148] sm:$0xf0]  ;;  %v17325_v43 = vld [vmem:[%s26445_s11 + $0x134] sm:$0xf]  ;;  %v15585_v32 = vld [vmem:[%s26445_s11 + $0x138] sm:$0xf0] }
 0x6c9   :  { %9082 = vmatpush.bf16.msra.mxu2 %v15448_v17 }
 0x6cc   :  { %8811 = vmatpush.bf16.msrb.mxu3 %v15316_v1  ;;  %9097 = vmatpush.bf16.msra.mxu1 %v15496_v35 }
 0x6cd   :  { %9083 = vmatpush.bf16.msra.mxu2 %v15440_v12 }
 0x6d0   :  { %8812 = vmatpush.bf16.msrb.mxu3 %v15308_v16  ;;  %v15609_v16 = vld [vmem:[%s26445_s11 + $0x168] sm:$0xf0] }
 0x6d1   :  { %9084 = vmatpush.bf16.msra.mxu2 %v15432_v8 }
 0x711   :  { %v8366_v24 = vpop.f32.mrf.mxu1 }
 0x712   :  { %v8371_v4 = vperm.slane %v8366_v24, 0  ;;  %v8380_v23 = vperm.slane %v8366_v24, 1  ;;  %v17311_v24 = vld [vmem:[%s26445_s11 + $0xc4] sm:$0xf] }
 0x713   :  { %v15532_v38 = vor.u32 %v17311_v24, %v15529_v60  ;;  %v15583_v24 = vld [vmem:[%s26445_s11 + $0x130] sm:$0xf]  ;;  %v17326_v60 = vld [vmem:[%s26445_s11 + $0x134] sm:$0xf0] }
 0x714   :  { %v8374_v13 = vmul.f32 %v8371_v4, %v24353_v49  ;;  %v8377_v62 = vmul.f32 %v8371_v4, %v24355_v63  ;;  %v17367_v49 = vld [vmem:[%s26445_s11 + $0x284] sm:$0xf] }
 0x715   :  { %v15372_v30 = vor.u32 %v17367_v49, %v15369_v22  ;;  %v15607_v49 = vld [vmem:[%s26445_s11 + $0x160] sm:$0xf] }
 0x716   :  { %v8383_v63 = vadd.f32 %v8380_v23, %v8374_v13  ;;  %v8386_v17 = vadd.f32 %v8380_v23, %v8377_v62  ;;  %v15489_v13 = vld [vmem:[%s26445_s11 + $0x78] sm:$0xf0]  ;;  %v17333_v62 = vld [vmem:[%s26445_s11 + $0x174] sm:$0xf]  ;;  %v15608_v35 = vor.u32 %v17332_v11, %v15607_v49  ;;  %v17291_v49 = vld [vmem:[%s26445_s11 + $0x24] sm:$0xf] }
 0x717   :  { %v8326_v40 = vpop.f32.mrf.mxu2  ;;  %8825 = vmatpush.bf16.msrb.mxu0 %v15372_v30  ;;  %v15617_v23 = vld [vmem:[%s26445_s11 + $0x178] sm:$0xf0]  ;;  %v15492_v22 = vor.u32 %v17301_v52, %v15489_v13  ;;  %v15847_v13 = vld [vmem:[%s26445_s11 + $0x460] sm:$0xf]  ;;  %v15577_v11 = vld [vmem:[%s26445_s11 + $0x128] sm:$0xf0] }
 0x718   :  { %v8389_v2 = vmax.f32 %v8383_v63, 0.0  ;;  %v8392_v44 = vmax.f32 %v8386_v17, 0.0  ;;  %v8369_v19 = vperm.slane %v8326_v40, 0  ;;  %v8378_v57 = vperm.slane %v8326_v40, 1  ;;  %v17299_v40 = vld [vmem:[%s26445_s11 + $0x64] sm:$0xf] }
 0x719   :  { %v15620_v55 = vor.u32 %v17333_v62, %v15617_v23  ;;  %v17428_v62 = vld [vmem:[%s26445_s11 + $0x464] sm:$0xf0] }
 0x71a   :  { %v8394_v12 = vpack.c.bf16 %v8389_v2, %v8389_v2  ;;  %v8396_v53 = vpack.c.bf16 %v8392_v44, %v8392_v44  ;;  %v8372_v5 = vmul.f32 %v8369_v19, %v24236_v29  ;;  %v8375_v26 = vmul.f32 %v8369_v19, %v24241_v28  ;;  %v15545_v29 = vld [vmem:[%s26445_s11 + $0xe8] sm:$0xf0]  ;;  %v17331_v44 = vld [vmem:[%s26445_s11 + $0x164] sm:$0xf] }
 0x71b   :  { %v15548_v48 = vor.u32 %v17315_v27, %v15545_v29  ;;  %v15481_v2 = vld [vmem:[%s26445_s11 + $0x68] sm:$0xf0]  ;;  %v15524_v19 = vor.u32 %v17309_v56, %v15521_v45  ;;  %v15612_v6 = vor.u32 %v17331_v44, %v15609_v16  ;;  %v17305_v29 = vld [vmem:[%s26445_s11 + $0x94] sm:$0xf]  ;;  %v15575_v56 = vld [vmem:[%s26445_s11 + $0x120] sm:$0xf] }
 0x71c   :  { %v24840_v34 = vunpack.c.l.b16 %v8394_v12  ;;  %v8503_v37 = vunpack.c.l.b16 %v8396_v53  ;;  %v8381_v10 = vadd.f32 %v8378_v57, %v8372_v5  ;;  %v8384_v39 = vadd.f32 %v8378_v57, %v8375_v26  ;;  %v17307_v12 = vld [vmem:[%s26445_s11 + $0xa4] sm:$0xf]  ;;  %v15513_v53 = vld [vmem:[%s26445_s11 + $0xa8] sm:$0xf0]  ;;  %v17330_v5 = vld [vmem:[%s26445_s11 + $0x154] sm:$0xf0] }
 0x71d   :  { %v17297_v26 = vld [vmem:[%s26445_s11 + $0x54] sm:$0xf]  ;;  %v15473_v57 = vld [vmem:[%s26445_s11 + $0x58] sm:$0xf0]  ;;  %v15600_v27 = vor.u32 %v17330_v5, %v15599_v58  ;;  %v17324_v45 = vld [vmem:[%s26445_s11 + $0x124] sm:$0xf0] }
 0x71e   :  { %v24850_v61 = vpack.c.b16 %v8503_v37, %v24840_v34  ;;  %v8387_v20 = vmax.f32 %v8381_v10, 0.0  ;;  %v15484_v37 = vor.u32 %v17299_v40, %v15481_v2  ;;  %v15505_v10 = vld [vmem:[%s26445_s11 + $0x98] sm:$0xf0]  ;;  %v15839_v40 = vld [vmem:[%s26445_s11 + $0x450] sm:$0xf] }
 0x71f   :  { %v8346_v50 = vpop.f32.mrf.mxu2  ;;  %v15508_v0 = vor.u32 %v17305_v29, %v15505_v10  ;;  %v17426_v2 = vld [vmem:[%s26445_s11 + $0x454] sm:$0xf0]  ;;  %v15831_v58 = vld [vmem:[%s26445_s11 + $0x440] sm:$0xf]  ;;  %v15433_v29 = vld [vmem:[%s26445_s11 + $0x8] sm:$0xf0] }
 0x720   :  { %v8509_v8 = vrot.slane %v24850_v61, 1  ;;  %v8370_v36 = vperm.slane %v8346_v50, 0  ;;  %v8379_v31 = vperm.slane %v8346_v50, 1  ;;  %v17329_v50 = vld [vmem:[%s26445_s11 + $0x154] sm:$0xf] }
 0x721   :  { %v17319_v10 = vld [vmem:[%s26445_s11 + $0x104] sm:$0xf] }
 0x722   :  { %v8373_v59 = vmul.f32 %v8370_v36, %v24292_v33  ;;  %v8376_v28 = vmul.f32 %v8370_v36, %v24294_v7  ;;  %8787 = vmatmul.bf16.vlgmr.msrb.gmra.mxu2 %v8509_v8  ;;  %v8390_v33 = vmax.f32 %v8384_v39, 0.0  ;;  %v15516_v36 = vor.u32 %v17307_v12, %v15513_v53  ;;  %v15441_v12 = vld [vmem:[%s26445_s11 + $0x18] sm:$0xf0]  ;;  %v17321_v53 = vld [vmem:[%s26445_s11 + $0x114] sm:$0xf] }
 0x723   :  { %9129 = vmatpush.bf16.msrb.mxu2 %v15556_v47  ;;  %v15601_v47 = vld [vmem:[%s26445_s11 + $0x158] sm:$0xf0]  ;;  %v15476_v39 = vor.u32 %v17297_v26, %v15473_v57  ;;  %v17424_v26 = vld [vmem:[%s26445_s11 + $0x444] sm:$0xf0]  ;;  %v15559_v57 = vld [vmem:[%s26445_s11 + $0x100] sm:$0xf] }
 0x724   :  { %v8382_v51 = vadd.f32 %v8379_v31, %v8373_v59  ;;  %v8385_v42 = vadd.f32 %v8379_v31, %v8376_v28  ;;  %v15604_v59 = vor.u32 %v17329_v50, %v15601_v47  ;;  %v15591_v28 = vld [vmem:[%s26445_s11 + $0x140] sm:$0xf]  ;;  %v17328_v31 = vld [vmem:[%s26445_s11 + $0x144] sm:$0xf0] }
 0x725   :  { %v17320_v50 = vld [vmem:[%s26445_s11 + $0x104] sm:$0xf0] }
 0x726   :  { %v8388_v41 = vmax.f32 %v8382_v51, 0.0  ;;  %v8391_v7 = vmax.f32 %v8385_v42, 0.0  ;;  %v15465_v51 = vld [vmem:[%s26445_s11 + $0x48] sm:$0xf0]  ;;  %v17327_v42 = vld [vmem:[%s26445_s11 + $0x144] sm:$0xf] }
 0x727   :  { %9130 = vmatpush.bf16.msrb.mxu2 %v15548_v48  ;;  %v17295_v48 = vld [vmem:[%s26445_s11 + $0x44] sm:$0xf] }
 0x728   :  { %v8393_v3 = vpack.c.bf16 %v8388_v41, %v8387_v20  ;;  %v8395_v18 = vpack.c.bf16 %v8391_v7, %v8390_v33  ;;  %v15592_v20 = vor.u32 %v17328_v31, %v15591_v28  ;;  %v17303_v33 = vld [vmem:[%s26445_s11 + $0x84] sm:$0xf]  ;;  %v15497_v41 = vld [vmem:[%s26445_s11 + $0x88] sm:$0xf0]  ;;  %v15468_v7 = vor.u32 %v17295_v48, %v15465_v51  ;;  %v17398_v28 = vld [vmem:[%s26445_s11 + $0x374] sm:$0xf0] }
 0x729   :  { %v15832_v31 = vor.u32 %v17424_v26, %v15831_v58  ;;  %v15791_v48 = vld [vmem:[%s26445_s11 + $0x3f0] sm:$0xf]  ;;  %v17414_v51 = vld [vmem:[%s26445_s11 + $0x3f4] sm:$0xf0] }
 0x72a   :  { %v8498_v15 = vunpack.c.l.b16 %v8393_v3  ;;  %v24876_v21 = vunpack.c.h.b16 %v8393_v3  ;;  %v8501_v54 = vunpack.c.l.b16 %v8395_v18  ;;  %v8502_v4 = vunpack.c.h.b16 %v8395_v18  ;;  %v15855_v3 = vld [vmem:[%s26445_s11 + $0x470] sm:$0xf]  ;;  %v17430_v18 = vld [vmem:[%s26445_s11 + $0x474] sm:$0xf0] }
 0x72b   :  { %9131 = vmatpush.bf16.msrb.mxu2 %v15540_v46  ;;  %v15596_v46 = vor.u32 %v17327_v42, %v15593_v25  ;;  %v15856_v52 = vor.u32 %v17430_v18, %v15855_v3  ;;  %v17397_v42 = vld [vmem:[%s26445_s11 + $0x374] sm:$0xf]  ;;  %v15560_v25 = vor.u32 %v17320_v50, %v15559_v57  ;;  %v15792_v3 = vor.u32 %v17414_v51, %v15791_v48  ;;  %v15719_v18 = vld [vmem:[%s26445_s11 + $0x360] sm:$0xf]  ;;  %v17390_v50 = vld [vmem:[%s26445_s11 + $0x334] sm:$0xf0] }
 0x72c   :  { %v24896_v1 = vpack.c.b16 %v8501_v54, %v8498_v15  ;;  %v24899_v9 = vpack.c.b16 %v8502_v4, %v24876_v21  ;;  %v24929_v30 = vpack.c.b16 %v8498_v15, %v8498_v15  ;;  %v17293_v15 = vld [vmem:[%s26445_s11 + $0x34] sm:$0xf]  ;;  %v15500_v54 = vor.u32 %v17303_v33, %v15497_v41  ;;  %v15457_v4 = vld [vmem:[%s26445_s11 + $0x38] sm:$0xf0]  ;;  %v17422_v33 = vld [vmem:[%s26445_s11 + $0x434] sm:$0xf0] }
 0x72d   :  { %v15460_v23 = vor.u32 %v17293_v15, %v15457_v4  ;;  %v17412_v4 = vld [vmem:[%s26445_s11 + $0x3e4] sm:$0xf0]  ;;  %v15751_v48 = vld [vmem:[%s26445_s11 + $0x3a0] sm:$0xf] }
 0x72e   :  { %v8507_v63 = vrot.slane %v24896_v1, 1  ;;  %v8508_v17 = vrot.slane %v24899_v9, 1  ;;  %v17404_v51 = vld [vmem:[%s26445_s11 + $0x3a4] sm:$0xf0] }
 0x72f   :  { %9132 = vmatpush.bf16.msrb.mxu2 %v15532_v38  ;;  %v15584_v38 = vor.u32 %v17326_v60, %v15583_v24  ;;  %v17396_v24 = vld [vmem:[%s26445_s11 + $0x364] sm:$0xf0] }
 0x730   :  { %8761 = vmatmul.bf16.vlgmr.msra.gmra.mxu3 %v8507_v63  ;;  %8774 = vmatmul.bf16.vlgmr.msra.gmra.mxu0 %v8508_v17 }
 0x731   :  { %8800 = vmatmul.bf16.vlgmr.msrb.gmra.mxu1 %v8507_v63  ;;  %9103 = vmatpush.bf16.msra.mxu3 %v15616_v14  ;;  %v15588_v14 = vor.u32 %v17325_v43, %v15585_v32  ;;  %v8832_v63 = vpack.c.b16 %v24876_v21, %v24876_v21  ;;  %v15848_v21 = vor.u32 %v17428_v62, %v15847_v13  ;;  %v17395_v43 = vld [vmem:[%s26445_s11 + $0x364] sm:$0xf]  ;;  %v15721_v32 = vld [vmem:[%s26445_s11 + $0x368] sm:$0xf0] }
 0x732   :  { %9116 = vmatpush.bf16.msra.mxu0 %v15492_v22  ;;  %9142 = vmatpush.bf16.msrb.mxu1 %v15620_v55  ;;  %v15449_v22 = vld [vmem:[%s26445_s11 + $0x28] sm:$0xf0]  ;;  %v17323_v55 = vld [vmem:[%s26445_s11 + $0x124] sm:$0xf]  ;;  %v8833_v13 = vpack.c.b16 %v24840_v34, %v24840_v34  ;;  %v15720_v62 = vor.u32 %v17396_v24, %v15719_v18  ;;  %v15775_v34 = vld [vmem:[%s26445_s11 + $0x3d0] sm:$0xf] }
 0x733   :  { %9085 = vmatmul.bf16.vlgmr.msra.gmra.mxu2 %v24929_v30  ;;  %v15452_v44 = vor.u32 %v17291_v49, %v15449_v22  ;;  %v15580_v16 = vor.u32 %v17323_v55, %v15577_v11  ;;  %v17393_v22 = vld [vmem:[%s26445_s11 + $0x354] sm:$0xf]  ;;  %v15713_v55 = vld [vmem:[%s26445_s11 + $0x358] sm:$0xf0]  ;;  %v15807_v11 = vld [vmem:[%s26445_s11 + $0x410] sm:$0xf] }
 0x734   :  { %9133 = vmatpush.bf16.msrb.mxu2 %v15524_v19  ;;  %v17322_v19 = vld [vmem:[%s26445_s11 + $0x114] sm:$0xf0]  ;;  %v17385_v24 = vld [vmem:[%s26445_s11 + $0x314] sm:$0xf] }
 0x735   :  { %9104 = vmatpush.bf16.msra.mxu3 %v15608_v35  ;;  %v17289_v35 = vld [vmem:[%s26445_s11 + $0x14] sm:$0xf]  ;;  %v17402_v18 = vld [vmem:[%s26445_s11 + $0x394] sm:$0xf0] }
 0x736   :  { %9117 = vmatpush.bf16.msra.mxu0 %v15484_v37  ;;  %9143 = vmatpush.bf16.msrb.mxu1 %v15612_v6  ;;  %v15569_v37 = vld [vmem:[%s26445_s11 + $0x118] sm:$0xf0]  ;;  %v15840_v6 = vor.u32 %v17426_v2, %v15839_v40  ;;  %v15444_v47 = vor.u32 %v17289_v35, %v15441_v12  ;;  %v17392_v2 = vld [vmem:[%s26445_s11 + $0x344] sm:$0xf0]  ;;  %v17391_v35 = vld [vmem:[%s26445_s11 + $0x344] sm:$0xf] }
 0x737   :  { %v15705_v12 = vld [vmem:[%s26445_s11 + $0x348] sm:$0xf0] }
 0x738   :  { %9134 = vmatpush.bf16.msrb.mxu2 %v15516_v36  ;;  %v15572_v36 = vor.u32 %v17321_v53, %v15569_v37  ;;  %v15799_v53 = vld [vmem:[%s26445_s11 + $0x400] sm:$0xf]  ;;  %v17416_v37 = vld [vmem:[%s26445_s11 + $0x404] sm:$0xf0]  ;;  %v15708_v26 = vor.u32 %v17391_v35, %v15705_v12  ;;  %v17425_v35 = vld [vmem:[%s26445_s11 + $0x454] sm:$0xf] }
 0x739   :  { %9105 = vmatpush.bf16.msra.mxu3 %v15600_v27  ;;  %v17287_v27 = vld [vmem:[%s26445_s11 + $0x4] sm:$0xf]  ;;  %v15800_v57 = vor.u32 %v17416_v37, %v15799_v53  ;;  %v15769_v37 = vld [vmem:[%s26445_s11 + $0x3c8] sm:$0xf0] }
 0x73a   :  { %9118 = vmatpush.bf16.msra.mxu0 %v15476_v39  ;;  %9144 = vmatpush.bf16.msrb.mxu1 %v15604_v59  ;;  %v15561_v39 = vld [vmem:[%s26445_s11 + $0x108] sm:$0xf0]  ;;  %v15727_v59 = vld [vmem:[%s26445_s11 + $0x370] sm:$0xf]  ;;  %v15436_v41 = vor.u32 %v17287_v27, %v15433_v29  ;;  %v17389_v27 = vld [vmem:[%s26445_s11 + $0x334] sm:$0xf] }
 0x73b   :  { %v15697_v29 = vld [vmem:[%s26445_s11 + $0x338] sm:$0xf0]  ;;  %v17407_v53 = vld [vmem:[%s26445_s11 + $0x3c4] sm:$0xf] }
 0x73c   :  { %9135 = vmatpush.bf16.msrb.mxu2 %v15508_v0  ;;  %v15729_v0 = vld [vmem:[%s26445_s11 + $0x378] sm:$0xf0] }
 0x73d   :  { %9106 = vmatpush.bf16.msra.mxu3 %v15592_v20  ;;  %v15823_v20 = vld [vmem:[%s26445_s11 + $0x430] sm:$0xf]  ;;  %v15732_v60 = vor.u32 %v17397_v42, %v15729_v0  ;;  %v17387_v42 = vld [vmem:[%s26445_s11 + $0x324] sm:$0xf]  ;;  %v9206_v0 = vrot.slane %v24850_v61, 2  ;;  %v9573_v61 = vld [vmem:[%s26448_s14 + $0x78] sm:$0xff] }
 0x73e   :  { %9119 = vmatpush.bf16.msra.mxu0 %v15468_v7  ;;  %9145 = vmatpush.bf16.msrb.mxu1 %v15596_v46  ;;  %v15564_v7 = vor.u32 %v17319_v10, %v15561_v39  ;;  %v15728_v46 = vor.u32 %v17398_v28, %v15727_v59  ;;  %v15824_v15 = vor.u32 %v17422_v33, %v15823_v20  ;;  %v15687_v59 = vld [vmem:[%s26445_s11 + $0x320] sm:$0xf] }
 0x73f   :  { %v15700_v28 = vor.u32 %v17389_v27, %v15697_v29  ;;  %v15752_v33 = vor.u32 %v17404_v51, %v15751_v48  ;;  %v17401_v51 = vld [vmem:[%s26445_s11 + $0x394] sm:$0xf] }
 0x740   :  { %9136 = vmatpush.bf16.msrb.mxu2 %v15500_v54  ;;  %8813 = vmatmul.bf16.vlgmr.msrb.gmra.mxu3 %v8508_v17  ;;  %v15576_v17 = vor.u32 %v17324_v45, %v15575_v56  ;;  %v15783_v54 = vld [vmem:[%s26445_s11 + $0x3e0] sm:$0xf]  ;;  %v17394_v56 = vld [vmem:[%s26445_s11 + $0x354] sm:$0xf0]  ;;  %v15724_v45 = vor.u32 %v17395_v43, %v15721_v32  ;;  %v17384_v43 = vld [vmem:[%s26445_s11 + $0x304] sm:$0xf0] }
 0x741   :  { %8826 = vmatmul.bf16.vlgmr.msrb.gmra.mxu0 %v8509_v8  ;;  %9098 = vmatmul.bf16.vlgmr.msra.gmra.mxu1 %v8832_v63  ;;  %v15567_v8 = vld [vmem:[%s26445_s11 + $0x110] sm:$0xf] }
 0x742   :  { %9107 = vmatpush.bf16.msra.mxu3 %v15584_v38  ;;  %9120 = vmatpush.bf16.msra.mxu0 %v15460_v23  ;;  %v15568_v5 = vor.u32 %v17322_v19, %v15567_v8  ;;  %v17420_v38 = vld [vmem:[%s26445_s11 + $0x424] sm:$0xf0]  ;;  %v15784_v23 = vor.u32 %v17412_v4, %v15783_v54  ;;  %v15767_v8 = vld [vmem:[%s26445_s11 + $0x3c0] sm:$0xf] }
 0x743   :  { %9146 = vmatpush.bf16.msrb.mxu1 %v15588_v14  ;;  %9137 = vmatmul.bf16.vlgmr.msrb.gmra.mxu2 %v8832_v63  ;;  %v15711_v14 = vld [vmem:[%s26445_s11 + $0x350] sm:$0xf]  ;;  %v17410_v63 = vld [vmem:[%s26445_s11 + $0x3d4] sm:$0xf0]  ;;  %v17408_v19 = vld [vmem:[%s26445_s11 + $0x3c4] sm:$0xf0] }
 0x744   :  { %9476 = vmatpush.bf16.msra.mxu2 %v15856_v52  ;;  %v15815_v52 = vld [vmem:[%s26445_s11 + $0x420] sm:$0xf]  ;;  %v15776_v40 = vor.u32 %v17410_v63, %v15775_v34  ;;  %v15768_v58 = vor.u32 %v17408_v19, %v15767_v8  ;;  %v17409_v8 = vld [vmem:[%s26445_s11 + $0x3d4] sm:$0xf]  ;;  %v15777_v19 = vld [vmem:[%s26445_s11 + $0x3d8] sm:$0xf0] }
 0x745   :  { %v15816_v49 = vor.u32 %v17420_v38, %v15815_v52  ;;  %v15671_v4 = vld [vmem:[%s26445_s11 + $0x300] sm:$0xf]  ;;  %v17400_v38 = vld [vmem:[%s26445_s11 + $0x384] sm:$0xf0] }
 0x746   :  { %9108 = vmatpush.bf16.msra.mxu3 %v15576_v17  ;;  %9121 = vmatpush.bf16.msra.mxu0 %v15452_v44  ;;  %v15712_v17 = vor.u32 %v17394_v56, %v15711_v14  ;;  %v15716_v44 = vor.u32 %v17393_v22, %v15713_v55  ;;  %v15735_v52 = vld [vmem:[%s26445_s11 + $0x380] sm:$0xf]  ;;  %v15793_v14 = vld [vmem:[%s26445_s11 + $0x3f8] sm:$0xf0]  ;;  %v17429_v56 = vld [vmem:[%s26445_s11 + $0x474] sm:$0xf] }
 0x747   :  { %9147 = vmatpush.bf16.msrb.mxu1 %v15580_v16  ;;  %v15736_v34 = vor.u32 %v17400_v38, %v15735_v52 }
 0x748   :  { %9477 = vmatpush.bf16.msra.mxu2 %v15848_v21  ;;  %v17418_v21 = vld [vmem:[%s26445_s11 + $0x414] sm:$0xf0] }
 0x749   :  { %v15808_v16 = vor.u32 %v17418_v21, %v15807_v11  ;;  %v17411_v11 = vld [vmem:[%s26445_s11 + $0x3e4] sm:$0xf]  ;;  %v15785_v21 = vld [vmem:[%s26445_s11 + $0x3e8] sm:$0xf0] }
 0x74a   :  { %9109 = vmatpush.bf16.msra.mxu3 %v15568_v5  ;;  %9122 = vmatpush.bf16.msra.mxu0 %v15444_v47  ;;  %v15695_v5 = vld [vmem:[%s26445_s11 + $0x330] sm:$0xf] }
 0x74b   :  { %9148 = vmatpush.bf16.msrb.mxu1 %v15572_v36  ;;  %v15759_v47 = vld [vmem:[%s26445_s11 + $0x3b0] sm:$0xf]  ;;  %v17406_v36 = vld [vmem:[%s26445_s11 + $0x3b4] sm:$0xf0]  ;;  %v15696_v10 = vor.u32 %v17390_v50, %v15695_v5  ;;  %v15772_v5 = vor.u32 %v17407_v53, %v15769_v37  ;;  %v15761_v50 = vld [vmem:[%s26445_s11 + $0x3b8] sm:$0xf0] }
 0x74c   :  { %9478 = vmatpush.bf16.msra.mxu2 %v15840_v6  ;;  %v15760_v39 = vor.u32 %v17406_v36, %v15759_v47  ;;  %v17421_v47 = vld [vmem:[%s26445_s11 + $0x434] sm:$0xf]  ;;  %v15825_v36 = vld [vmem:[%s26445_s11 + $0x438] sm:$0xf0]  ;;  %v9567_v53 = vld [vmem:[%s26448_s14 + $0x48] sm:$0xff] }
 0x74d   :  { %v15828_v29 = vor.u32 %v17421_v47, %v15825_v36  ;;  %v9562_v47 = vld [vmem:[%s26448_s14 + $0x20] sm:$0xff]  ;;  %v9561_v36 = vld [vmem:[%s26448_s14 + $0x18] sm:$0xff] }
 0x74e   :  { %9110 = vmatpush.bf16.msra.mxu3 %v15560_v25  ;;  %9123 = vmatpush.bf16.msra.mxu0 %v15436_v41  ;;  %v15689_v25 = vld [vmem:[%s26445_s11 + $0x328] sm:$0xf0]  ;;  %v15679_v41 = vld [vmem:[%s26445_s11 + $0x310] sm:$0xf] }
 0x74f   :  { %9149 = vmatpush.bf16.msrb.mxu1 %v15564_v7  ;;  %v15692_v7 = vor.u32 %v17387_v42, %v15689_v25  ;;  %v15745_v42 = vld [vmem:[%s26445_s11 + $0x398] sm:$0xf0]  ;;  %v17417_v25 = vld [vmem:[%s26445_s11 + $0x414] sm:$0xf] }
 0x750   :  { %9479 = vmatpush.bf16.msra.mxu2 %v15832_v31  ;;  %v17388_v31 = vld [vmem:[%s26445_s11 + $0x324] sm:$0xf0] }
 0x751   :  { %9111 = vmatmul.bf16.vlgmr.msra.gmra.mxu3 %v8833_v13  ;;  %9124 = vmatmul.bf16.vlgmr.msra.gmra.mxu0 %v24929_v30  ;;  %v15703_v30 = vld [vmem:[%s26445_s11 + $0x340] sm:$0xf]  ;;  %v15688_v20 = vor.u32 %v17388_v31, %v15687_v59  ;;  %v17419_v59 = vld [vmem:[%s26445_s11 + $0x424] sm:$0xf] }
 0x752   :  { %9450 = vmatpush.bf16.msrb.mxu3 %v15728_v46  ;;  %9463 = vmatpush.bf16.msrb.mxu0 %v15792_v3  ;;  %v15704_v6 = vor.u32 %v17392_v2, %v15703_v30  ;;  %v17386_v46 = vld [vmem:[%s26445_s11 + $0x314] sm:$0xf0]  ;;  %v15743_v3 = vld [vmem:[%s26445_s11 + $0x390] sm:$0xf]  ;;  %v9204_v30 = vrot.slane %v24896_v1, 2  ;;  %v9205_v2 = vrot.slane %v24899_v9, 2  ;;  %v15780_v9 = vor.u32 %v17409_v8, %v15777_v19 }
 0x753   :  { %9489 = vmatpush.bf16.msra.mxu1 %v15732_v60  ;;  %v15681_v60 = vld [vmem:[%s26445_s11 + $0x318] sm:$0xf0]  ;;  %v15744_v54 = vor.u32 %v17402_v18, %v15743_v3  ;;  %v17415_v3 = vld [vmem:[%s26445_s11 + $0x404] sm:$0xf]  ;;  %v15801_v18 = vld [vmem:[%s26445_s11 + $0x408] sm:$0xf0] }
 0x754   :  { %9480 = vmatpush.bf16.msra.mxu2 %v15824_v15  ;;  %9150 = vmatmul.bf16.vlgmr.msrb.gmra.mxu1 %v8833_v13  ;;  %v15680_v15 = vor.u32 %v17386_v46, %v15679_v41  ;;  %v15684_v32 = vor.u32 %v17385_v24, %v15681_v60  ;;  %v17383_v13 = vld [vmem:[%s26445_s11 + $0x304] sm:$0xf]  ;;  %v15841_v1 = vld [vmem:[%s26445_s11 + $0x458] sm:$0xf0]  ;;  %v15737_v46 = vld [vmem:[%s26445_s11 + $0x388] sm:$0xf0]  ;;  %v15804_v60 = vor.u32 %v17415_v3, %v15801_v18 }
 0x755   :  { %v15844_v12 = vor.u32 %v17425_v35, %v15841_v1 }
 0x756   :  { %9451 = vmatpush.bf16.msrb.mxu3 %v15720_v62  ;;  %9464 = vmatpush.bf16.msrb.mxu0 %v15784_v23  ;;  %v15673_v62 = vld [vmem:[%s26445_s11 + $0x308] sm:$0xf0]  ;;  %v17413_v23 = vld [vmem:[%s26445_s11 + $0x3f4] sm:$0xf] }
 0x757   :  { %9490 = vmatpush.bf16.msra.mxu1 %v15724_v45  ;;  %v15857_v45 = vld [vmem:[%s26445_s11 + $0x478] sm:$0xf0]  ;;  %v15676_v63 = vor.u32 %v17383_v13, %v15673_v62  ;;  %v15796_v22 = vor.u32 %v17413_v23, %v15793_v14 }
 0x758   :  { %9481 = vmatpush.bf16.msra.mxu2 %v15816_v49  ;;  %v15672_v49 = vor.u32 %v17384_v43, %v15671_v4  ;;  %v15860_v55 = vor.u32 %v17429_v56, %v15857_v45 }
 0x75a   :  { %9452 = vmatpush.bf16.msrb.mxu3 %v15712_v17  ;;  %9465 = vmatpush.bf16.msrb.mxu0 %v15776_v40  ;;  %v17427_v17 = vld [vmem:[%s26445_s11 + $0x464] sm:$0xf]  ;;  %v15849_v40 = vld [vmem:[%s26445_s11 + $0x468] sm:$0xf0] }
 0x75b   :  { %9491 = vmatpush.bf16.msra.mxu1 %v15716_v44  ;;  %v15788_v44 = vor.u32 %v17411_v11, %v15785_v21  ;;  %v9571_v21 = vld [vmem:[%s26448_s14 + $0x68] sm:$0xff] }
 0x75c   :  { %9482 = vmatpush.bf16.msra.mxu2 %v15808_v16  ;;  %v15852_v16 = vor.u32 %v17427_v17, %v15849_v40  ;;  %v9570_v17 = vld [vmem:[%s26448_s14 + $0x60] sm:$0xff] }
 0x75e   :  { %9453 = vmatpush.bf16.msrb.mxu3 %v15704_v6  ;;  %9466 = vmatpush.bf16.msrb.mxu0 %v15768_v58  ;;  %v17423_v6 = vld [vmem:[%s26445_s11 + $0x444] sm:$0xf]  ;;  %v15833_v58 = vld [vmem:[%s26445_s11 + $0x448] sm:$0xf0] }
 0x75f   :  { %9492 = vmatpush.bf16.msra.mxu1 %v15708_v26  ;;  %v15836_v26 = vor.u32 %v17423_v6, %v15833_v58  ;;  %v9566_v6 = vld [vmem:[%s26448_s14 + $0x40] sm:$0xff]  ;;  %v9589_v58 = vld [vmem:[%s26448_s14 + $0xf8] sm:$0xff] }
 0x760   :  { %9483 = vmatpush.bf16.msra.mxu2 %v15800_v57  ;;  %v17405_v57 = vld [vmem:[%s26445_s11 + $0x3b4] sm:$0xf] }
 0x761   :  { %v15764_v27 = vor.u32 %v17405_v57, %v15761_v50  ;;  %v9563_v57 = vld [vmem:[%s26448_s14 + $0x28] sm:$0xff] }
 0x762   :  { %9454 = vmatpush.bf16.msrb.mxu3 %v15696_v10  ;;  %9467 = vmatpush.bf16.msrb.mxu0 %v15760_v39  ;;  %v17403_v10 = vld [vmem:[%s26445_s11 + $0x3a4] sm:$0xf]  ;;  %v15753_v39 = vld [vmem:[%s26445_s11 + $0x3a8] sm:$0xf0] }
 0x763   :  { %9493 = vmatpush.bf16.msra.mxu1 %v15700_v28  ;;  %9484 = vmatmul.bf16.vlgmr.msra.gmra.mxu2 %v9206_v0  ;;  %v15817_v28 = vld [vmem:[%s26445_s11 + $0x428] sm:$0xf0]  ;;  %v15756_v31 = vor.u32 %v17403_v10, %v15753_v39  ;;  %v9560_v10 = vld [vmem:[%s26448_s14 + $0x10] sm:$0xff] }
 0x764   :  { %v15820_v48 = vor.u32 %v17419_v59, %v15817_v28  ;;  %9590 = vmatpush.msrb.mxu2 %v9573_v61  ;;  %v9587_v39 = vld [vmem:[%s26448_s14 + $0xe8] sm:$0xff]  ;;  %v9586_v59 = vld [vmem:[%s26448_s14 + $0xe0] sm:$0xff] }
 0x765   :  { %v9559_v28 = vld [vmem:[%s26448_s14 + $0x8] sm:$0xff] }
 0x766   :  { %9455 = vmatpush.bf16.msrb.mxu3 %v15688_v20  ;;  %9468 = vmatpush.bf16.msrb.mxu0 %v15752_v33  ;;  %v15809_v20 = vld [vmem:[%s26445_s11 + $0x418] sm:$0xf0]  ;;  %v15748_v33 = vor.u32 %v17401_v51, %v15745_v42 }
 0x767   :  { %9494 = vmatpush.bf16.msra.mxu1 %v15692_v7  ;;  %v15812_v41 = vor.u32 %v17417_v25, %v15809_v20  ;;  %v17399_v7 = vld [vmem:[%s26445_s11 + $0x384] sm:$0xf]  ;;  %v9585_v51 = vld [vmem:[%s26448_s14 + $0xd8] sm:$0xff] }
 0x768   :  { %v15740_v24 = vor.u32 %v17399_v7, %v15737_v46  ;;  %v9558_v20 = vld [vmem:[%s26448_s14] sm:$0xff] }
 0x76a   :  { %9456 = vmatpush.bf16.msrb.mxu3 %v15680_v15  ;;  %9469 = vmatpush.bf16.msrb.mxu0 %v15744_v54 }
 0x76b   :  { %9495 = vmatpush.bf16.msra.mxu1 %v15684_v32 }
 0x76e   :  { %9457 = vmatpush.bf16.msrb.mxu3 %v15672_v49  ;;  %9470 = vmatpush.bf16.msrb.mxu0 %v15736_v34 }
 0x76f   :  { %9496 = vmatpush.bf16.msra.mxu1 %v15676_v63 }
 0x771   :  { %9458 = vmatmul.bf16.vlgmr.msrb.gmra.mxu3 %v9204_v30  ;;  %9471 = vmatmul.bf16.vlgmr.msrb.gmra.mxu0 %v9205_v2 }
 0x772   :  { %9502 = vmatpush.bf16.msra.mxu3 %v15796_v22  ;;  %9515 = vmatpush.bf16.msra.mxu0 %v15860_v55 }
 0x773   :  { %9497 = vmatmul.bf16.vlgmr.msra.gmra.mxu1 %v9204_v30 }
 0x774   :  { %9610 = vmatpush.msrb.mxu1 %v9589_v58 }
 0x776   :  { %9503 = vmatpush.bf16.msra.mxu3 %v15788_v44  ;;  %9516 = vmatpush.bf16.msra.mxu0 %v15852_v16 }
 0x77a   :  { %9504 = vmatpush.bf16.msra.mxu3 %v15780_v9  ;;  %9517 = vmatpush.bf16.msra.mxu0 %v15844_v12  ;;  %v9568_v12 = vld [vmem:[%s26448_s14 + $0x50] sm:$0xff] }
 0x77e   :  { %9505 = vmatpush.bf16.msra.mxu3 %v15772_v5  ;;  %9518 = vmatpush.bf16.msra.mxu0 %v15836_v26  ;;  %v9565_v5 = vld [vmem:[%s26448_s14 + $0x38] sm:$0xff]  ;;  %v9564_v26 = vld [vmem:[%s26448_s14 + $0x30] sm:$0xff] }
 0x782   :  { %9506 = vmatpush.bf16.msra.mxu3 %v15764_v27  ;;  %9519 = vmatpush.bf16.msra.mxu0 %v15828_v29  ;;  %v9588_v27 = vld [vmem:[%s26448_s14 + $0xf0] sm:$0xff] }
 0x783   :  { %9611 = vmatpush.msrb.mxu1 %v9588_v27 }
 0x785   :  { %9612 = vmatpush.msrb.mxu1 %v9587_v39 }
 0x786   :  { %9507 = vmatpush.bf16.msra.mxu3 %v15756_v31  ;;  %9520 = vmatpush.bf16.msra.mxu0 %v15820_v48 }
 0x787   :  { %9613 = vmatpush.msrb.mxu1 %v9586_v59 }
 0x789   :  { %9614 = vmatpush.msrb.mxu1 %v9585_v51 }
 0x78a   :  { %9508 = vmatpush.bf16.msra.mxu3 %v15748_v33  ;;  %9521 = vmatpush.bf16.msra.mxu0 %v15812_v41 }
 0x78e   :  { %9509 = vmatpush.bf16.msra.mxu3 %v15740_v24  ;;  %9522 = vmatpush.bf16.msra.mxu0 %v15804_v60 }
 0x791   :  { %9510 = vmatmul.bf16.vlgmr.msra.gmra.mxu3 %v9205_v2  ;;  %9523 = vmatmul.bf16.vlgmr.msra.gmra.mxu0 %v9206_v0  ;;  %v9572_v0 = vld [vmem:[%s26448_s14 + $0x70] sm:$0xff]  ;;  %v9569_v2 = vld [vmem:[%s26448_s14 + $0x58] sm:$0xff] }
 0x792   :  { %9591 = vmatpush.msrb.mxu2 %v9572_v0  ;;  %v9579_v0 = vld [vmem:[%s26448_s14 + $0xa8] sm:$0xff] }
 0x794   :  { %9592 = vmatpush.msrb.mxu2 %v9571_v21 }
 0x796   :  { %9593 = vmatpush.msrb.mxu2 %v9570_v17 }
 0x798   :  { %9594 = vmatpush.msrb.mxu2 %v9569_v2  ;;  %v9575_v2 = vld [vmem:[%s26448_s14 + $0x88] sm:$0xff] }
 0x79a   :  { %9595 = vmatpush.msrb.mxu2 %v9568_v12 }
 0x79c   :  { %9596 = vmatpush.msrb.mxu2 %v9567_v53 }
 0x79e   :  { %9597 = vmatpush.msrb.mxu2 %v9566_v6 }
 0x7a0   :  { %9598 = vmatpush.msrb.mxu2 %v9565_v5 }
 0x7a2   :  { %9599 = vmatpush.msrb.mxu2 %v9564_v26 }
 0x7a4   :  { %9600 = vmatpush.msrb.mxu2 %v9563_v57 }
 0x7a5   :  { %v25362_v15 = vpop.f32.mrf.mxu2 }
 0x7a6   :  { %9601 = vmatpush.msrb.mxu2 %v9562_v47 }
 0x7a8   :  { %9602 = vmatpush.msrb.mxu2 %v9561_v36 }
 0x7aa   :  { %9603 = vmatpush.msrb.mxu2 %v9560_v10 }
 0x7ac   :  { %9604 = vmatpush.msrb.mxu2 %v9559_v28 }
 0x7ad   :  { %v8775_v54 = vpop.f32.mrf.mxu0  ;;  %v8790_v4 = vpop.f32.mrf.mxu2 }
 0x7ae   :  { %v8801_v43 = vpop.f32.mrf.mxu1  ;;  %9605 = vmatpush.msrb.mxu2 %v9558_v20  ;;  %v9583_v4 = vld [vmem:[%s26448_s14 + $0xc8] sm:$0xff]  ;;  %v9675_v20 = vld [vmem:[%s26449_s15 + $0x70] sm:$0xff] }
 0x7af   :  { %9688 = vmatpush.msrb.mxu3 %v9675_v20 }
 0x7b3   :  { %v8762_v32 = vpop.f32.mrf.mxu3 }
 0x7b4   :  { %v8776_v29 = vadd.f32 %v8775_v54, %v8762_v32  ;;  %v9584_v54 = vld [vmem:[%s26448_s14 + $0xd0] sm:$0xff] }
 0x7b5   :  { %v8777_v52 = vpop.f32.mrf.mxu0  ;;  %9615 = vmatpush.msrb.mxu1 %v9584_v54  ;;  %v9667_v54 = vld [vmem:[%s26449_s15 + $0x30] sm:$0xff] }
 0x7b6   :  { %v8803_v38 = vpop.f32.mrf.mxu1  ;;  %v25364_v13 = vpop.f32.mrf.mxu2  ;;  %v8789_v42 = vadd.f32 %v25362_v15, %v8776_v29 }
 0x7b7   :  { %v9582_v38 = vld [vmem:[%s26448_s14 + $0xc0] sm:$0xff]  ;;  %9616 = vmatpush.msrb.mxu1 %v9583_v4  ;;  %v9668_v4 = vld [vmem:[%s26449_s15 + $0x38] sm:$0xff] }
 0x7b8   :  { %v9087_v33 = vadd.f32 %v25364_v13, %v8789_v42 }
 0x7b9   :  { %9617 = vmatpush.msrb.mxu1 %v9582_v38  ;;  %v9664_v38 = vld [vmem:[%s26449_s15 + $0x18] sm:$0xff] }
 0x7bb   :  { %v8764_v62 = vpop.f32.mrf.mxu3 }
 0x7be   :  { %v8827_v23 = vpop.f32.mrf.mxu0  ;;  %v9088_v14 = vpop.f32.mrf.mxu2 }
 0x7bf   :  { %v25366_v56 = vpop.f32.mrf.mxu1 }
 0x7c0   :  { %v9100_v7 = vadd.f32 %v25366_v56, %v9087_v33  ;;  %v9676_v33 = vld [vmem:[%s26449_s15 + $0x78] sm:$0xff] }
 0x7c1   :  { %9708 = vmatpush.msrb.mxu0 %v9676_v33 }
 0x7c3   :  { %v8814_v45 = vpop.f32.mrf.mxu3 }
 0x7c4   :  { %v8815_v49 = vadd.f32 %v8814_v45, %v8801_v43  ;;  %v9580_v45 = vld [vmem:[%s26448_s14 + $0xb0] sm:$0xff] }
 0x7c6   :  { %v8829_v34 = vpop.f32.mrf.mxu0  ;;  %v8828_v63 = vadd.f32 %v8827_v23, %v8815_v49  ;;  %v9138_v55 = vpop.f32.mrf.mxu2  ;;  %v9581_v23 = vld [vmem:[%s26448_s14 + $0xb8] sm:$0xff] }
 0x7c7   :  { %v9101_v22 = vpop.f32.mrf.mxu1  ;;  %9618 = vmatpush.msrb.mxu1 %v9581_v23  ;;  %v16113_v23 = vld [vmem:[%s26450_s16 + $0x1f0] sm:$0xf] }
 0x7c8   :  { %v9578_v22 = vld [vmem:[%s26448_s14 + $0xa0] sm:$0xff] }
 0x7c9   :  { %9619 = vmatpush.msrb.mxu1 %v9580_v45  ;;  %v15977_v45 = vld [vmem:[%s26450_s16 + $0xe0] sm:$0xf] }
 0x7cb   :  { %v8816_v11 = vpop.f32.mrf.mxu3  ;;  %9620 = vmatpush.msrb.mxu1 %v9579_v0  ;;  %v9661_v0 = vld [vmem:[%s26449_s15] sm:$0xff] }
 0x7cc   :  { %v9577_v11 = vld [vmem:[%s26448_s14 + $0x98] sm:$0xff] }
 0x7cd   :  { %9621 = vmatpush.msrb.mxu1 %v9578_v22 }
 0x7ce   :  { %v9125_v40 = vpop.f32.mrf.mxu0  ;;  %v9140_v30 = vpop.f32.mrf.mxu2 }
 0x7cf   :  { %v9126_v44 = vadd.f32 %v9125_v40, %v8828_v63  ;;  %v9576_v40 = vld [vmem:[%s26448_s14 + $0x90] sm:$0xff]  ;;  %9622 = vmatpush.msrb.mxu1 %v9577_v11 }
 0x7d1   :  { %v9151_v16 = vpop.f32.mrf.mxu1  ;;  %v9139_v8 = vadd.f32 %v9138_v55, %v9126_v44  ;;  %9623 = vmatpush.msrb.mxu1 %v9576_v40 }
 0x7d3   :  { %v25383_v19 = vadd.f32 %v9151_v16, %v9139_v8  ;;  %v9574_v16 = vld [vmem:[%s26448_s14 + $0x80] sm:$0xff]  ;;  %9624 = vmatpush.msrb.mxu1 %v9575_v2  ;;  %v15969_v2 = vld [vmem:[%s26450_s16 + $0xd0] sm:$0xf] }
 0x7d4   :  { %v9112_v35 = vpop.f32.mrf.mxu3 }
 0x7d5   :  { %v9113_v18 = vadd.f32 %v9112_v35, %v9100_v7  ;;  %9625 = vmatpush.msrb.mxu1 %v9574_v16  ;;  %v9673_v7 = vld [vmem:[%s26449_s15 + $0x60] sm:$0xff]  ;;  %v17478_v16 = vld [vmem:[%s26450_s16 + $0x174] sm:$0xf0] }
 0x7d6   :  { %v9127_v1 = vpop.f32.mrf.mxu0  ;;  %9689 = vmatpush.msrb.mxu3 %v9673_v7  ;;  %v16089_v7 = vld [vmem:[%s26450_s16 + $0x1c0] sm:$0xf] }
 0x7d9   :  { %v9153_v9 = vpop.f32.mrf.mxu1 }
 0x7dc   :  { %v9114_v37 = vpop.f32.mrf.mxu3 }
 0x7e6   :  { %v9485_v50 = vpop.f32.mrf.mxu2 }
 0x7ee   :  { %v9472_v31 = vpop.f32.mrf.mxu0  ;;  %v9487_v48 = vpop.f32.mrf.mxu2 }
 0x7f0   :  { %v9498_v25 = vpop.f32.mrf.mxu1 }
 0x7f4   :  { %v9459_v41 = vpop.f32.mrf.mxu3 }
 0x7f5   :  { %v9473_v46 = vadd.f32 %v9472_v31, %v9459_v41 }
 0x7f6   :  { %v9474_v3 = vpop.f32.mrf.mxu0 }
 0x7f7   :  { %v9486_v24 = vadd.f32 %v9485_v50, %v9473_v46  ;;  %v9674_v46 = vld [vmem:[%s26449_s15 + $0x68] sm:$0xff]  ;;  %v9671_v3 = vld [vmem:[%s26449_s15 + $0x50] sm:$0xff] }
 0x7f8   :  { %v9500_v60 = vpop.f32.mrf.mxu1  ;;  %9709 = vmatpush.msrb.mxu0 %v9674_v46  ;;  %9690 = vmatpush.msrb.mxu3 %v9671_v3  ;;  %v15953_v3 = vld [vmem:[%s26450_s16 + $0xb0] sm:$0xf] }
 0x7f9   :  { %v25436_v15 = vadd.f32 %v9486_v24, %v9113_v18  ;;  %v9672_v18 = vld [vmem:[%s26449_s15 + $0x58] sm:$0xff]  ;;  %v9669_v24 = vld [vmem:[%s26449_s15 + $0x40] sm:$0xff]  ;;  %v9670_v60 = vld [vmem:[%s26449_s15 + $0x48] sm:$0xff] }
 0x7fa   :  { %9710 = vmatpush.msrb.mxu0 %v9672_v18  ;;  %9691 = vmatpush.msrb.mxu3 %v9669_v24  ;;  %v17454_v18 = vld [vmem:[%s26450_s16 + $0xb4] sm:$0xf0] }
 0x7fb   :  { %v9530_v43 = vrot.slane %v25436_v15, 4  ;;  %v9542_v32 = vmul.f32 %v25436_v15, %v25436_v15 }
 0x7fc   :  { %v9461_v52 = vpop.f32.mrf.mxu3  ;;  %9711 = vmatpush.msrb.mxu0 %v9670_v60  ;;  %9692 = vmatpush.msrb.mxu3 %v9667_v54  ;;  %v16025_v54 = vld [vmem:[%s26450_s16 + $0x140] sm:$0xf] }
 0x7fd   :  { %v9531_v13 = vadd.f32 %v9530_v43, %v25436_v15  ;;  %v9544_v62 = vrot.slane %v9542_v32, 4  ;;  %v9665_v43 = vld [vmem:[%s26449_s15 + $0x20] sm:$0xff]  ;;  %v9663_v52 = vld [vmem:[%s26449_s15 + $0x10] sm:$0xff] }
 0x7fe   :  { %9712 = vmatpush.msrb.mxu0 %v9668_v4  ;;  %9693 = vmatpush.msrb.mxu3 %v9665_v43  ;;  %v17472_v4 = vld [vmem:[%s26450_s16 + $0x144] sm:$0xf0]  ;;  %v15889_v43 = vld [vmem:[%s26450_s16 + $0x30] sm:$0xf] }
 0x7ff   :  { %v9532_v14 = vrot.slane %v9531_v13, 2  ;;  %v9545_v56 = vadd.f32 %v9544_v62, %v9542_v32  ;;  %v9666_v32 = vld [vmem:[%s26449_s15 + $0x28] sm:$0xff]  ;;  %v17462_v62 = vld [vmem:[%s26450_s16 + $0xf4] sm:$0xf0] }
 0x800   :  { %9713 = vmatpush.msrb.mxu0 %v9666_v32  ;;  %9694 = vmatpush.msrb.mxu3 %v9663_v52  ;;  %v17438_v32 = vld [vmem:[%s26450_s16 + $0x34] sm:$0xf0] }
 0x801   :  { %v9533_v49 = vadd.f32 %v9532_v14, %v9531_v13  ;;  %v9546_v61 = vrot.slane %v9545_v56, 2  ;;  %v15985_v13 = vld [vmem:[%s26450_s16 + $0xf0] sm:$0xf] }
 0x802   :  { %v15986_v14 = vor.u32 %v17462_v62, %v15985_v13  ;;  %9714 = vmatpush.msrb.mxu0 %v9664_v38  ;;  %9695 = vmatpush.msrb.mxu3 %v9661_v0  ;;  %v15954_v38 = vor.u32 %v17454_v18, %v15953_v3  ;;  %v16081_v13 = vld [vmem:[%s26450_s16 + $0x1b0] sm:$0xf]  ;;  %v17486_v62 = vld [vmem:[%s26450_s16 + $0x1b4] sm:$0xf0]  ;;  %v9636_v0 = vld [vmem:[%s26446_s12] sm:$0x1] }
 0x803   :  { %v9534_v34 = vrot.slane %v9533_v49, 1  ;;  %v9547_v63 = vadd.f32 %v9546_v61, %v9545_v56  ;;  %v17494_v56 = vld [vmem:[%s26450_s16 + $0x1f4] sm:$0xf0] }
 0x804   :  { %10539 = vmatpush.bf16.msra.mxu1 %v15986_v14  ;;  %v16114_v40 = vor.u32 %v17494_v56, %v16113_v23  ;;  %v15945_v23 = vld [vmem:[%s26450_s16 + $0xa0] sm:$0xf]  ;;  %v17452_v14 = vld [vmem:[%s26450_s16 + $0xa4] sm:$0xf0]  ;;  %v16026_v56 = vor.u32 %v17472_v4, %v16025_v54  ;;  %v17558_v18 = vld [vmem:[%s26450_s16 + $0x3f4] sm:$0xf0] }
 0x805   :  { %v9548_v55 = vrot.slane %v9547_v63, 1  ;;  %v9535_v21 = vadd.f32 %v9534_v34, %v9533_v49  ;;  %v17460_v49 = vld [vmem:[%s26450_s16 + $0xe4] sm:$0xf0]  ;;  %v15921_v34 = vld [vmem:[%s26450_s16 + $0x70] sm:$0xf] }
 0x807   :  { %v9549_v17 = vadd.f32 %v9548_v55, %v9547_v63  ;;  %v17446_v63 = vld [vmem:[%s26450_s16 + $0x74] sm:$0xf0]  ;;  %v9662_v55 = vld [vmem:[%s26449_s15 + $0x8] sm:$0xff] }
 0x808   :  { %v15922_v11 = vor.u32 %v17446_v63, %v15921_v34  ;;  %9715 = vmatpush.msrb.mxu0 %v9662_v55  ;;  %v15881_v34 = vld [vmem:[%s26450_s16 + $0x20] sm:$0xf]  ;;  %v17436_v63 = vld [vmem:[%s26450_s16 + $0x24] sm:$0xf0]  ;;  %v15946_v55 = vor.u32 %v17452_v14, %v15945_v23 }
 0x809   :  { %v9556_v30 = vsel %vm4738_vm5, %v9535_v21, %v9549_v17  ;;  %v16105_v21 = vld [vmem:[%s26450_s16 + $0x1e0] sm:$0xf]  ;;  %v17492_v17 = vld [vmem:[%s26450_s16 + $0x1e4] sm:$0xf0] }
 0x80a   :  { %9606 = vmatmul.f32.vlgmr.msrb.gmra.mxu2 %v9556_v30  ;;  %v15978_v30 = vor.u32 %v17460_v49, %v15977_v45  ;;  %10565 = vmatpush.bf16.msra.mxu0 %v16114_v40  ;;  %v15890_v45 = vor.u32 %v17438_v32, %v15889_v43  ;;  %v16017_v49 = vld [vmem:[%s26450_s16 + $0x130] sm:$0xf]  ;;  %v15993_v43 = vld [vmem:[%s26450_s16 + $0x100] sm:$0xf]  ;;  %v17464_v32 = vld [vmem:[%s26450_s16 + $0x104] sm:$0xf0] }
 0x80b   :  { %10526 = vmatpush.bf16.msra.mxu2 %v15922_v11  ;;  %v16073_v11 = vld [vmem:[%s26450_s16 + $0x1a0] sm:$0xf]  ;;  %v15937_v40 = vld [vmem:[%s26450_s16 + $0x90] sm:$0xf]  ;;  %v17508_v23 = vld [vmem:[%s26450_s16 + $0x264] sm:$0xf0] }
 0x80c   :  { %10540 = vmatpush.bf16.msra.mxu1 %v15978_v30  ;;  %v17450_v30 = vld [vmem:[%s26450_s16 + $0x94] sm:$0xf0] }
 0x80e   :  { %v9524_v44 = vpop.f32.mrf.mxu0 }
 0x814   :  { %v9511_v8 = vpop.f32.mrf.mxu3 }
 0x815   :  { %v9512_v35 = vadd.f32 %v9511_v8, %v9498_v25 }
 0x816   :  { %v9526_v9 = vpop.f32.mrf.mxu0 }
 0x817   :  { %v9525_v1 = vadd.f32 %v9524_v44, %v9512_v35  ;;  %v16049_v44 = vld [vmem:[%s26450_s16 + $0x170] sm:$0xf]  ;;  %v17458_v35 = vld [vmem:[%s26450_s16 + $0xd4] sm:$0xf0]  ;;  %v15913_v9 = vld [vmem:[%s26450_s16 + $0x60] sm:$0xf] }
 0x819   :  { %v25477_v12 = vadd.f32 %v9525_v1, %v25383_v19  ;;  %v16050_v1 = vor.u32 %v17478_v16, %v16049_v44  ;;  %v15882_v16 = vor.u32 %v17436_v63, %v15881_v34  ;;  %v17522_v34 = vld [vmem:[%s26450_s16 + $0x2d4] sm:$0xf0] }
 0x81b   :  { %v9536_v53 = vrot.slane %v25477_v12, 4  ;;  %v9543_v37 = vmul.f32 %v25477_v12, %v25477_v12  ;;  %10552 = vmatpush.bf16.msra.mxu3 %v16050_v1  ;;  %v9654_v1 = vld [vmem:[%s26447_s13] sm:$0x1] }
 0x81c   :  { %v9513_v6 = vpop.f32.mrf.mxu3 }
 0x81d   :  { %v9537_v58 = vadd.f32 %v9536_v53, %v25477_v12  ;;  %v9550_v5 = vrot.slane %v9543_v37, 4  ;;  %v17444_v53 = vld [vmem:[%s26450_s16 + $0x64] sm:$0xf0] }
 0x81f   :  { %v9538_v26 = vrot.slane %v9537_v58, 2  ;;  %v9551_v57 = vadd.f32 %v9550_v5, %v9543_v37  ;;  %v15914_v37 = vor.u32 %v17444_v53, %v15913_v9  ;;  %v16041_v5 = vld [vmem:[%s26450_s16 + $0x160] sm:$0xf]  ;;  %v15873_v9 = vld [vmem:[%s26450_s16 + $0x10] sm:$0xf] }
 0x820   :  { %v17434_v53 = vld [vmem:[%s26450_s16 + $0x14] sm:$0xf0] }
 0x821   :  { %v9539_v50 = vadd.f32 %v9538_v26, %v9537_v58  ;;  %v9552_v47 = vrot.slane %v9551_v57, 2  ;;  %v16097_v58 = vld [vmem:[%s26450_s16 + $0x1d0] sm:$0xf]  ;;  %v17476_v26 = vld [vmem:[%s26450_s16 + $0x164] sm:$0xf0]  ;;  %10527 = vmatpush.bf16.msra.mxu2 %v15914_v37 }
 0x823   :  { %v9540_v36 = vrot.slane %v9539_v50, 1  ;;  %v9553_v27 = vadd.f32 %v9552_v47, %v9551_v57  ;;  %v16106_v57 = vor.u32 %v17492_v17, %v16105_v21  ;;  %v17490_v47 = vld [vmem:[%s26450_s16 + $0x1d4] sm:$0xf0]  ;;  %v17484_v21 = vld [vmem:[%s26450_s16 + $0x1a4] sm:$0xf0] }
 0x824   :  { %v16098_v20 = vor.u32 %v17490_v47, %v16097_v58  ;;  %v15938_v58 = vor.u32 %v17450_v30, %v15937_v40  ;;  %v16241_v47 = vld [vmem:[%s26450_s16 + $0x2f0] sm:$0xf] }
 0x825   :  { %v9554_v29 = vrot.slane %v9553_v27, 1  ;;  %v9541_v10 = vadd.f32 %v9540_v36, %v9539_v50  ;;  %v15970_v50 = vor.u32 %v17458_v35, %v15969_v2  ;;  %v15905_v36 = vld [vmem:[%s26450_s16 + $0x50] sm:$0xf]  ;;  %10566 = vmatpush.bf16.msra.mxu0 %v16106_v57  ;;  %v17468_v35 = vld [vmem:[%s26450_s16 + $0x124] sm:$0xf0] }
 0x826   :  { %v15929_v57 = vld [vmem:[%s26450_s16 + $0x80] sm:$0xf] }
 0x827   :  { %v9555_v39 = vadd.f32 %v9554_v29, %v9553_v27  ;;  %v17442_v27 = vld [vmem:[%s26450_s16 + $0x54] sm:$0xf0]  ;;  %10541 = vmatpush.bf16.msra.mxu1 %v15970_v50 }
 0x829   :  { %v9557_v19 = vsel %vm4738_vm5, %v9541_v10, %v9555_v39  ;;  %v15961_v10 = vld [vmem:[%s26450_s16 + $0xc0] sm:$0xf]  ;;  %v17456_v39 = vld [vmem:[%s26450_s16 + $0xc4] sm:$0xf0]  ;;  %10567 = vmatpush.bf16.msra.mxu0 %v16098_v20 }
 0x82a   :  { %9626 = vmatmul.f32.vlgmr.msrb.gmra.mxu1 %v9557_v19  ;;  %v16042_v19 = vor.u32 %v17476_v26, %v16041_v5  ;;  %v15962_v33 = vor.u32 %v17456_v39, %v15961_v10  ;;  %v16065_v5 = vld [vmem:[%s26450_s16 + $0x190] sm:$0xf]  ;;  %v17482_v26 = vld [vmem:[%s26450_s16 + $0x194] sm:$0xf0] }
 0x82b   :  { %v16001_v10 = vld [vmem:[%s26450_s16 + $0x110] sm:$0xf]  ;;  %v17466_v39 = vld [vmem:[%s26450_s16 + $0x114] sm:$0xf0] }
 0x82c   :  { %10553 = vmatpush.bf16.msra.mxu3 %v16042_v19  ;;  %10542 = vmatpush.bf16.msra.mxu1 %v15962_v33  ;;  %v15865_v19 = vld [vmem:[%s26450_s16] sm:$0xf] }
 0x82d   :  { %v16057_v33 = vld [vmem:[%s26450_s16 + $0x180] sm:$0xf] }
 0x830   :  { %10543 = vmatpush.bf16.msra.mxu1 %v15954_v38 }
 0x834   :  { %10544 = vmatpush.bf16.msra.mxu1 %v15946_v55  ;;  %v16297_v55 = vld [vmem:[%s26450_s16 + $0x360] sm:$0xf] }
 0x838   :  { %10545 = vmatpush.bf16.msra.mxu1 %v15938_v58  ;;  %v16345_v58 = vld [vmem:[%s26450_s16 + $0x3c0] sm:$0xf] }
 0x88d   :  { %v9607_v59 = vpop.f32.mrf.mxu2 }
 0x8a7   :  { %v9627_v28 = vpop.f32.mrf.mxu1 }
 0x8a8   :  { %v9628_v31 = vadd.f32 %v9627_v28, %v9607_v59  ;;  %v15906_v59 = vor.u32 %v17442_v27, %v15905_v36  ;;  %v16033_v28 = vld [vmem:[%s26450_s16 + $0x150] sm:$0xf]  ;;  %v17526_v27 = vld [vmem:[%s26450_s16 + $0x2f4] sm:$0xf0] }
 0x8a9   :  { %v16242_v20 = vor.u32 %v17526_v27, %v16241_v47  ;;  %v17504_v27 = vld [vmem:[%s26450_s16 + $0x244] sm:$0xf0] }
 0x8aa   :  { %v25484_v48 = vmul.f32 0.03125, %v9628_v31  ;;  %v17474_v31 = vld [vmem:[%s26450_s16 + $0x154] sm:$0xf0]  ;;  %10528 = vmatpush.bf16.msra.mxu2 %v15906_v59  ;;  %v17432_v59 = vld [vmem:[%s26450_s16 + $0x4] sm:$0xf0] }
 0x8ab   :  { %v16034_v24 = vor.u32 %v17474_v31, %v16033_v28  ;;  %v16066_v31 = vor.u32 %v17482_v26, %v16065_v5  ;;  %v15866_v54 = vor.u32 %v17432_v59, %v15865_v19  ;;  %v17552_v5 = vld [vmem:[%s26450_s16 + $0x3c4] sm:$0xf0]  ;;  %v16209_v26 = vld [vmem:[%s26450_s16 + $0x2b0] sm:$0xf]  ;;  %v16201_v59 = vld [vmem:[%s26450_s16 + $0x2a0] sm:$0xf] }
 0x8ac   :  { %v9631_v51 = vmul.f32 %v25484_v48, %v25484_v48 }
 0x8ad   :  { %10554 = vmatpush.bf16.msra.mxu3 %v16034_v24  ;;  %v16233_v24 = vld [vmem:[%s26450_s16 + $0x2e0] sm:$0xf] }
 0x8ae   :  { %v9633_v42 = vrot.slane %v9631_v51, 7 }
 0x8b0   :  { %v9635_v25 = vsub.f32 %v25484_v48, %v9633_v42  ;;  %v15897_v42 = vld [vmem:[%s26450_s16 + $0x40] sm:$0xf] }
 0x8b1   :  { %10555 = vmatpush.bf16.msra.mxu3 %v16026_v56 }
 0x8b2   :  { %v25495_v41 = vadd.f32 1e-05, %v9635_v25  ;;  %v17440_v25 = vld [vmem:[%s26450_s16 + $0x44] sm:$0xf0] }
 0x8b3   :  { %v15898_v60 = vor.u32 %v17440_v25, %v15897_v42  ;;  %v16177_v42 = vld [vmem:[%s26450_s16 + $0x270] sm:$0xf]  ;;  %v17510_v25 = vld [vmem:[%s26450_s16 + $0x274] sm:$0xf0] }
 0x8b4   :  { %17583 = vrsqrt.f32 %v25495_v41  ;;  %vm9644_vm0 = vweird.f32 %v25495_v41  ;;  %v16178_v4 = vor.u32 %v17510_v25, %v16177_v42  ;;  %v17536_v42 = vld [vmem:[%s26450_s16 + $0x344] sm:$0xf0]  ;;  %v16145_v25 = vld [vmem:[%s26450_s16 + $0x230] sm:$0xf] }
 0x8b5   :  { %10529 = vmatpush.bf16.msra.mxu2 %v15898_v60  ;;  %v17524_v60 = vld [vmem:[%s26450_s16 + $0x2e4] sm:$0xf0] }
 0x8b6   :  { %v16234_v56 = vor.u32 %v17524_v60, %v16233_v24  ;;  %v17514_v24 = vld [vmem:[%s26450_s16 + $0x294] sm:$0xf0]  ;;  %v16273_v60 = vld [vmem:[%s26450_s16 + $0x330] sm:$0xf] }
 0x8b9   :  { %10530 = vmatpush.bf16.msra.mxu2 %v15890_v45  ;;  %v16361_v45 = vld [vmem:[%s26450_s16 + $0x3e0] sm:$0xf] }
 0x8ba   :  { %v25552_v61 = vpop.eup %17583 }
 0x8bb   :  { %v9639_v22 = vmul.f32 %v25552_v61, %v25495_v41  ;;  %vm9645_vm15 = vweird.f32 %v25552_v61  ;;  %v17488_v41 = vld [vmem:[%s26450_s16 + $0x1c4] sm:$0xf0] }
 0x8bc   :  { %vm9646_vm1 = vmor %vm9644_vm0, %vm9645_vm15  ;;  %v16090_v52 = vor.u32 %v17488_v41, %v16089_v7  ;;  %v17480_v7 = vld [vmem:[%s26450_s16 + $0x184] sm:$0xf0]  ;;  %v16002_v41 = vor.u32 %v17466_v39, %v16001_v10  ;;  %v17550_v39 = vld [vmem:[%s26450_s16 + $0x3b4] sm:$0xf0] }
 0x8bd   :  { %v9640_v8 = vmul.f32 %v25552_v61, %v9639_v22  ;;  %v16082_v22 = vor.u32 %v17486_v62, %v16081_v13  ;;  %10531 = vmatpush.bf16.msra.mxu2 %v15882_v16  ;;  %v16058_v38 = vor.u32 %v17480_v7, %v16057_v33  ;;  %v17542_v13 = vld [vmem:[%s26450_s16 + $0x374] sm:$0xf0]  ;;  %v16169_v62 = vld [vmem:[%s26450_s16 + $0x260] sm:$0xf] }
 0x8be   :  { %10568 = vmatpush.bf16.msra.mxu0 %v16090_v52  ;;  %v16305_v52 = vld [vmem:[%s26450_s16 + $0x370] sm:$0xf]  ;;  %v16217_v16 = vld [vmem:[%s26450_s16 + $0x2c0] sm:$0xf] }
 0x8bf   :  { %v9641_v6 = vmul.f32 0.5, %v9640_v8  ;;  %v16009_v8 = vld [vmem:[%s26450_s16 + $0x120] sm:$0xf]  ;;  %v16306_v63 = vor.u32 %v17542_v13, %v16305_v52  ;;  %v17500_v52 = vld [vmem:[%s26450_s16 + $0x224] sm:$0xf0] }
 0x8c0   :  { %v16010_v50 = vor.u32 %v17468_v35, %v16009_v8  ;;  %v17520_v8 = vld [vmem:[%s26450_s16 + $0x2c4] sm:$0xf0] }
 0x8c1   :  { %v9642_v29 = vsub.f32 1.5, %v9641_v6  ;;  %v16074_v6 = vor.u32 %v17484_v21, %v16073_v11  ;;  %v17540_v11 = vld [vmem:[%s26450_s16 + $0x364] sm:$0xf0]  ;;  %v16161_v21 = vld [vmem:[%s26450_s16 + $0x250] sm:$0xf] }
 0x8c2   :  { %10569 = vmatpush.bf16.msra.mxu0 %v16082_v22  ;;  %v16170_v22 = vor.u32 %v17508_v23, %v16169_v62  ;;  %v16298_v35 = vor.u32 %v17540_v11, %v16297_v55  ;;  %v17546_v62 = vld [vmem:[%s26450_s16 + $0x394] sm:$0xf0]  ;;  %v16185_v23 = vld [vmem:[%s26450_s16 + $0x280] sm:$0xf]  ;;  %v17544_v11 = vld [vmem:[%s26450_s16 + $0x384] sm:$0xf0] }
 0x8c3   :  { %v9643_v51 = vmul.f32 %v25552_v61, %v9642_v29  ;;  %v15874_v29 = vor.u32 %v17434_v53, %v15873_v9  ;;  %v16289_v9 = vld [vmem:[%s26450_s16 + $0x350] sm:$0xf]  ;;  %v17538_v53 = vld [vmem:[%s26450_s16 + $0x354] sm:$0xf0]  ;;  %v16313_v55 = vld [vmem:[%s26450_s16 + $0x380] sm:$0xf] }
 0x8c5   :  { %v9647_v46 = vsel %vm9646_vm1, %v25552_v61, %v9643_v51  ;;  %v17470_v61 = vld [vmem:[%s26450_s16 + $0x134] sm:$0xf0]  ;;  %10532 = vmatpush.bf16.msra.mxu2 %v15874_v29  ;;  %v16337_v29 = vld [vmem:[%s26450_s16 + $0x3b0] sm:$0xf] }
 0x8c6   :  { %9649 = vst [vmem:[#allocation1] sm:$0xff] %v9647_v46  ;;  %v16018_v2 = vor.u32 %v17470_v61, %v16017_v49  ;;  %10570 = vmatpush.bf16.msra.mxu0 %v16074_v6  ;;  %v16369_v46 = vld [vmem:[%s26450_s16 + $0x3f0] sm:$0xf]  ;;  %v17556_v49 = vld [vmem:[%s26450_s16 + $0x3e4] sm:$0xf0]  ;;  %v15994_v61 = vor.u32 %v17464_v32, %v15993_v43  ;;  %v16218_v6 = vor.u32 %v17520_v8, %v16217_v16 }
 0x8c7   :  { %v16370_v14 = vor.u32 %v17558_v18, %v16369_v46  ;;  %v16362_v40 = vor.u32 %v17556_v49, %v16361_v45  ;;  %v16338_v19 = vor.u32 %v17550_v39, %v16337_v29  ;;  %v16329_v46 = vld [vmem:[%s26450_s16 + $0x3a0] sm:$0xf]  ;;  %v16193_v18 = vld [vmem:[%s26450_s16 + $0x290] sm:$0xf] }
 0x8c8   :  { %10556 = vmatpush.bf16.msra.mxu3 %v16018_v2  ;;  %v16353_v2 = vld [vmem:[%s26450_s16 + $0x3d0] sm:$0xf]  ;;  %v16137_v32 = vld [vmem:[%s26450_s16 + $0x220] sm:$0xf] }
 0x8c9   :  { %10533 = vmatpush.bf16.msra.mxu2 %v15866_v54  ;;  %v16194_v54 = vor.u32 %v17514_v24, %v16193_v18  ;;  %v16138_v13 = vor.u32 %v17500_v52, %v16137_v32  ;;  %v16265_v49 = vld [vmem:[%s26450_s16 + $0x320] sm:$0xf]  ;;  %v17489_v52 = vld [vmem:[%s26450_s16 + $0x1d4] sm:$0xf] }
 0x8ca   :  { %10571 = vmatpush.bf16.msra.mxu0 %v16066_v31  ;;  %v16281_v31 = vld [vmem:[%s26450_s16 + $0x340] sm:$0xf] }
 0x8cb   :  { %v16282_v33 = vor.u32 %v17536_v42, %v16281_v31  ;;  %v16249_v8 = vld [vmem:[%s26450_s16 + $0x300] sm:$0xf]  ;;  %v17445_v31 = vld [vmem:[%s26450_s16 + $0x74] sm:$0xf]  ;;  %v15923_v42 = vld [vmem:[%s26450_s16 + $0x78] sm:$0xf0] }
 0x8cc   :  { %10557 = vmatpush.bf16.msra.mxu3 %v16010_v50  ;;  %v16346_v50 = vor.u32 %v17552_v5, %v16345_v58  ;;  %v15926_v18 = vor.u32 %v17445_v31, %v15923_v42  ;;  %v17469_v42 = vld [vmem:[%s26450_s16 + $0x134] sm:$0xf] }
 0x8cd   :  { %v9651_v17 = vld [vmem:[#allocation1 + $0x1] ss:$9 sm:$0xff]  ;;  %10578 = vmatpush.bf16.msrb.mxu2 %v16178_v4  ;;  %v17534_v4 = vld [vmem:[%s26450_s16 + $0x334] sm:$0xf0] }
 0x8ce   :  { %v9653_v44 = vmul.f32 %v9651_v17, %v9636_v0  ;;  %v16225_v0 = vld [vmem:[%s26450_s16 + $0x2d0] sm:$0xf]  ;;  %10572 = vmatpush.bf16.msra.mxu0 %v16058_v38  ;;  %v17506_v17 = vld [vmem:[%s26450_s16 + $0x254] sm:$0xf0]  ;;  %v16274_v43 = vor.u32 %v17534_v4, %v16273_v60  ;;  %v15971_v60 = vld [vmem:[%s26450_s16 + $0xd8] sm:$0xf0] }
 0x8cf   :  { %v16226_v30 = vor.u32 %v17522_v34, %v16225_v0  ;;  %v16321_v38 = vld [vmem:[%s26450_s16 + $0x390] sm:$0xf]  ;;  %v15915_v4 = vld [vmem:[%s26450_s16 + $0x68] sm:$0xf0] }
 0x8d0   :  { %v9655_v37 = vmul.f32 %v9653_v44, %v25484_v48  ;;  %v17448_v48 = vld [vmem:[%s26450_s16 + $0x84] sm:$0xf0]  ;;  %10558 = vmatpush.bf16.msra.mxu3 %v16002_v41  ;;  %v16129_v34 = vld [vmem:[%s26450_s16 + $0x210] sm:$0xf] }
 0x8d1   :  { %v15930_v51 = vor.u32 %v17448_v48, %v15929_v57  ;;  %10579 = vmatpush.bf16.msrb.mxu2 %v16170_v22  ;;  %v17518_v57 = vld [vmem:[%s26450_s16 + $0x2b4] sm:$0xf0]  ;;  %v16290_v48 = vor.u32 %v17538_v53, %v16289_v9  ;;  %v17548_v41 = vld [vmem:[%s26450_s16 + $0x3a4] sm:$0xf0] }
 0x8d2   :  { %v9656_v36 = vsub.f32 %v9654_v1, %v9655_v37  ;;  %v16162_v1 = vor.u32 %v17506_v17, %v16161_v21  ;;  %v16210_v47 = vor.u32 %v17518_v57, %v16209_v26  ;;  %v16314_v21 = vor.u32 %v17544_v11, %v16313_v55  ;;  %v16257_v17 = vld [vmem:[%s26450_s16 + $0x310] sm:$0xf]  ;;  %v17461_v26 = vld [vmem:[%s26450_s16 + $0xf4] sm:$0xf]  ;;  %v15987_v57 = vld [vmem:[%s26450_s16 + $0xf8] sm:$0xf0] }
 0x8d3   :  { %10546 = vmatpush.bf16.msra.mxu1 %v15930_v51  ;;  %v16091_v55 = vld [vmem:[%s26450_s16 + $0x1c8] sm:$0xf0] }
 0x8d4   :  { %v9658_v28 = vperm.slane %v9656_v36, 0  ;;  %10559 = vmatpush.bf16.msra.mxu3 %v15994_v61  ;;  %v16153_v36 = vld [vmem:[%s26450_s16 + $0x240] sm:$0xf]  ;;  %v17532_v61 = vld [vmem:[%s26450_s16 + $0x324] sm:$0xf0] }
 0x8d5   :  { %10580 = vmatpush.bf16.msrb.mxu2 %v16162_v1  ;;  %v16154_v10 = vor.u32 %v17504_v27, %v16153_v36  ;;  %v16266_v0 = vor.u32 %v17532_v61, %v16265_v49  ;;  %v17455_v61 = vld [vmem:[%s26450_s16 + $0xc4] sm:$0xf] }
 0x8d6   :  { %v9660_v3 = vsel %vm4738_vm5, %v9653_v44, %v9658_v28  ;;  %v17554_v44 = vld [vmem:[%s26450_s16 + $0x3d4] sm:$0xf0]  ;;  %v17516_v28 = vld [vmem:[%s26450_s16 + $0x2a4] sm:$0xf0] }
 0x8d7   :  { %15861 = vmatmul.msk.f32.vlgmr.msrb.gmra.mxu3 %vm4523_vm3, %v9660_v3  ;;  %15862 = vmatmul.msk.f32.vlgmr.msrb.gmra.mxu0 %vm4523_vm3, %v9660_v3  ;;  %v16354_v37 = vor.u32 %v17554_v44, %v16353_v2  ;;  %v16202_v51 = vor.u32 %v17516_v28, %v16201_v59  ;;  %v16330_v3 = vor.u32 %v17548_v41, %v16329_v46  ;;  %v16121_v2 = vld [vmem:[%s26450_s16 + $0x200] sm:$0xf]  ;;  %v17496_v44 = vld [vmem:[%s26450_s16 + $0x204] sm:$0xf0]  ;;  %v17459_v59 = vld [vmem:[%s26450_s16 + $0xe4] sm:$0xf] }
 0x8d8   :  { %10591 = vmatpush.bf16.msrb.mxu1 %v16242_v20  ;;  %10617 = vmatpush.bf16.msrb.mxu0 %v16370_v14  ;;  %v17502_v20 = vld [vmem:[%s26450_s16 + $0x234] sm:$0xf0]  ;;  %v17512_v14 = vld [vmem:[%s26450_s16 + $0x284] sm:$0xf0]  ;;  %v16122_v16 = vor.u32 %v17496_v44, %v16121_v2  ;;  %v15979_v28 = vld [vmem:[%s26450_s16 + $0xe8] sm:$0xf0] }
 0x8d9   :  { %10604 = vmatpush.bf16.msrb.mxu3 %v16306_v63  ;;  %10581 = vmatpush.bf16.msrb.mxu2 %v16154_v10  ;;  %v16146_v7 = vor.u32 %v17502_v20, %v16145_v25  ;;  %v16186_v45 = vor.u32 %v17512_v14, %v16185_v23  ;;  %v17498_v63 = vld [vmem:[%s26450_s16 + $0x214] sm:$0xf0]  ;;  %v15990_v10 = vor.u32 %v17461_v26, %v15987_v57  ;;  %v17491_v25 = vld [vmem:[%s26450_s16 + $0x1e4] sm:$0xf]  ;;  %v16107_v20 = vld [vmem:[%s26450_s16 + $0x1e8] sm:$0xf0] }
 0x8da   :  { %v16130_v22 = vor.u32 %v17498_v63, %v16129_v34  ;;  %v15982_v46 = vor.u32 %v17459_v59, %v15979_v28  ;;  %v17477_v41 = vld [vmem:[%s26450_s16 + $0x174] sm:$0xf]  ;;  %v16110_v24 = vor.u32 %v17491_v25, %v16107_v20  ;;  %v17475_v14 = vld [vmem:[%s26450_s16 + $0x164] sm:$0xf]  ;;  %v15907_v63 = vld [vmem:[%s26450_s16 + $0x58] sm:$0xf0] }
 0x8db   :  { %v17441_v34 = vld [vmem:[%s26450_s16 + $0x54] sm:$0xf]  ;;  %v16035_v2 = vld [vmem:[%s26450_s16 + $0x158] sm:$0xf0]  ;;  %v17471_v26 = vld [vmem:[%s26450_s16 + $0x144] sm:$0xf] }
 0x8dc   :  { %10592 = vmatpush.bf16.msrb.mxu1 %v16234_v56  ;;  %10618 = vmatpush.bf16.msrb.mxu0 %v16362_v40  ;;  %v16322_v56 = vor.u32 %v17546_v62, %v16321_v38  ;;  %v17530_v40 = vld [vmem:[%s26450_s16 + $0x314] sm:$0xf0]  ;;  %v16099_v38 = vld [vmem:[%s26450_s16 + $0x1d8] sm:$0xf0]  ;;  %v16027_v57 = vld [vmem:[%s26450_s16 + $0x148] sm:$0xf0] }
 0x8dd   :  { %10605 = vmatpush.bf16.msrb.mxu3 %v16298_v35  ;;  %10582 = vmatpush.bf16.msrb.mxu2 %v16146_v7  ;;  %v17528_v35 = vld [vmem:[%s26450_s16 + $0x304] sm:$0xf0]  ;;  %v16102_v49 = vor.u32 %v17489_v52, %v16099_v38  ;;  %v16075_v59 = vld [vmem:[%s26450_s16 + $0x1a8] sm:$0xf0]  ;;  %v16030_v28 = vor.u32 %v17471_v26, %v16027_v57  ;;  %v16019_v25 = vld [vmem:[%s26450_s16 + $0x138] sm:$0xf0] }
 0x8de   :  { %v16250_v1 = vor.u32 %v17528_v35, %v16249_v8  ;;  %v17439_v35 = vld [vmem:[%s26450_s16 + $0x44] sm:$0xf]  ;;  %v16011_v38 = vld [vmem:[%s26450_s16 + $0x128] sm:$0xf0] }
 0x8df   :  { %v17467_v52 = vld [vmem:[%s26450_s16 + $0x124] sm:$0xf] }
 0x8e0   :  { %10593 = vmatpush.bf16.msrb.mxu1 %v16226_v30  ;;  %10619 = vmatpush.bf16.msrb.mxu0 %v16354_v37  ;;  %v16258_v30 = vor.u32 %v17530_v40, %v16257_v17  ;;  %v15955_v40 = vld [vmem:[%s26450_s16 + $0xb8] sm:$0xf0] }
 0x8e1   :  { %10606 = vmatpush.bf16.msrb.mxu3 %v16290_v48  ;;  %10583 = vmatpush.bf16.msrb.mxu2 %v16138_v13 }
 0x8e4   :  { %10594 = vmatpush.bf16.msrb.mxu1 %v16218_v6  ;;  %10620 = vmatpush.bf16.msrb.mxu0 %v16346_v50 }
 0x8e5   :  { %10607 = vmatpush.bf16.msrb.mxu3 %v16282_v33  ;;  %10584 = vmatpush.bf16.msrb.mxu2 %v16130_v22  ;;  %v17457_v33 = vld [vmem:[%s26450_s16 + $0xd4] sm:$0xf]  ;;  %v17487_v22 = vld [vmem:[%s26450_s16 + $0x1c4] sm:$0xf] }
 0x8e6   :  { %v15974_v23 = vor.u32 %v17457_v33, %v15971_v60  ;;  %v16094_v8 = vor.u32 %v17487_v22, %v16091_v55  ;;  %v16067_v60 = vld [vmem:[%s26450_s16 + $0x198] sm:$0xf0]  ;;  %v16059_v22 = vld [vmem:[%s26450_s16 + $0x188] sm:$0xf0] }
 0x8e8   :  { %10595 = vmatpush.bf16.msrb.mxu1 %v16210_v47  ;;  %10621 = vmatpush.bf16.msrb.mxu0 %v16338_v19  ;;  %v17493_v47 = vld [vmem:[%s26450_s16 + $0x1f4] sm:$0xf] }
 0x8e9   :  { %10608 = vmatpush.bf16.msrb.mxu3 %v16274_v43  ;;  %10585 = vmatpush.bf16.msrb.mxu2 %v16122_v16  ;;  %v15910_v16 = vor.u32 %v17441_v34, %v15907_v63  ;;  %v16014_v34 = vor.u32 %v17467_v52, %v16011_v38  ;;  %v17479_v63 = vld [vmem:[%s26450_s16 + $0x184] sm:$0xf] }
 0x8ec   :  { %10596 = vmatpush.bf16.msrb.mxu1 %v16202_v51  ;;  %10622 = vmatpush.bf16.msrb.mxu0 %v16330_v3  ;;  %v16051_v3 = vld [vmem:[%s26450_s16 + $0x178] sm:$0xf0] }
 0x8ed   :  { %10609 = vmatpush.bf16.msrb.mxu3 %v16266_v0  ;;  %v16054_v13 = vor.u32 %v17477_v41, %v16051_v3  ;;  %v15963_v0 = vld [vmem:[%s26450_s16 + $0xc8] sm:$0xf0]  ;;  %v17435_v41 = vld [vmem:[%s26450_s16 + $0x24] sm:$0xf] }
 0x8ee   :  { %v15966_v17 = vor.u32 %v17455_v61, %v15963_v0  ;;  %v17433_v61 = vld [vmem:[%s26450_s16 + $0x14] sm:$0xf]  ;;  %v15875_v0 = vld [vmem:[%s26450_s16 + $0x18] sm:$0xf0] }
 0x8f0   :  { %10597 = vmatpush.bf16.msrb.mxu1 %v16194_v54  ;;  %10623 = vmatpush.bf16.msrb.mxu0 %v16322_v56  ;;  %v17443_v54 = vld [vmem:[%s26450_s16 + $0x64] sm:$0xf]  ;;  %v16043_v56 = vld [vmem:[%s26450_s16 + $0x168] sm:$0xf0] }
 0x8f1   :  { %10610 = vmatpush.bf16.msrb.mxu3 %v16258_v30  ;;  %v16046_v11 = vor.u32 %v17475_v14, %v16043_v56  ;;  %v17473_v30 = vld [vmem:[%s26450_s16 + $0x154] sm:$0xf]  ;;  %v17447_v14 = vld [vmem:[%s26450_s16 + $0x84] sm:$0xf]  ;;  %v15931_v56 = vld [vmem:[%s26450_s16 + $0x88] sm:$0xf0] }
 0x8f2   :  { %v15934_v55 = vor.u32 %v17447_v14, %v15931_v56  ;;  %v17537_v14 = vld [vmem:[%s26450_s16 + $0x354] sm:$0xf]  ;;  %v16291_v56 = vld [vmem:[%s26450_s16 + $0x358] sm:$0xf0] }
 0x8f4   :  { %10598 = vmatpush.bf16.msrb.mxu1 %v16186_v45  ;;  %10624 = vmatpush.bf16.msrb.mxu0 %v16314_v21  ;;  %v15918_v45 = vor.u32 %v17443_v54, %v15915_v4  ;;  %v17453_v21 = vld [vmem:[%s26450_s16 + $0xb4] sm:$0xf]  ;;  %v16022_v54 = vor.u32 %v17469_v42, %v16019_v25  ;;  %v16355_v25 = vld [vmem:[%s26450_s16 + $0x3d8] sm:$0xf0] }
 0x8f5   :  { %10611 = vmatpush.bf16.msrb.mxu3 %v16250_v1  ;;  %v15899_v1 = vld [vmem:[%s26450_s16 + $0x48] sm:$0xf0]  ;;  %v17553_v42 = vld [vmem:[%s26450_s16 + $0x3d4] sm:$0xf] }
 0x954   :  { %v9717_v9 = vpop.f32.mrf.mxu0 }
 0x955   :  { %v9721_v53 = vperm.slane %v9717_v9, 0  ;;  %v9725_v6 = vperm.slane %v9717_v9, 1 }
 0x957   :  { %v9723_v37 = vmul.f32 %v9721_v53, %v25477_v12  ;;  %v16115_v12 = vld [vmem:[%s26450_s16 + $0x1f8] sm:$0xf0]  ;;  %v17485_v53 = vld [vmem:[%s26450_s16 + $0x1b4] sm:$0xf] }
 0x958   :  { %v16118_v19 = vor.u32 %v17493_v47, %v16115_v12  ;;  %v15947_v12 = vld [vmem:[%s26450_s16 + $0xa8] sm:$0xf0] }
 0x959   :  { %v9727_v58 = vadd.f32 %v9725_v6, %v9723_v37  ;;  %v16083_v37 = vld [vmem:[%s26450_s16 + $0x1b8] sm:$0xf0]  ;;  %v16038_v6 = vor.u32 %v17473_v30, %v16035_v2  ;;  %v17465_v30 = vld [vmem:[%s26450_s16 + $0x114] sm:$0xf] }
 0x95a   :  { %v9697_v5 = vpop.f32.mrf.mxu3  ;;  %v16086_v47 = vor.u32 %v17485_v53, %v16083_v37  ;;  %v16003_v2 = vld [vmem:[%s26450_s16 + $0x118] sm:$0xf0]  ;;  %v17509_v53 = vld [vmem:[%s26450_s16 + $0x274] sm:$0xf] }
 0x95b   :  { %v25950_v48 = vmax.f32 %v9727_v58, 0.0  ;;  %v9720_v50 = vperm.slane %v9697_v5, 0  ;;  %v9724_v29 = vperm.slane %v9697_v5, 1  ;;  %v15958_v58 = vor.u32 %v17453_v21, %v15955_v40  ;;  %v17451_v5 = vld [vmem:[%s26450_s16 + $0xa4] sm:$0xf] }
 0x95c   :  { %v16371_v21 = vld [vmem:[%s26450_s16 + $0x3f8] sm:$0xf0]  ;;  %v15878_v40 = vor.u32 %v17433_v61, %v15875_v0  ;;  %v16155_v61 = vld [vmem:[%s26450_s16 + $0x248] sm:$0xf0]  ;;  %v17549_v0 = vld [vmem:[%s26450_s16 + $0x3b4] sm:$0xf] }
 0x95d   :  { %v9733_v36 = vrot.slane %v25950_v48, 2  ;;  %v9722_v27 = vmul.f32 %v9720_v50, %v25436_v15  ;;  %v25962_v39 = vpack.c.bf16 %v25950_v48, %v25950_v48  ;;  %v9737_v44 = vrot.slane %v25950_v48, 4  ;;  %v16179_v37 = vld [vmem:[%s26450_s16 + $0x278] sm:$0xf0] }
 0x95e   :  { %v9741_v9 = vrot.slane %v25950_v48, 6  ;;  %v15902_v50 = vor.u32 %v17439_v35, %v15899_v1  ;;  %v17431_v35 = vld [vmem:[%s26450_s16 + $0x4] sm:$0xf]  ;;  %v15867_v1 = vld [vmem:[%s26450_s16 + $0x8] sm:$0xf0] }
 0x95f   :  { %v9726_v15 = vadd.f32 %v9724_v29, %v9722_v27  ;;  %v25973_v51 = vpack.c.bf16 %v9733_v36, %v9733_v36  ;;  %10547 = vmatmul.bf16.vlgmr.msra.gmra.mxu1 %v25962_v39  ;;  %v26080_v48 = vpack.c.bf16 %v9737_v44, %v9737_v44  ;;  %v17437_v36 = vld [vmem:[%s26450_s16 + $0x34] sm:$0xf]  ;;  %v15891_v27 = vld [vmem:[%s26450_s16 + $0x38] sm:$0xf0]  ;;  %v17523_v44 = vld [vmem:[%s26450_s16 + $0x2e4] sm:$0xf]  ;;  %v15870_v57 = vor.u32 %v17431_v35, %v15867_v1 }
 0x960   :  { %10643 = vmatpush.bf16.msra.mxu1 %v15990_v10  ;;  %v26092_v10 = vpack.c.bf16 %v9741_v9, %v9741_v9  ;;  %v15894_v20 = vor.u32 %v17437_v36, %v15891_v27  ;;  %v16182_v36 = vor.u32 %v17509_v53, %v16179_v37  ;;  %v16227_v27 = vld [vmem:[%s26450_s16 + $0x2d8] sm:$0xf0]  ;;  %v17513_v1 = vld [vmem:[%s26450_s16 + $0x294] sm:$0xf] }
 0x961   :  { %v25988_v7 = vmax.f32 %v9726_v15, 0.0  ;;  %10573 = vmatmul.bf16.vlgmr.msra.gmra.mxu0 %v25973_v51  ;;  %v15950_v15 = vor.u32 %v17451_v5, %v15947_v12  ;;  %v16363_v5 = vld [vmem:[%s26450_s16 + $0x3e8] sm:$0xf0]  ;;  %v17521_v12 = vld [vmem:[%s26450_s16 + $0x2d4] sm:$0xf] }
 0x962   :  { %10669 = vmatpush.bf16.msra.mxu0 %v16118_v19  ;;  %v17483_v19 = vld [vmem:[%s26450_s16 + $0x1a4] sm:$0xf]  ;;  %v16195_v53 = vld [vmem:[%s26450_s16 + $0x298] sm:$0xf0]  ;;  %v17533_v37 = vld [vmem:[%s26450_s16 + $0x334] sm:$0xf] }
 0x963   :  { %v9732_v43 = vrot.slane %v25988_v7, 2  ;;  %v26009_v32 = vpack.c.bf16 %v25988_v7, %v25988_v7  ;;  %v9736_v29 = vrot.slane %v25988_v7, 4  ;;  %v9740_v31 = vrot.slane %v25988_v7, 6  ;;  %v17449_v7 = vld [vmem:[%s26450_s16 + $0x94] sm:$0xf] }
 0x964   :  { %10644 = vmatpush.bf16.msra.mxu1 %v15982_v46  ;;  %v16078_v33 = vor.u32 %v17483_v19, %v16075_v59  ;;  %v15939_v46 = vld [vmem:[%s26450_s16 + $0x98] sm:$0xf0] }
 0x965   :  { %10534 = vmatmul.bf16.vlgmr.msra.gmra.mxu2 %v26009_v32  ;;  %v26018_v62 = vpack.c.bf16 %v9732_v43, %v9732_v43  ;;  %v26118_v3 = vpack.c.bf16 %v9736_v29, %v9736_v29  ;;  %v26130_v4 = vpack.c.bf16 %v9740_v31, %v9740_v31  ;;  %v15942_v43 = vor.u32 %v17449_v7, %v15939_v46  ;;  %v17541_v29 = vld [vmem:[%s26450_s16 + $0x374] sm:$0xf]  ;;  %v16307_v19 = vld [vmem:[%s26450_s16 + $0x378] sm:$0xf0]  ;;  %v16171_v31 = vld [vmem:[%s26450_s16 + $0x268] sm:$0xf0] }
 0x966   :  { %10630 = vmatpush.bf16.msra.mxu2 %v15926_v18  ;;  %10670 = vmatpush.bf16.msra.mxu0 %v16110_v24  ;;  %v15883_v18 = vld [vmem:[%s26450_s16 + $0x28] sm:$0xf0]  ;;  %v17481_v24 = vld [vmem:[%s26450_s16 + $0x194] sm:$0xf] }
 0x967   :  { %10560 = vmatmul.bf16.vlgmr.msra.gmra.mxu3 %v26018_v62  ;;  %v16219_v46 = vld [vmem:[%s26450_s16 + $0x2c8] sm:$0xf0] }
 0x968   :  { %10656 = vmatpush.bf16.msra.mxu3 %v16054_v13  ;;  %10645 = vmatpush.bf16.msra.mxu1 %v15974_v23  ;;  %v15886_v13 = vor.u32 %v17435_v41, %v15883_v18  ;;  %v16070_v23 = vor.u32 %v17481_v24, %v16067_v60  ;;  %v17539_v41 = vld [vmem:[%s26450_s16 + $0x364] sm:$0xf]  ;;  %v16299_v18 = vld [vmem:[%s26450_s16 + $0x368] sm:$0xf0]  ;;  %v16358_v24 = vor.u32 %v17553_v42, %v16355_v25  ;;  %v16163_v60 = vld [vmem:[%s26450_s16 + $0x258] sm:$0xf0] }
 0x969   :  { %v16302_v38 = vor.u32 %v17539_v41, %v16299_v18  ;;  %v17543_v42 = vld [vmem:[%s26450_s16 + $0x384] sm:$0xf]  ;;  %v16315_v25 = vld [vmem:[%s26450_s16 + $0x388] sm:$0xf0] }
 0x96a   :  { %10631 = vmatpush.bf16.msra.mxu2 %v15918_v45  ;;  %10671 = vmatpush.bf16.msra.mxu0 %v16102_v49  ;;  %v17525_v45 = vld [vmem:[%s26450_s16 + $0x2f4] sm:$0xf]  ;;  %v16243_v49 = vld [vmem:[%s26450_s16 + $0x2f8] sm:$0xf0]  ;;  %v16318_v41 = vor.u32 %v17543_v42, %v16315_v25  ;;  %v17495_v18 = vld [vmem:[%s26450_s16 + $0x204] sm:$0xf] }
 0x96b   :  { %v17568_v25 = vld [vmem:[%s26452_s18 + $0x48] sm:$0xff] }
 0x96c   :  { %10657 = vmatpush.bf16.msra.mxu3 %v16046_v11  ;;  %10646 = vmatpush.bf16.msra.mxu1 %v15966_v17  ;;  %v17557_v11 = vld [vmem:[%s26450_s16 + $0x3f4] sm:$0xf]  ;;  %v16246_v17 = vor.u32 %v17525_v45, %v16243_v49  ;;  %v17503_v49 = vld [vmem:[%s26450_s16 + $0x244] sm:$0xf] }
 0x96d   :  { %v16374_v9 = vor.u32 %v17557_v11, %v16371_v21  ;;  %v16203_v11 = vld [vmem:[%s26450_s16 + $0x2a8] sm:$0xf0]  ;;  %v17535_v21 = vld [vmem:[%s26450_s16 + $0x344] sm:$0xf] }
 0x96e   :  { %10632 = vmatpush.bf16.msra.mxu2 %v15910_v16  ;;  %10672 = vmatpush.bf16.msra.mxu0 %v16094_v8  ;;  %v16062_v16 = vor.u32 %v17479_v63, %v16059_v22  ;;  %v16235_v8 = vld [vmem:[%s26450_s16 + $0x2e8] sm:$0xf0]  ;;  %v16294_v63 = vor.u32 %v17537_v14, %v16291_v56  ;;  %v17515_v22 = vld [vmem:[%s26450_s16 + $0x2a4] sm:$0xf]  ;;  %v9880_v14 = vld [vmem:[%s26451_s17] sm:$0x3] }
 0x96f   :  { %10599 = vmatmul.bf16.vlgmr.msrb.gmra.mxu1 %v26080_v48  ;;  %v16238_v26 = vor.u32 %v17523_v44, %v16235_v8  ;;  %v17547_v44 = vld [vmem:[%s26450_s16 + $0x3a4] sm:$0xf]  ;;  %v16206_v8 = vor.u32 %v17515_v22, %v16203_v11  ;;  %v17560_v56 = vld [vmem:[%s26452_s18 + $0x8] sm:$0xff] }
 0x970   :  { %10658 = vmatpush.bf16.msra.mxu3 %v16038_v6  ;;  %10647 = vmatpush.bf16.msra.mxu1 %v15958_v58  ;;  %v16006_v6 = vor.u32 %v17465_v30, %v16003_v2  ;;  %v17555_v58 = vld [vmem:[%s26450_s16 + $0x3e4] sm:$0xf]  ;;  %v17501_v30 = vld [vmem:[%s26450_s16 + $0x234] sm:$0xf]  ;;  %v16147_v2 = vld [vmem:[%s26450_s16 + $0x238] sm:$0xf0] }
 0x971   :  { %10625 = vmatmul.bf16.vlgmr.msrb.gmra.mxu0 %v26092_v10  ;;  %v16366_v59 = vor.u32 %v17555_v58, %v16363_v5  ;;  %v17499_v5 = vld [vmem:[%s26450_s16 + $0x224] sm:$0xf] }
 0x972   :  { %10633 = vmatpush.bf16.msra.mxu2 %v15902_v50  ;;  %10673 = vmatpush.bf16.msra.mxu0 %v16086_v47  ;;  %v17463_v50 = vld [vmem:[%s26450_s16 + $0x104] sm:$0xf]  ;;  %v15995_v47 = vld [vmem:[%s26450_s16 + $0x108] sm:$0xf0] }
 0x974   :  { %10659 = vmatpush.bf16.msra.mxu3 %v16030_v28  ;;  %10648 = vmatpush.bf16.msra.mxu1 %v15950_v15  ;;  %v17507_v28 = vld [vmem:[%s26450_s16 + $0x264] sm:$0xf]  ;;  %v15998_v15 = vor.u32 %v17463_v50, %v15995_v47  ;;  %v16323_v50 = vld [vmem:[%s26450_s16 + $0x398] sm:$0xf0]  ;;  %v16198_v47 = vor.u32 %v17513_v1, %v16195_v53 }
 0x975   :  { %10586 = vmatmul.bf16.vlgmr.msrb.gmra.mxu2 %v26118_v3  ;;  %v16174_v7 = vor.u32 %v17507_v28, %v16171_v31  ;;  %v17497_v31 = vld [vmem:[%s26450_s16 + $0x214] sm:$0xf] }
 0x976   :  { %10634 = vmatpush.bf16.msra.mxu2 %v15894_v20  ;;  %10674 = vmatpush.bf16.msra.mxu0 %v16078_v33  ;;  %v16310_v20 = vor.u32 %v17541_v29, %v16307_v19  ;;  %v17519_v33 = vld [vmem:[%s26450_s16 + $0x2c4] sm:$0xf]  ;;  %v16187_v29 = vld [vmem:[%s26450_s16 + $0x288] sm:$0xf0] }
 0x977   :  { %10612 = vmatmul.bf16.vlgmr.msrb.gmra.mxu3 %v26130_v4  ;;  %v16222_v52 = vor.u32 %v17519_v33, %v16219_v46  ;;  %v17531_v19 = vld [vmem:[%s26450_s16 + $0x324] sm:$0xf]  ;;  %v16259_v46 = vld [vmem:[%s26450_s16 + $0x318] sm:$0xf0] }
 0x978   :  { %10660 = vmatpush.bf16.msra.mxu3 %v16022_v54  ;;  %10649 = vmatpush.bf16.msra.mxu1 %v15942_v43  ;;  %v17551_v54 = vld [vmem:[%s26450_s16 + $0x3c4] sm:$0xf]  ;;  %v16347_v43 = vld [vmem:[%s26450_s16 + $0x3c8] sm:$0xf0] }
 0x979   :  { %v16350_v45 = vor.u32 %v17551_v54, %v16347_v43  ;;  %v17527_v54 = vld [vmem:[%s26450_s16 + $0x304] sm:$0xf]  ;;  %v16251_v43 = vld [vmem:[%s26450_s16 + $0x308] sm:$0xf0] }
 0x97a   :  { %10635 = vmatpush.bf16.msra.mxu2 %v15886_v13  ;;  %10675 = vmatpush.bf16.msra.mxu0 %v16070_v23  ;;  %v17517_v13 = vld [vmem:[%s26450_s16 + $0x2b4] sm:$0xf] }
 0x97c   :  { %10661 = vmatpush.bf16.msra.mxu3 %v16014_v34  ;;  %10650 = vmatpush.bf16.msra.mxu1 %v15934_v55  ;;  %v16339_v34 = vld [vmem:[%s26450_s16 + $0x3b8] sm:$0xf0]  ;;  %v16158_v55 = vor.u32 %v17503_v49, %v16155_v61  ;;  %v9882_v61 = vperm.slane %v9880_v14, 0 }
 0x97e   :  { %10636 = vmatpush.bf16.msra.mxu2 %v15878_v40  ;;  %10676 = vmatpush.bf16.msra.mxu0 %v16062_v16  ;;  %v16342_v40 = vor.u32 %v17549_v0, %v16339_v34  ;;  %v16331_v16 = vld [vmem:[%s26450_s16 + $0x3a8] sm:$0xf0]  ;;  %v17559_v34 = vld [vmem:[%s26452_s18] sm:$0xff] }
 0x97f   :  { %10651 = vmatmul.bf16.vlgmr.msra.gmra.mxu1 %v25962_v39  ;;  %v16230_v39 = vor.u32 %v17521_v12, %v16227_v27  ;;  %v16334_v58 = vor.u32 %v17547_v44, %v16331_v16  ;;  %v17573_v44 = vld [vmem:[%s26452_s18 + $0x70] sm:$0xff] }
 0x980   :  { %10695 = vmatpush.bf16.msrb.mxu1 %v16246_v17  ;;  %10662 = vmatpush.bf16.msra.mxu3 %v16006_v6  ;;  %v16283_v17 = vld [vmem:[%s26450_s16 + $0x348] sm:$0xf0]  ;;  %v16275_v6 = vld [vmem:[%s26450_s16 + $0x338] sm:$0xf0] }
 0x981   :  { %10677 = vmatmul.bf16.vlgmr.msra.gmra.mxu0 %v25973_v51  ;;  %v17505_v51 = vld [vmem:[%s26450_s16 + $0x254] sm:$0xf]  ;;  %v16286_v35 = vor.u32 %v17535_v21, %v16283_v17  ;;  %v16278_v12 = vor.u32 %v17533_v37, %v16275_v6  ;;  %v17572_v37 = vld [vmem:[%s26452_s18 + $0x68] sm:$0xff] }
 0x982   :  { %10721 = vmatpush.bf16.msrb.mxu0 %v16374_v9  ;;  %10637 = vmatpush.bf16.msra.mxu2 %v15870_v57  ;;  %v16166_v23 = vor.u32 %v17505_v51, %v16163_v60  ;;  %v16150_v9 = vor.u32 %v17501_v30, %v16147_v2  ;;  %v17545_v57 = vld [vmem:[%s26450_s16 + $0x394] sm:$0xf]  ;;  %v17574_v30 = vld [vmem:[%s26452_s18 + $0x78] sm:$0xff] }
 0x983   :  { %v16326_v28 = vor.u32 %v17545_v57, %v16323_v50 }
 0x984   :  { %10696 = vmatpush.bf16.msrb.mxu1 %v16238_v26  ;;  %10663 = vmatpush.bf16.msra.mxu3 %v15998_v15  ;;  %v16139_v26 = vld [vmem:[%s26450_s16 + $0x228] sm:$0xf0]  ;;  %v16131_v15 = vld [vmem:[%s26450_s16 + $0x218] sm:$0xf0] }
 0x985   :  { %10638 = vmatmul.bf16.vlgmr.msra.gmra.mxu2 %v26009_v32  ;;  %v16211_v32 = vld [vmem:[%s26450_s16 + $0x2b8] sm:$0xf0]  ;;  %v16142_v27 = vor.u32 %v17499_v5, %v16139_v26  ;;  %v16134_v33 = vor.u32 %v17497_v31, %v16131_v15  ;;  %v17571_v5 = vld [vmem:[%s26452_s18 + $0x60] sm:$0xff]  ;;  %v17569_v15 = vld [vmem:[%s26452_s18 + $0x50] sm:$0xff] }
 0x986   :  { %10682 = vmatpush.bf16.msrb.mxu2 %v16182_v36  ;;  %10722 = vmatpush.bf16.msrb.mxu0 %v16366_v59  ;;  %v17511_v36 = vld [vmem:[%s26450_s16 + $0x284] sm:$0xf]  ;;  %v16267_v59 = vld [vmem:[%s26450_s16 + $0x328] sm:$0xf0] }
 0x987   :  { %10664 = vmatmul.bf16.vlgmr.msra.gmra.mxu3 %v26018_v62  ;;  %v16214_v62 = vor.u32 %v17517_v13, %v16211_v32  ;;  %v17565_v13 = vld [vmem:[%s26452_s18 + $0x30] sm:$0xff] }
 0x988   :  { %10697 = vmatpush.bf16.msrb.mxu1 %v16230_v39  ;;  %10708 = vmatpush.bf16.msrb.mxu3 %v16310_v20  ;;  %v16190_v39 = vor.u32 %v17511_v36, %v16187_v29  ;;  %v16270_v20 = vor.u32 %v17531_v19, %v16267_v59  ;;  %v17561_v32 = vld [vmem:[%s26452_s18 + $0x10] sm:$0xff]  ;;  %v17570_v29 = vld [vmem:[%s26452_s18 + $0x58] sm:$0xff] }
 0x98a   :  { %10683 = vmatpush.bf16.msrb.mxu2 %v16174_v7  ;;  %10723 = vmatpush.bf16.msrb.mxu0 %v16358_v24  ;;  %v17529_v7 = vld [vmem:[%s26450_s16 + $0x314] sm:$0xf]  ;;  %v16123_v24 = vld [vmem:[%s26450_s16 + $0x208] sm:$0xf0] }
 0x98b   :  { %v16262_v51 = vor.u32 %v17529_v7, %v16259_v46  ;;  %v16126_v60 = vor.u32 %v17495_v18, %v16123_v24 }
 0x98c   :  { %10698 = vmatpush.bf16.msrb.mxu1 %v16222_v52  ;;  %10709 = vmatpush.bf16.msrb.mxu3 %v16302_v38  ;;  %v16254_v52 = vor.u32 %v17527_v54, %v16251_v43  ;;  %v17566_v38 = vld [vmem:[%s26452_s18 + $0x38] sm:$0xff] }
 0x98e   :  { %10684 = vmatpush.bf16.msrb.mxu2 %v16166_v23  ;;  %10724 = vmatpush.bf16.msrb.mxu0 %v16350_v45 }
 0x990   :  { %10699 = vmatpush.bf16.msrb.mxu1 %v16214_v62  ;;  %10710 = vmatpush.bf16.msrb.mxu3 %v16294_v63 }
 0x992   :  { %10685 = vmatpush.bf16.msrb.mxu2 %v16158_v55  ;;  %10725 = vmatpush.bf16.msrb.mxu0 %v16342_v40 }
 0x994   :  { %10700 = vmatpush.bf16.msrb.mxu1 %v16206_v8  ;;  %10711 = vmatpush.bf16.msrb.mxu3 %v16286_v35 }
 0x996   :  { %10686 = vmatpush.bf16.msrb.mxu2 %v16150_v9  ;;  %10726 = vmatpush.bf16.msrb.mxu0 %v16334_v58 }
 0x998   :  { %10701 = vmatpush.bf16.msrb.mxu1 %v16198_v47  ;;  %10712 = vmatpush.bf16.msrb.mxu3 %v16278_v12 }
 0x99a   :  { %10687 = vmatpush.bf16.msrb.mxu2 %v16142_v27  ;;  %10727 = vmatpush.bf16.msrb.mxu0 %v16326_v28 }
 0x99c   :  { %10702 = vmatpush.bf16.msrb.mxu1 %v16190_v39  ;;  %10713 = vmatpush.bf16.msrb.mxu3 %v16270_v20  ;;  %v9883_v20 = vperm.slane %v9880_v14, 1 }
 0x99e   :  { %10688 = vmatpush.bf16.msrb.mxu2 %v16134_v33  ;;  %10728 = vmatpush.bf16.msrb.mxu0 %v16318_v41  ;;  %v17567_v33 = vld [vmem:[%s26452_s18 + $0x40] sm:$0xff] }
 0x99f   :  { %10703 = vmatmul.bf16.vlgmr.msrb.gmra.mxu1 %v26080_v48  ;;  %v17564_v48 = vld [vmem:[%s26452_s18 + $0x28] sm:$0xff] }
 0x9a0   :  { %10714 = vmatpush.bf16.msrb.mxu3 %v16262_v51  ;;  %10887 = vmatpush.bf16.msra.mxu1 %v17574_v30 }
 0x9a1   :  { %10729 = vmatmul.bf16.vlgmr.msrb.gmra.mxu0 %v26092_v10  ;;  %v17563_v10 = vld [vmem:[%s26452_s18 + $0x20] sm:$0xff] }
 0x9a2   :  { %10689 = vmatpush.bf16.msrb.mxu2 %v16126_v60 }
 0x9a4   :  { %10715 = vmatpush.bf16.msrb.mxu3 %v16254_v52  ;;  %10888 = vmatpush.bf16.msra.mxu1 %v17573_v44 }
 0x9a5   :  { %10690 = vmatmul.bf16.vlgmr.msrb.gmra.mxu2 %v26118_v3  ;;  %v17562_v3 = vld [vmem:[%s26452_s18 + $0x18] sm:$0xff] }
 0x9a6   :  { %10874 = vmatpush.bf16.msra.mxu2 %v17566_v38 }
 0x9a7   :  { %10716 = vmatmul.bf16.vlgmr.msrb.gmra.mxu3 %v26130_v4 }
 0x9a8   :  { %10889 = vmatpush.bf16.msra.mxu1 %v17572_v37 }
 0x9aa   :  { %10875 = vmatpush.bf16.msra.mxu2 %v17565_v13 }
 0x9ac   :  { %10890 = vmatpush.bf16.msra.mxu1 %v17571_v5 }
 0x9ae   :  { %10876 = vmatpush.bf16.msra.mxu2 %v17564_v48 }
 0x9b0   :  { %10891 = vmatpush.bf16.msra.mxu1 %v17570_v29 }
 0x9b2   :  { %10877 = vmatpush.bf16.msra.mxu2 %v17563_v10 }
 0x9b4   :  { %10892 = vmatpush.bf16.msra.mxu1 %v17569_v15 }
 0x9b6   :  { %10878 = vmatpush.bf16.msra.mxu2 %v17562_v3 }
 0x9b8   :  { %10893 = vmatpush.bf16.msra.mxu1 %v17568_v25 }
 0x9ba   :  { %10879 = vmatpush.bf16.msra.mxu2 %v17561_v32 }
 0x9bc   :  { %10894 = vmatpush.bf16.msra.mxu1 %v17567_v33 }
 0x9be   :  { %10880 = vmatpush.bf16.msra.mxu2 %v17560_v56 }
 0x9c2   :  { %10881 = vmatpush.bf16.msra.mxu2 %v17559_v34 }
 0x9dc   :  { %v10548_v4 = vpop.f32.mrf.mxu1 }
 0x9de   :  { %v10574_v23 = vpop.f32.mrf.mxu0 }
 0x9e4   :  { %v10550_v45 = vpop.f32.mrf.mxu1 }
 0x9e6   :  { %v10576_v49 = vpop.f32.mrf.mxu0 }
 0x9e7   :  { %v17611_v49 = vmov 6  }
 0x9e8   :  { %v10535_v0 = vpop.f32.mrf.mxu2  ;;  %17577 = vset.pattern.permute.xlu0 %v17611_v49 }
 0x9e9   :  { %v10536_v63 = vadd.f32 %v10535_v0, %v9882_v61  ;;  %v17578_v61 = vld [vmem:[%s26453_s19] ss:$0 sm:$0xff] }
 0x9ea   :  { %v10561_v62 = vpop.f32.mrf.mxu3 }
 0x9eb   :  { %v10549_v11 = vadd.f32 %v10548_v4, %v10536_v63 }
 0x9ec   :  { %v10600_v22 = vpop.f32.mrf.mxu1 }
 0x9ed   :  { %v10562_v40 = vadd.f32 %v10561_v62, %v10549_v11 }
 0x9ee   :  { %v10626_v55 = vpop.f32.mrf.mxu0 }
 0x9ef   :  { %v10575_v8 = vadd.f32 %v10574_v23, %v10562_v40 }
 0x9f0   :  { %v10537_v21 = vpop.f32.mrf.mxu2 }
 0x9f2   :  { %v10563_v17 = vpop.f32.mrf.mxu3 }
 0x9f4   :  { %v10602_v2 = vpop.f32.mrf.mxu1 }
 0x9f6   :  { %v10628_v16 = vpop.f32.mrf.mxu0 }
 0x9f8   :  { %v10587_v35 = vpop.f32.mrf.mxu2 }
 0x9f9   :  { %v10588_v1 = vadd.f32 %v10587_v35, %v10575_v8 }
 0x9fa   :  { %v10613_v9 = vpop.f32.mrf.mxu3 }
 0x9fb   :  { %v10601_v53 = vadd.f32 %v10600_v22, %v10588_v1 }
 0x9fc   :  { %v10652_v58 = vpop.f32.mrf.mxu1 }
 0x9fd   :  { %v10614_v6 = vadd.f32 %v10613_v9, %v10601_v53 }
 0x9fe   :  { %v10678_v57 = vpop.f32.mrf.mxu0 }
 0x9ff   :  { %v10627_v26 = vadd.f32 %v10626_v55, %v10614_v6 }
 0xa00   :  { %v10589_v50 = vpop.f32.mrf.mxu2 }
 0xa01   :  { %vm10734_vm2 = vcmp.gt.f32.partialorder %v10627_v26, 0.0  ;;  %v10736_v47 = vmul.f32 0.01, %v10627_v26 }
 0xa02   :  { %v10615_v12 = vpop.f32.mrf.mxu3 }
 0xa03   :  { %v10738_v36 = vsel %vm10734_vm2, %v10627_v26, %v10736_v47 }
 0xa04   :  { %v10740_v27 = vpack.c.bf16 %v10738_v36, %v10738_v36  ;;  %v10654_v19 = vpop.f32.mrf.mxu1 }
 0xa06   :  { %10882 = vmatmul.bf16.vlgmr.msra.gmra.mxu2 %v10740_v27  ;;  %v10680_v59 = vpop.f32.mrf.mxu0 }
 0xa08   :  { %v10639_v28 = vpop.f32.mrf.mxu2 }
 0xa09   :  { %v10640_v7 = vadd.f32 %v10639_v28, %v9883_v20 }
 0xa0a   :  { %v10665_v31 = vpop.f32.mrf.mxu3 }
 0xa0b   :  { %v10653_v41 = vadd.f32 %v10652_v58, %v10640_v7 }
 0xa0d   :  { %v10666_v24 = vadd.f32 %v10665_v31, %v10653_v41 }
 0xa0f   :  { %v10679_v54 = vadd.f32 %v10678_v57, %v10666_v24 }
 0xa10   :  { %v10641_v42 = vpop.f32.mrf.mxu2 }
 0xa12   :  { %v10667_v39 = vpop.f32.mrf.mxu3 }
 0xa1c   :  { %v10704_v46 = vpop.f32.mrf.mxu1 }
 0xa1e   :  { %v10730_v18 = vpop.f32.mrf.mxu0 }
 0xa24   :  { %v10706_v51 = vpop.f32.mrf.mxu1 }
 0xa26   :  { %v10732_v60 = vpop.f32.mrf.mxu0 }
 0xa28   :  { %v10691_v43 = vpop.f32.mrf.mxu2 }
 0xa29   :  { %v10692_v52 = vadd.f32 %v10691_v43, %v10679_v54 }
 0xa2a   :  { %v10717_v13 = vpop.f32.mrf.mxu3 }
 0xa2b   :  { %v10705_v38 = vadd.f32 %v10704_v46, %v10692_v52 }
 0xa2d   :  { %v10718_v48 = vadd.f32 %v10717_v13, %v10705_v38 }
 0xa2f   :  { %v10731_v10 = vadd.f32 %v10730_v18, %v10718_v48 }
 0xa30   :  { %v10693_v3 = vpop.f32.mrf.mxu2 }
 0xa31   :  { %vm10735_vm3 = vcmp.gt.f32.partialorder %v10731_v10, 0.0  ;;  %v10737_v4 = vmul.f32 0.01, %v10731_v10 }
 0xa32   :  { %v10719_v32 = vpop.f32.mrf.mxu3 }
 0xa33   :  { %v10739_v23 = vsel %vm10735_vm3, %v10731_v10, %v10737_v4 }
 0xa34   :  { %v10741_v14 = vpack.c.bf16 %v10739_v23, %v10739_v23 }
 0xa36   :  { %10895 = vmatmul.bf16.vlgmr.msra.gmra.mxu1 %v10741_v14 }
 0xa89   :  { %v10883_v56 = vpop.f32.mrf.mxu2 }
 0xa8a   :  { %v10884_v0 = vadd.f32 %v17578_v61, %v10883_v56 }
 0xa91   :  { %v10885_v45 = vpop.f32.mrf.mxu2 }
 0xab3   :  { %v10896_v34 = vpop.f32.mrf.mxu1 }
 0xab4   :  { %v10897_v62 = vadd.f32 %v10896_v34, %v10884_v0 }
 0xab6   :  { %v10907_v63 = vsel %vm10906_vm4, %v10897_v62, 0.0 }
 0xab7   :  { %10908 = vadd.xlane.f32.xlu0 %v10907_v63 }
 0xabb   :  { %v10898_v22 = vpop.f32.mrf.mxu1 }
 0xacb   :  { %10902 = vperm.xlu0 %17577, %v10897_v62  }
 0xb2a   :  { %v10909_v55 = vpop.xlane.xlu0 %10908 }
 0xb2b   :  { %v10910_v21 = vmul.f32 0.16666667, %v10909_v55 }
 0xb3d   :  { %v10903_v11 = vpop.permute.xlu0 %10902 }
 0xb3e   :  { %v10905_v17 = vadd.f32 %v10903_v11, %v10897_v62 }
 0xb40   :  { %v10911_v40 = vsub.f32 %v10905_v17, %v10910_v21 }
 0xb42   :  { %10912 = vst.msk [vmem:[#allocation2] sm:$0x3] %vm10906_vm4, %v10911_v40 }
 0xb43   :  { %10923 = dma.vmem_to_hbm [thread:$0]  %s10919_s22, 32, %s10921_s3, [#allocation3]  }
 0xb44   :  { %17609 = dma.done.wait [#allocation3], 32  }
 0xb45   :  { %17610 = vsyncadd [#allocation3], 4294967264 }
 0xb46   :  { %10928 = vsyncpa [#allocation3], 1 }

</bundles_post_ra>
